<compile_context>
chip_gen: v7x
topology: tpu7x:2x2x1
jax: 0.10.0
libtpu: 0.0.40
codegen_flags: <defaults>
</compile_context>

<pallas_src>
import numpy as np

import jax
import jax.numpy as jnp
from jax import lax
from jax.experimental import pallas as pl
from jax.experimental.pallas import tpu as pltpu


# ----------------------- weight packing (wrapper side) ------------------------

def _build_conv3_polyphase_weight(w4):
    """Express conv3 (3x3, pad=1 on the 2x-upsampled grid) in the polyphase
    domain.  Input/output channels are packed as [phase(2a+b), channel], so the
    layer becomes a standard 9-tap im2col matmul on the ORIGINAL HxW row grid
    with this [9 * 4*Cin, 4*Cout] weight."""
    c_in, c_out = w4.shape[2], w4.shape[3]
    asm = np.zeros((9, 4, 4, 3, 3), np.float32)
    for a in range(2):                 # output row phase
        for b in range(2):             # output col phase
            for dh in range(3):        # conv3 kernel row
                for dw in range(3):    # conv3 kernel col
                    y, x = a + dh - 1, b + dw - 1
                    di, ap = y // 2, y % 2      # floor div/mod handle -1 right
                    dj, bp = x // 2, x % 2
                    tap = (di + 1) * 3 + (dj + 1)
                    asm[tap, 2 * ap + bp, 2 * a + b, dh, dw] = 1.0
    w = jnp.einsum("tpqhw,hwio->tpiqo", jnp.asarray(asm), w4)
    return w.reshape(9 * 4 * c_in, 4 * c_out)


# ------------------------------ fused kernel ----------------------------------

def _fused_forward(x_pad, mask, weights, *, H, W):
    """One pallas_call for the whole network; one grid step per batch image.

    x_pad:  [N, ALLOC, Cin]  zero-padded image, rows flattened (row-major),
            ALLOC >= (H+2)*(W+2)+2 so every 3x3 tap slice stays in bounds.
    mask:   [H*(W+2), 1] f32, 1.0 for valid "extended" rows (col < W).
    Output: [N, H*(W+2), 16*num_classes]  (16 sub-pixel phases on the lane dim,
            garbage at the 2 extended columns per row; dropped by the wrapper).
    """
    N, alloc, cin = x_pad.shape
    Wp = W + 2
    R = H * Wp                         # "extended" output rows
    off = Wp + 1                       # flat index of padded pixel (1, 1)
    tail = (H + 1) * Wp + 1            # first halo row after the interior
    (w1, _b1, _w2, _b2, w3, _b3, _w4, _b4, _w5, _b5, w6, _b6) = weights
    out_ch = w6.shape[-1]              # 16 * num_classes

    def kernel(x_ref, m_ref, w1_ref, b1_ref, w2_ref, b2_ref, w3_ref, b3_ref,
               w4_ref, b4_ref, w5_ref, b5_ref, w6_ref, b6_ref,
               o_ref, pa_ref, pb_ref):
        valid = m_ref[...] > 0.5                              # [R, 1]

        def taps(src):
            # 9 row-shifted views of a padded-flat buffer, lane-concatenated
            # into the im2col matrix of one 3x3 conv -> single MXU matmul.
            return jnp.concatenate(
                [src[pl.ds(kh * Wp + kw, R), :]
                 for kh in range(3) for kw in range(3)], axis=-1)

        def pad_store(dst, val):
            # Zero only the halo head/tail rows; the left/right border columns
            # are zeroed by the validity mask on the interior write (the two
            # garbage extended columns land exactly on them).
            nrows, nch = dst.shape
            dst[pl.ds(0, off), :] = jnp.zeros((off, nch), jnp.float32)
            dst[pl.ds(tail, nrows - tail), :] = jnp.zeros(
                (nrows - tail, nch), jnp.float32)
            dst[pl.ds(off, R), :] = jnp.where(valid, val, 0.0)

        # conv1 (3x3 + ReLU) -> padded buffer A
        c1 = jnp.dot(taps(x_ref), w1_ref[...], preferred_element_type=jnp.float32)
        pad_store(pa_ref, jnp.maximum(c1 + b1_ref[...], 0.0))

        # conv2 (3x3 + ReLU); deconv1 (2x2 s2) as a phase-packed matmul + ReLU
        c2 = jnp.dot(taps(pa_ref), w2_ref[...], preferred_element_type=jnp.float32)
        c2 = jnp.maximum(c2 + b2_ref[...], 0.0)
        d1 = jnp.dot(c2, w3_ref[...], preferred_element_type=jnp.float32)
        pad_store(pb_ref, jnp.maximum(d1 + b3_ref[...], 0.0))

        # conv3 (3x3 + ReLU) in the polyphase domain: stays [R, 4*h2] packed,
        # no sub-pixel interleave ever materializes.
        c3 = jnp.dot(taps(pb_ref), w4_ref[...], preferred_element_type=jnp.float32)
        c3 = jnp.maximum(c3 + b4_ref[...], 0.0)

        # deconv2 (block-diag phase-packed matmul + ReLU) and fused 1x1 conv.
        d2 = jnp.dot(c3, w5_ref[...], preferred_element_type=jnp.float32)
        d2 = jnp.maximum(d2 + b5_ref[...], 0.0)
        out = jnp.dot(d2, w6_ref[...], preferred_element_type=jnp.float32)
        o_ref[...] = (out + b6_ref[...]).astype(o_ref.dtype)

    def full(a):
        nd = a.ndim
        return pl.BlockSpec(a.shape, lambda n: (0,) * nd)

    grid_spec = pltpu.PrefetchScalarGridSpec(
        num_scalar_prefetch=0,
        grid=(N,),
        in_specs=[pl.BlockSpec((None, alloc, cin), lambda n: (n, 0, 0)),
                  full(mask)] + [full(w) for w in weights],
        out_specs=pl.BlockSpec((None, R, out_ch), lambda n: (n, 0, 0)),
        scratch_shapes=[
            pltpu.VMEM((alloc, w1.shape[-1]), jnp.float32),   # padded conv1 out
            pltpu.VMEM((alloc, w3.shape[-1]), jnp.float32),   # padded deconv1 out
        ],
    )
    # TODO(synk): if reused at N=1 or large H/W on v7x, add a row-band grid axis
    # (with its own 1-row halo) and raise vmem_limit_bytes before scaling up.
    return pl.pallas_call(
        kernel,
        out_shape=jax.ShapeDtypeStruct((N, R, out_ch), jnp.float32),
        grid_spec=grid_spec,
        compiler_params=pltpu.CompilerParams(
            dimension_semantics=("parallel",)),
    )(x_pad, mask, *weights)


# --------------------------------- model --------------------------------------

def init_params(key, in_channels, hidden_dim, num_classes):
    ks = jax.random.split(key, 12)

    def u(k, shape, fan_in):
        s = 1.0 / jnp.sqrt(float(fan_in))
        return jax.random.uniform(k, shape, jnp.float32, -s, s)

    h, h2, h4 = hidden_dim, hidden_dim // 2, hidden_dim // 4
    return {
        "w1": u(ks[0], (3, 3, in_channels, h), in_channels * 9),
        "b1": u(ks[1], (1, h), in_channels * 9),
        "w2": u(ks[2], (3, 3, h, h), h * 9),
        "b2": u(ks[3], (1, h), h * 9),
        "w3": u(ks[4], (2, 2, h, h2), h * 4),      # ConvTranspose2d(h, h/2, 2, 2)
        "b3": u(ks[5], (1, h2), h * 4),
        "w4": u(ks[6], (3, 3, h2, h2), h2 * 9),
        "b4": u(ks[7], (1, h2), h2 * 9),
        "w5": u(ks[8], (2, 2, h2, h4), h2 * 4),    # ConvTranspose2d(h/2, h/4, 2, 2)
        "b5": u(ks[9], (1, h4), h2 * 4),
        "w6": u(ks[10], (h4, num_classes), h4),    # Conv2d(h/4, num_classes, 1)
        "b6": u(ks[11], (1, num_classes), h4),
    }


def advanced_mask_predictor(x_nchw, p):
    N, cin, H, W = x_nchw.shape
    h = p["w1"].shape[-1]
    h2 = p["w3"].shape[-1]
    h4 = p["w5"].shape[-1]
    nc = p["w6"].shape[-1]
    Wp = W + 2
    Lp = (H + 2) * Wp
    alloc = (Lp + 2 + 7) // 8 * 8

    # ---- weight packing (tiny, traced once) ----
    w1r = p["w1"].reshape(9 * cin, h)                              # im2col conv1
    w2r = p["w2"].reshape(9 * h, h)                                # im2col conv2
    w3p = p["w3"].transpose(2, 0, 1, 3).reshape(h, 4 * h2)         # deconv1 packed
    b3p = jnp.tile(p["b3"], (1, 4))
    w4poly = _build_conv3_polyphase_weight(p["w4"])                # [9*4*h2, 4*h2]
    b4p = jnp.tile(p["b4"], (1, 4))
    w5p = p["w5"].transpose(2, 0, 1, 3).reshape(h2, 4 * h4)        # deconv2 packed
    w5blk = jnp.kron(jnp.eye(4, dtype=jnp.float32), w5p)           # [4*h2, 16*h4]
    b5blk = jnp.tile(p["b5"], (1, 16))
    w6blk = jnp.kron(jnp.eye(16, dtype=jnp.float32), p["w6"])      # [16*h4, 16*nc]
    b6blk = jnp.tile(p["b6"], (1, 16))
    weights = (w1r, p["b1"], w2r, p["b2"], w3p, b3p, w4poly, b4p,
               w5blk, b5blk, w6blk, b6blk)

    # ---- input: NCHW -> zero-padded, row-flattened NHWC (4 KiB; fused by XLA)
    x = jnp.transpose(x_nchw, (0, 2, 3, 1))
    x = jnp.pad(x, ((0, 0), (1, 1), (1, 1), (0, 0))).reshape(N, Lp, cin)
    x = jnp.pad(x, ((0, 0), (0, alloc - Lp), (0, 0)))

    # validity mask over the "extended" rows (garbage columns j >= W).
    mask = jnp.asarray(
        (np.arange(H * Wp) % Wp < W).astype(np.float32).reshape(H * Wp, 1))

    raw = _fused_forward(x, mask, weights, H=H, W=W)               # [N, R, 16*nc]

    # ---- unpack the 16 sub-pixel phases (tiny final transpose in XLA) ----
    o = raw.reshape(N, H, Wp, 2, 2, 2, 2, nc)[:, :, :W]
    o = o.transpose(0, 7, 1, 3, 5, 2, 4, 6)                        # N,nc,i,a,a2,j,b,b2
    return o.reshape(N, nc, 4 * H, 4 * W)


# ---------------------------- pure-JAX reference ------------------------------

def _ref_forward(x_nchw, p):
    dn = ("NHWC", "HWIO", "NHWC")

    def c3(x, w, b):
        y = lax.conv_general_dilated(x, w, (1, 1), "SAME", dimension_numbers=dn)
        return jax.nn.relu(y + b.reshape(1, 1, 1, -1))

    def dc(x, w, b):
        N, H, W, _ = x.shape
        Cout = w.shape[-1]
        y = jnp.einsum("nijc,abcd->niajbd", x, w).reshape(N, 2 * H, 2 * W, Cout)
        return jax.nn.relu(y + b.reshape(1, 1, 1, -1))

    x = jnp.transpose(x_nchw, (0, 2, 3, 1))
    x = c3(x, p["w1"], p["b1"])
    x = c3(x, p["w2"], p["b2"])
    x = dc(x, p["w3"], p["b3"])
    x = c3(x, p["w4"], p["b4"])
    x = dc(x, p["w5"], p["b5"])
    x = jnp.einsum("nhwc,cd->nhwd", x, p["w6"]) + p["b6"].reshape(1, 1, 1, -1)
    return jnp.transpose(x, (0, 3, 1, 2))


# ----------------------------------- main --------------------------------------

if __name__ == "__main__":
    in_channels, hidden_dim, num_classes = 4, 32, 3
    N, H, W = 2, 16, 16

    key = jax.random.PRNGKey(0)
    k_x, k_p = jax.random.split(key)
    x = jax.random.normal(k_x, (N, in_channels, H, W), jnp.float32)
    params = init_params(k_p, in_channels, hidden_dim, num_classes)

    fwd = jax.jit(advanced_mask_predictor)
    out = jax.block_until_ready(fwd(x, params))
    assert out.shape == (N, num_classes, 4 * H, 4 * W), out.shape

    ref = jax.block_until_ready(_ref_forward(x, params))
    assert jnp.allclose(out, ref, atol=1e-3, rtol=1e-3), (
        float(jnp.max(jnp.abs(out - ref))))

    print("KERNEL_OK")
</pallas_src>

<mosaic_0001>
module attributes {stable_mosaic.version = 11 : i64} {
  func.func @kernel(%arg0: i32, %arg1: memref<1x328x4xf32, #tpu.memory_space<vmem>>, %arg2: memref<288x1xf32, #tpu.memory_space<vmem>>, %arg3: memref<36x32xf32, #tpu.memory_space<vmem>>, %arg4: memref<1x32xf32, #tpu.memory_space<vmem>>, %arg5: memref<288x32xf32, #tpu.memory_space<vmem>>, %arg6: memref<1x32xf32, #tpu.memory_space<vmem>>, %arg7: memref<32x64xf32, #tpu.memory_space<vmem>>, %arg8: memref<1x64xf32, #tpu.memory_space<vmem>>, %arg9: memref<576x64xf32, #tpu.memory_space<vmem>>, %arg10: memref<1x64xf32, #tpu.memory_space<vmem>>, %arg11: memref<64x128xf32, #tpu.memory_space<vmem>>, %arg12: memref<1x128xf32, #tpu.memory_space<vmem>>, %arg13: memref<128x48xf32, #tpu.memory_space<vmem>>, %arg14: memref<1x48xf32, #tpu.memory_space<vmem>>, %arg15: memref<1x288x48xf32, #tpu.memory_space<vmem>>, %arg16: memref<328x32xf32, #tpu.memory_space<vmem>>, %arg17: memref<328x64xf32, #tpu.memory_space<vmem>>) attributes {dimension_semantics = [#tpu.dimension_semantics<parallel>], iteration_bounds = array<i64: 2>, scalar_prefetch = 0 : i64, scratch_operands = 2 : i64, tpu.core_type = #tpu.core_type<tc>, window_params = [{transform_indices = @transform_0, window_bounds = array<i64: 1, 328, 4>}, {pipeline_mode = #tpu.pipeline_mode<synchronous>, transform_indices = @transform_1, window_bounds = array<i64: 288, 1>}, {pipeline_mode = #tpu.pipeline_mode<synchronous>, transform_indices = @transform_2, window_bounds = array<i64: 36, 32>}, {pipeline_mode = #tpu.pipeline_mode<synchronous>, transform_indices = @transform_3, window_bounds = array<i64: 1, 32>}, {pipeline_mode = #tpu.pipeline_mode<synchronous>, transform_indices = @transform_4, window_bounds = array<i64: 288, 32>}, {pipeline_mode = #tpu.pipeline_mode<synchronous>, transform_indices = @transform_5, window_bounds = array<i64: 1, 32>}, {pipeline_mode = #tpu.pipeline_mode<synchronous>, transform_indices = @transform_6, window_bounds = array<i64: 32, 64>}, {pipeline_mode = #tpu.pipeline_mode<synchronous>, transform_indices = @transform_7, window_bounds = array<i64: 1, 64>}, {pipeline_mode = #tpu.pipeline_mode<synchronous>, transform_indices = @transform_8, window_bounds = array<i64: 576, 64>}, {pipeline_mode = #tpu.pipeline_mode<synchronous>, transform_indices = @transform_9, window_bounds = array<i64: 1, 64>}, {pipeline_mode = #tpu.pipeline_mode<synchronous>, transform_indices = @transform_10, window_bounds = array<i64: 64, 128>}, {pipeline_mode = #tpu.pipeline_mode<synchronous>, transform_indices = @transform_11, window_bounds = array<i64: 1, 128>}, {pipeline_mode = #tpu.pipeline_mode<synchronous>, transform_indices = @transform_12, window_bounds = array<i64: 128, 48>}, {pipeline_mode = #tpu.pipeline_mode<synchronous>, transform_indices = @transform_13, window_bounds = array<i64: 1, 48>}, {transform_indices = @transform_14, window_bounds = array<i64: 1, 288, 48>}]} {
    %c0 = arith.constant 0 : index
    %c0_0 = arith.constant 0 : index
    %0 = vector.load %arg2[%c0, %c0_0] : memref<288x1xf32, #tpu.memory_space<vmem>>, vector<288x1xf32>
    %cst = arith.constant 5.000000e-01 : f32
    %1 = vector.broadcast %cst : f32 to vector<288x1xf32>
    %2 = arith.cmpf ogt, %0, %1 : vector<288x1xf32>
    %c0_1 = arith.constant 0 : index
    %c0_2 = arith.constant 0 : index
    %c0_3 = arith.constant 0 : index
    %3 = vector.load %arg1[%c0_1, %c0_2, %c0_3] : memref<1x328x4xf32, #tpu.memory_space<vmem>>, vector<1x288x4xf32>
    %4 = vector.shape_cast %3 : vector<1x288x4xf32> to vector<288x4xf32>
    %c0_4 = arith.constant 0 : index
    %c1 = arith.constant 1 : index
    %c0_5 = arith.constant 0 : index
    %5 = vector.load %arg1[%c0_4, %c1, %c0_5] : memref<1x328x4xf32, #tpu.memory_space<vmem>>, vector<1x288x4xf32>
    %6 = vector.shape_cast %5 : vector<1x288x4xf32> to vector<288x4xf32>
    %c0_6 = arith.constant 0 : index
    %c2 = arith.constant 2 : index
    %c0_7 = arith.constant 0 : index
    %7 = vector.load %arg1[%c0_6, %c2, %c0_7] : memref<1x328x4xf32, #tpu.memory_space<vmem>>, vector<1x288x4xf32>
    %8 = vector.shape_cast %7 : vector<1x288x4xf32> to vector<288x4xf32>
    %c0_8 = arith.constant 0 : index
    %c18 = arith.constant 18 : index
    %c0_9 = arith.constant 0 : index
    %9 = vector.load %arg1[%c0_8, %c18, %c0_9] : memref<1x328x4xf32, #tpu.memory_space<vmem>>, vector<1x288x4xf32>
    %10 = vector.shape_cast %9 : vector<1x288x4xf32> to vector<288x4xf32>
    %c0_10 = arith.constant 0 : index
    %c19 = arith.constant 19 : index
    %c0_11 = arith.constant 0 : index
    %11 = vector.load %arg1[%c0_10, %c19, %c0_11] : memref<1x328x4xf32, #tpu.memory_space<vmem>>, vector<1x288x4xf32>
    %12 = vector.shape_cast %11 : vector<1x288x4xf32> to vector<288x4xf32>
    %c0_12 = arith.constant 0 : index
    %c20 = arith.constant 20 : index
    %c0_13 = arith.constant 0 : index
    %13 = vector.load %arg1[%c0_12, %c20, %c0_13] : memref<1x328x4xf32, #tpu.memory_space<vmem>>, vector<1x288x4xf32>
    %14 = vector.shape_cast %13 : vector<1x288x4xf32> to vector<288x4xf32>
    %c0_14 = arith.constant 0 : index
    %c36 = arith.constant 36 : index
    %c0_15 = arith.constant 0 : index
    %15 = vector.load %arg1[%c0_14, %c36, %c0_15] : memref<1x328x4xf32, #tpu.memory_space<vmem>>, vector<1x288x4xf32>
    %16 = vector.shape_cast %15 : vector<1x288x4xf32> to vector<288x4xf32>
    %c0_16 = arith.constant 0 : index
    %c37 = arith.constant 37 : index
    %c0_17 = arith.constant 0 : index
    %17 = vector.load %arg1[%c0_16, %c37, %c0_17] : memref<1x328x4xf32, #tpu.memory_space<vmem>>, vector<1x288x4xf32>
    %18 = vector.shape_cast %17 : vector<1x288x4xf32> to vector<288x4xf32>
    %c0_18 = arith.constant 0 : index
    %c38 = arith.constant 38 : index
    %c0_19 = arith.constant 0 : index
    %19 = vector.load %arg1[%c0_18, %c38, %c0_19] : memref<1x328x4xf32, #tpu.memory_space<vmem>>, vector<1x288x4xf32>
    %20 = vector.shape_cast %19 : vector<1x288x4xf32> to vector<288x4xf32>
    %21 = tpu.concatenate %4, %6, %8, %10, %12, %14, %16, %18, %20 in 1 : vector<288x4xf32>, vector<288x4xf32>, vector<288x4xf32>, vector<288x4xf32>, vector<288x4xf32>, vector<288x4xf32>, vector<288x4xf32>, vector<288x4xf32>, vector<288x4xf32> -> vector<288x36xf32>
    %c0_20 = arith.constant 0 : index
    %c0_21 = arith.constant 0 : index
    %22 = vector.load %arg3[%c0_20, %c0_21] : memref<36x32xf32, #tpu.memory_space<vmem>>, vector<36x32xf32>
    %cst_22 = arith.constant dense<0.000000e+00> : vector<288x32xf32>
    %23 = tpu.matmul %21, %22, %cst_22 {dimension_numbers = #tpu.dot_dimension_numbers<[1], [0], [0], [1], [0, 0, 1, 1], [], []>} : vector<288x36xf32>, vector<36x32xf32>, vector<288x32xf32> -> vector<288x32xf32>
    %c0_23 = arith.constant 0 : index
    %c0_24 = arith.constant 0 : index
    %24 = vector.load %arg4[%c0_23, %c0_24] : memref<1x32xf32, #tpu.memory_space<vmem>>, vector<1x32xf32>
    %25 = vector.broadcast %24 : vector<1x32xf32> to vector<288x32xf32>
    %26 = arith.addf %23, %25 : vector<288x32xf32>
    %cst_25 = arith.constant 0.000000e+00 : f32
    %27 = vector.broadcast %cst_25 : f32 to vector<288x32xf32>
    %28 = arith.maximumf %26, %27 : vector<288x32xf32>
    %cst_26 = arith.constant 0.000000e+00 : f32
    %29 = vector.broadcast %cst_26 : f32 to vector<19x32xf32>
    %c0_27 = arith.constant 0 : index
    %c0_28 = arith.constant 0 : index
    %30 = vector.load %arg16[%c0_27, %c0_28] : memref<328x32xf32, #tpu.memory_space<vmem>>, vector<19x32xf32>
    tpu.vector_store %arg16[%c0_27, %c0_28], %29 {strides = array<i32>} : memref<328x32xf32, #tpu.memory_space<vmem>>, vector<19x32xf32>,
    %cst_29 = arith.constant 0.000000e+00 : f32
    %31 = vector.broadcast %cst_29 : f32 to vector<21x32xf32>
    %c307 = arith.constant 307 : index
    %c0_30 = arith.constant 0 : index
    %32 = vector.load %arg16[%c307, %c0_30] : memref<328x32xf32, #tpu.memory_space<vmem>>, vector<21x32xf32>
    tpu.vector_store %arg16[%c307, %c0_30], %31 {strides = array<i32>} : memref<328x32xf32, #tpu.memory_space<vmem>>, vector<21x32xf32>,
    %cst_31 = arith.constant 0.000000e+00 : f32
    %33 = vector.shape_cast %2 : vector<288x1xi1> to vector<288x1xi1>
    %34 = vector.broadcast %33 : vector<288x1xi1> to vector<288x32xi1>
    %35 = vector.broadcast %cst_31 : f32 to vector<288x32xf32>
    %36 = arith.select %34, %28, %35 : vector<288x32xi1>, vector<288x32xf32>
    %c19_32 = arith.constant 19 : index
    %c0_33 = arith.constant 0 : index
    %37 = vector.load %arg16[%c19_32, %c0_33] : memref<328x32xf32, #tpu.memory_space<vmem>>, vector<288x32xf32>
    tpu.vector_store %arg16[%c19_32, %c0_33], %36 {strides = array<i32>} : memref<328x32xf32, #tpu.memory_space<vmem>>, vector<288x32xf32>,
    %c0_34 = arith.constant 0 : index
    %c0_35 = arith.constant 0 : index
    %38 = vector.load %arg16[%c0_34, %c0_35] : memref<328x32xf32, #tpu.memory_space<vmem>>, vector<288x32xf32>
    %c1_36 = arith.constant 1 : index
    %c0_37 = arith.constant 0 : index
    %39 = vector.load %arg16[%c1_36, %c0_37] : memref<328x32xf32, #tpu.memory_space<vmem>>, vector<288x32xf32>
    %c2_38 = arith.constant 2 : index
    %c0_39 = arith.constant 0 : index
    %40 = vector.load %arg16[%c2_38, %c0_39] : memref<328x32xf32, #tpu.memory_space<vmem>>, vector<288x32xf32>
    %c18_40 = arith.constant 18 : index
    %c0_41 = arith.constant 0 : index
    %41 = vector.load %arg16[%c18_40, %c0_41] : memref<328x32xf32, #tpu.memory_space<vmem>>, vector<288x32xf32>
    %c19_42 = arith.constant 19 : index
    %c0_43 = arith.constant 0 : index
    %42 = vector.load %arg16[%c19_42, %c0_43] : memref<328x32xf32, #tpu.memory_space<vmem>>, vector<288x32xf32>
    %c20_44 = arith.constant 20 : index
    %c0_45 = arith.constant 0 : index
    %43 = vector.load %arg16[%c20_44, %c0_45] : memref<328x32xf32, #tpu.memory_space<vmem>>, vector<288x32xf32>
    %c36_46 = arith.constant 36 : index
    %c0_47 = arith.constant 0 : index
    %44 = vector.load %arg16[%c36_46, %c0_47] : memref<328x32xf32, #tpu.memory_space<vmem>>, vector<288x32xf32>
    %c37_48 = arith.constant 37 : index
    %c0_49 = arith.constant 0 : index
    %45 = vector.load %arg16[%c37_48, %c0_49] : memref<328x32xf32, #tpu.memory_space<vmem>>, vector<288x32xf32>
    %c38_50 = arith.constant 38 : index
    %c0_51 = arith.constant 0 : index
    %46 = vector.load %arg16[%c38_50, %c0_51] : memref<328x32xf32, #tpu.memory_space<vmem>>, vector<288x32xf32>
    %47 = tpu.concatenate %38, %39, %40, %41, %42, %43, %44, %45, %46 in 1 : vector<288x32xf32>, vector<288x32xf32>, vector<288x32xf32>, vector<288x32xf32>, vector<288x32xf32>, vector<288x32xf32>, vector<288x32xf32>, vector<288x32xf32>, vector<288x32xf32> -> vector<288x288xf32>
    %c0_52 = arith.constant 0 : index
    %c0_53 = arith.constant 0 : index
    %48 = vector.load %arg5[%c0_52, %c0_53] : memref<288x32xf32, #tpu.memory_space<vmem>>, vector<288x32xf32>
    %cst_54 = arith.constant dense<0.000000e+00> : vector<288x32xf32>
    %49 = tpu.matmul %47, %48, %cst_54 {dimension_numbers = #tpu.dot_dimension_numbers<[1], [0], [0], [1], [0, 0, 1, 1], [], []>} : vector<288x288xf32>, vector<288x32xf32>, vector<288x32xf32> -> vector<288x32xf32>
    %c0_55 = arith.constant 0 : index
    %c0_56 = arith.constant 0 : index
    %50 = vector.load %arg6[%c0_55, %c0_56] : memref<1x32xf32, #tpu.memory_space<vmem>>, vector<1x32xf32>
    %51 = vector.broadcast %50 : vector<1x32xf32> to vector<288x32xf32>
    %52 = arith.addf %49, %51 : vector<288x32xf32>
    %cst_57 = arith.constant 0.000000e+00 : f32
    %53 = vector.broadcast %cst_57 : f32 to vector<288x32xf32>
    %54 = arith.maximumf %52, %53 : vector<288x32xf32>
    %c0_58 = arith.constant 0 : index
    %c0_59 = arith.constant 0 : index
    %55 = vector.load %arg7[%c0_58, %c0_59] : memref<32x64xf32, #tpu.memory_space<vmem>>, vector<32x64xf32>
    %cst_60 = arith.constant dense<0.000000e+00> : vector<288x64xf32>
    %56 = tpu.matmul %54, %55, %cst_60 {dimension_numbers = #tpu.dot_dimension_numbers<[1], [0], [0], [1], [0, 0, 1, 1], [], []>} : vector<288x32xf32>, vector<32x64xf32>, vector<288x64xf32> -> vector<288x64xf32>
    %c0_61 = arith.constant 0 : index
    %c0_62 = arith.constant 0 : index
    %57 = vector.load %arg8[%c0_61, %c0_62] : memref<1x64xf32, #tpu.memory_space<vmem>>, vector<1x64xf32>
    %58 = vector.broadcast %57 : vector<1x64xf32> to vector<288x64xf32>
    %59 = arith.addf %56, %58 : vector<288x64xf32>
    %cst_63 = arith.constant 0.000000e+00 : f32
    %60 = vector.broadcast %cst_63 : f32 to vector<288x64xf32>
    %61 = arith.maximumf %59, %60 : vector<288x64xf32>
    %cst_64 = arith.constant 0.000000e+00 : f32
    %62 = vector.broadcast %cst_64 : f32 to vector<19x64xf32>
    %c0_65 = arith.constant 0 : index
    %c0_66 = arith.constant 0 : index
    %63 = vector.load %arg17[%c0_65, %c0_66] : memref<328x64xf32, #tpu.memory_space<vmem>>, vector<19x64xf32>
    tpu.vector_store %arg17[%c0_65, %c0_66], %62 {strides = array<i32>} : memref<328x64xf32, #tpu.memory_space<vmem>>, vector<19x64xf32>,
    %cst_67 = arith.constant 0.000000e+00 : f32
    %64 = vector.broadcast %cst_67 : f32 to vector<21x64xf32>
    %c307_68 = arith.constant 307 : index
    %c0_69 = arith.constant 0 : index
    %65 = vector.load %arg17[%c307_68, %c0_69] : memref<328x64xf32, #tpu.memory_space<vmem>>, vector<21x64xf32>
    tpu.vector_store %arg17[%c307_68, %c0_69], %64 {strides = array<i32>} : memref<328x64xf32, #tpu.memory_space<vmem>>, vector<21x64xf32>,
    %cst_70 = arith.constant 0.000000e+00 : f32
    %66 = vector.shape_cast %2 : vector<288x1xi1> to vector<288x1xi1>
    %67 = vector.broadcast %66 : vector<288x1xi1> to vector<288x64xi1>
    %68 = vector.broadcast %cst_70 : f32 to vector<288x64xf32>
    %69 = arith.select %67, %61, %68 : vector<288x64xi1>, vector<288x64xf32>
    %c19_71 = arith.constant 19 : index
    %c0_72 = arith.constant 0 : index
    %70 = vector.load %arg17[%c19_71, %c0_72] : memref<328x64xf32, #tpu.memory_space<vmem>>, vector<288x64xf32>
    tpu.vector_store %arg17[%c19_71, %c0_72], %69 {strides = array<i32>} : memref<328x64xf32, #tpu.memory_space<vmem>>, vector<288x64xf32>,
    %c0_73 = arith.constant 0 : index
    %c0_74 = arith.constant 0 : index
    %71 = vector.load %arg17[%c0_73, %c0_74] : memref<328x64xf32, #tpu.memory_space<vmem>>, vector<288x64xf32>
    %c1_75 = arith.constant 1 : index
    %c0_76 = arith.constant 0 : index
    %72 = vector.load %arg17[%c1_75, %c0_76] : memref<328x64xf32, #tpu.memory_space<vmem>>, vector<288x64xf32>
    %c2_77 = arith.constant 2 : index
    %c0_78 = arith.constant 0 : index
    %73 = vector.load %arg17[%c2_77, %c0_78] : memref<328x64xf32, #tpu.memory_space<vmem>>, vector<288x64xf32>
    %c18_79 = arith.constant 18 : index
    %c0_80 = arith.constant 0 : index
    %74 = vector.load %arg17[%c18_79, %c0_80] : memref<328x64xf32, #tpu.memory_space<vmem>>, vector<288x64xf32>
    %c19_81 = arith.constant 19 : index
    %c0_82 = arith.constant 0 : index
    %75 = vector.load %arg17[%c19_81, %c0_82] : memref<328x64xf32, #tpu.memory_space<vmem>>, vector<288x64xf32>
    %c20_83 = arith.constant 20 : index
    %c0_84 = arith.constant 0 : index
    %76 = vector.load %arg17[%c20_83, %c0_84] : memref<328x64xf32, #tpu.memory_space<vmem>>, vector<288x64xf32>
    %c36_85 = arith.constant 36 : index
    %c0_86 = arith.constant 0 : index
    %77 = vector.load %arg17[%c36_85, %c0_86] : memref<328x64xf32, #tpu.memory_space<vmem>>, vector<288x64xf32>
    %c37_87 = arith.constant 37 : index
    %c0_88 = arith.constant 0 : index
    %78 = vector.load %arg17[%c37_87, %c0_88] : memref<328x64xf32, #tpu.memory_space<vmem>>, vector<288x64xf32>
    %c38_89 = arith.constant 38 : index
    %c0_90 = arith.constant 0 : index
    %79 = vector.load %arg17[%c38_89, %c0_90] : memref<328x64xf32, #tpu.memory_space<vmem>>, vector<288x64xf32>
    %80 = tpu.concatenate %71, %72, %73, %74, %75, %76, %77, %78, %79 in 1 : vector<288x64xf32>, vector<288x64xf32>, vector<288x64xf32>, vector<288x64xf32>, vector<288x64xf32>, vector<288x64xf32>, vector<288x64xf32>, vector<288x64xf32>, vector<288x64xf32> -> vector<288x576xf32>
    %c0_91 = arith.constant 0 : index
    %c0_92 = arith.constant 0 : index
    %81 = vector.load %arg9[%c0_91, %c0_92] : memref<576x64xf32, #tpu.memory_space<vmem>>, vector<576x64xf32>
    %cst_93 = arith.constant dense<0.000000e+00> : vector<288x64xf32>
    %82 = tpu.matmul %80, %81, %cst_93 {dimension_numbers = #tpu.dot_dimension_numbers<[1], [0], [0], [1], [0, 0, 1, 1], [], []>} : vector<288x576xf32>, vector<576x64xf32>, vector<288x64xf32> -> vector<288x64xf32>
    %c0_94 = arith.constant 0 : index
    %c0_95 = arith.constant 0 : index
    %83 = vector.load %arg10[%c0_94, %c0_95] : memref<1x64xf32, #tpu.memory_space<vmem>>, vector<1x64xf32>
    %84 = vector.broadcast %83 : vector<1x64xf32> to vector<288x64xf32>
    %85 = arith.addf %82, %84 : vector<288x64xf32>
    %cst_96 = arith.constant 0.000000e+00 : f32
    %86 = vector.broadcast %cst_96 : f32 to vector<288x64xf32>
    %87 = arith.maximumf %85, %86 : vector<288x64xf32>
    %c0_97 = arith.constant 0 : index
    %c0_98 = arith.constant 0 : index
    %88 = vector.load %arg11[%c0_97, %c0_98] : memref<64x128xf32, #tpu.memory_space<vmem>>, vector<64x128xf32>
    %cst_99 = arith.constant dense<0.000000e+00> : vector<288x128xf32>
    %89 = tpu.matmul %87, %88, %cst_99 {dimension_numbers = #tpu.dot_dimension_numbers<[1], [0], [0], [1], [0, 0, 1, 1], [], []>} : vector<288x64xf32>, vector<64x128xf32>, vector<288x128xf32> -> vector<288x128xf32>
    %c0_100 = arith.constant 0 : index
    %c0_101 = arith.constant 0 : index
    %90 = vector.load %arg12[%c0_100, %c0_101] : memref<1x128xf32, #tpu.memory_space<vmem>>, vector<1x128xf32>
    %91 = vector.broadcast %90 : vector<1x128xf32> to vector<288x128xf32>
    %92 = arith.addf %89, %91 : vector<288x128xf32>
    %cst_102 = arith.constant 0.000000e+00 : f32
    %93 = vector.broadcast %cst_102 : f32 to vector<288x128xf32>
    %94 = arith.maximumf %92, %93 : vector<288x128xf32>
    %c0_103 = arith.constant 0 : index
    %c0_104 = arith.constant 0 : index
    %95 = vector.load %arg13[%c0_103, %c0_104] : memref<128x48xf32, #tpu.memory_space<vmem>>, vector<128x48xf32>
    %cst_105 = arith.constant dense<0.000000e+00> : vector<288x48xf32>
    %96 = tpu.matmul %94, %95, %cst_105 {dimension_numbers = #tpu.dot_dimension_numbers<[1], [0], [0], [1], [0, 0, 1, 1], [], []>} : vector<288x128xf32>, vector<128x48xf32>, vector<288x48xf32> -> vector<288x48xf32>
    %c0_106 = arith.constant 0 : index
    %c0_107 = arith.constant 0 : index
    %97 = vector.load %arg14[%c0_106, %c0_107] : memref<1x48xf32, #tpu.memory_space<vmem>>, vector<1x48xf32>
    %98 = vector.broadcast %97 : vector<1x48xf32> to vector<288x48xf32>
    %99 = arith.addf %96, %98 : vector<288x48xf32>
    %c0_108 = arith.constant 0 : index
    %c0_109 = arith.constant 0 : index
    %c0_110 = arith.constant 0 : index
    %100 = vector.load %arg15[%c0_108, %c0_109, %c0_110] : memref<1x288x48xf32, #tpu.memory_space<vmem>>, vector<1x288x48xf32>
    %101 = vector.shape_cast %100 : vector<1x288x48xf32> to vector<288x48xf32>
    %102 = vector.shape_cast %99 : vector<288x48xf32> to vector<1x288x48xf32>
    tpu.vector_store %arg15[%c0_108, %c0_109, %c0_110], %102 {strides = array<i32>} : memref<1x288x48xf32, #tpu.memory_space<vmem>>, vector<1x288x48xf32>,
    return
  }
  func.func @transform_0(%arg0: i32) -> (i32, i32, i32) {
    %c0_i32 = arith.constant 0 : i32
    %c0_i32_0 = arith.constant 0 : i32
    %c0_i32_1 = arith.constant 0 : i32
    return %arg0, %c0_i32, %c0_i32_0 : i32, i32, i32
  }
  func.func @transform_1(%arg0: i32) -> (i32, i32) {
    %c0_i32 = arith.constant 0 : i32
    %c0_i32_0 = arith.constant 0 : i32
    %c0_i32_1 = arith.constant 0 : i32
    return %c0_i32, %c0_i32_0 : i32, i32
  }
  func.func @transform_2(%arg0: i32) -> (i32, i32) {
    %c0_i32 = arith.constant 0 : i32
    %c0_i32_0 = arith.constant 0 : i32
    %c0_i32_1 = arith.constant 0 : i32
    return %c0_i32, %c0_i32_0 : i32, i32
  }
  func.func @transform_3(%arg0: i32) -> (i32, i32) {
    %c0_i32 = arith.constant 0 : i32
    %c0_i32_0 = arith.constant 0 : i32
    %c0_i32_1 = arith.constant 0 : i32
    return %c0_i32, %c0_i32_0 : i32, i32
  }
  func.func @transform_4(%arg0: i32) -> (i32, i32) {
    %c0_i32 = arith.constant 0 : i32
    %c0_i32_0 = arith.constant 0 : i32
    %c0_i32_1 = arith.constant 0 : i32
    return %c0_i32, %c0_i32_0 : i32, i32
  }
  func.func @transform_5(%arg0: i32) -> (i32, i32) {
    %c0_i32 = arith.constant 0 : i32
    %c0_i32_0 = arith.constant 0 : i32
    %c0_i32_1 = arith.constant 0 : i32
    return %c0_i32, %c0_i32_0 : i32, i32
  }
  func.func @transform_6(%arg0: i32) -> (i32, i32) {
    %c0_i32 = arith.constant 0 : i32
    %c0_i32_0 = arith.constant 0 : i32
    %c0_i32_1 = arith.constant 0 : i32
    return %c0_i32, %c0_i32_0 : i32, i32
  }
  func.func @transform_7(%arg0: i32) -> (i32, i32) {
    %c0_i32 = arith.constant 0 : i32
    %c0_i32_0 = arith.constant 0 : i32
    %c0_i32_1 = arith.constant 0 : i32
    return %c0_i32, %c0_i32_0 : i32, i32
  }
  func.func @transform_8(%arg0: i32) -> (i32, i32) {
    %c0_i32 = arith.constant 0 : i32
    %c0_i32_0 = arith.constant 0 : i32
    %c0_i32_1 = arith.constant 0 : i32
    return %c0_i32, %c0_i32_0 : i32, i32
  }
  func.func @transform_9(%arg0: i32) -> (i32, i32) {
    %c0_i32 = arith.constant 0 : i32
    %c0_i32_0 = arith.constant 0 : i32
    %c0_i32_1 = arith.constant 0 : i32
    return %c0_i32, %c0_i32_0 : i32, i32
  }
  func.func @transform_10(%arg0: i32) -> (i32, i32) {
    %c0_i32 = arith.constant 0 : i32
    %c0_i32_0 = arith.constant 0 : i32
    %c0_i32_1 = arith.constant 0 : i32
    return %c0_i32, %c0_i32_0 : i32, i32
  }
  func.func @transform_11(%arg0: i32) -> (i32, i32) {
    %c0_i32 = arith.constant 0 : i32
    %c0_i32_0 = arith.constant 0 : i32
    %c0_i32_1 = arith.constant 0 : i32
    return %c0_i32, %c0_i32_0 : i32, i32
  }
  func.func @transform_12(%arg0: i32) -> (i32, i32) {
    %c0_i32 = arith.constant 0 : i32
    %c0_i32_0 = arith.constant 0 : i32
    %c0_i32_1 = arith.constant 0 : i32
    return %c0_i32, %c0_i32_0 : i32, i32
  }
  func.func @transform_13(%arg0: i32) -> (i32, i32) {
    %c0_i32 = arith.constant 0 : i32
    %c0_i32_0 = arith.constant 0 : i32
    %c0_i32_1 = arith.constant 0 : i32
    return %c0_i32, %c0_i32_0 : i32, i32
  }
  func.func @transform_14(%arg0: i32) -> (i32, i32, i32) {
    %c0_i32 = arith.constant 0 : i32
    %c0_i32_0 = arith.constant 0 : i32
    %c0_i32_1 = arith.constant 0 : i32
    return %arg0, %c0_i32, %c0_i32_0 : i32, i32, i32
  }
}

</mosaic_0001>

<bundles_post_ra>
// kernel: advanced_mask_predictor.1
= control target key start
LH: loop header
LB: loop body
LE: loop exit
PB: predicated region body
PF: predicated region fallthrough
CT: control target
= control target key end

     0   :  { %s10233_s29 = smov 0   ;;  %s13986_s0 = inlined_call_operand.vmem [shape: f32[2,328,4], index: 0, kind: input, shape index: {}]   ;;  %s13987_s1 = inlined_call_operand.vmem [shape: f32[288,1], index: 1, kind: input, shape index: {}]   ;;  %s13988_s2 = inlined_call_operand.vmem [shape: f32[36,32], index: 2, kind: input, shape index: {}]   ;;  %s13989_s3 = inlined_call_operand.vmem [shape: f32[1,32], index: 3, kind: input, shape index: {}]   ;;  %s13990_s4 = inlined_call_operand.vmem [shape: f32[288,32], index: 4, kind: input, shape index: {}]   ;;  %s13991_s5 = inlined_call_operand.vmem [shape: f32[1,32], index: 5, kind: input, shape index: {}]   ;;  %s13992_s6 = inlined_call_operand.vmem [shape: f32[32,64], index: 6, kind: input, shape index: {}]   ;;  %s13993_s7 = inlined_call_operand.vmem [shape: f32[1,64], index: 7, kind: input, shape index: {}]   ;;  %s13994_s8 = inlined_call_operand.vmem [shape: f32[576,64], index: 8, kind: input, shape index: {}]   ;;  %s13995_s9 = inlined_call_operand.vmem [shape: f32[1,64], index: 9, kind: input, shape index: {}]   ;;  %s13996_s10 = inlined_call_operand.vmem [shape: f32[64,128], index: 10, kind: input, shape index: {}]   ;;  %s13997_s11 = inlined_call_operand.vmem [shape: f32[1,128], index: 11, kind: input, shape index: {}]   ;;  %s13998_s12 = inlined_call_operand.vmem [shape: f32[128,48], index: 12, kind: input, shape index: {}]   ;;  %s13999_s13 = inlined_call_operand.vmem [shape: f32[1,48], index: 13, kind: input, shape index: {}]   ;;  %s14000_s14 = inlined_call_operand.vmem [shape: f32[2,288,48], index: 14, kind: output, shape index: {}]  }
   0x1 LB: > { %s7967_s30 = sadd.s32 4294967295, %s10143_s29   ;;  %p7971_p0 = scmp.ge.s32.totalorder %s10143_s29, 1  ;;  %s10143_s29 = sphi %s10233_s29, %s24_s29  }
   0x2   : > { %p412_p1 = scmp.lt.s32.totalorder %s10143_s29, 3 }
   0x4   : > { %p413_p2 = pnand %p7971_p0, %p412_p1 }
   0x6   : > { %416 = sbr.rel (%p413_p2) target bundleno = 2504 (0x9c8), region = 76 }
   0xd   : > { %p458_p3 = scmp.lt.s32.totalorder %s7967_s30, 1  ;;  %s10145_s19 = smov 8   ;;  %v2176_v13 = vld [vmem:[%s13988_s2] sm:$0xff]  ;;  %v2177_v14 = vld [vmem:[%s13988_s2 + $0x8] sm:$0xff]  ;;  %v2178_v17 = vld [vmem:[%s13988_s2 + $0x10] sm:$0xff]  ;;  %vm2297_vm0 = vcmask 1043456  }
   0xe   : > { %s10146_s20 = smov 4   ;;  %s10147_s21 = smov 12   ;;  %v8838_v16 = vpack.c.bf16 %v2177_v14, %v2176_v13  ;;  %v2179_v18 = vld [vmem:[%s13988_s2 + $0x18] sm:$0xff]  ;;  %v2180_v22 = vld [vmem:[%s13988_s2 + $0x20] sm:$0xf]  ;;  %vm1880_vm1 = vcmask 31744  }
   0xf   : > { %s14085_s30 = smov (!%p458_p3, %s7967_s30), 1  ;;  %s10148_s22 = smov 16   ;;  %v8842_v21 = vpack.c.bf16 %v2179_v18, %v2178_v17  ;;  %vm1917_vm2 = vcmask 64512   ;;  %vm1954_vm3 = vcmask 97280   ;;  %vm1991_vm4 = vcmask 130048  }
  0x10   : > { %s9210_s15 = smul.u32 328, %s14085_s30  ;;  %s10149_s23 = smov 20   ;;  %8839 = vmatprep.subr.bf16.mxu0 %v8838_v16  ;;  %vm2028_vm5 = vcmask 162816   ;;  %vm2065_vm6 = vcmask 195584   ;;  %vm2102_vm7 = vcmask 228352   ;;  %vm2139_vm8 = vcmask 261120  }
  0x11   : > { %s10150_s26 = smov 24   ;;  %8841 = vmatpush3.bf16.msra.mxu0 %v8838_v16  ;;  %s10151_s25 = smov 28   ;;  %vm2188_vm9 = vcmask 293888  }
  0x12   : > { %s10247_s18 = scalar_lea.vmem %s13986_s0, %s9210_s15  ;;  %8843 = vmatprep.subr.bf16.mxu0 %v8842_v21  ;;  %s10152_s15 = smov 32  }
  0x13   : > { %v612_v0 = vld [vmem:[%s10247_s18 + $0x2] sm:$0xff]  ;;  %v613_v2 = vld [vmem:[%s10247_s18 + $0xa] sm:$0xff]  ;;  %v615_v4 = vld [vmem:[%s10247_s18 + $0x1a] sm:$0xff] }
  0x14   : > { %v576_v1 = vld [vmem:[%s10247_s18 + $0x1] sm:$0xff]  ;;  %976 = vrot.lane.b32.xlu1 %v612_v0, %s10145_s19  ;;  %v577_v3 = vld [vmem:[%s10247_s18 + $0x9] sm:$0xff]  ;;  %v614_v5 = vld [vmem:[%s10247_s18 + $0x12] sm:$0xff] }
  0x15   : > { %832 = vrot.lane.b32.xlu0 %v576_v1, %s10146_s20  ;;  %v578_v6 = vld [vmem:[%s10247_s18 + $0x11] sm:$0xff]  ;;  %v651_v9 = vld [vmem:[%s10247_s18 + $0x1b] sm:$0xff]  ;;  %v688_v11 = vld [vmem:[%s10247_s18 + $0x24] sm:$0xff]  ;;  %8845 = vmatpush3.bf16.msra.mxu0 %v8842_v21 }
  0x16   : > { %v650_v7 = vld [vmem:[%s10247_s18 + $0x13] sm:$0xff]  ;;  %v687_v12 = vld [vmem:[%s10247_s18 + $0x1c] sm:$0xff]  ;;  %v724_v19 = vld [vmem:[%s10247_s18 + $0x25] sm:$0xff]  ;;  %8432 = vmatprep.subr.msk.mxu0 %vm2297_vm0, %v2180_v22 }
  0x17   : > { %v686_v8 = vld [vmem:[%s10247_s18 + $0x14] sm:$0xff]  ;;  %v616_v15 = vld [vmem:[%s10247_s18 + $0x22] sm:$0xff]  ;;  %v689_v20 = vld [vmem:[%s10247_s18 + $0x2c] sm:$0xff] }
  0x18   : > { %978 = vrot.lane.b32.xlu1 %v613_v2, %s10145_s19  ;;  %v579_v10 = vld [vmem:[%s10247_s18 + $0x19] sm:$0xff]  ;;  %v652_v23 = vld [vmem:[%s10247_s18 + $0x23] sm:$0xff]  ;;  %v725_v26 = vld [vmem:[%s10247_s18 + $0x2d] sm:$0xff] }
  0x19   : > { %834 = vrot.lane.b32.xlu0 %v577_v3, %s10146_s20  ;;  %v617_v24 = vld [vmem:[%s10247_s18 + $0x2a] sm:$0xff]  ;;  %8433 = vmatpush3.msk.msra.mxu0 %vm2297_vm0, %v2180_v22  ;;  %v580_v28 = vld [vmem:[%s10247_s18 + $0x21] sm:$0xff]  ;;  %v690_v31 = vld [vmem:[%s10247_s18 + $0x34] sm:$0xff]  ;;  %vm2584_vm0 = vcmask 256000  }
  0x1a   : > { %v760_v25 = vld [vmem:[%s10247_s18 + $0x26] sm:$0xff]  ;;  %v761_v29 = vld [vmem:[%s10247_s18 + $0x2e] sm:$0xff]  ;;  %v691_v34 = vld [vmem:[%s10247_s18 + $0x3c] sm:$0xff] }
  0x1b   : > { %v653_v27 = vld [vmem:[%s10247_s18 + $0x2b] sm:$0xff]  ;;  %v726_v33 = vld [vmem:[%s10247_s18 + $0x35] sm:$0xff]  ;;  %v727_v38 = vld [vmem:[%s10247_s18 + $0x3d] sm:$0xff] }
  0x1c   : > { %1088 = vrot.lane.b32.xlu1 %v615_v4, %s10147_s21  ;;  %v581_v30 = vld [vmem:[%s10247_s18 + $0x29] sm:$0xff]  ;;  %v618_v32 = vld [vmem:[%s10247_s18 + $0x32] sm:$0xff]  ;;  %v619_v36 = vld [vmem:[%s10247_s18 + $0x3a] sm:$0xff] }
  0x1d   : > { %1086 = vrot.lane.b32.xlu0 %v614_v5, %s10147_s21  ;;  %v654_v35 = vld [vmem:[%s10247_s18 + $0x33] sm:$0xff]  ;;  %v655_v39 = vld [vmem:[%s10247_s18 + $0x3b] sm:$0xff]  ;;  %v692_v42 = vld [vmem:[%s10247_s18 + $0x44] sm:$0xff] }
  0x1e   : > { %v762_v37 = vld [vmem:[%s10247_s18 + $0x36] sm:$0xff]  ;;  %v763_v40 = vld [vmem:[%s10247_s18 + $0x3e] sm:$0xff]  ;;  %v693_v41 = vld [vmem:[%s10247_s18 + $0x4c] sm:$0xff] }
  0x1f   : > { %v729_v43 = vld [vmem:[%s10247_s18 + $0x4d] sm:$0xff]  ;;  %v728_v44 = vld [vmem:[%s10247_s18 + $0x45] sm:$0xff]  ;;  %v583_v47 = vld [vmem:[%s10247_s18 + $0x39] sm:$0xff] }
  0x20   : > { %836 = vrot.lane.b32.xlu1 %v578_v6, %s10146_s20  ;;  %v582_v45 = vld [vmem:[%s10247_s18 + $0x31] sm:$0xff]  ;;  %v764_v46 = vld [vmem:[%s10247_s18 + $0x46] sm:$0xff]  ;;  %v695_v53 = vld [vmem:[%s10247_s18 + $0x5c] sm:$0xff] }
  0x21   : > { %1230 = vrot.lane.b32.xlu0 %v650_v7, %s10148_s22  ;;  %v765_v48 = vld [vmem:[%s10247_s18 + $0x4e] sm:$0xff]  ;;  %v620_v50 = vld [vmem:[%s10247_s18 + $0x42] sm:$0xff]  ;;  %v766_v62 = vld [vmem:[%s10247_s18 + $0x56] sm:$0xff] }
  0x22   : > { %v621_v49 = vld [vmem:[%s10247_s18 + $0x4a] sm:$0xff]  ;;  %v694_v54 = vld [vmem:[%s10247_s18 + $0x54] sm:$0xff]  ;;  %v731_v57 = vld [vmem:[%s10247_s18 + $0x5d] sm:$0xff] }
  0x23   : > { %v657_v51 = vld [vmem:[%s10247_s18 + $0x4b] sm:$0xff]  ;;  %v656_v52 = vld [vmem:[%s10247_s18 + $0x43] sm:$0xff]  ;;  %v730_v58 = vld [vmem:[%s10247_s18 + $0x55] sm:$0xff] }
  0x24   : > { %1374 = vrot.lane.b32.xlu1 %v686_v8, %s10149_s23  ;;  %v584_v61 = vld [vmem:[%s10247_s18 + $0x41] sm:$0xff]  ;;  %v585_v1 = vld [vmem:[%s10247_s18 + $0x49] sm:$0xff]  ;;  %v10400_v8 = vld [vmem:[%s10247_s18 + $0x52] sm:$0xff] }
  0x25   : > { %1232 = vrot.lane.b32.xlu0 %v651_v9, %s10148_s22  ;;  %v767_v2 = vld [vmem:[%s10247_s18 + $0x5e] sm:$0xff]  ;;  %v10422_v18 = vld [vmem:[%s10247_s18 + $0x6c] sm:$0xff] }
  0x26   : > { %v10397_v7 = vld [vmem:[%s10247_s18 + $0x5a] sm:$0xff] }
  0x27   : > { %v540_v17 = vld [vmem:[%s10247_s18] sm:$0xff] }
  0x28   : > { %980 = vrot.lane.b32.xlu1 %v614_v5, %s10145_s19 }
  0x29   : > { %838 = vrot.lane.b32.xlu0 %v579_v10, %s10146_s20 }
  0x2c   : > { %1484 = vrot.lane.b32.xlu1 %v688_v11, %s10150_s26 }
  0x2d   : > { %1376 = vrot.lane.b32.xlu0 %v687_v12, %s10149_s23  ;;  %v658_v12 = vld [vmem:[%s10247_s18 + $0x53] sm:$0xff] }
  0x30   : > { %1090 = vrot.lane.b32.xlu1 %v616_v15, %s10147_s21 }
  0x31   : > { %982 = vrot.lane.b32.xlu0 %v615_v4, %s10145_s19 }
  0x34   : > { %1628 = vrot.lane.b32.xlu1 %v724_v19, %s10151_s25  ;;  %v10425_v19 = vld [vmem:[%s10247_s18 + $0x64] sm:$0xff] }
  0x35   : > { %1486 = vrot.lane.b32.xlu0 %v689_v20, %s10150_s26 }
  0x38   : > { %1234 = vrot.lane.b32.xlu1 %v652_v23, %s10148_s22 }
  0x39   : > { %1092 = vrot.lane.b32.xlu0 %v617_v24, %s10147_s21 }
  0x3c   : > { %1772 = vrot.lane.b32.xlu1 %v760_v25, %s10152_s15  ;;  %v732_v25 = vld [vmem:[%s10247_s18 + $0x65] sm:$0xff] }
  0x3d   : > { %1630 = vrot.lane.b32.xlu0 %v725_v26, %s10151_s25 }
  0x40   : > { %1236 = vrot.lane.b32.xlu1 %v653_v27, %s10148_s22 }
  0x41   : > { %840 = vrot.lane.b32.xlu0 %v580_v28, %s10146_s20 }
  0x44   : > { %1774 = vrot.lane.b32.xlu1 %v761_v29, %s10152_s15  ;;  %v541_v29 = vld [vmem:[%s10247_s18 + $0x8] sm:$0xff] }
  0x45   : > { %1378 = vrot.lane.b32.xlu0 %v688_v11, %s10149_s23  ;;  %v659_v11 = vld [vmem:[%s10247_s18 + $0x5b] sm:$0xff] }
  0x48   : > { %984 = vrot.lane.b32.xlu1 %v616_v15, %s10145_s19 }
  0x49   : > { %842 = vrot.lane.b32.xlu0 %v581_v30, %s10146_s20 }
  0x4c   : > { %1488 = vrot.lane.b32.xlu1 %v690_v31, %s10150_s26 }
  0x4d   : > { %1380 = vrot.lane.b32.xlu0 %v689_v20, %s10149_s23 }
  0x50   : > { %1094 = vrot.lane.b32.xlu1 %v618_v32, %s10147_s21 }
  0x51   : > { %986 = vrot.lane.b32.xlu0 %v617_v24, %s10145_s19  ;;  %v733_v24 = vld [vmem:[%s10247_s18 + $0x6d] sm:$0xff] }
  0x54   : > { %1632 = vrot.lane.b32.xlu1 %v726_v33, %s10151_s25  ;;  %v769_v33 = vld [vmem:[%s10247_s18 + $0x6e] sm:$0xff] }
  0x55   : > { %1490 = vrot.lane.b32.xlu0 %v691_v34, %s10150_s26 }
  0x58   : > { %1238 = vrot.lane.b32.xlu1 %v654_v35, %s10148_s22 }
  0x59   : > { %1096 = vrot.lane.b32.xlu0 %v619_v36, %s10147_s21 }
  0x5c   : > { %1776 = vrot.lane.b32.xlu1 %v762_v37, %s10152_s15 }
  0x5d   : > { %1634 = vrot.lane.b32.xlu0 %v727_v38, %s10151_s25 }
  0x60   : > { %1382 = vrot.lane.b32.xlu1 %v690_v31, %s10149_s23 }
  0x61   : > { %1240 = vrot.lane.b32.xlu0 %v655_v39, %s10148_s22 }
  0x64   : > { %1384 = vrot.lane.b32.xlu1 %v691_v34, %s10149_s23  ;;  %v768_v34 = vld [vmem:[%s10247_s18 + $0x66] sm:$0xff] }
  0x65   : > { %1778 = vrot.lane.b32.xlu0 %v763_v40, %s10152_s15 }
  0x68   : > { %1494 = vrot.lane.b32.xlu1 %v693_v41, %s10150_s26 }
  0x69   : > { %1492 = vrot.lane.b32.xlu0 %v692_v42, %s10150_s26 }
  0x6c   : > { %1638 = vrot.lane.b32.xlu1 %v729_v43, %s10151_s25 }
  0x6d   : > { %1636 = vrot.lane.b32.xlu0 %v728_v44, %s10151_s25 }
  0x70   : > { %844 = vrot.lane.b32.xlu1 %v582_v45, %s10146_s20 }
  0x71   : > { %1780 = vrot.lane.b32.xlu0 %v764_v46, %s10152_s15 }
  0x74   : > { %846 = vrot.lane.b32.xlu1 %v583_v47, %s10146_s20 }
  0x75   : > { %1782 = vrot.lane.b32.xlu0 %v765_v48, %s10152_s15 }
  0x78   : > { %990 = vrot.lane.b32.xlu1 %v619_v36, %s10145_s19 }
  0x79   : > { %988 = vrot.lane.b32.xlu0 %v618_v32, %s10145_s19 }
  0x7c   : > { %1100 = vrot.lane.b32.xlu1 %v621_v49, %s10147_s21 }
  0x7d   : > { %1098 = vrot.lane.b32.xlu0 %v620_v50, %s10147_s21 }
  0x80   : > { %1244 = vrot.lane.b32.xlu1 %v657_v51, %s10148_s22 }
  0x81   : > { %1242 = vrot.lane.b32.xlu0 %v656_v52, %s10148_s22 }
  0x84   : > { %1388 = vrot.lane.b32.xlu1 %v693_v41, %s10149_s23  ;;  %v587_v41 = vld [vmem:[%s10247_s18 + $0x59] sm:$0xff] }
  0x85   : > { %1386 = vrot.lane.b32.xlu0 %v692_v42, %s10149_s23  ;;  %v586_v42 = vld [vmem:[%s10247_s18 + $0x51] sm:$0xff] }
  0x86   : > { %v977_v55 = vpop.permute.xlu1 %976 }
  0x87   : > { %v833_v56 = vpop.permute.xlu0 %832 }
  0x88   : > { %1498 = vrot.lane.b32.xlu1 %v695_v53, %s10150_s26  ;;  %v1881_v20 = vsel %vm1880_vm1, %v540_v17, %v833_v56  ;;  %v543_v17 = vld [vmem:[%s10247_s18 + $0x18] sm:$0xff] }
  0x89   : > { %1496 = vrot.lane.b32.xlu0 %v694_v54, %s10150_s26  ;;  %v1918_v23 = vsel %vm1917_vm2, %v1881_v20, %v977_v55 }
  0x8a   : > { %v10374_v59 = vpop.permute.xlu1 %978 }
  0x8b   : > { %v10376_v60 = vpop.permute.xlu0 %834 }
  0x8c   : > { %1642 = vrot.lane.b32.xlu1 %v731_v57, %s10151_s25  ;;  %v1882_v35 = vsel %vm1880_vm1, %v541_v29, %v10376_v60  ;;  %v661_v57 = vld [vmem:[%s10247_s18 + $0x6b] sm:$0xff] }
  0x8d   : > { %1640 = vrot.lane.b32.xlu0 %v730_v58, %s10151_s25  ;;  %v1919_v40 = vsel %vm1917_vm2, %v1882_v35, %v10374_v59  ;;  %v660_v58 = vld [vmem:[%s10247_s18 + $0x63] sm:$0xff] }
  0x8e   : > { %v10382_v63 = vpop.permute.xlu1 %1088  ;;  %v544_v35 = vld [vmem:[%s10247_s18 + $0x20] sm:$0xff] }
  0x8f   : > { %v1087_v0 = vpop.permute.xlu0 %1086  ;;  %v1956_v43 = vsel %vm1954_vm3, %v1919_v40, %v10382_v63  ;;  %v542_v63 = vld [vmem:[%s10247_s18 + $0x10] sm:$0xff] }
  0x90   : > { %848 = vrot.lane.b32.xlu1 %v584_v61, %s10146_s20  ;;  %v1955_v26 = vsel %vm1954_vm3, %v1918_v23, %v1087_v0  ;;  %v10500_v0 = vld [vmem:[%s10247_s18 + $0x7c] sm:$0xff] }
  0x91   : > { %1784 = vrot.lane.b32.xlu0 %v766_v62, %s10152_s15 }
  0x92   : > { %v10388_v3 = vpop.permute.xlu1 %836 }
  0x93   : > { %v1231_v4 = vpop.permute.xlu0 %1230 }
  0x94   : > { %850 = vrot.lane.b32.xlu1 %v585_v1, %s10146_s20  ;;  %v1992_v30 = vsel %vm1991_vm4, %v1955_v26, %v1231_v4  ;;  %v10503_v1 = vld [vmem:[%s10247_s18 + $0x74] sm:$0xff]  ;;  %v771_v26 = vld [vmem:[%s10247_s18 + $0x7e] sm:$0xff] }
  0x95   : > { %1786 = vrot.lane.b32.xlu0 %v767_v2, %s10152_s15 }
  0x96   : > { %v1375_v5 = vpop.permute.xlu1 %1374 }
  0x97   : > { %v10392_v6 = vpop.permute.xlu0 %1232  ;;  %v2029_v31 = vsel %vm2028_vm5, %v1992_v30, %v1375_v5  ;;  %v1883_v5 = vsel %vm1880_vm1, %v542_v63, %v10388_v3 }
  0x98   : > { %994 = vrot.lane.b32.xlu1 %v621_v49, %s10145_s19  ;;  %v1993_v46 = vsel %vm1991_vm4, %v1956_v43, %v10392_v6  ;;  %v663_v43 = vld [vmem:[%s10247_s18 + $0x7b] sm:$0xff] }
  0x99   : > { %992 = vrot.lane.b32.xlu0 %v620_v50, %s10145_s19 }
  0x9a   : > { %v10402_v9 = vpop.permute.xlu1 %980 }
  0x9b   : > { %v10404_v10 = vpop.permute.xlu0 %838  ;;  %v1920_v6 = vsel %vm1917_vm2, %v1883_v5, %v10402_v9 }
  0x9c   : > { %1104 = vrot.lane.b32.xlu1 %v10397_v7, %s10147_s21  ;;  %v1884_v23 = vsel %vm1880_vm1, %v543_v17, %v10404_v10 }
  0x9d   : > { %1102 = vrot.lane.b32.xlu0 %v10400_v8, %s10147_s21 }
  0x9e   : > { %v1485_v13 = vpop.permute.xlu1 %1484 }
  0x9f   : > { %v1377_v14 = vpop.permute.xlu0 %1376  ;;  %v2066_v32 = vsel %vm2065_vm6, %v2029_v31, %v1485_v13 }
  0xa0   : > { %1248 = vrot.lane.b32.xlu1 %v659_v11, %s10148_s22  ;;  %v2030_v47 = vsel %vm2028_vm5, %v1993_v46, %v1377_v14 }
  0xa1   : > { %1246 = vrot.lane.b32.xlu0 %v658_v12, %s10148_s22 }
  0xa2   : > { %v10414_v15 = vpop.permute.xlu1 %1090 }
  0xa3   : > { %v10416_v16 = vpop.permute.xlu0 %982  ;;  %v1957_v11 = vsel %vm1954_vm3, %v1920_v6, %v10414_v15 }
  0xa4   : > { %1392 = vrot.lane.b32.xlu1 %v695_v53, %s10149_s23  ;;  %v625_v53 = vld [vmem:[%s10247_s18 + $0x6a] sm:$0xff] }
  0xa5   : > { %1390 = vrot.lane.b32.xlu0 %v694_v54, %s10149_s23  ;;  %v624_v54 = vld [vmem:[%s10247_s18 + $0x62] sm:$0xff] }
  0xa6   : > { %v1629_v21 = vpop.permute.xlu1 %1628 }
  0xa7   : > { %v1487_v22 = vpop.permute.xlu0 %1486  ;;  %v2103_v36 = vsel %vm2102_vm7, %v2066_v32, %v1629_v21 }
  0xa8   : > { %1502 = vrot.lane.b32.xlu1 %v10422_v18, %s10150_s26  ;;  %v2067_v48 = vsel %vm2065_vm6, %v2030_v47, %v1487_v22 }
  0xa9   : > { %1500 = vrot.lane.b32.xlu0 %v10425_v19, %s10150_s26 }
  0xaa   : > { %v10436_v27 = vpop.permute.xlu1 %1234 }
  0xab   : > { %v10438_v28 = vpop.permute.xlu0 %1092  ;;  %v1994_v3 = vsel %vm1991_vm4, %v1957_v11, %v10436_v27  ;;  %v772_v11 = vld [vmem:[%s10247_s18 + $0x86] sm:$0xff] }
  0xac   : > { %1646 = vrot.lane.b32.xlu1 %v733_v24, %s10151_s25  ;;  %v1921_v24 = vsel %vm1917_vm2, %v1884_v23, %v10416_v16 }
  0xad   : > { %1644 = vrot.lane.b32.xlu0 %v732_v25, %s10151_s25  ;;  %v589_v25 = vld [vmem:[%s10247_s18 + $0x69] sm:$0xff]  ;;  %v1958_v27 = vsel %vm1954_vm3, %v1921_v24, %v10438_v28 }
  0xae   : > { %v1773_v37 = vpop.permute.xlu1 %1772 }
  0xaf   : > { %v1631_v38 = vpop.permute.xlu0 %1630  ;;  %v2140_v39 = vsel %vm2139_vm8, %v2103_v36, %v1773_v37  ;;  %v627_v36 = vld [vmem:[%s10247_s18 + $0x7a] sm:$0xff]  ;;  %v626_v37 = vld [vmem:[%s10247_s18 + $0x72] sm:$0xff] }
  0xb0   : > { %1790 = vrot.lane.b32.xlu1 %v769_v33, %s10152_s15  ;;  %8434 = vmatprep.mubr.msk.f32.mxu0 %vm2188_vm9, %v2140_v39  ;;  %v2104_v49 = vsel %vm2102_vm7, %v2067_v48, %v1631_v38 }
  0xb1   : > { %1788 = vrot.lane.b32.xlu0 %v768_v34, %s10152_s15 }
  0xb2   : > { %v10461_v44 = vpop.permute.xlu1 %1236 }
  0xb3   : > { %v10463_v45 = vpop.permute.xlu0 %840  ;;  %v1995_v10 = vsel %vm1991_vm4, %v1958_v27, %v10461_v44  ;;  %v662_v44 = vld [vmem:[%s10247_s18 + $0x73] sm:$0xff]  ;;  %v665_v27 = vld [vmem:[%s10247_s18 + $0x8b] sm:$0xff] }
  0xb4   : > { %854 = vrot.lane.b32.xlu1 %v587_v41, %s10146_s20  ;;  %v1885_v40 = vsel %vm1880_vm1, %v544_v35, %v10463_v45 }
  0xb5   : > { %852 = vrot.lane.b32.xlu0 %v586_v42, %s10146_s20  ;;  %v545_v42 = vld [vmem:[%s10247_s18 + $0x28] sm:$0xff] }
  0xb6   : > { %v1775_v50 = vpop.permute.xlu1 %1774 }
  0xb7   : > { %v1379_v51 = vpop.permute.xlu0 %1378  ;;  %v2141_v52 = vsel %vm2139_vm8, %v2104_v49, %v1775_v50 }
  0xb8   : > { %998 = vrot.lane.b32.xlu1 %v10397_v7, %s10145_s19  ;;  %8435 = vmatmul.mubr.msk.f32.vlgmr.msra.gmra.mrb[0].mxu0 %vm2188_vm9, %v2141_v52  ;;  %v735_v7 = vld [vmem:[%s10247_s18 + $0x7d] sm:$0xff]  ;;  %v2031_v14 = vsel %vm2028_vm5, %v1994_v3, %v1379_v51 }
  0xb9   : > { %996 = vrot.lane.b32.xlu0 %v10400_v8, %s10145_s19  ;;  %v734_v8 = vld [vmem:[%s10247_s18 + $0x75] sm:$0xff] }
  0xba   : > { %v10480_v55 = vpop.permute.xlu1 %984  ;;  %v591_v3 = vld [vmem:[%s10247_s18 + $0x79] sm:$0xff] }
  0xbb   : > { %v10482_v56 = vpop.permute.xlu0 %842  ;;  %v1922_v41 = vsel %vm1917_vm2, %v1885_v40, %v10480_v55 }
  0xbc   : > { %1108 = vrot.lane.b32.xlu1 %v625_v53, %s10147_s21  ;;  %v1886_v45 = vsel %vm1880_vm1, %v545_v42, %v10482_v56 }
  0xbd   : > { %1106 = vrot.lane.b32.xlu0 %v624_v54, %s10147_s21 }
  0xbe   : > { %v1489_v59 = vpop.permute.xlu1 %1488 }
  0xbf   : > { %v1381_v60 = vpop.permute.xlu0 %1380  ;;  %v2068_v9 = vsel %vm2065_vm6, %v2031_v14, %v1489_v59  ;;  %v773_v14 = vld [vmem:[%s10247_s18 + $0x8e] sm:$0xff] }
  0xc0   : > { %1252 = vrot.lane.b32.xlu1 %v661_v57, %s10148_s22  ;;  %v2032_v31 = vsel %vm2028_vm5, %v1995_v10, %v1381_v60 }
  0xc1   : > { %1250 = vrot.lane.b32.xlu0 %v660_v58, %s10148_s22 }
  0xc2   : > { %v10490_v61 = vpop.permute.xlu1 %1094 }
  0xc3   : > { %v10492_v62 = vpop.permute.xlu0 %986  ;;  %v1959_v46 = vsel %vm1954_vm3, %v1922_v41, %v10490_v61  ;;  %v701_v61 = vld [vmem:[%s10247_s18 + $0x8c] sm:$0xff] }
  0xc4   : > { %1396 = vrot.lane.b32.xlu1 %v10422_v18, %s10149_s23  ;;  %v588_v18 = vld [vmem:[%s10247_s18 + $0x61] sm:$0xff]  ;;  %v1923_v51 = vsel %vm1917_vm2, %v1886_v45, %v10492_v62 }
  0xc5   : > { %1394 = vrot.lane.b32.xlu0 %v10425_v19, %s10149_s23  ;;  %v770_v19 = vld [vmem:[%s10247_s18 + $0x76] sm:$0xff]  ;;  %v700_v62 = vld [vmem:[%s10247_s18 + $0x84] sm:$0xff] }
  0xc6   : > { %v1633_v2 = vpop.permute.xlu1 %1632  ;;  %v739_v45 = vld [vmem:[%s10247_s18 + $0x9d] sm:$0xff] }
  0xc7   : > { %v1491_v4 = vpop.permute.xlu0 %1490  ;;  %v2105_v15 = vsel %vm2102_vm7, %v2068_v9, %v1633_v2 }
  0xc8   : > { %1506 = vrot.lane.b32.xlu1 %v10500_v0, %s10150_s26  ;;  %v2069_v16 = vsel %vm2065_vm6, %v2032_v31, %v1491_v4 }
  0xc9   : > { %1504 = vrot.lane.b32.xlu0 %v10503_v1, %s10150_s26 }
  0xca   : > { %v1239_v12 = vpop.permute.xlu1 %1238 }
  0xcb   : > { %v1097_v13 = vpop.permute.xlu0 %1096  ;;  %v1996_v49 = vsel %vm1991_vm4, %v1959_v46, %v1239_v12 }
  0xcc   : > { %1650 = vrot.lane.b32.xlu1 %v735_v7, %s10151_s25 }
  0xcd   : > { %1648 = vrot.lane.b32.xlu0 %v734_v8, %s10151_s25  ;;  %v590_v8 = vld [vmem:[%s10247_s18 + $0x71] sm:$0xff] }
  0xce   : > { %v1777_v20 = vpop.permute.xlu1 %1776 }
  0xcf   : > { %v1635_v21 = vpop.permute.xlu0 %1634  ;;  %v2142_v22 = vsel %vm2139_vm8, %v2105_v15, %v1777_v20  ;;  %v546_v15 = vld [vmem:[%s10247_s18 + $0x30] sm:$0xff] }
  0xd0   : > { %856 = vrot.lane.b32.xlu1 %v588_v18, %s10146_s20  ;;  %8437 = vmatprep.mubr.msk.f32.mxu0 %vm2188_vm9, %v2142_v22  ;;  %v2106_v32 = vsel %vm2102_vm7, %v2069_v16, %v1635_v21  ;;  %v629_v20 = vld [vmem:[%s10247_s18 + $0x8a] sm:$0xff]  ;;  %v628_v21 = vld [vmem:[%s10247_s18 + $0x82] sm:$0xff] }
  0xd1   : > { %1792 = vrot.lane.b32.xlu0 %v770_v19, %s10152_s15 }
  0xd2   : > { %v1383_v29 = vpop.permute.xlu1 %1382 }
  0xd3   : > { %v1241_v30 = vpop.permute.xlu0 %1240  ;;  %v2033_v50 = vsel %vm2028_vm5, %v1996_v49, %v1383_v29  ;;  %v664_v29 = vld [vmem:[%s10247_s18 + $0x83] sm:$0xff] }
  0xd4   : > { %858 = vrot.lane.b32.xlu1 %v589_v25, %s10146_s20  ;;  %v547_v25 = vld [vmem:[%s10247_s18 + $0x38] sm:$0xff] }
  0xd5   : > { %1794 = vrot.lane.b32.xlu0 %v771_v26, %s10152_s15 }
  0xd6   : > { %v1385_v33 = vpop.permute.xlu1 %1384 }
  0xd7   : > { %v1779_v28 = vpop.permute.xlu0 %1778 }
  0xd8   : > { %v2143_v34 = vsel %vm2139_vm8, %v2106_v32, %v1779_v28  ;;  %1002 = vrot.lane.b32.xlu1 %v625_v53, %s10145_s19  ;;  %v1960_v53 = vsel %vm1954_vm3, %v1923_v51, %v1097_v13 }
  0xd9   : > { %1000 = vrot.lane.b32.xlu0 %v624_v54, %s10145_s19  ;;  %8438 = vmatmul.mubr.msk.f32.gmra.mrb[2].mxu0 %vm2188_vm9, %v2143_v34  ;;  %v1997_v56 = vsel %vm1991_vm4, %v1960_v53, %v1241_v30  ;;  %v592_v53 = vld [vmem:[%s10247_s18 + $0x81] sm:$0xff] }
  0xda   : > { %v1495_v38 = vpop.permute.xlu1 %1494  ;;  %v2034_v59 = vsel %vm2028_vm5, %v1997_v56, %v1385_v33  ;;  %v593_v56 = vld [vmem:[%s10247_s18 + $0x89] sm:$0xff] }
  0xdb   : > { %v1493_v39 = vpop.permute.xlu0 %1492  ;;  %v2071_v60 = vsel %vm2065_vm6, %v2034_v59, %v1495_v38 }
  0xdc   : > { %1112 = vrot.lane.b32.xlu1 %v627_v36, %s10147_s21  ;;  %v2070_v52 = vsel %vm2065_vm6, %v2033_v50, %v1493_v39  ;;  %v738_v50 = vld [vmem:[%s10247_s18 + $0x95] sm:$0xff] }
  0xdd   : > { %1110 = vrot.lane.b32.xlu0 %v626_v37, %s10147_s21 }
  0xde   : > { %v1639_v47 = vpop.permute.xlu1 %1638 }
  0xdf   : > { %v1637_v48 = vpop.permute.xlu0 %1636  ;;  %v2108_v63 = vsel %vm2102_vm7, %v2071_v60, %v1639_v47 }
  0xe0   : > { %1256 = vrot.lane.b32.xlu1 %v663_v43, %s10148_s22  ;;  %v2107_v54 = vsel %vm2102_vm7, %v2070_v52, %v1637_v48  ;;  %v10633_v43 = vld [vmem:[%s10247_s18 + $0x9c] sm:$0xff] }
  0xe1   : > { %1254 = vrot.lane.b32.xlu0 %v662_v44, %s10148_s22  ;;  %v10636_v44 = vld [vmem:[%s10247_s18 + $0x94] sm:$0xff] }
  0xe2   : > { %v845_v55 = vpop.permute.xlu1 %844 }
  0xe3   : > { %v1781_v57 = vpop.permute.xlu0 %1780  ;;  %v1887_v24 = vsel %vm1880_vm1, %v546_v15, %v845_v55 }
  0xe4   : > { %v2144_v58 = vsel %vm2139_vm8, %v2107_v54, %v1781_v57  ;;  %1400 = vrot.lane.b32.xlu1 %v10500_v0, %s10149_s23  ;;  %v737_v0 = vld [vmem:[%s10247_s18 + $0x8d] sm:$0xff]  ;;  %v774_v54 = vld [vmem:[%s10247_s18 + $0x96] sm:$0xff] }
  0xe5   : > { %1398 = vrot.lane.b32.xlu0 %v10503_v1, %s10149_s23  ;;  %8440 = vmatprep.mubr.msk.f32.mxu0 %vm2188_vm9, %v2144_v58  ;;  %v736_v1 = vld [vmem:[%s10247_s18 + $0x85] sm:$0xff] }
  0xe6   : > { %v847_v2 = vpop.permute.xlu1 %846  ;;  %v775_v58 = vld [vmem:[%s10247_s18 + $0x9e] sm:$0xff] }
  0xe7   : > { %v1783_v4 = vpop.permute.xlu0 %1782  ;;  %v1888_v32 = vsel %vm1880_vm1, %v547_v25, %v847_v2  ;;  %v549_v2 = vld [vmem:[%s10247_s18 + $0x48] sm:$0xff] }
  0xe8   : > { %v2145_v5 = vsel %vm2139_vm8, %v2108_v63, %v1783_v4  ;;  %1510 = vrot.lane.b32.xlu1 %v701_v61, %s10150_s26  ;;  %v548_v63 = vld [vmem:[%s10247_s18 + $0x40] sm:$0xff] }
  0xe9   : > { %1508 = vrot.lane.b32.xlu0 %v700_v62, %s10150_s26  ;;  %8441 = vmatmul.mubr.msk.f32.gmra.mrb[4].mxu0 %vm2188_vm9, %v2145_v5  ;;  %v631_v4 = vld [vmem:[%s10247_s18 + $0x9a] sm:$0xff]  ;;  %v630_v5 = vld [vmem:[%s10247_s18 + $0x92] sm:$0xff] }
  0xea   : > { %v991_v6 = vpop.permute.xlu1 %990 }
  0xeb   : > { %v989_v7 = vpop.permute.xlu0 %988  ;;  %v1925_v28 = vsel %vm1917_vm2, %v1888_v32, %v991_v6  ;;  %v741_v32 = vld [vmem:[%s10247_s18 + $0xad] sm:$0xff] }
  0xec   : > { %1654 = vrot.lane.b32.xlu1 %v737_v0, %s10151_s25  ;;  %v1924_v26 = vsel %vm1917_vm2, %v1887_v24, %v989_v7 }
  0xed   : > { %1652 = vrot.lane.b32.xlu0 %v736_v1, %s10151_s25 }
  0xee   : > { %v1101_v12 = vpop.permute.xlu1 %1100 }
  0xef   : > { %v1099_v13 = vpop.permute.xlu0 %1098  ;;  %v1962_v35 = vsel %vm1954_vm3, %v1925_v28, %v1101_v12  ;;  %v667_v12 = vld [vmem:[%s10247_s18 + $0x9b] sm:$0xff] }
  0xf0   : > { %860 = vrot.lane.b32.xlu1 %v590_v8, %s10146_s20  ;;  %v1961_v30 = vsel %vm1954_vm3, %v1924_v26, %v1099_v13  ;;  %v666_v13 = vld [vmem:[%s10247_s18 + $0x93] sm:$0xff] }
  0xf1   : > { %1796 = vrot.lane.b32.xlu0 %v772_v11, %s10152_s15 }
  0xf2   : > { %v1245_v17 = vpop.permute.xlu1 %1244 }
  0xf3   : > { %v1243_v9 = vpop.permute.xlu0 %1242  ;;  %v1999_v39 = vsel %vm1991_vm4, %v1962_v35, %v1245_v17  ;;  %v594_v35 = vld [vmem:[%s10247_s18 + $0x91] sm:$0xff] }
  0xf4   : > { %862 = vrot.lane.b32.xlu1 %v591_v3, %s10146_s20  ;;  %v1998_v16 = vsel %vm1991_vm4, %v1961_v30, %v1243_v9  ;;  %v705_v30 = vld [vmem:[%s10247_s18 + $0xac] sm:$0xff] }
  0xf5   : > { %1798 = vrot.lane.b32.xlu0 %v773_v14, %s10152_s15 }
  0xf6   : > { %v1389_v18 = vpop.permute.xlu1 %1388 }
  0xf7   : > { %v1387_v19 = vpop.permute.xlu0 %1386  ;;  %v2036_v41 = vsel %vm2028_vm5, %v1999_v39, %v1389_v18  ;;  %v595_v39 = vld [vmem:[%s10247_s18 + $0x99] sm:$0xff] }
  0xf8   : > { %1006 = vrot.lane.b32.xlu1 %v627_v36, %s10145_s19  ;;  %v2035_v33 = vsel %vm2028_vm5, %v1998_v16, %v1387_v19 }
  0xf9   : > { %1004 = vrot.lane.b32.xlu0 %v626_v37, %s10145_s19 }
  0xfa   : > { %v1499_v22 = vpop.permute.xlu1 %1498 }
  0xfb   : > { %v1497_v23 = vpop.permute.xlu0 %1496  ;;  %v2073_v42 = vsel %vm2065_vm6, %v2036_v41, %v1499_v22 }
  0xfc   : > { %1116 = vrot.lane.b32.xlu1 %v629_v20, %s10147_s21  ;;  %v2072_v34 = vsel %vm2065_vm6, %v2035_v33, %v1497_v23  ;;  %v740_v33 = vld [vmem:[%s10247_s18 + $0xa5] sm:$0xff] }
  0xfd   : > { %1114 = vrot.lane.b32.xlu0 %v628_v21, %s10147_s21 }
  0xfe   : > { %v1643_v10 = vpop.permute.xlu1 %1642 }
  0xff   : > { %v1641_v31 = vpop.permute.xlu0 %1640  ;;  %v2110_v46 = vsel %vm2102_vm7, %v2073_v42, %v1643_v10  ;;  %v704_v10 = vld [vmem:[%s10247_s18 + $0xa4] sm:$0xff] }
 0x100   : > { %1260 = vrot.lane.b32.xlu1 %v665_v27, %s10148_s22  ;;  %v2109_v36 = vsel %vm2102_vm7, %v2072_v34, %v1641_v31 }
 0x101   : > { %1258 = vrot.lane.b32.xlu0 %v664_v29, %s10148_s22 }
 0x102   : > { %v849_v37 = vpop.permute.xlu1 %848 }
 0x103   : > { %v1785_v38 = vpop.permute.xlu0 %1784  ;;  %v1889_v6 = vsel %vm1880_vm1, %v548_v63, %v849_v37 }
 0x104   : > { %v2146_v40 = vsel %vm2139_vm8, %v2109_v36, %v1785_v38  ;;  %1404 = vrot.lane.b32.xlu1 %v701_v61, %s10149_s23  ;;  %v776_v36 = vld [vmem:[%s10247_s18 + $0xa6] sm:$0xff] }
 0x105   : > { %1402 = vrot.lane.b32.xlu0 %v700_v62, %s10149_s23  ;;  %8443 = vmatprep.mubr.msk.f32.mxu0 %vm2188_vm9, %v2146_v40  ;;  %v777_v40 = vld [vmem:[%s10247_s18 + $0xae] sm:$0xff] }
 0x106   : > { %v851_v47 = vpop.permute.xlu1 %850 }
 0x107   : > { %v1787_v48 = vpop.permute.xlu0 %1786  ;;  %v1890_v7 = vsel %vm1880_vm1, %v549_v2, %v851_v47  ;;  %v633_v47 = vld [vmem:[%s10247_s18 + $0xaa] sm:$0xff] }
 0x108   : > { %v2147_v49 = vsel %vm2139_vm8, %v2110_v46, %v1787_v48  ;;  %1514 = vrot.lane.b32.xlu1 %v10633_v43, %s10150_s26  ;;  %v550_v46 = vld [vmem:[%s10247_s18 + $0x50] sm:$0xff]  ;;  %v632_v48 = vld [vmem:[%s10247_s18 + $0xa2] sm:$0xff] }
 0x109   : > { %1512 = vrot.lane.b32.xlu0 %v10636_v44, %s10150_s26  ;;  %8444 = vmatmul.mubr.msk.f32.gmra.mrb[6].mxu0 %vm2188_vm9, %v2147_v49 }
 0x10a   : > { %v995_v51 = vpop.permute.xlu1 %994 }
 0x10b   : > { %v993_v52 = vpop.permute.xlu0 %992  ;;  %v1927_v8 = vsel %vm1917_vm2, %v1890_v7, %v995_v51  ;;  %v551_v51 = vld [vmem:[%s10247_s18 + $0x58] sm:$0xff] }
 0x10c   : > { %1658 = vrot.lane.b32.xlu1 %v739_v45, %s10151_s25  ;;  %v1926_v11 = vsel %vm1917_vm2, %v1889_v6, %v993_v52 }
 0x10d   : > { %1656 = vrot.lane.b32.xlu0 %v738_v50, %s10151_s25 }
 0x10e   : > { %v1105_v55 = vpop.permute.xlu1 %1104 }
 0x10f   : > { %v1103_v57 = vpop.permute.xlu0 %1102  ;;  %v1964_v3 = vsel %vm1954_vm3, %v1927_v8, %v1105_v55  ;;  %v707_v8 = vld [vmem:[%s10247_s18 + $0xbc] sm:$0xff] }
 0x110   : > { %864 = vrot.lane.b32.xlu1 %v592_v53, %s10146_s20  ;;  %v1963_v14 = vsel %vm1954_vm3, %v1926_v11, %v1103_v57  ;;  %v669_v53 = vld [vmem:[%s10247_s18 + $0xab] sm:$0xff]  ;;  %v706_v11 = vld [vmem:[%s10247_s18 + $0xb4] sm:$0xff] }
 0x111   : > { %1800 = vrot.lane.b32.xlu0 %v774_v54, %s10152_s15  ;;  %v668_v54 = vld [vmem:[%s10247_s18 + $0xa3] sm:$0xff] }
 0x112   : > { %v1249_v59 = vpop.permute.xlu1 %1248 }
 0x113   : > { %v1247_v60 = vpop.permute.xlu0 %1246  ;;  %v2001_v18 = vsel %vm1991_vm4, %v1964_v3, %v1249_v59 }
 0x114   : > { %866 = vrot.lane.b32.xlu1 %v593_v56, %s10146_s20  ;;  %v2000_v19 = vsel %vm1991_vm4, %v1963_v14, %v1247_v60 }
 0x115   : > { %1802 = vrot.lane.b32.xlu0 %v775_v58, %s10152_s15 }
 0x116   : > { %v1393_v61 = vpop.permute.xlu1 %1392 }
 0x117   : > { %v1391_v62 = vpop.permute.xlu0 %1390  ;;  %v2038_v15 = vsel %vm2028_vm5, %v2001_v18, %v1393_v61 }
 0x118   : > { %1010 = vrot.lane.b32.xlu1 %v629_v20, %s10145_s19  ;;  %v2037_v20 = vsel %vm2028_vm5, %v2000_v19, %v1391_v62 }
 0x119   : > { %1008 = vrot.lane.b32.xlu0 %v628_v21, %s10145_s19 }
 0x11a   : > { %v1503_v0 = vpop.permute.xlu1 %1502 }
 0x11b   : > { %v1501_v1 = vpop.permute.xlu0 %1500  ;;  %v2075_v21 = vsel %vm2065_vm6, %v2038_v15, %v1503_v0  ;;  %v596_v15 = vld [vmem:[%s10247_s18 + $0xa1] sm:$0xff] }
 0x11c   : > { %1120 = vrot.lane.b32.xlu1 %v631_v4, %s10147_s21  ;;  %v2074_v22 = vsel %vm2065_vm6, %v2037_v20, %v1501_v1  ;;  %v778_v20 = vld [vmem:[%s10247_s18 + $0xb6] sm:$0xff] }
 0x11d   : > { %1118 = vrot.lane.b32.xlu0 %v630_v5, %s10147_s21 }
 0x11e   : > { %v1647_v17 = vpop.permute.xlu1 %1646 }
 0x11f   : > { %v1645_v9 = vpop.permute.xlu0 %1644  ;;  %v2112_v23 = vsel %vm2102_vm7, %v2075_v21, %v1647_v17  ;;  %v743_v17 = vld [vmem:[%s10247_s18 + $0xbd] sm:$0xff] }
 0x120   : > { %1264 = vrot.lane.b32.xlu1 %v667_v12, %s10148_s22  ;;  %v2111_v24 = vsel %vm2102_vm7, %v2074_v22, %v1645_v9  ;;  %v742_v9 = vld [vmem:[%s10247_s18 + $0xb5] sm:$0xff] }
 0x121   : > { %1262 = vrot.lane.b32.xlu0 %v666_v13, %s10148_s22 }
 0x122   : > { %v1791_v25 = vpop.permute.xlu1 %1790 }
 0x123   : > { %v1789_v26 = vpop.permute.xlu0 %1788  ;;  %v2149_v27 = vsel %vm2139_vm8, %v2112_v23, %v1791_v25  ;;  %v597_v23 = vld [vmem:[%s10247_s18 + $0xa9] sm:$0xff] }
 0x124   : > { %v2148_v29 = vsel %vm2139_vm8, %v2111_v24, %v1789_v26  ;;  %1408 = vrot.lane.b32.xlu1 %v10633_v43, %s10149_s23  ;;  %v779_v24 = vld [vmem:[%s10247_s18 + $0xbe] sm:$0xff] }
 0x125   : > { %1406 = vrot.lane.b32.xlu0 %v10636_v44, %s10149_s23  ;;  %8446 = vmatprep.mubr.msk.f32.mxu0 %vm2188_vm9, %v2148_v29 }
 0x126   : > { %8447 = vmatmul.mubr.msk.f32.gmra.mrb[8].mxu0 %vm2188_vm9, %v2149_v27  ;;  %v855_v31 = vpop.permute.xlu1 %854 }
 0x127   : > { %v853_v16 = vpop.permute.xlu0 %852  ;;  %v1892_v59 = vsel %vm1880_vm1, %v551_v51, %v855_v31  ;;  %v634_v31 = vld [vmem:[%s10247_s18 + $0xb2] sm:$0xff] }
 0x128   : > { %1518 = vrot.lane.b32.xlu1 %v705_v30, %s10150_s26  ;;  %v1891_v50 = vsel %vm1880_vm1, %v550_v46, %v853_v16 }
 0x129   : > { %1516 = vrot.lane.b32.xlu0 %v704_v10, %s10150_s26 }
 0x12a   : > { %v999_v28 = vpop.permute.xlu1 %998 }
 0x12b   : > { %v997_v34 = vpop.permute.xlu0 %996  ;;  %v1929_v61 = vsel %vm1917_vm2, %v1892_v59, %v999_v28  ;;  %v553_v28 = vld [vmem:[%s10247_s18 + $0x68] sm:$0xff] }
 0x12c   : > { %1662 = vrot.lane.b32.xlu1 %v741_v32, %s10151_s25  ;;  %v1928_v52 = vsel %vm1917_vm2, %v1891_v50, %v997_v34  ;;  %v745_v59 = vld [vmem:[%s10247_s18 + $0xcd] sm:$0xff] }
 0x12d   : > { %1660 = vrot.lane.b32.xlu0 %v740_v33, %s10151_s25 }
 0x12e   : > { %v1109_v37 = vpop.permute.xlu1 %1108 }
 0x12f   : > { %v1107_v38 = vpop.permute.xlu0 %1106  ;;  %v1966_v63 = vsel %vm1954_vm3, %v1929_v61, %v1109_v37 }
 0x130   : > { %868 = vrot.lane.b32.xlu1 %v594_v35, %s10146_s20  ;;  %v1965_v55 = vsel %vm1954_vm3, %v1928_v52, %v1107_v38  ;;  %v671_v35 = vld [vmem:[%s10247_s18 + $0xbb] sm:$0xff] }
 0x131   : > { %1804 = vrot.lane.b32.xlu0 %v776_v36, %s10152_s15  ;;  %v670_v36 = vld [vmem:[%s10247_s18 + $0xb3] sm:$0xff] }
 0x132   : > { %v1253_v41 = vpop.permute.xlu1 %1252 }
 0x133   : > { %v1251_v42 = vpop.permute.xlu0 %1250  ;;  %v2003_v0 = vsel %vm1991_vm4, %v1966_v63, %v1253_v41  ;;  %v598_v63 = vld [vmem:[%s10247_s18 + $0xb1] sm:$0xff] }
 0x134   : > { %870 = vrot.lane.b32.xlu1 %v595_v39, %s10146_s20  ;;  %v2002_v58 = vsel %vm1991_vm4, %v1965_v55, %v1251_v42 }
 0x135   : > { %1806 = vrot.lane.b32.xlu0 %v777_v40, %s10152_s15 }
 0x136   : > { %v1397_v43 = vpop.permute.xlu1 %1396 }
 0x137   : > { %v1395_v44 = vpop.permute.xlu0 %1394  ;;  %v2040_v6 = vsel %vm2028_vm5, %v2003_v0, %v1397_v43  ;;  %v599_v0 = vld [vmem:[%s10247_s18 + $0xb9] sm:$0xff] }
 0x138   : > { %1014 = vrot.lane.b32.xlu1 %v631_v4, %s10145_s19  ;;  %v2039_v60 = vsel %vm2028_vm5, %v2002_v58, %v1395_v44 }
 0x139   : > { %1012 = vrot.lane.b32.xlu0 %v630_v5, %s10145_s19 }
 0x13a   : > { %v1507_v49 = vpop.permute.xlu1 %1506 }
 0x13b   : > { %v1505_v45 = vpop.permute.xlu0 %1504  ;;  %v2077_v7 = vsel %vm2065_vm6, %v2040_v6, %v1507_v49 }
 0x13c   : > { %1124 = vrot.lane.b32.xlu1 %v633_v47, %s10147_s21  ;;  %v2076_v62 = vsel %vm2065_vm6, %v2039_v60, %v1505_v45  ;;  %v744_v60 = vld [vmem:[%s10247_s18 + $0xc5] sm:$0xff] }
 0x13d   : > { %1122 = vrot.lane.b32.xlu0 %v632_v48, %s10147_s21 }
 0x13e   : > { %v1651_v57 = vpop.permute.xlu1 %1650 }
 0x13f   : > { %v1649_v56 = vpop.permute.xlu0 %1648  ;;  %v2114_v12 = vsel %vm2102_vm7, %v2077_v7, %v1651_v57 }
 0x140   : > { %1268 = vrot.lane.b32.xlu1 %v669_v53, %s10148_s22  ;;  %v2113_v2 = vsel %vm2102_vm7, %v2076_v62, %v1649_v56  ;;  %v709_v53 = vld [vmem:[%s10247_s18 + $0xcc] sm:$0xff] }
 0x141   : > { %1266 = vrot.lane.b32.xlu0 %v668_v54, %s10148_s22  ;;  %v708_v54 = vld [vmem:[%s10247_s18 + $0xc4] sm:$0xff] }
 0x142   : > { %v857_v4 = vpop.permute.xlu1 %856 }
 0x143   : > { %v1793_v5 = vpop.permute.xlu0 %1792 }
 0x144   : > { %v2150_v1 = vsel %vm2139_vm8, %v2113_v2, %v1793_v5  ;;  %1412 = vrot.lane.b32.xlu1 %v705_v30, %s10149_s23  ;;  %v552_v30 = vld [vmem:[%s10247_s18 + $0x60] sm:$0xff] }
 0x145   : > { %1410 = vrot.lane.b32.xlu0 %v704_v10, %s10149_s23  ;;  %8449 = vmatprep.mubr.msk.f32.mxu0 %vm2188_vm9, %v2150_v1  ;;  %v635_v10 = vld [vmem:[%s10247_s18 + $0xba] sm:$0xff]  ;;  %v1893_v33 = vsel %vm1880_vm1, %v552_v30, %v857_v4  ;;  %v780_v2 = vld [vmem:[%s10247_s18 + $0xc6] sm:$0xff]  ;;  %v781_v1 = vld [vmem:[%s10247_s18 + $0xce] sm:$0xff] }
 0x146   : > { %v859_v13 = vpop.permute.xlu1 %858 }
 0x147   : > { %v1795_v3 = vpop.permute.xlu0 %1794  ;;  %v1894_v41 = vsel %vm1880_vm1, %v553_v28, %v859_v13  ;;  %v637_v13 = vld [vmem:[%s10247_s18 + $0xca] sm:$0xff] }
 0x148   : > { %v2151_v14 = vsel %vm2139_vm8, %v2114_v12, %v1795_v3  ;;  %1522 = vrot.lane.b32.xlu1 %v707_v8, %s10150_s26  ;;  %v554_v12 = vld [vmem:[%s10247_s18 + $0x70] sm:$0xff]  ;;  %v636_v3 = vld [vmem:[%s10247_s18 + $0xc2] sm:$0xff] }
 0x149   : > { %1520 = vrot.lane.b32.xlu0 %v706_v11, %s10150_s26  ;;  %8450 = vmatmul.mubr.msk.f32.gmra.mrb[10].mxu0 %vm2188_vm9, %v2151_v14 }
 0x14a   : > { %v1003_v18 = vpop.permute.xlu1 %1002 }
 0x14b   : > { %v1001_v19 = vpop.permute.xlu0 %1000  ;;  %v1931_v43 = vsel %vm1917_vm2, %v1894_v41, %v1003_v18  ;;  %v555_v18 = vld [vmem:[%s10247_s18 + $0x78] sm:$0xff] }
 0x14c   : > { %1666 = vrot.lane.b32.xlu1 %v743_v17, %s10151_s25  ;;  %v1930_v34 = vsel %vm1917_vm2, %v1893_v33, %v1001_v19  ;;  %v747_v41 = vld [vmem:[%s10247_s18 + $0xdd] sm:$0xff] }
 0x14d   : > { %1664 = vrot.lane.b32.xlu0 %v742_v9, %s10151_s25 }
 0x14e   : > { %v1113_v21 = vpop.permute.xlu1 %1112 }
 0x14f   : > { %v1111_v22 = vpop.permute.xlu0 %1110  ;;  %v1968_v46 = vsel %vm1954_vm3, %v1931_v43, %v1113_v21 }
 0x150   : > { %872 = vrot.lane.b32.xlu1 %v596_v15, %s10146_s20  ;;  %v1967_v37 = vsel %vm1954_vm3, %v1930_v34, %v1111_v22  ;;  %v673_v15 = vld [vmem:[%s10247_s18 + $0xcb] sm:$0xff] }
 0x151   : > { %1808 = vrot.lane.b32.xlu0 %v778_v20, %s10152_s15  ;;  %v672_v20 = vld [vmem:[%s10247_s18 + $0xc3] sm:$0xff] }
 0x152   : > { %v1257_v25 = vpop.permute.xlu1 %1256 }
 0x153   : > { %v1255_v26 = vpop.permute.xlu0 %1254  ;;  %v2005_v45 = vsel %vm1991_vm4, %v1968_v46, %v1257_v25 }
 0x154   : > { %874 = vrot.lane.b32.xlu1 %v597_v23, %s10146_s20  ;;  %v2004_v40 = vsel %vm1991_vm4, %v1967_v37, %v1255_v26 }
 0x155   : > { %1810 = vrot.lane.b32.xlu0 %v779_v24, %s10152_s15 }
 0x156   : > { %v1401_v27 = vpop.permute.xlu1 %1400 }
 0x157   : > { %v1399_v29 = vpop.permute.xlu0 %1398  ;;  %v2042_v51 = vsel %vm2028_vm5, %v2005_v45, %v1401_v27 }
 0x158   : > { %1018 = vrot.lane.b32.xlu1 %v633_v47, %s10145_s19  ;;  %v2041_v42 = vsel %vm2028_vm5, %v2004_v40, %v1399_v29 }
 0x159   : > { %1016 = vrot.lane.b32.xlu0 %v632_v48, %s10145_s19 }
 0x15a   : > { %v1511_v16 = vpop.permute.xlu1 %1510 }
 0x15b   : > { %v1509_v32 = vpop.permute.xlu0 %1508  ;;  %v2079_v52 = vsel %vm2065_vm6, %v2042_v51, %v1511_v16  ;;  %v601_v51 = vld [vmem:[%s10247_s18 + $0xc9] sm:$0xff] }
 0x15c   : > { %1128 = vrot.lane.b32.xlu1 %v635_v10, %s10147_s21  ;;  %v2078_v44 = vsel %vm2065_vm6, %v2041_v42, %v1509_v32  ;;  %v746_v42 = vld [vmem:[%s10247_s18 + $0xd5] sm:$0xff] }
 0x15d   : > { %1126 = vrot.lane.b32.xlu0 %v634_v31, %s10147_s21 }
 0x15e   : > { %v1655_v38 = vpop.permute.xlu1 %1654 }
 0x15f   : > { %v1653_v39 = vpop.permute.xlu0 %1652  ;;  %v2116_v55 = vsel %vm2102_vm7, %v2079_v52, %v1655_v38  ;;  %v783_v52 = vld [vmem:[%s10247_s18 + $0xde] sm:$0xff] }
 0x160   : > { %1272 = vrot.lane.b32.xlu1 %v671_v35, %s10148_s22  ;;  %v2115_v47 = vsel %vm2102_vm7, %v2078_v44, %v1653_v39  ;;  %v10833_v35 = vld [vmem:[%s10247_s18 + $0xdc] sm:$0xff] }
 0x161   : > { %1270 = vrot.lane.b32.xlu0 %v670_v36, %s10148_s22  ;;  %v710_v36 = vld [vmem:[%s10247_s18 + $0xd4] sm:$0xff] }
 0x162   : > { %v861_v48 = vpop.permute.xlu1 %860 }
 0x163   : > { %v1797_v49 = vpop.permute.xlu0 %1796  ;;  %v1895_v9 = vsel %vm1880_vm1, %v554_v12, %v861_v48  ;;  %v600_v48 = vld [vmem:[%s10247_s18 + $0xc1] sm:$0xff] }
 0x164   : > { %v2152_v50 = vsel %vm2139_vm8, %v2115_v47, %v1797_v49  ;;  %1416 = vrot.lane.b32.xlu1 %v707_v8, %s10149_s23  ;;  %v782_v49 = vld [vmem:[%s10247_s18 + $0xd6] sm:$0xff] }
 0x165   : > { %1414 = vrot.lane.b32.xlu0 %v706_v11, %s10149_s23  ;;  %8452 = vmatprep.mubr.msk.f32.mxu0 %vm2188_vm9, %v2152_v50 }
 0x166   : > { %v863_v57 = vpop.permute.xlu1 %862 }
 0x167   : > { %v1799_v56 = vpop.permute.xlu0 %1798  ;;  %v1896_v25 = vsel %vm1880_vm1, %v555_v18, %v863_v57 }
 0x168   : > { %v2153_v58 = vsel %vm2139_vm8, %v2116_v55, %v1799_v56  ;;  %1526 = vrot.lane.b32.xlu1 %v709_v53, %s10150_s26  ;;  %v556_v56 = vld [vmem:[%s10247_s18 + $0x80] sm:$0xff] }
 0x169   : > { %1524 = vrot.lane.b32.xlu0 %v708_v54, %s10150_s26  ;;  %8453 = vmatmul.mubr.msk.f32.gmra.mrb[12].mxu0 %vm2188_vm9, %v2153_v58  ;;  %v639_v58 = vld [vmem:[%s10247_s18 + $0xda] sm:$0xff] }
 0x16a   : > { %v1007_v61 = vpop.permute.xlu1 %1006 }
 0x16b   : > { %v1005_v62 = vpop.permute.xlu0 %1004  ;;  %v1933_v27 = vsel %vm1917_vm2, %v1896_v25, %v1007_v61 }
 0x16c   : > { %1670 = vrot.lane.b32.xlu1 %v745_v59, %s10151_s25  ;;  %v1932_v19 = vsel %vm1917_vm2, %v1895_v9, %v1005_v62  ;;  %v638_v59 = vld [vmem:[%s10247_s18 + $0xd2] sm:$0xff] }
 0x16d   : > { %1668 = vrot.lane.b32.xlu0 %v744_v60, %s10151_s25 }
 0x16e   : > { %v1117_v4 = vpop.permute.xlu1 %1116 }
 0x16f   : > { %v1115_v5 = vpop.permute.xlu0 %1114  ;;  %v1970_v30 = vsel %vm1954_vm3, %v1933_v27, %v1117_v4  ;;  %v675_v4 = vld [vmem:[%s10247_s18 + $0xdb] sm:$0xff]  ;;  %v749_v27 = vld [vmem:[%s10247_s18 + $0xed] sm:$0xff] }
 0x170   : > { %876 = vrot.lane.b32.xlu1 %v598_v63, %s10146_s20  ;;  %v1969_v21 = vsel %vm1954_vm3, %v1932_v19, %v1115_v5  ;;  %v557_v63 = vld [vmem:[%s10247_s18 + $0x88] sm:$0xff]  ;;  %v674_v5 = vld [vmem:[%s10247_s18 + $0xd3] sm:$0xff] }
 0x171   : > { %1812 = vrot.lane.b32.xlu0 %v780_v2, %s10152_s15 }
 0x172   : > { %v1261_v6 = vpop.permute.xlu1 %1260 }
 0x173   : > { %v1259_v7 = vpop.permute.xlu0 %1258  ;;  %v2007_v32 = vsel %vm1991_vm4, %v1970_v30, %v1261_v6 }
 0x174   : > { %878 = vrot.lane.b32.xlu1 %v599_v0, %s10146_s20  ;;  %v2006_v24 = vsel %vm1991_vm4, %v1969_v21, %v1259_v7  ;;  %v10889_v21 = vld [vmem:[%s10247_s18 + $0xec] sm:$0xff] }
 0x175   : > { %1814 = vrot.lane.b32.xlu0 %v781_v1, %s10152_s15 }
 0x176   : > { %v1405_v8 = vpop.permute.xlu1 %1404 }
 0x177   : > { %v1403_v11 = vpop.permute.xlu0 %1402  ;;  %v2044_v28 = vsel %vm2028_vm5, %v2007_v32, %v1405_v8  ;;  %v602_v32 = vld [vmem:[%s10247_s18 + $0xd1] sm:$0xff] }
 0x178   : > { %1022 = vrot.lane.b32.xlu1 %v635_v10, %s10145_s19  ;;  %v2043_v26 = vsel %vm2028_vm5, %v2006_v24, %v1403_v11 }
 0x179   : > { %1020 = vrot.lane.b32.xlu0 %v634_v31, %s10145_s19 }
 0x17a   : > { %v1515_v14 = vpop.permute.xlu1 %1514 }
 0x17b   : > { %v1513_v17 = vpop.permute.xlu0 %1512  ;;  %v2081_v34 = vsel %vm2065_vm6, %v2044_v28, %v1515_v14 }
 0x17c   : > { %1132 = vrot.lane.b32.xlu1 %v637_v13, %s10147_s21  ;;  %v2080_v29 = vsel %vm2065_vm6, %v2043_v26, %v1513_v17 }
 0x17d   : > { %1130 = vrot.lane.b32.xlu0 %v636_v3, %s10147_s21 }
 0x17e   : > { %v1659_v22 = vpop.permute.xlu1 %1658 }
 0x17f   : > { %v1657_v23 = vpop.permute.xlu0 %1656  ;;  %v2118_v37 = vsel %vm2102_vm7, %v2081_v34, %v1659_v22  ;;  %v10892_v22 = vld [vmem:[%s10247_s18 + $0xe4] sm:$0xff] }
 0x180   : > { %1276 = vrot.lane.b32.xlu1 %v673_v15, %s10148_s22  ;;  %v2117_v10 = vsel %vm2102_vm7, %v2080_v29, %v1657_v23  ;;  %v748_v29 = vld [vmem:[%s10247_s18 + $0xe5] sm:$0xff] }
 0x181   : > { %1274 = vrot.lane.b32.xlu0 %v672_v20, %s10148_s22 }
 0x182   : > { %v865_v31 = vpop.permute.xlu1 %864 }
 0x183   : > { %v1801_v16 = vpop.permute.xlu0 %1800  ;;  %v1897_v62 = vsel %vm1880_vm1, %v556_v56, %v865_v31 }
 0x184   : > { %v2154_v33 = vsel %vm2139_vm8, %v2117_v10, %v1801_v16  ;;  %1420 = vrot.lane.b32.xlu1 %v709_v53, %s10149_s23 }
 0x185   : > { %1418 = vrot.lane.b32.xlu0 %v708_v54, %s10149_s23  ;;  %8455 = vmatprep.mubr.msk.f32.mxu0 %vm2188_vm9, %v2154_v33  ;;  %v784_v33 = vld [vmem:[%s10247_s18 + $0xe6] sm:$0xff] }
 0x186   : > { %v867_v38 = vpop.permute.xlu1 %866 }
 0x187   : > { %v1803_v39 = vpop.permute.xlu0 %1802  ;;  %v1898_v8 = vsel %vm1880_vm1, %v557_v63, %v867_v38 }
 0x188   : > { %v2155_v40 = vsel %vm2139_vm8, %v2118_v37, %v1803_v39  ;;  %1530 = vrot.lane.b32.xlu1 %v10833_v35, %s10150_s26 }
 0x189   : > { %1528 = vrot.lane.b32.xlu0 %v710_v36, %s10150_s26  ;;  %8456 = vmatmul.mubr.msk.f32.gmra.mrb[14].mxu0 %vm2188_vm9, %v2155_v40 }
 0x18a   : > { %v1011_v43 = vpop.permute.xlu1 %1010 }
 0x18b   : > { %v1009_v44 = vpop.permute.xlu0 %1008  ;;  %v10844_v46 = vpop.f32.mrb[0].mxu0  ;;  %v1935_v12 = vsel %vm1917_vm2, %v1898_v8, %v1011_v43  ;;  %v10924_v43 = vld [vmem:[%s10247_s18 + $0xe2] sm:$0xff] }
 0x18c   : > { %1674 = vrot.lane.b32.xlu1 %v747_v41, %s10151_s25  ;;  %v10848_v47 = vpop.f32.mrb[1].mxu0  ;;  %v1934_v2 = vsel %vm1917_vm2, %v1897_v62, %v1009_v44  ;;  %v558_v41 = vld [vmem:[%s10247_s18 + $0x90] sm:$0xff]  ;;  %v10959_v8 = vld [vmem:[%s10247_s18 + $0xfc] sm:$0xff] }
 0x18d   : > { %1672 = vrot.lane.b32.xlu0 %v746_v42, %s10151_s25  ;;  %v10921_v42 = vld [vmem:[%s10247_s18 + $0xea] sm:$0xff] }
 0x18e   : > { %v1121_v45 = vpop.permute.xlu1 %1120 }
 0x18f   : > { %v1119_v50 = vpop.permute.xlu0 %1118 }
 0x190   : > { %880 = vrot.lane.b32.xlu1 %v600_v48, %s10146_s20  ;;  %v1971_v0 = vsel %vm1954_vm3, %v1934_v2, %v1119_v50  ;;  %v559_v50 = vld [vmem:[%s10247_s18 + $0x98] sm:$0xff] }
 0x191   : > { %1816 = vrot.lane.b32.xlu0 %v782_v49, %s10152_s15 }
 0x192   : > { %v1265_v53 = vpop.permute.xlu1 %1264 }
 0x193   : > { %v1263_v54 = vpop.permute.xlu0 %1262 }
 0x194   : > { %882 = vrot.lane.b32.xlu1 %v601_v51, %s10146_s20  ;;  %v2008_v7 = vsel %vm1991_vm4, %v1971_v0, %v1263_v54  ;;  %v676_v54 = vld [vmem:[%s10247_s18 + $0xe3] sm:$0xff] }
 0x195   : > { %1818 = vrot.lane.b32.xlu0 %v783_v52, %s10152_s15 }
 0x196   : > { %v1409_v55 = vpop.permute.xlu1 %1408 }
 0x197   : > { %v1407_v57 = vpop.permute.xlu0 %1406 }
 0x198   : > { %1026 = vrot.lane.b32.xlu1 %v637_v13, %s10145_s19  ;;  %v2045_v11 = vsel %vm2028_vm5, %v2008_v7, %v1407_v57 }
 0x199   : > { %1024 = vrot.lane.b32.xlu0 %v636_v3, %s10145_s19  ;;  %v1972_v3 = vsel %vm1954_vm3, %v1935_v12, %v1121_v45 }
 0x19a   : > { %v1519_v60 = vpop.permute.xlu1 %1518  ;;  %v2009_v18 = vsel %vm1991_vm4, %v1972_v3, %v1265_v53  ;;  %v677_v53 = vld [vmem:[%s10247_s18 + $0xeb] sm:$0xff] }
 0x19b   : > { %v1517_v61 = vpop.permute.xlu0 %1516  ;;  %v2046_v15 = vsel %vm2028_vm5, %v2009_v18, %v1409_v55 }
 0x19c   : > { %1136 = vrot.lane.b32.xlu1 %v639_v58, %s10147_s21  ;;  %v2082_v13 = vsel %vm2065_vm6, %v2045_v11, %v1517_v61  ;;  %v2083_v20 = vsel %vm2065_vm6, %v2046_v15, %v1519_v60  ;;  %v10962_v11 = vld [vmem:[%s10247_s18 + $0xf4] sm:$0xff]  ;;  %v604_v15 = vld [vmem:[%s10247_s18 + $0xe1] sm:$0xff] }
 0x19d   : > { %1134 = vrot.lane.b32.xlu0 %v638_v59, %s10147_s21 }
 0x19e   : > { %v1663_v1 = vpop.permute.xlu1 %1662 }
 0x19f   : > { %v1661_v6 = vpop.permute.xlu0 %1660  ;;  %v2120_v23 = vsel %vm2102_vm7, %v2083_v20, %v1663_v1  ;;  %v786_v20 = vld [vmem:[%s10247_s18 + $0xf6] sm:$0xff] }
 0x1a0   : > { %1280 = vrot.lane.b32.xlu1 %v675_v4, %s10148_s22  ;;  %v2119_v14 = vsel %vm2102_vm7, %v2082_v13, %v1661_v6 }
 0x1a1   : > { %1278 = vrot.lane.b32.xlu0 %v674_v5, %s10148_s22 }
 0x1a2   : > { %v869_v17 = vpop.permute.xlu1 %868 }
 0x1a3   : > { %v1805_v9 = vpop.permute.xlu0 %1804  ;;  %v1899_v49 = vsel %vm1880_vm1, %v558_v41, %v869_v17  ;;  %v751_v17 = vld [vmem:[%s10247_s18 + $0xfd] sm:$0xff]  ;;  %v678_v41 = vld [vmem:[%s10247_s18 + $0xf3] sm:$0xff] }
 0x1a4   : > { %v2156_v19 = vsel %vm2139_vm8, %v2119_v14, %v1805_v9  ;;  %1424 = vrot.lane.b32.xlu1 %v10833_v35, %s10149_s23  ;;  %v603_v35 = vld [vmem:[%s10247_s18 + $0xd9] sm:$0xff] }
 0x1a5   : > { %1422 = vrot.lane.b32.xlu0 %v710_v36, %s10149_s23  ;;  %8458 = vmatprep.mubr.msk.f32.mxu0 %vm2188_vm9, %v2156_v19  ;;  %v785_v36 = vld [vmem:[%s10247_s18 + $0xee] sm:$0xff] }
 0x1a6   : > { %v871_v24 = vpop.permute.xlu1 %870  ;;  %v750_v9 = vld [vmem:[%s10247_s18 + $0xf5] sm:$0xff] }
 0x1a7   : > { %v1807_v25 = vpop.permute.xlu0 %1806 }
 0x1a8   : > { %v2157_v26 = vsel %vm2139_vm8, %v2120_v23, %v1807_v25  ;;  %1534 = vrot.lane.b32.xlu1 %v10889_v21, %s10150_s26  ;;  %v605_v23 = vld [vmem:[%s10247_s18 + $0xe9] sm:$0xff] }
 0x1a9   : > { %1532 = vrot.lane.b32.xlu0 %v10892_v22, %s10150_s26  ;;  %8459 = vmatmul.mubr.msk.f32.gmra.mrb[16].mxu0 %vm2188_vm9, %v2157_v26 }
 0x1aa   : > { %v1015_v30 = vpop.permute.xlu1 %1014 }
 0x1ab   : > { %v1013_v10 = vpop.permute.xlu0 %1012 }
 0x1ac   : > { %v10903_v31 = vpop.f32.mrb[2].mxu0  ;;  %1678 = vrot.lane.b32.xlu1 %v749_v27, %s10151_s25  ;;  %v1936_v51 = vsel %vm1917_vm2, %v1899_v49, %v1013_v10  ;;  %v10153_v27 = vmov 0   ;;  %v560_v10 = vld [vmem:[%s10247_s18 + $0xa0] sm:$0xff] }
 0x1ad   : > { %1676 = vrot.lane.b32.xlu0 %v748_v29, %s10151_s25  ;;  %v10907_v16 = vpop.f32.mrb[3].mxu0  ;;  %9234 = vset.pattern.permute.xlu1 %v10153_v27 }
 0x1ae   : > { %v1125_v28 = vpop.permute.xlu1 %1124  ;;  %9233 = vset.pattern.permute.xlu0 %v10153_v27 }
 0x1af   : > { %v1123_v34 = vpop.permute.xlu0 %1122 }
 0x1b0   : > { %884 = vrot.lane.b32.xlu1 %v602_v32, %s10146_s20  ;;  %v1973_v55 = vsel %vm1954_vm3, %v1936_v51, %v1123_v34  ;;  %v643_v32 = vld [vmem:[%s10247_s18 + $0xfa] sm:$0xff] }
 0x1b1   : > { %1820 = vrot.lane.b32.xlu0 %v784_v33, %s10152_s15  ;;  %v642_v33 = vld [vmem:[%s10247_s18 + $0xf2] sm:$0xff] }
 0x1b2   : > { %v1269_v37 = vpop.permute.xlu1 %1268 }
 0x1b3   : > { %v1267_v38 = vpop.permute.xlu0 %1266 }
 0x1b4   : > { %886 = vrot.lane.b32.xlu1 %v603_v35, %s10146_s20 }
 0x1b5   : > { %1822 = vrot.lane.b32.xlu0 %v785_v36, %s10152_s15 }
 0x1b6   : > { %v1413_v39 = vpop.permute.xlu1 %1412 }
 0x1b7   : > { %v1411_v40 = vpop.permute.xlu0 %1410 }
 0x1b8   : > { %1030 = vrot.lane.b32.xlu1 %v639_v58, %s10145_s19  ;;  %v2010_v58 = vsel %vm1991_vm4, %v1973_v55, %v1267_v38 }
 0x1b9   : > { %1028 = vrot.lane.b32.xlu0 %v638_v59, %s10145_s19  ;;  %v1900_v59 = vsel %vm1880_vm1, %v559_v50, %v871_v24  ;;  %v2047_v60 = vsel %vm2028_vm5, %v2010_v58, %v1411_v40  ;;  %v787_v24 = vld [vmem:[%s10247_s18 + $0xfe] sm:$0xff] }
 0x1ba   : > { %v1523_v44 = vpop.permute.xlu1 %1522  ;;  %v1937_v61 = vsel %vm1917_vm2, %v1900_v59, %v1015_v30  ;;  %v679_v40 = vld [vmem:[%s10247_s18 + $0xfb] sm:$0xff] }
 0x1bb   : > { %v1521_v48 = vpop.permute.xlu0 %1520  ;;  %v1974_v63 = vsel %vm1954_vm3, %v1937_v61, %v1125_v28 }
 0x1bc   : > { %v10927_v45 = vpop.f32.mrb[4].mxu0  ;;  %1140 = vrot.lane.b32.xlu1 %v10921_v42, %s10147_s21  ;;  %v2084_v62 = vsel %vm2065_vm6, %v2047_v60, %v1521_v48  ;;  %v2011_v0 = vsel %vm1991_vm4, %v1974_v63, %v1269_v37  ;;  %v561_v37 = vld [vmem:[%s10247_s18 + $0xa8] sm:$0xff] }
 0x1bd   : > { %1138 = vrot.lane.b32.xlu0 %v10924_v43, %s10147_s21  ;;  %v10935_v52 = vpop.f32.mrb[5].mxu0  ;;  %v2048_v6 = vsel %vm2028_vm5, %v2011_v0, %v1413_v39  ;;  %v716_v63 = vld [vmem:[%s10247_s18 + $0x104] sm:$0xff] }
 0x1be   : > { %v1667_v57 = vpop.permute.xlu1 %1666  ;;  %v2085_v7 = vsel %vm2065_vm6, %v2048_v6, %v1523_v44  ;;  %v752_v6 = vld [vmem:[%s10247_s18 + $0x105] sm:$0xff] }
 0x1bf   : > { %v1665_v56 = vpop.permute.xlu0 %1664  ;;  %v2122_v12 = vsel %vm2102_vm7, %v2085_v7, %v1667_v57 }
 0x1c0   : > { %1284 = vrot.lane.b32.xlu1 %v677_v53, %s10148_s22  ;;  %v2121_v2 = vsel %vm2102_vm7, %v2084_v62, %v1665_v56  ;;  %v717_v62 = vld [vmem:[%s10247_s18 + $0x10c] sm:$0xff] }
 0x1c1   : > { %1282 = vrot.lane.b32.xlu0 %v676_v54, %s10148_s22 }
 0x1c2   : > { %v873_v4 = vpop.permute.xlu1 %872 }
 0x1c3   : > { %v1809_v5 = vpop.permute.xlu0 %1808  ;;  %v1901_v35 = vsel %vm1880_vm1, %v560_v10, %v873_v4  ;;  %v680_v10 = vld [vmem:[%s10247_s18 + $0x103] sm:$0xff] }
 0x1c4   : > { %v2158_v1 = vsel %vm2139_vm8, %v2121_v2, %v1809_v5  ;;  %1428 = vrot.lane.b32.xlu1 %v10889_v21, %s10149_s23 }
 0x1c5   : > { %1426 = vrot.lane.b32.xlu0 %v10892_v22, %s10149_s23  ;;  %8461 = vmatprep.mubr.msk.f32.mxu0 %vm2188_vm9, %v2158_v1  ;;  %v753_v1 = vld [vmem:[%s10247_s18 + $0x10d] sm:$0xff] }
 0x1c6   : > { %v875_v13 = vpop.permute.xlu1 %874 }
 0x1c7   : > { %v1811_v3 = vpop.permute.xlu0 %1810  ;;  %v1902_v49 = vsel %vm1880_vm1, %v561_v37, %v875_v13 }
 0x1c8   : > { %v2159_v14 = vsel %vm2139_vm8, %v2122_v12, %v1811_v3  ;;  %1538 = vrot.lane.b32.xlu1 %v10959_v8, %s10150_s26  ;;  %v788_v12 = vld [vmem:[%s10247_s18 + $0x106] sm:$0xff] }
 0x1c9   : > { %1536 = vrot.lane.b32.xlu0 %v10962_v11, %s10150_s26  ;;  %8462 = vmatmul.mubr.msk.f32.gmra.mrb[18].mxu0 %vm2188_vm9, %v2159_v14  ;;  %v607_v14 = vld [vmem:[%s10247_s18 + $0xf9] sm:$0xff] }
 0x1ca   : > { %v1019_v18 = vpop.permute.xlu1 %1018 }
 0x1cb   : > { %v1017_v19 = vpop.permute.xlu0 %1016  ;;  %v1939_v51 = vsel %vm1917_vm2, %v1902_v49, %v1019_v18 }
 0x1cc   : > { %1682 = vrot.lane.b32.xlu1 %v751_v17, %s10151_s25  ;;  %v1938_v38 = vsel %vm1917_vm2, %v1901_v35, %v1017_v19  ;;  %v789_v17 = vld [vmem:[%s10247_s18 + $0x10e] sm:$0xff] }
 0x1cd   : > { %1680 = vrot.lane.b32.xlu0 %v750_v9, %s10151_s25 }
 0x1ce   : > { %v1129_v21 = vpop.permute.xlu1 %1128 }
 0x1cf   : > { %v1127_v22 = vpop.permute.xlu0 %1126  ;;  %v1976_v54 = vsel %vm1954_vm3, %v1939_v51, %v1129_v21  ;;  %v645_v21 = vld [vmem:[%s10247_s18 + $0x10a] sm:$0xff] }
 0x1d0   : > { %888 = vrot.lane.b32.xlu1 %v604_v15, %s10146_s20 }
 0x1d1   : > { %1824 = vrot.lane.b32.xlu0 %v786_v20, %s10152_s15 }
 0x1d2   : > { %v1273_v25 = vpop.permute.xlu1 %1272 }
 0x1d3   : > { %v1271_v26 = vpop.permute.xlu0 %1270  ;;  %v2013_v58 = vsel %vm1991_vm4, %v1976_v54, %v1273_v25  ;;  %v11074_v54 = vld [vmem:[%s10247_s18 + $0x11c] sm:$0xff] }
 0x1d4   : > { %890 = vrot.lane.b32.xlu1 %v605_v23, %s10146_s20  ;;  %v562_v23 = vld [vmem:[%s10247_s18 + $0xb0] sm:$0xff] }
 0x1d5   : > { %1826 = vrot.lane.b32.xlu0 %v787_v24, %s10152_s15 }
 0x1d6   : > { %v1417_v29 = vpop.permute.xlu1 %1416 }
 0x1d7   : > { %v1415_v30 = vpop.permute.xlu0 %1414  ;;  %v2050_v60 = vsel %vm2028_vm5, %v2013_v58, %v1417_v29 }
 0x1d8   : > { %1034 = vrot.lane.b32.xlu1 %v10921_v42, %s10145_s19  ;;  %v1975_v42 = vsel %vm1954_vm3, %v1938_v38, %v1127_v22  ;;  %v644_v22 = vld [vmem:[%s10247_s18 + $0x102] sm:$0xff] }
 0x1d9   : > { %1032 = vrot.lane.b32.xlu0 %v10924_v43, %s10145_s19  ;;  %v2012_v48 = vsel %vm1991_vm4, %v1975_v42, %v1271_v26 }
 0x1da   : > { %v1527_v28 = vpop.permute.xlu1 %1526  ;;  %v2049_v50 = vsel %vm2028_vm5, %v2012_v48, %v1415_v30  ;;  %v681_v30 = vld [vmem:[%s10247_s18 + $0x10b] sm:$0xff] }
 0x1db   : > { %v1525_v34 = vpop.permute.xlu0 %1524  ;;  %v2087_v61 = vsel %vm2065_vm6, %v2050_v60, %v1527_v28 }
 0x1dc   : > { %v10993_v36 = vpop.f32.mrb[6].mxu0  ;;  %1144 = vrot.lane.b32.xlu1 %v643_v32, %s10147_s21  ;;  %v2086_v53 = vsel %vm2065_vm6, %v2049_v50, %v1525_v34 }
 0x1dd   : > { %1142 = vrot.lane.b32.xlu0 %v642_v33, %s10147_s21  ;;  %v10999_v39 = vpop.f32.mrb[7].mxu0 }
 0x1de   : > { %v1671_v43 = vpop.permute.xlu1 %1670 }
 0x1df   : > { %v1669_v44 = vpop.permute.xlu0 %1668  ;;  %v2124_v2 = vsel %vm2102_vm7, %v2087_v61, %v1671_v43  ;;  %v755_v61 = vld [vmem:[%s10247_s18 + $0x11d] sm:$0xff] }
 0x1e0   : > { %1288 = vrot.lane.b32.xlu1 %v679_v40, %s10148_s22  ;;  %v2123_v55 = vsel %vm2102_vm7, %v2086_v53, %v1669_v44 }
 0x1e1   : > { %1286 = vrot.lane.b32.xlu0 %v678_v41, %s10148_s22 }
 0x1e2   : > { %v877_v57 = vpop.permute.xlu1 %876 }
 0x1e3   : > { %v1813_v56 = vpop.permute.xlu0 %1812  ;;  %v1903_v29 = vsel %vm1880_vm1, %v562_v23, %v877_v57  ;;  %v682_v23 = vld [vmem:[%s10247_s18 + $0x113] sm:$0xff] }
 0x1e4   : > { %v2160_v59 = vsel %vm2139_vm8, %v2123_v55, %v1813_v56  ;;  %1432 = vrot.lane.b32.xlu1 %v10959_v8, %s10149_s23  ;;  %v718_v55 = vld [vmem:[%s10247_s18 + $0x114] sm:$0xff] }
 0x1e5   : > { %1430 = vrot.lane.b32.xlu0 %v10962_v11, %s10149_s23  ;;  %8464 = vmatprep.mubr.msk.f32.mxu0 %vm2188_vm9, %v2160_v59  ;;  %v606_v11 = vld [vmem:[%s10247_s18 + $0xf1] sm:$0xff] }
 0x1e6   : > { %v879_v4 = vpop.permute.xlu1 %878 }
 0x1e7   : > { %v1815_v5 = vpop.permute.xlu0 %1814 }
 0x1e8   : > { %v2161_v0 = vsel %vm2139_vm8, %v2124_v2, %v1815_v5  ;;  %1542 = vrot.lane.b32.xlu1 %v717_v62, %s10150_s26  ;;  %v790_v5 = vld [vmem:[%s10247_s18 + $0x116] sm:$0xff] }
 0x1e9   : > { %1540 = vrot.lane.b32.xlu0 %v716_v63, %s10150_s26  ;;  %8465 = vmatmul.mubr.msk.f32.gmra.mrb[20].mxu0 %vm2188_vm9, %v2161_v0 }
 0x1ea   : > { %v1023_v7 = vpop.permute.xlu1 %1022 }
 0x1eb   : > { %v1021_v8 = vpop.permute.xlu0 %1020 }
 0x1ec   : > { %1686 = vrot.lane.b32.xlu1 %v753_v1, %s10151_s25 }
 0x1ed   : > { %1684 = vrot.lane.b32.xlu0 %v752_v6, %s10151_s25  ;;  %v609_v6 = vld [vmem:[%s10247_s18 + $0x109] sm:$0xff] }
 0x1ee   : > { %v1133_v13 = vpop.permute.xlu1 %1132 }
 0x1ef   : > { %v1131_v3 = vpop.permute.xlu0 %1130 }
 0x1f0   : > { %892 = vrot.lane.b32.xlu1 %v606_v11, %s10146_s20 }
 0x1f1   : > { %1828 = vrot.lane.b32.xlu0 %v788_v12, %s10152_s15 }
 0x1f2   : > { %v1277_v9 = vpop.permute.xlu1 %1276 }
 0x1f3   : > { %v1275_v18 = vpop.permute.xlu0 %1274 }
 0x1f4   : > { %894 = vrot.lane.b32.xlu1 %v607_v14, %s10146_s20  ;;  %v11102_v14 = vld [vmem:[%s10247_s18 + $0x112] sm:$0xff] }
 0x1f5   : > { %1830 = vrot.lane.b32.xlu0 %v789_v17, %s10152_s15  ;;  %v564_v17 = vld [vmem:[%s10247_s18 + $0xc0] sm:$0xff] }
 0x1f6   : > { %v1421_v19 = vpop.permute.xlu1 %1420 }
 0x1f7   : > { %v1419_v15 = vpop.permute.xlu0 %1418 }
 0x1f8   : > { %1038 = vrot.lane.b32.xlu1 %v643_v32, %s10145_s19  ;;  %v563_v32 = vld [vmem:[%s10247_s18 + $0xb8] sm:$0xff] }
 0x1f9   : > { %1036 = vrot.lane.b32.xlu0 %v642_v33, %s10145_s19  ;;  %v11043_v20 = vpop.f32.mrb[8].mxu0  ;;  %v1940_v33 = vsel %vm1917_vm2, %v1903_v29, %v1021_v8  ;;  %v1904_v38 = vsel %vm1880_vm1, %v563_v32, %v879_v4  ;;  %v608_v4 = vld [vmem:[%s10247_s18 + $0x101] sm:$0xff] }
 0x1fa   : > { %v11048_v24 = vpop.f32.mrb[9].mxu0  ;;  %v1531_v25 = vpop.permute.xlu1 %1530  ;;  %v1977_v34 = vsel %vm1954_vm3, %v1940_v33, %v1131_v3  ;;  %v1941_v41 = vsel %vm1917_vm2, %v1904_v38, %v1023_v7  ;;  %v791_v7 = vld [vmem:[%s10247_s18 + $0x11e] sm:$0xff] }
 0x1fb   : > { %v1529_v26 = vpop.permute.xlu0 %1528  ;;  %v2014_v37 = vsel %vm1991_vm4, %v1977_v34, %v1275_v18  ;;  %v1978_v44 = vsel %vm1954_vm3, %v1941_v41, %v1133_v13  ;;  %v11099_v3 = vld [vmem:[%s10247_s18 + $0x11a] sm:$0xff] }
 0x1fc   : > { %1148 = vrot.lane.b32.xlu1 %v645_v21, %s10147_s21  ;;  %v2051_v40 = vsel %vm2028_vm5, %v2014_v37, %v1419_v15  ;;  %v2015_v50 = vsel %vm1991_vm4, %v1978_v44, %v1277_v9 }
 0x1fd   : > { %1146 = vrot.lane.b32.xlu0 %v644_v22, %s10147_s21  ;;  %v2088_v42 = vsel %vm2065_vm6, %v2051_v40, %v1529_v26  ;;  %v2052_v53 = vsel %vm2028_vm5, %v2015_v50, %v1421_v19 }
 0x1fe   : > { %v1675_v28 = vpop.permute.xlu1 %1674  ;;  %v2089_v57 = vsel %vm2065_vm6, %v2052_v53, %v1531_v25  ;;  %v565_v25 = vld [vmem:[%s10247_s18 + $0xc8] sm:$0xff] }
 0x1ff   : > { %v1673_v35 = vpop.permute.xlu0 %1672  ;;  %v2126_v58 = vsel %vm2102_vm7, %v2089_v57, %v1675_v28 }
 0x200   : > { %1292 = vrot.lane.b32.xlu1 %v681_v30, %s10148_s22  ;;  %v2125_v48 = vsel %vm2102_vm7, %v2088_v42, %v1673_v35 }
 0x201   : > { %1290 = vrot.lane.b32.xlu0 %v680_v10, %s10148_s22 }
 0x202   : > { %v881_v43 = vpop.permute.xlu1 %880 }
 0x203   : > { %v1817_v49 = vpop.permute.xlu0 %1816  ;;  %v1905_v15 = vsel %vm1880_vm1, %v564_v17, %v881_v43 }
 0x204   : > { %v2162_v51 = vsel %vm2139_vm8, %v2125_v48, %v1817_v49  ;;  %1436 = vrot.lane.b32.xlu1 %v717_v62, %s10149_s23  ;;  %v754_v62 = vld [vmem:[%s10247_s18 + $0x115] sm:$0xff]  ;;  %v11136_v48 = vld [vmem:[%s10247_s18 + $0x12c] sm:$0xff]  ;;  %v720_v49 = vld [vmem:[%s10247_s18 + $0x124] sm:$0xff] }
 0x205   : > { %1434 = vrot.lane.b32.xlu0 %v716_v63, %s10149_s23  ;;  %8467 = vmatprep.mubr.msk.f32.mxu0 %vm2188_vm9, %v2162_v51 }
 0x206   : > { %v883_v56 = vpop.permute.xlu1 %882 }
 0x207   : > { %v1819_v59 = vpop.permute.xlu0 %1818  ;;  %v1906_v33 = vsel %vm1880_vm1, %v565_v25, %v883_v56 }
 0x208   : > { %v2163_v60 = vsel %vm2139_vm8, %v2126_v58, %v1819_v59  ;;  %1546 = vrot.lane.b32.xlu1 %v11074_v54, %s10150_s26 }
 0x209   : > { %1544 = vrot.lane.b32.xlu0 %v718_v55, %s10150_s26  ;;  %8468 = vmatmul.mubr.msk.f32.gmra.mrb[22].mxu0 %vm2188_vm9, %v2163_v60  ;;  %v610_v60 = vld [vmem:[%s10247_s18 + $0x111] sm:$0xff] }
 0x20a   : > { %v1027_v63 = vpop.permute.xlu1 %1026 }
 0x20b   : > { %v1025_v2 = vpop.permute.xlu0 %1024  ;;  %v1943_v34 = vsel %vm1917_vm2, %v1906_v33, %v1027_v63 }
 0x20c   : > { %1690 = vrot.lane.b32.xlu1 %v755_v61, %s10151_s25  ;;  %v1942_v26 = vsel %vm1917_vm2, %v1905_v15, %v1025_v2  ;;  %v792_v61 = vld [vmem:[%s10247_s18 + $0x126] sm:$0xff]  ;;  %v611_v2 = vld [vmem:[%s10247_s18 + $0x119] sm:$0xff] }
 0x20d   : > { %1688 = vrot.lane.b32.xlu0 %v754_v62, %s10151_s25  ;;  %v685_v15 = vld [vmem:[%s10247_s18 + $0x12b] sm:$0xff] }
 0x20e   : > { %v1137_v0 = vpop.permute.xlu1 %1136 }
 0x20f   : > { %v1135_v1 = vpop.permute.xlu0 %1134  ;;  %v1980_v38 = vsel %vm1954_vm3, %v1943_v34, %v1137_v0 }
 0x210   : > { %896 = vrot.lane.b32.xlu1 %v608_v4, %s10146_s20  ;;  %v1979_v30 = vsel %vm1954_vm3, %v1942_v26, %v1135_v1  ;;  %v793_v4 = vld [vmem:[%s10247_s18 + $0x12e] sm:$0xff] }
 0x211   : > { %1832 = vrot.lane.b32.xlu0 %v790_v5, %s10152_s15 }
 0x212   : > { %v1281_v8 = vpop.permute.xlu1 %1280 }
 0x213   : > { %v1279_v11 = vpop.permute.xlu0 %1278  ;;  %v2017_v42 = vsel %vm1991_vm4, %v1980_v38, %v1281_v8  ;;  %v648_v8 = vld [vmem:[%s10247_s18 + $0x122] sm:$0xff] }
 0x214   : > { %898 = vrot.lane.b32.xlu1 %v609_v6, %s10146_s20  ;;  %v2016_v32 = vsel %vm1991_vm4, %v1979_v30, %v1279_v11  ;;  %v566_v11 = vld [vmem:[%s10247_s18 + $0xd0] sm:$0xff] }
 0x215   : > { %1834 = vrot.lane.b32.xlu0 %v791_v7, %s10152_s15  ;;  %v649_v7 = vld [vmem:[%s10247_s18 + $0x12a] sm:$0xff] }
 0x216   : > { %v1425_v12 = vpop.permute.xlu1 %1424 }
 0x217   : > { %v1423_v13 = vpop.permute.xlu0 %1422  ;;  %v2054_v44 = vsel %vm2028_vm5, %v2017_v42, %v1425_v12  ;;  %v723_v42 = vld [vmem:[%s10247_s18 + $0x13c] sm:$0xff] }
 0x218   : > { %1042 = vrot.lane.b32.xlu1 %v645_v21, %s10145_s19  ;;  %v2053_v28 = vsel %vm2028_vm5, %v2016_v32, %v1423_v13 }
 0x219   : > { %1040 = vrot.lane.b32.xlu0 %v644_v22, %s10145_s19  ;;  %v683_v22 = vld [vmem:[%s10247_s18 + $0x11b] sm:$0xff] }
 0x21a   : > { %v1535_v9 = vpop.permute.xlu1 %1534 }
 0x21b   : > { %v1533_v18 = vpop.permute.xlu0 %1532  ;;  %v2091_v50 = vsel %vm2065_vm6, %v2054_v44, %v1535_v9 }
 0x21c   : > { %v11105_v19 = vpop.f32.mrb[10].mxu0  ;;  %1152 = vrot.lane.b32.xlu1 %v11099_v3, %s10147_s21  ;;  %v2090_v35 = vsel %vm2065_vm6, %v2053_v28, %v1533_v18 }
 0x21d   : > { %1150 = vrot.lane.b32.xlu0 %v11102_v14, %s10147_s21  ;;  %v11112_v21 = vpop.f32.mrb[11].mxu0 }
 0x21e   : > { %v1679_v29 = vpop.permute.xlu1 %1678 }
 0x21f   : > { %v1677_v10 = vpop.permute.xlu0 %1676  ;;  %v2128_v53 = vsel %vm2102_vm7, %v2091_v50, %v1679_v29 }
 0x220   : > { %1296 = vrot.lane.b32.xlu1 %v683_v22, %s10148_s22  ;;  %v2127_v40 = vsel %vm2102_vm7, %v2090_v35, %v1677_v10  ;;  %v567_v22 = vld [vmem:[%s10247_s18 + $0xd8] sm:$0xff] }
 0x221   : > { %1294 = vrot.lane.b32.xlu0 %v682_v23, %s10148_s22 }
 0x222   : > { %v885_v37 = vpop.permute.xlu1 %884 }
 0x223   : > { %v1821_v41 = vpop.permute.xlu0 %1820  ;;  %v1907_v9 = vsel %vm1880_vm1, %v566_v11, %v885_v37 }
 0x224   : > { %v2164_v43 = vsel %vm2139_vm8, %v2127_v40, %v1821_v41  ;;  %1440 = vrot.lane.b32.xlu1 %v11074_v54, %s10149_s23  ;;  %v757_v54 = vld [vmem:[%s10247_s18 + $0x12d] sm:$0xff] }
 0x225   : > { %1438 = vrot.lane.b32.xlu0 %v718_v55, %s10149_s23  ;;  %8470 = vmatprep.mubr.msk.f32.mxu0 %vm2188_vm9, %v2164_v43  ;;  %v756_v55 = vld [vmem:[%s10247_s18 + $0x125] sm:$0xff]  ;;  %v722_v43 = vld [vmem:[%s10247_s18 + $0x134] sm:$0xff] }
 0x226   : > { %v887_v51 = vpop.permute.xlu1 %886 }
 0x227   : > { %v1823_v57 = vpop.permute.xlu0 %1822  ;;  %v1908_v30 = vsel %vm1880_vm1, %v567_v22, %v887_v51 }
 0x228   : > { %v2165_v56 = vsel %vm2139_vm8, %v2128_v53, %v1823_v57  ;;  %1550 = vrot.lane.b32.xlu1 %v11136_v48, %s10150_s26 }
 0x229   : > { %1548 = vrot.lane.b32.xlu0 %v720_v49, %s10150_s26  ;;  %8471 = vmatmul.mubr.msk.f32.gmra.mrb[24].mxu0 %vm2188_vm9, %v2165_v56 }
 0x22a   : > { %v1031_v58 = vpop.permute.xlu1 %1030 }
 0x22b   : > { %v1029_v59 = vpop.permute.xlu0 %1028  ;;  %v1945_v32 = vsel %vm1917_vm2, %v1908_v30, %v1031_v58  ;;  %v468_v58 = vld [vmem:[%s13987_s1] sm:$0xff]  ;;  %v477_v30 = vld [vmem:[%s13987_s1 + $0x48] sm:$0xff] }
 0x22c   : > { %1694 = vrot.lane.b32.xlu1 %v757_v54, %s10151_s25  ;;  %vm504_vm11 = vcmp.gt.f32.partialorder %v468_v58, 0.5 }
 0x22d   : > { %1692 = vrot.lane.b32.xlu0 %v756_v55, %s10151_s25  ;;  %v469_v55 = vld [vmem:[%s13987_s1 + $0x8] sm:$0xff] }
 0x22e   : > { %v1141_v62 = vpop.permute.xlu1 %1140  ;;  %vm505_vm10 = vcmp.gt.f32.partialorder %v469_v55, 0.5 }
 0x22f   : > { %v1139_v63 = vpop.permute.xlu0 %1138  ;;  %v1982_v34 = vsel %vm1954_vm3, %v1945_v32, %v1141_v62 }
 0x230   : > { %900 = vrot.lane.b32.xlu1 %v610_v60, %s10146_s20  ;;  %v794_v60 = vld [vmem:[%s10247_s18 + $0x136] sm:$0xff] }
 0x231   : > { %1836 = vrot.lane.b32.xlu0 %v792_v61, %s10152_s15 }
 0x232   : > { %v1285_v5 = vpop.permute.xlu1 %1284 }
 0x233   : > { %v1283_v0 = vpop.permute.xlu0 %1282  ;;  %v2019_v38 = vsel %vm1991_vm4, %v1982_v34, %v1285_v5  ;;  %v2590_v5 = vsel %vm504_vm11, 1, %v10153_v27 }
 0x234   : > { %902 = vrot.lane.b32.xlu1 %v611_v2, %s10146_s20  ;;  %v471_v2 = vld [vmem:[%s13987_s1 + $0x18] sm:$0xff] }
 0x235   : > { %1838 = vrot.lane.b32.xlu0 %v793_v4, %s10152_s15  ;;  %v2591_v4 = vsel %vm505_vm10, 1, %v10153_v27  ;;  %vm507_vm13 = vcmp.gt.f32.partialorder %v471_v2, 0.5 }
 0x236   : > { %v1429_v1 = vpop.permute.xlu1 %1428  ;;  %v2593_v11 = vsel %vm507_vm13, 1, %v10153_v27  ;;  %vm513_vm13 = vcmp.gt.f32.partialorder %v477_v30, 0.5 }
 0x237   : > { %v1427_v6 = vpop.permute.xlu0 %1426  ;;  %v2056_v41 = vsel %vm2028_vm5, %v2019_v38, %v1429_v1 }
 0x238   : > { %1046 = vrot.lane.b32.xlu1 %v11099_v3, %s10145_s19  ;;  %v684_v3 = vld [vmem:[%s10247_s18 + $0x123] sm:$0xff] }
 0x239   : > { %1044 = vrot.lane.b32.xlu0 %v11102_v14, %s10145_s19  ;;  %v1944_v14 = vsel %vm1917_vm2, %v1907_v9, %v1029_v59  ;;  %v795_v59 = vld [vmem:[%s10247_s18 + $0x13e] sm:$0xff]  ;;  %v474_v9 = vld [vmem:[%s13987_s1 + $0x30] sm:$0xff] }
 0x23a   : > { %v1539_v12 = vpop.permute.xlu1 %1538  ;;  %v1981_v25 = vsel %vm1954_vm3, %v1944_v14, %v1139_v63  ;;  %v470_v63 = vld [vmem:[%s13987_s1 + $0x10] sm:$0xff]  ;;  %vm510_vm10 = vcmp.gt.f32.partialorder %v474_v9, 0.5 }
 0x23b   : > { %v1537_v13 = vpop.permute.xlu0 %1536  ;;  %v2018_v29 = vsel %vm1991_vm4, %v1981_v25, %v1283_v0  ;;  %v2093_v44 = vsel %vm2065_vm6, %v2056_v41, %v1539_v12  ;;  %vm506_vm12 = vcmp.gt.f32.partialorder %v470_v63, 0.5  ;;  %v2596_v34 = vsel %vm510_vm10, 1, %v10153_v27 }
 0x23c   : > { %v11165_v17 = vpop.f32.mrb[12].mxu0  ;;  %1156 = vrot.lane.b32.xlu1 %v649_v7, %s10147_s21  ;;  %v2055_v10 = vsel %vm2028_vm5, %v2018_v29, %v1427_v6  ;;  %v472_v6 = vld [vmem:[%s13987_s1 + $0x20] sm:$0xff]  ;;  %v473_v7 = vld [vmem:[%s13987_s1 + $0x28] sm:$0xff] }
 0x23d   : > { %1154 = vrot.lane.b32.xlu0 %v648_v8, %s10147_s21  ;;  %v11170_v18 = vpop.f32.mrb[13].mxu0  ;;  %v2092_v33 = vsel %vm2065_vm6, %v2055_v10, %v1537_v13  ;;  %v2592_v8 = vsel %vm506_vm12, 1, %v10153_v27  ;;  %vm508_vm14 = vcmp.gt.f32.partialorder %v472_v6, 0.5  ;;  %vm509_vm15 = vcmp.gt.f32.partialorder %v473_v7, 0.5  ;;  %v476_v29 = vld [vmem:[%s13987_s1 + $0x40] sm:$0xff]  ;;  %v482_v7 = vld [vmem:[%s13987_s1 + $0x70] sm:$0xff] }
 0x23e   : > { %v1683_v23 = vpop.permute.xlu1 %1682  ;;  %v2594_v22 = vsel %vm508_vm14, 1, %v10153_v27  ;;  %v2595_v14 = vsel %vm509_vm15, 1, %v10153_v27  ;;  %vm512_vm12 = vcmp.gt.f32.partialorder %v476_v29, 0.5 }
 0x23f   : > { %v1681_v26 = vpop.permute.xlu0 %1680  ;;  %v2130_v51 = vsel %vm2102_vm7, %v2093_v44, %v1683_v23  ;;  %v568_v23 = vld [vmem:[%s10247_s18 + $0xe0] sm:$0xff] }
 0x240   : > { %1300 = vrot.lane.b32.xlu1 %v685_v15, %s10148_s22  ;;  %v2129_v35 = vsel %vm2102_vm7, %v2092_v33, %v1681_v26  ;;  %v475_v15 = vld [vmem:[%s13987_s1 + $0x38] sm:$0xff] }
 0x241   : > { %1298 = vrot.lane.b32.xlu0 %v684_v3, %s10148_s22  ;;  %v14026_v3 = vmov 0.0   ;;  %vm511_vm11 = vcmp.gt.f32.partialorder %v475_v15, 0.5  ;;  %s9211_s22 = smul.u32 288, %s14085_s30 }
 0x242   : > { %v11184_v28 = vpop.permute.xlu1 %888  ;;  %2582 = vst.msk [vmem:[#allocation2] sm:$0xff] %vm2139_vm8, %v14026_v3  ;;  %2583 = vst.msk [vmem:[#allocation2 + $0x8] sm:$0xff] %vm2139_vm8, %v14026_v3 }
 0x243   : > { %v1825_v37 = vpop.permute.xlu0 %1824  ;;  %2586 = vst.msk [vmem:[#allocation2 + $0x133] sm:$0xff] %vm2139_vm8, %v14026_v3  ;;  %2587 = vst.msk [vmem:[#allocation2 + $0x13b] sm:$0xff] %vm2139_vm8, %v14026_v3  ;;  %v1909_v32 = vsel %vm1880_vm1, %v568_v23, %v11184_v28  ;;  %v479_v28 = vld [vmem:[%s13987_s1 + $0x58] sm:$0xff]  ;;  %s13873_s24 = scalar_lea.vmem %s14000_s14, %s9211_s22 }
 0x244   : > { %v2166_v40 = vsel %vm2139_vm8, %v2129_v35, %v1825_v37  ;;  %1444 = vrot.lane.b32.xlu1 %v11136_v48, %s10149_s23  ;;  %v759_v48 = vld [vmem:[%s10247_s18 + $0x13d] sm:$0xff]  ;;  %2585 = vst.msk [vmem:[#allocation2 + $0x10] sm:$0x7] %vm2584_vm0, %v14026_v3  ;;  %v2597_v35 = vsel %vm511_vm11, 1, %v10153_v27  ;;  %v569_v37 = vld [vmem:[%s10247_s18 + $0xe8] sm:$0xff]  ;;  %vm515_vm15 = vcmp.gt.f32.partialorder %v479_v28, 0.5 }
 0x245   : > { %1442 = vrot.lane.b32.xlu0 %v720_v49, %s10149_s23  ;;  %8473 = vmatprep.mubr.msk.f32.mxu0 %vm2188_vm9, %v2166_v40  ;;  %v758_v49 = vld [vmem:[%s10247_s18 + $0x135] sm:$0xff]  ;;  %vm518_vm11 = vcmp.gt.f32.partialorder %v482_v7, 0.5 }
 0x246   : > { %v11198_v50 = vpop.permute.xlu1 %890  ;;  %v571_v28 = vld [vmem:[%s10247_s18 + $0xf8] sm:$0xff] }
 0x247   : > { %v1827_v53 = vpop.permute.xlu0 %1826 }
 0x248   : > { %v2167_v57 = vsel %vm2139_vm8, %v2130_v51, %v1827_v53  ;;  %1554 = vrot.lane.b32.xlu1 %v723_v42, %s10150_s26  ;;  %v1910_v51 = vsel %vm1880_vm1, %v569_v37, %v11198_v50  ;;  %v570_v37 = vld [vmem:[%s10247_s18 + $0xf0] sm:$0xff] }
 0x249   : > { %1552 = vrot.lane.b32.xlu0 %v722_v43, %s10150_s26  ;;  %8474 = vmatmul.mubr.msk.f32.gmra.mrb[26].mxu0 %vm2188_vm9, %v2167_v57  ;;  %v478_v43 = vld [vmem:[%s13987_s1 + $0x50] sm:$0xff]  ;;  %v2598_v57 = vsel %vm512_vm12, 1, %v10153_v27  ;;  %s10156_s26 = smov 64  }
 0x24a   : > { %v11207_v56 = vpop.permute.xlu1 %1034  ;;  %vm514_vm14 = vcmp.gt.f32.partialorder %v478_v43, 0.5 }
 0x24b   : > { %v1033_v54 = vpop.permute.xlu0 %1032  ;;  %v2600_v2 = vsel %vm514_vm14, 1, %v10153_v27 }
 0x24c   : > { %1698 = vrot.lane.b32.xlu1 %v759_v48, %s10151_s25  ;;  %v1946_v38 = vsel %vm1917_vm2, %v1909_v32, %v1033_v54  ;;  %v2599_v48 = vsel %vm513_vm13, 1, %v10153_v27 }
 0x24d   : > { %1696 = vrot.lane.b32.xlu0 %v758_v49, %s10151_s25  ;;  %v1947_v49 = vsel %vm1917_vm2, %v1910_v51, %v11207_v56 }
 0x24e   : > { %v11219_v61 = vpop.permute.xlu1 %1144 }
 0x24f   : > { %v1143_v62 = vpop.permute.xlu0 %1142  ;;  %v1984_v58 = vsel %vm1954_vm3, %v1947_v49, %v11219_v61 }
 0x250   : > { %1842 = vrot.lane.b32.xlu1 %v795_v59, %s10152_s15  ;;  %v1983_v41 = vsel %vm1954_vm3, %v1946_v38, %v1143_v62  ;;  %v481_v62 = vld [vmem:[%s13987_s1 + $0x68] sm:$0xff] }
 0x251   : > { %1840 = vrot.lane.b32.xlu0 %v794_v60, %s10152_s15  ;;  %v480_v60 = vld [vmem:[%s13987_s1 + $0x60] sm:$0xff]  ;;  %vm517_vm10 = vcmp.gt.f32.partialorder %v481_v62, 0.5 }
 0x252   : > { %v11231_v0 = vpop.permute.xlu1 %1288  ;;  %vm516_vm0 = vcmp.gt.f32.partialorder %v480_v60, 0.5 }
 0x253   : > { %v1287_v1 = vpop.permute.xlu0 %1286  ;;  %v2021_v56 = vsel %vm1991_vm4, %v1984_v58, %v11231_v0 }
 0x254   : > { %2630 = vperm.xlu1 %9234, %v2591_v4   ;;  %v2020_v44 = vsel %vm1991_vm4, %v1983_v41, %v1287_v1  ;;  %v2601_v4 = vsel %vm515_vm15, 1, %v10153_v27 }
 0x255   : > { %2627 = vperm.xlu0 %9233, %v2590_v5  }
 0x256   : > { %v1433_v12 = vpop.permute.xlu1 %1432 }
 0x257   : > { %v1431_v13 = vpop.permute.xlu0 %1430  ;;  %v2058_v61 = vsel %vm2028_vm5, %v2021_v56, %v1433_v12  ;;  %v2602_v12 = vsel %vm516_vm0, 1, %v10153_v27 }
 0x258   : > { %2633 = vperm.xlu1 %9234, %v2592_v8   ;;  %v2057_v53 = vsel %vm2028_vm5, %v2020_v44, %v1431_v13  ;;  %v483_v8 = vld [vmem:[%s13987_s1 + $0x78] sm:$0xff]  ;;  %v2603_v13 = vsel %vm517_vm10, 1, %v10153_v27 }
 0x259   : > { %2636 = vperm.xlu0 %9233, %v2593_v11   ;;  %vm519_vm12 = vcmp.gt.f32.partialorder %v483_v8, 0.5 }
 0x25a   : > { %v1543_v25 = vpop.permute.xlu1 %1542  ;;  %v2605_v23 = vsel %vm519_vm12, 1, %v10153_v27 }
 0x25b   : > { %v1541_v26 = vpop.permute.xlu0 %1540  ;;  %v2095_v5 = vsel %vm2065_vm6, %v2058_v61, %v1543_v25 }
 0x25c   : > { %v11265_v10 = vpop.f32.mrb[14].mxu0  ;;  %2639 = vperm.xlu1 %9234, %v2594_v22   ;;  %v2094_v54 = vsel %vm2065_vm6, %v2057_v53, %v1541_v26  ;;  %v484_v22 = vld [vmem:[%s13987_s1 + $0x80] sm:$0xff] }
 0x25d   : > { %2642 = vperm.xlu0 %9233, %v2595_v14   ;;  %v11269_v33 = vpop.f32.mrb[15].mxu0  ;;  %v2604_v14 = vsel %vm518_vm11, 1, %v10153_v27  ;;  %vm520_vm13 = vcmp.gt.f32.partialorder %v484_v22, 0.5  ;;  %v572_v22 = vld [vmem:[%s10247_s18 + $0x100] sm:$0xff] }
 0x25e   : > { %v1687_v40 = vpop.permute.xlu1 %1686  ;;  %v2606_v29 = vsel %vm520_vm13, 1, %v10153_v27 }
 0x25f   : > { %v1685_v42 = vpop.permute.xlu0 %1684  ;;  %v2132_v6 = vsel %vm2102_vm7, %v2095_v5, %v1687_v40 }
 0x260   : > { %2645 = vperm.xlu1 %9234, %v2596_v34   ;;  %v2131_v59 = vsel %vm2102_vm7, %v2094_v54, %v1685_v42 }
 0x261   : > { %2648 = vperm.xlu0 %9233, %v2597_v35  }
 0x262   : > { %v893_v55 = vpop.permute.xlu1 %892 }
 0x263   : > { %v1829_v50 = vpop.permute.xlu0 %1828  ;;  %v1911_v42 = vsel %vm1880_vm1, %v570_v37, %v893_v55 }
 0x264   : > { %v2168_v63 = vsel %vm2139_vm8, %v2131_v59, %v1829_v50  ;;  %2651 = vperm.xlu1 %9234, %v2598_v57  }
 0x265   : > { %2654 = vperm.xlu0 %9233, %v2599_v48   ;;  %8476 = vmatprep.mubr.msk.f32.mxu0 %vm2188_vm9, %v2168_v63 }
 0x266   : > { %v895_v1 = vpop.permute.xlu1 %894 }
 0x267   : > { %v1831_v0 = vpop.permute.xlu0 %1830  ;;  %v1912_v49 = vsel %vm1880_vm1, %v571_v28, %v895_v1 }
 0x268   : > { %v2169_v11 = vsel %vm2139_vm8, %v2132_v6, %v1831_v0  ;;  %2657 = vperm.xlu1 %9234, %v2600_v2  }
 0x269   : > { %2660 = vperm.xlu0 %9233, %v2601_v4   ;;  %8477 = vmatmul.mubr.msk.f32.gmra.mrb[28].mxu0 %vm2188_vm9, %v2169_v11 }
 0x26a   : > { %v1039_v9 = vpop.permute.xlu1 %1038 }
 0x26b   : > { %v1037_v15 = vpop.permute.xlu0 %1036  ;;  %v1949_v58 = vsel %vm1917_vm2, %v1912_v49, %v1039_v9 }
 0x26c   : > { %2663 = vperm.xlu1 %9234, %v2602_v12   ;;  %v1948_v44 = vsel %vm1917_vm2, %v1911_v42, %v1037_v15 }
 0x26d   : > { %2666 = vperm.xlu0 %9233, %v2603_v13  }
 0x26e   : > { %v1149_v25 = vpop.permute.xlu1 %1148 }
 0x26f   : > { %v1147_v26 = vpop.permute.xlu0 %1146  ;;  %v1986_v50 = vsel %vm1954_vm3, %v1949_v58, %v1149_v25 }
 0x270   : > { %2669 = vperm.xlu1 %9234, %v2604_v14   ;;  %v1985_v53 = vsel %vm1954_vm3, %v1948_v44, %v1147_v26  ;;  %v4114_v44 = vld [vmem:[%s13990_s4 + $0x10] sm:$0xff] }
 0x271   : > { %2672 = vperm.xlu0 %9233, %v2605_v23  }
 0x272   : > { %v1293_v30 = vpop.permute.xlu1 %1292 }
 0x273   : > { %v1291_v32 = vpop.permute.xlu0 %1290  ;;  %v2023_v56 = vsel %vm1991_vm4, %v1986_v50, %v1293_v30  ;;  %v573_v30 = vld [vmem:[%s10247_s18 + $0x108] sm:$0xff] }
 0x274   : > { %2675 = vperm.xlu1 %9234, %v2606_v29   ;;  %v2022_v48 = vsel %vm1991_vm4, %v1985_v53, %v1291_v32 }
 0x276   : > { %v1437_v34 = vpop.permute.xlu1 %1436 }
 0x277   : > { %v1435_v35 = vpop.permute.xlu0 %1434  ;;  %v2060_v61 = vsel %vm2028_vm5, %v2023_v56, %v1437_v34 }
 0x278   : > { %v2059_v54 = vsel %vm2028_vm5, %v2022_v48, %v1435_v35  ;;  %v14024_v48 = vmov 0.0|0.0  }
 0x279   : > { %8846 = vmatprep.subr.bf16.mxu0 %v14024_v48  ;;  %9070 = vmatprep.subr.bf16.mxu1 %v14024_v48 }
 0x27a   : > { %v1547_v38 = vpop.permute.xlu1 %1546 }
 0x27b   : > { %v1545_v40 = vpop.permute.xlu0 %1544  ;;  %v2097_v2 = vsel %vm2065_vm6, %v2060_v61, %v1547_v38  ;;  %v4112_v38 = vld [vmem:[%s13990_s4] sm:$0xff]  ;;  %v4117_v61 = vld [vmem:[%s13990_s4 + $0x28] sm:$0xff] }
 0x27c   : > { %v11326_v41 = vpop.f32.mrb[16].mxu0  ;;  %v2096_v59 = vsel %vm2065_vm6, %v2059_v54, %v1545_v40  ;;  %v4113_v40 = vld [vmem:[%s13990_s4 + $0x8] sm:$0xff] }
 0x27d   : > { %v11329_v43 = vpop.f32.mrb[17].mxu0  ;;  %v8847_v28 = vpack.c.bf16 %v4113_v40, %v4112_v38  ;;  %v4124_v38 = vld [vmem:[%s13990_s4 + $0x60] sm:$0xff]  ;;  %v4125_v40 = vld [vmem:[%s13990_s4 + $0x68] sm:$0xff] }
 0x27e   : > { %v1691_v51 = vpop.permute.xlu1 %1690 }
 0x27f   : > { %v1689_v57 = vpop.permute.xlu0 %1688  ;;  %v2134_v5 = vsel %vm2102_vm7, %v2097_v2, %v1691_v51  ;;  %v4115_v51 = vld [vmem:[%s13990_s4 + $0x18] sm:$0xff]  ;;  %8848 = vmatpush1.bf16.msra.mxu0 %v8847_v28  ;;  %9086 = vmatpush1.bf16.msra.mxu1 %v8847_v28  ;;  %v8865_v28 = vpack.c.bf16 %v4125_v40, %v4124_v38  ;;  %v4133_v38 = vld [vmem:[%s13990_s4 + $0xa8] sm:$0xff] }
 0x280   : > { %v2133_v60 = vsel %vm2102_vm7, %v2096_v59, %v1689_v57  ;;  %v8850_v59 = vpack.c.bf16 %v4115_v51, %v4114_v44  ;;  %8849 = vmatprep.subr.bf16.mxu0 %v14024_v48  ;;  %9071 = vmatprep.subr.bf16.mxu1 %v14024_v48  ;;  %v575_v51 = vld [vmem:[%s10247_s18 + $0x118] sm:$0xff] }
 0x282   : > { %v897_v55 = vpop.permute.xlu1 %896 }
 0x283   : > { %v1833_v62 = vpop.permute.xlu0 %1832  ;;  %v1913_v26 = vsel %vm1880_vm1, %v572_v22, %v897_v55  ;;  %8851 = vmatpush1.bf16.msra.mxu0 %v8850_v59  ;;  %9087 = vmatpush1.bf16.msra.mxu1 %v8850_v59  ;;  %v4121_v22 = vld [vmem:[%s13990_s4 + $0x48] sm:$0xff]  ;;  %v4127_v59 = vld [vmem:[%s13990_s4 + $0x78] sm:$0xff] }
 0x284   : > { %v2170_v63 = vsel %vm2139_vm8, %v2133_v60, %v1833_v62  ;;  %8852 = vmatprep.subr.bf16.mxu0 %v14024_v48  ;;  %9072 = vmatprep.subr.bf16.mxu1 %v14024_v48 }
 0x285   : > { %8479 = vmatprep.mubr.msk.f32.mxu0 %vm2188_vm9, %v2170_v63  ;;  %v4116_v63 = vld [vmem:[%s13990_s4 + $0x20] sm:$0xff] }
 0x286   : > { %v899_v4 = vpop.permute.xlu1 %898 }
 0x287   : > { %v1835_v1 = vpop.permute.xlu0 %1834  ;;  %v1914_v53 = vsel %vm1880_vm1, %v573_v30, %v899_v4  ;;  %v4122_v30 = vld [vmem:[%s13990_s4 + $0x50] sm:$0xff] }
 0x288   : > { %v2171_v6 = vsel %vm2139_vm8, %v2134_v5, %v1835_v1  ;;  %v8853_v1 = vpack.c.bf16 %v4117_v61, %v4116_v63 }
 0x289   : > { %8480 = vmatmul.mubr.msk.f32.gmra.mrb[30].mxu0 %vm2188_vm9, %v2171_v6 }
 0x28a   : > { %v1043_v0 = vpop.permute.xlu1 %1042  ;;  %8854 = vmatpush1.bf16.msra.mxu0 %v8853_v1  ;;  %9088 = vmatpush1.bf16.msra.mxu1 %v8853_v1 }
 0x28b   : > { %v1041_v7 = vpop.permute.xlu0 %1040  ;;  %v1951_v49 = vsel %vm1917_vm2, %v1914_v53, %v1043_v0  ;;  %8855 = vmatprep.subr.bf16.mxu0 %v14024_v48  ;;  %9073 = vmatprep.subr.bf16.mxu1 %v14024_v48  ;;  %v574_v53 = vld [vmem:[%s10247_s18 + $0x110] sm:$0xff]  ;;  %s10157_s18 = smov 96  }
 0x28c   : > { %v1950_v32 = vsel %vm1917_vm2, %v1913_v26, %v1041_v7 }
 0x28e   : > { %v1153_v8 = vpop.permute.xlu1 %1152 }
 0x28f   : > { %v1151_v11 = vpop.permute.xlu0 %1150  ;;  %v1988_v55 = vsel %vm1954_vm3, %v1951_v49, %v1153_v8  ;;  %v4118_v8 = vld [vmem:[%s13990_s4 + $0x30] sm:$0xff] }
 0x290   : > { %v1987_v35 = vsel %vm1954_vm3, %v1950_v32, %v1151_v11  ;;  %v4119_v11 = vld [vmem:[%s13990_s4 + $0x38] sm:$0xff] }
 0x291   : > { %v4123_v32 = vld [vmem:[%s13990_s4 + $0x58] sm:$0xff] }
 0x292   : > { %v1297_v12 = vpop.permute.xlu1 %1296 }
 0x293   : > { %v1295_v13 = vpop.permute.xlu0 %1294  ;;  %v2025_v62 = vsel %vm1991_vm4, %v1988_v55, %v1297_v12 }
 0x294   : > { %v2024_v42 = vsel %vm1991_vm4, %v1987_v35, %v1295_v13  ;;  %v8856_v13 = vpack.c.bf16 %v4119_v11, %v4118_v8  ;;  %v8862_v35 = vpack.c.bf16 %v4123_v32, %v4122_v30 }
 0x296   : > { %v1441_v9 = vpop.permute.xlu1 %1440  ;;  %8857 = vmatpush1.bf16.msra.mxu0 %v8856_v13  ;;  %9089 = vmatpush1.bf16.msra.mxu1 %v8856_v13  ;;  %v4131_v13 = vld [vmem:[%s13990_s4 + $0x98] sm:$0xff] }
 0x297   : > { %v1439_v15 = vpop.permute.xlu0 %1438  ;;  %v2062_v2 = vsel %vm2028_vm5, %v2025_v62, %v1441_v9  ;;  %8858 = vmatprep.subr.bf16.mxu0 %v14024_v48  ;;  %9074 = vmatprep.subr.bf16.mxu1 %v14024_v48 }
 0x298   : > { %v2061_v57 = vsel %vm2028_vm5, %v2024_v42, %v1439_v15  ;;  %v4120_v15 = vld [vmem:[%s13990_s4 + $0x40] sm:$0xff] }
 0x29a   : > { %v1551_v14 = vpop.permute.xlu1 %1550 }
 0x29b   : > { %v1549_v23 = vpop.permute.xlu0 %1548  ;;  %v2099_v4 = vsel %vm2065_vm6, %v2062_v2, %v1551_v14 }
 0x29c   : > { %v11350_v25 = vpop.f32.mrb[18].mxu0  ;;  %v2098_v54 = vsel %vm2065_vm6, %v2061_v57, %v1549_v23  ;;  %v8859_v23 = vpack.c.bf16 %v4121_v22, %v4120_v15 }
 0x29d   : > { %v11353_v29 = vpop.f32.mrb[19].mxu0 }
 0x29e   : > { %v1695_v34 = vpop.permute.xlu1 %1694  ;;  %8860 = vmatpush1.bf16.msra.mxu0 %v8859_v23  ;;  %9090 = vmatpush1.bf16.msra.mxu1 %v8859_v23 }
 0x29f   : > { %v1693_v37 = vpop.permute.xlu0 %1692  ;;  %v2136_v6 = vsel %vm2102_vm7, %v2099_v4, %v1695_v34  ;;  %8861 = vmatprep.subr.bf16.mxu0 %v14024_v48  ;;  %9075 = vmatprep.subr.bf16.mxu1 %v14024_v48 }
 0x2a0   : > { %v2135_v50 = vsel %vm2102_vm7, %v2098_v54, %v1693_v37  ;;  %v4126_v54 = vld [vmem:[%s13990_s4 + $0x70] sm:$0xff] }
 0x2a2   : > { %v11377_v58 = vpop.permute.xlu1 %900  ;;  %8863 = vmatpush1.bf16.msra.mxu0 %v8862_v35  ;;  %9091 = vmatpush1.bf16.msra.mxu1 %v8862_v35 }
 0x2a3   : > { %v1837_v60 = vpop.permute.xlu0 %1836  ;;  %8864 = vmatprep.subr.bf16.mxu0 %v14024_v48  ;;  %9076 = vmatprep.subr.bf16.mxu1 %v14024_v48  ;;  %v1915_v62 = vsel %vm1880_vm1, %v574_v53, %v11377_v58  ;;  %v4128_v58 = vld [vmem:[%s13990_s4 + $0x80] sm:$0xff] }
 0x2a4   : > { %v2172_v56 = vsel %vm2139_vm8, %v2135_v50, %v1837_v60  ;;  %v8868_v60 = vpack.c.bf16 %v4127_v59, %v4126_v54  ;;  %v4136_v53 = vld [vmem:[%s13990_s4 + $0xc0] sm:$0xff] }
 0x2a5   : > { %8482 = vmatprep.mubr.msk.f32.mxu0 %vm2188_vm9, %v2172_v56 }
 0x2a6   : > { %v903_v5 = vpop.permute.xlu1 %902  ;;  %8866 = vmatpush1.bf16.msra.mxu0 %v8865_v28  ;;  %9092 = vmatpush1.bf16.msra.mxu1 %v8865_v28  ;;  %v4135_v28 = vld [vmem:[%s13990_s4 + $0xb8] sm:$0xff] }
 0x2a7   : > { %v1839_v0 = vpop.permute.xlu0 %1838  ;;  %8867 = vmatprep.subr.bf16.mxu0 %v14024_v48  ;;  %9077 = vmatprep.subr.bf16.mxu1 %v14024_v48  ;;  %v1916_v55 = vsel %vm1880_vm1, %v575_v51, %v903_v5  ;;  %v11498_v51 = vld [vmem:[%s13989_s3] ss:$0 sm:$0xff] }
 0x2a8   : > { %v2173_v7 = vsel %vm2139_vm8, %v2136_v6, %v1839_v0  ;;  %v4129_v0 = vld [vmem:[%s13990_s4 + $0x88] sm:$0xff]  ;;  %v2368_v54 = vadd.f32 %v11498_v51, %v10848_v47  ;;  %v4138_v47 = vld [vmem:[%s13990_s4 + $0xd0] sm:$0xff] }
 0x2a9   : > { %8483 = vmatmul.mubr.msk.f32.gmra.mrb[32].mxu0 %vm2188_vm9, %v2173_v7  ;;  %v8871_v11 = vpack.c.bf16 %v4129_v0, %v4128_v58  ;;  %v2388_v58 = vadd.f32 %v11498_v51, %v10935_v52 }
 0x2aa   : > { %v1047_v12 = vpop.permute.xlu1 %1046  ;;  %8869 = vmatpush1.bf16.msra.mxu0 %v8868_v60  ;;  %9093 = vmatpush1.bf16.msra.mxu1 %v8868_v60  ;;  %v2546_v60 = vmax.f32 %v2368_v54, 0.0 }
 0x2ab   : > { %v1045_v9 = vpop.permute.xlu0 %1044  ;;  %v1953_v56 = vsel %vm1917_vm2, %v1916_v55, %v1047_v12  ;;  %8870 = vmatprep.subr.bf16.mxu0 %v14024_v48  ;;  %9078 = vmatprep.subr.bf16.mxu1 %v14024_v48  ;;  %v4130_v12 = vld [vmem:[%s13990_s4 + $0x90] sm:$0xff] }
 0x2ac   : > { %v1952_v61 = vsel %vm1917_vm2, %v1915_v62, %v1045_v9  ;;  %v2383_v62 = vadd.f32 %v10903_v31, %v11498_v51 }
 0x2ae   : > { %v1157_v14 = vpop.permute.xlu1 %1156  ;;  %8872 = vmatpush1.bf16.msra.mxu0 %v8871_v11  ;;  %9094 = vmatpush1.bf16.msra.mxu1 %v8871_v11  ;;  %v4141_v11 = vld [vmem:[%s13990_s4 + $0xe8] sm:$0xff] }
 0x2af   : > { %v1155_v26 = vpop.permute.xlu0 %1154  ;;  %v1990_v2 = vsel %vm1954_vm3, %v1953_v56, %v1157_v14  ;;  %8873 = vmatprep.subr.bf16.mxu0 %v14024_v48  ;;  %9079 = vmatprep.subr.bf16.mxu1 %v14024_v48  ;;  %v2378_v56 = vadd.f32 %v11498_v51, %v10907_v16 }
 0x2b0   : > { %v1989_v1 = vsel %vm1954_vm3, %v1952_v61, %v1155_v26 }
 0x2b2   : > { %v1301_v34 = vpop.permute.xlu1 %1300 }
 0x2b3   : > { %v1299_v37 = vpop.permute.xlu0 %1298  ;;  %v2027_v5 = vsel %vm1991_vm4, %v1990_v2, %v1301_v34  ;;  %v8874_v34 = vpack.c.bf16 %v4131_v13, %v4130_v12  ;;  %v4139_v2 = vld [vmem:[%s13990_s4 + $0xd8] sm:$0xff]  ;;  %v2878_v13 = vld [vmem:[#allocation2 + $0x1] sm:$0xff] }
 0x2b4   : > { %v2026_v7 = vsel %vm1991_vm4, %v1989_v1, %v1299_v37  ;;  %v4132_v37 = vld [vmem:[%s13990_s4 + $0xa0] sm:$0xff]  ;;  %v8886_v31 = vpack.c.bf16 %v4139_v2, %v4138_v47  ;;  %v2549_v1 = vmax.f32 %v2383_v62, 0.0 }
 0x2b5   : > { %9095 = vmatpush1.bf16.msra.mxu1 %v8874_v34  ;;  %8875 = vmatpush1.bf16.msra.mxu0 %v8874_v34  ;;  %v8877_v40 = vpack.c.bf16 %v4133_v38, %v4132_v37 }
 0x2b6   : > { %v1445_v42 = vpop.permute.xlu1 %1444  ;;  %9080 = vmatprep.subr.bf16.mxu1 %v14024_v48  ;;  %8876 = vmatprep.subr.bf16.mxu0 %v14024_v48 }
 0x2b7   : > { %v1443_v44 = vpop.permute.xlu0 %1442  ;;  %v2064_v8 = vsel %vm2028_vm5, %v2027_v5, %v1445_v42  ;;  %v4134_v42 = vld [vmem:[%s13990_s4 + $0xb0] sm:$0xff]  ;;  %v2548_v5 = vmax.f32 %v2378_v56, 0.0 }
 0x2b8   : > { %v2063_v9 = vsel %vm2028_vm5, %v2026_v7, %v1443_v44  ;;  %v8880_v44 = vpack.c.bf16 %v4135_v28, %v4134_v42  ;;  %vm3930_vm5 = vcmask 523264   ;;  %v2879_v56 = vld [vmem:[#allocation2 + $0x9] sm:$0xff] }
 0x2b9   : > { %9096 = vmatpush1.bf16.msra.mxu1 %v8877_v40  ;;  %8878 = vmatpush1.bf16.msra.mxu0 %v8877_v40  ;;  %5189 = vst.msk [vmem:[#allocation3] sm:$0xff] %vm3930_vm5, %v14026_v3  ;;  %5190 = vst.msk [vmem:[#allocation3 + $0x8] sm:$0xff] %vm3930_vm5, %v14026_v3 }
 0x2ba   : > { %v1555_v57 = vpop.permute.xlu1 %1554  ;;  %9081 = vmatprep.subr.bf16.mxu1 %v14024_v48  ;;  %8879 = vmatprep.subr.bf16.mxu0 %v14024_v48  ;;  %5193 = vst.msk [vmem:[#allocation3 + $0x133] sm:$0xff] %vm3930_vm5, %v14026_v3  ;;  %5194 = vst.msk [vmem:[#allocation3 + $0x13b] sm:$0xff] %vm3930_vm5, %v14026_v3 }
 0x2bb   : > { %v1553_v49 = vpop.permute.xlu0 %1552  ;;  %v2101_v15 = vsel %vm2065_vm6, %v2064_v8, %v1555_v57  ;;  %v4137_v57 = vld [vmem:[%s13990_s4 + $0xc8] sm:$0xff]  ;;  %v4140_v8 = vld [vmem:[%s13990_s4 + $0xe0] sm:$0xff] }
 0x2bc   : > { %v11442_v50 = vpop.f32.mrb[20].mxu0  ;;  %v2100_v22 = vsel %vm2065_vm6, %v2063_v9, %v1553_v49  ;;  %v2373_v49 = vadd.f32 %v10844_v46, %v11498_v51  ;;  %v8883_v59 = vpack.c.bf16 %v4137_v57, %v4136_v53  ;;  %v2413_v53 = vadd.f32 %v11043_v20, %v11498_v51 }
 0x2bd   : > { %v11447_v63 = vpop.f32.mrb[21].mxu0  ;;  %9097 = vmatpush1.bf16.msra.mxu1 %v8880_v44  ;;  %8881 = vmatpush1.bf16.msra.mxu0 %v8880_v44  ;;  %v2408_v57 = vadd.f32 %v11498_v51, %v11048_v24 }
 0x2be   : > { %v1699_v4 = vpop.permute.xlu1 %1698  ;;  %9082 = vmatprep.subr.bf16.mxu1 %v14024_v48  ;;  %8882 = vmatprep.subr.bf16.mxu0 %v14024_v48  ;;  %v2547_v55 = vmax.f32 %v2373_v49, 0.0  ;;  %v2555_v47 = vmax.f32 %v2413_v53, 0.0  ;;  %v487_v53 = vld [vmem:[%s13987_s1 + $0x98] sm:$0xff] }
 0x2bf   : > { %v1697_v6 = vpop.permute.xlu0 %1696  ;;  %v2138_v14 = vsel %vm2102_vm7, %v2101_v15, %v1699_v4  ;;  %v2550_v15 = vmax.f32 %v2388_v58, 0.0  ;;  %v2554_v2 = vmax.f32 %v2408_v57, 0.0  ;;  %v486_v58 = vld [vmem:[%s13987_s1 + $0x90] sm:$0xff] }
 0x2c0   : > { %v2137_v26 = vsel %vm2102_vm7, %v2100_v22, %v1697_v6  ;;  %v2393_v6 = vadd.f32 %v10927_v45, %v11498_v51  ;;  %v8889_v45 = vpack.c.bf16 %v4141_v11, %v4140_v8  ;;  %v2403_v22 = vadd.f32 %v10993_v36, %v11498_v51  ;;  %v4143_v36 = vld [vmem:[%s13990_s4 + $0xf8] sm:$0xff] }
 0x2c1   : > { %9098 = vmatpush1.bf16.msra.mxu1 %v8883_v59  ;;  %8884 = vmatpush1.bf16.msra.mxu0 %v8883_v59  ;;  %v2914_v59 = vld [vmem:[#allocation2 + $0x2] sm:$0xff]  ;;  %vm522_vm11 = vcmp.gt.f32.partialorder %v486_v58, 0.5 }
 0x2c2   : > { %v1843_v23 = vpop.permute.xlu1 %1842  ;;  %9083 = vmatprep.subr.bf16.mxu1 %v14024_v48  ;;  %8885 = vmatprep.subr.bf16.mxu0 %v14024_v48  ;;  %v2551_v9 = vmax.f32 %v2393_v6, 0.0  ;;  %v2553_v28 = vmax.f32 %v2403_v22, 0.0 }
 0x2c3   : > { %v2175_v30 = vsel %vm2139_vm8, %v2138_v14, %v1843_v23  ;;  %v1841_v32 = vpop.permute.xlu0 %1840  ;;  %v2398_v14 = vadd.f32 %v11498_v51, %v10999_v39 }
 0x2c4   : > { %v2174_v35 = vsel %vm2139_vm8, %v2137_v26, %v1841_v32  ;;  %v4142_v32 = vld [vmem:[%s13990_s4 + $0xf0] sm:$0xff] }
 0x2c5   : > { %8485 = vmatprep.mubr.msk.f32.mxu0 %vm2188_vm9, %v2174_v35  ;;  %9099 = vmatpush1.bf16.msra.mxu1 %v8886_v31  ;;  %v8892_v34 = vpack.c.bf16 %v4143_v36, %v4142_v32  ;;  %v2552_v44 = vmax.f32 %v2398_v14, 0.0  ;;  %v2915_v14 = vld [vmem:[#allocation2 + $0xa] sm:$0xff]  ;;  %v2608_v32 = vsel %vm522_vm11, 1, %v10153_v27 }
 0x2c6   : > { %8486 = vmatmul.mubr.msk.f32.gmra.mrb[34].mxu0 %vm2188_vm9, %v2175_v30  ;;  %9084 = vmatprep.subr.bf16.mxu1 %v14024_v48  ;;  %v485_v30 = vld [vmem:[%s13987_s1 + $0x88] sm:$0xff] }
 0x2c7   : > { %8887 = vmatpush1.bf16.msra.mxu0 %v8886_v31  ;;  %vm521_vm9 = vcmp.gt.f32.partialorder %v485_v30, 0.5  ;;  %v2423_v31 = vadd.f32 %v11105_v19, %v11498_v51 }
 0x2c8   : > { %8888 = vmatprep.subr.bf16.mxu0 %v14024_v48 }
 0x2c9   : > { %9100 = vmatpush1.bf16.msra.mxu1 %v8889_v45 }
 0x2ca   : > { %9085 = vmatprep.subr.bf16.mxu1 %v14024_v48 }
 0x2cb   : > { %8890 = vmatpush1.bf16.msra.mxu0 %v8889_v45 }
 0x2cc   : > { %8891 = vmatprep.subr.bf16.mxu0 %v14024_v48 }
 0x2cd   : > { %9101 = vmatpush1.bf16.msra.mxu1 %v8892_v34 }
 0x2ce   : > { %8910 = vmatprep.subr.bf16.mxu1 %v14024_v48 }
 0x2cf   : > { %8893 = vmatpush1.bf16.msra.mxu0 %v8892_v34 }
 0x2d3   : > { %v11517_v61 = vpop.permute.xlu1 %2630 }
 0x2d4   : > { %v11519_v46 = vpop.permute.xlu0 %2627  ;;  %vm2735_vm1 = vcmp.eq.s32.totalorder %v11517_v61, 1 }
 0x2d5   : > { %vm2734_vm2 = vcmp.eq.s32.totalorder %v11519_v46, 1  ;;  %v2771_v16 = vsel %vm2735_vm1, %v2547_v55, 0.0 }
 0x2d6   : > { %v2770_v4 = vsel %vm2734_vm2, %v2546_v60, 0.0  ;;  %2807 = vst.msk [vmem:[#allocation2 + $0x1b] sm:$0xff] %vm2139_vm8, %v2771_v16  ;;  %v2607_v60 = vsel %vm521_vm9, 1, %v10153_v27  ;;  %v2418_v16 = vadd.f32 %v11498_v51, %v11112_v21 }
 0x2d7   : > { %2806 = vst.msk [vmem:[#allocation2 + $0x13] sm:$0xff] %vm2139_vm8, %v2770_v4  ;;  %v11541_v0 = vpop.permute.xlu1 %2633 }
 0x2d8   : > { %v11543_v7 = vpop.permute.xlu0 %2636  ;;  %vm2736_vm3 = vcmp.eq.s32.totalorder %v11541_v0, 1 }
 0x2d9   : > { %vm2737_vm4 = vcmp.eq.s32.totalorder %v11543_v7, 1  ;;  %v2772_v52 = vsel %vm2736_vm3, %v2548_v5, 0.0 }
 0x2da   : > { %v2773_v12 = vsel %vm2737_vm4, %v2549_v1, 0.0  ;;  %2808 = vst.msk [vmem:[#allocation2 + $0x23] sm:$0xff] %vm2139_vm8, %v2772_v52  ;;  %v2557_v52 = vmax.f32 %v2423_v31, 0.0 }
 0x2db   : > { %2809 = vst.msk [vmem:[#allocation2 + $0x2b] sm:$0xff] %vm2139_vm8, %v2773_v12  ;;  %v11565_v23 = vpop.permute.xlu1 %2639  ;;  %v2556_v12 = vmax.f32 %v2418_v16, 0.0 }
 0x2dc   : > { %v11567_v26 = vpop.permute.xlu0 %2642  ;;  %vm2738_vm6 = vcmp.eq.s32.totalorder %v11565_v23, 1  ;;  %v11589_v39 = vpop.f32.mrb[22].mxu0 }
 0x2dd   : > { %vm2739_vm7 = vcmp.eq.s32.totalorder %v11567_v26, 1  ;;  %v2774_v35 = vsel %vm2738_vm6, %v2550_v15, 0.0  ;;  %v11596_v38 = vpop.f32.mrb[23].mxu0 }
 0x2de   : > { %v2775_v37 = vsel %vm2739_vm7, %v2551_v9, 0.0  ;;  %v2988_v40 = vld [vmem:[#allocation2 + $0x14] sm:$0xff]  ;;  %2810 = vst.msk [vmem:[#allocation2 + $0x33] sm:$0xff] %vm2139_vm8, %v2774_v35  ;;  %v2428_v9 = vadd.f32 %v11498_v51, %v11170_v18 }
 0x2df   : > { %2811 = vst.msk [vmem:[#allocation2 + $0x3b] sm:$0xff] %vm2139_vm8, %v2775_v37  ;;  %v9235_v42 = vpack.i.bf16 %v2878_v13, %v2988_v40  ;;  %v11604_v49 = vpop.permute.xlu1 %2645  ;;  %v11641_v8 = vld [vmem:[#allocation2 + $0x12] sm:$0xff]  ;;  %v2433_v13 = vadd.f32 %v11165_v17, %v11498_v51  ;;  %v2443_v37 = vadd.f32 %v11265_v10, %v11498_v51  ;;  %v2438_v40 = vadd.f32 %v11498_v51, %v11269_v33  ;;  %v2917_v57 = vld [vmem:[#allocation2 + $0x1a] sm:$0xff] }
 0x2e0   : > { %v11606_v54 = vpop.permute.xlu0 %2648  ;;  %vm2740_vm14 = vcmp.eq.s32.totalorder %v11604_v49, 1  ;;  %v2558_v35 = vmax.f32 %v2428_v9, 0.0 }
 0x2e1   : > { %vm2741_vm15 = vcmp.eq.s32.totalorder %v11606_v54, 1  ;;  %9236 = vrot.lane.b32.xlu0 %v9235_v42, %s10152_s15  ;;  %v2776_v20 = vsel %vm2740_vm14, %v2552_v44, 0.0  ;;  %v2989_v5 = vld [vmem:[#allocation2 + $0x1c] sm:$0xff]  ;;  %v2559_v34 = vmax.f32 %v2433_v13, 0.0 }
 0x2e2   : > { %v2777_v24 = vsel %vm2741_vm15, %v2553_v28, 0.0  ;;  %v11616_v55 = vld [vmem:[#allocation2 + $0x24] sm:$0xff]  ;;  %2812 = vst.msk [vmem:[#allocation2 + $0x43] sm:$0xff] %vm2139_vm8, %v2776_v20  ;;  %v9250_v11 = vpack.i.bf16 %v2879_v56, %v2989_v5  ;;  %v2448_v56 = vadd.f32 %v11498_v51, %v11329_v43 }
 0x2e3   : > { %2813 = vst.msk [vmem:[#allocation2 + $0x4b] sm:$0xff] %vm2139_vm8, %v2777_v24  ;;  %v9240_v62 = vpack.i.bf16 %v2914_v59, %v11616_v55  ;;  %v11627_v4 = vpop.permute.xlu1 %2651  ;;  %v3026_v6 = vld [vmem:[#allocation2 + $0x25] sm:$0xff]  ;;  %v2880_v59 = vld [vmem:[#allocation2 + $0x11] sm:$0xff] }
 0x2e4   : > { %v11629_v1 = vpop.permute.xlu0 %2654  ;;  %vm2742_vm0 = vcmp.eq.s32.totalorder %v11627_v4, 1  ;;  %v9245_v45 = vpack.i.bf16 %v11641_v8, %v3026_v6  ;;  %v9265_v24 = vpack.i.bf16 %v2880_v59, %v11616_v55  ;;  %v2562_v6 = vmax.f32 %v2448_v56, 0.0  ;;  %v2883_v59 = vld [vmem:[#allocation2 + $0x29] sm:$0xff]  ;;  %v4144_v56 = vld [vmem:[%s13990_s4 + $0x100] sm:$0xff] }
 0x2e5   : > { %vm2743_vm10 = vcmp.eq.s32.totalorder %v11629_v1, 1  ;;  %9241 = vrot.lane.b32.xlu1 %v9240_v62, %s10156_s26  ;;  %2678 = vperm.xlu0 %9233, %v2607_v60   ;;  %v2778_v19 = vsel %vm2742_vm0, %v2554_v2, 0.0  ;;  %v11654_v30 = vld [vmem:[#allocation2 + $0x2c] sm:$0xff]  ;;  %v2561_v60 = vmax.f32 %v2443_v37, 0.0  ;;  %v2560_v62 = vmax.f32 %v2438_v40, 0.0 }
 0x2e6   : > { %v2779_v21 = vsel %vm2743_vm10, %v2555_v47, 0.0  ;;  %2814 = vst.msk [vmem:[#allocation2 + $0x53] sm:$0xff] %vm2139_vm8, %v2778_v19  ;;  %v9255_v36 = vpack.i.bf16 %v2915_v14, %v11654_v30  ;;  %v3027_v44 = vld [vmem:[#allocation2 + $0x2d] sm:$0xff]  ;;  %v3028_v19 = vld [vmem:[#allocation2 + $0x35] sm:$0xff] }
 0x2e7   : > { %2815 = vst.msk [vmem:[#allocation2 + $0x5b] sm:$0xff] %vm2139_vm8, %v2779_v21  ;;  %v11650_v15 = vpop.permute.xlu1 %2657  ;;  %v9260_v20 = vpack.i.bf16 %v2917_v57, %v3027_v44  ;;  %v2992_v31 = vld [vmem:[#allocation2 + $0x34] sm:$0xff]  ;;  %v488_v21 = vld [vmem:[%s13987_s1 + $0xa0] sm:$0xff] }
 0x2e8   : > { %v11652_v22 = vpop.permute.xlu0 %2660  ;;  %vm14001_vm12 = vcmp.eq.s32.totalorder %v11650_v15, 1  ;;  %v9270_v5 = vpack.i.bf16 %v11641_v8, %v2992_v31 }
 0x2e9   : > { %vm14007_vm13 = vcmp.eq.s32.totalorder %v11652_v22, 1  ;;  %9251 = vrot.lane.b32.xlu0 %v9250_v11, %s10152_s15  ;;  %9246 = vrot.lane.b32.xlu1 %v9245_v45, %s10157_s18  ;;  %v2780_v17 = vsel %vm14001_vm12, %v2556_v12, 0.0  ;;  %vm523_vm12 = vcmp.gt.f32.partialorder %v487_v53, 0.5  ;;  %v2918_v45 = vld [vmem:[#allocation2 + $0x22] sm:$0xff] }
 0x2ea   : > { %v2781_v18 = vsel %vm14007_vm13, %v2557_v52, 0.0  ;;  %2816 = vst.msk [vmem:[#allocation2 + $0x63] sm:$0xff] %vm2139_vm8, %v2780_v17  ;;  %v2609_v43 = vsel %vm523_vm12, 1, %v10153_v27  ;;  %v2881_v52 = vld [vmem:[#allocation2 + $0x19] sm:$0xff]  ;;  %v9275_v8 = vpack.i.bf16 %v2918_v45, %v3028_v19  ;;  %vm524_vm12 = vcmp.gt.f32.partialorder %v488_v21, 0.5  ;;  %v2994_v40 = vld [vmem:[#allocation2 + $0x44] sm:$0xff] }
 0x2eb   : > { %2817 = vst.msk [vmem:[#allocation2 + $0x6b] sm:$0xff] %vm2139_vm8, %v2781_v18  ;;  %v11673_v42 = vpop.permute.xlu1 %2663  ;;  %v9280_v12 = vpack.i.bf16 %v2881_v52, %v11654_v30  ;;  %v2993_v13 = vld [vmem:[#allocation2 + $0x3c] sm:$0xff]  ;;  %v2610_v9 = vsel %vm524_vm12, 1, %v10153_v27  ;;  %v489_v18 = vld [vmem:[%s13987_s1 + $0xa8] sm:$0xff]  ;;  %v9300_v53 = vpack.i.bf16 %v2918_v45, %v2994_v40  ;;  %v494_v52 = vld [vmem:[%s13987_s1 + $0xd0] sm:$0xff] }
 0x2ec   : > { %v11675_v28 = vpop.permute.xlu0 %2666  ;;  %vm14002_vm9 = vcmp.eq.s32.totalorder %v11673_v42, 1  ;;  %v9285_v14 = vpack.i.bf16 %v2917_v57, %v2993_v13  ;;  %v3029_v17 = vld [vmem:[#allocation2 + $0x3d] sm:$0xff]  ;;  %v2920_v57 = vld [vmem:[#allocation2 + $0x32] sm:$0xff]  ;;  %v493_v19 = vld [vmem:[%s13987_s1 + $0xc8] sm:$0xff]  ;;  %vm530_vm13 = vcmp.gt.f32.partialorder %v494_v52, 0.5 }
 0x2ed   : > { %vm14003_vm11 = vcmp.eq.s32.totalorder %v11675_v28, 1  ;;  %2681 = vperm.xlu0 %9233, %v2608_v32   ;;  %9256 = vrot.lane.b32.xlu1 %v9255_v36, %s10156_s26  ;;  %v2782_v10 = vsel %vm14002_vm9, %v2558_v35, 0.0  ;;  %v2919_v36 = vld [vmem:[#allocation2 + $0x2a] sm:$0xff]  ;;  %v2921_v21 = vld [vmem:[#allocation2 + $0x3a] sm:$0xff]  ;;  %v2924_v52 = vld [vmem:[#allocation2 + $0x52] sm:$0xff] }
 0x2ee   : > { %v2783_v33 = vsel %vm14003_vm11, %v2559_v34, 0.0  ;;  %2818 = vst.msk [vmem:[#allocation2 + $0x73] sm:$0xff] %vm2139_vm8, %v2782_v10  ;;  %v2882_v34 = vld [vmem:[#allocation2 + $0x21] sm:$0xff]  ;;  %v9290_v35 = vpack.i.bf16 %v2919_v36, %v3029_v17  ;;  %v2996_v17 = vld [vmem:[#allocation2 + $0x54] sm:$0xff] }
 0x2ef   : > { %2819 = vst.msk [vmem:[#allocation2 + $0x7b] sm:$0xff] %vm2139_vm8, %v2783_v33  ;;  %v11692_v47 = vpop.permute.xlu1 %2669  ;;  %v9295_v37 = vpack.i.bf16 %v2882_v34, %v2992_v31  ;;  %v3030_v10 = vld [vmem:[#allocation2 + $0x45] sm:$0xff]  ;;  %v490_v33 = vld [vmem:[%s13987_s1 + $0xb0] sm:$0xff] }
 0x2f0   : > { %v11694_v2 = vpop.permute.xlu0 %2672  ;;  %vm14004_vm9 = vcmp.eq.s32.totalorder %v11692_v47, 1  ;;  %vm526_vm12 = vcmp.gt.f32.partialorder %v490_v33, 0.5  ;;  %v4145_v31 = vld [vmem:[%s13990_s4 + $0x108] sm:$0xff] }
 0x2f1   : > { %vm14006_vm11 = vcmp.eq.s32.totalorder %v11694_v2, 1  ;;  %9261 = vrot.lane.b32.xlu1 %v9260_v20, %s10157_s18  ;;  %9266 = vrot.lane.b32.xlu0 %v9265_v24, %s10152_s15  ;;  %v2784_v55 = vsel %vm14004_vm9, %v2560_v62, 0.0  ;;  %v9305_v20 = vpack.i.bf16 %v2920_v57, %v3030_v10  ;;  %v9310_v24 = vpack.i.bf16 %v2883_v59, %v2993_v13  ;;  %v491_v62 = vld [vmem:[%s13987_s1 + $0xb8] sm:$0xff]  ;;  %v2922_v33 = vld [vmem:[#allocation2 + $0x42] sm:$0xff] }
 0x2f2   : > { %v2785_v16 = vsel %vm14006_vm11, %v2561_v60, 0.0  ;;  %2820 = vst.msk [vmem:[#allocation2 + $0x83] sm:$0xff] %vm2139_vm8, %v2784_v55  ;;  %v2995_v60 = vld [vmem:[#allocation2 + $0x4c] sm:$0xff]  ;;  %v2612_v55 = vsel %vm526_vm12, 1, %v10153_v27  ;;  %vm529_vm11 = vcmp.gt.f32.partialorder %v493_v19, 0.5 }
 0x2f3   : > { %2821 = vst.msk [vmem:[#allocation2 + $0x8b] sm:$0xff] %vm2139_vm8, %v2785_v16  ;;  %v11708_v58 = vpop.permute.xlu1 %2675  ;;  %v11749_v16 = vpack.c.bf16 %v4145_v31, %v4144_v56  ;;  %v2615_v13 = vsel %vm529_vm11, 1, %v10153_v27  ;;  %v3033_v56 = vld [vmem:[#allocation2 + $0x5d] sm:$0xff] }
 0x2f4   : > { %vm14005_vm9 = vcmp.eq.s32.totalorder %v11708_v58, 1 }
 0x2f5   : > { %9271 = vrot.lane.b32.xlu1 %v9270_v5, %s10156_s26  ;;  %2684 = vperm.xlu0 %9233, %v2609_v43   ;;  %v2786_v11 = vsel %vm14005_vm9, %v2562_v6, 0.0  ;;  %vm525_vm9 = vcmp.gt.f32.partialorder %v489_v18, 0.5  ;;  %v9315_v43 = vpack.i.bf16 %v2919_v36, %v2995_v60  ;;  %v3031_v5 = vld [vmem:[#allocation2 + $0x4d] sm:$0xff]  ;;  %v492_v6 = vld [vmem:[%s13987_s1 + $0xc0] sm:$0xff] }
 0x2f6   : > { %2822 = vst.msk [vmem:[#allocation2 + $0x93] sm:$0xff] %vm2139_vm8, %v2786_v11  ;;  %v2611_v44 = vsel %vm525_vm9, 1, %v10153_v27  ;;  %vm527_vm9 = vcmp.gt.f32.partialorder %v491_v62, 0.5  ;;  %8895 = vmatprep.subr.bf16.mxu0 %v11749_v16  ;;  %v9320_v45 = vpack.i.bf16 %v2921_v21, %v3031_v5  ;;  %vm528_vm12 = vcmp.gt.f32.partialorder %v492_v6, 0.5  ;;  %v496_v18 = vld [vmem:[%s13987_s1 + $0xe0] sm:$0xff]  ;;  %v2884_v36 = vld [vmem:[#allocation2 + $0x31] sm:$0xff] }
 0x2f7   : > { %v2613_v11 = vsel %vm527_vm9, 1, %v10153_v27  ;;  %v9325_v34 = vpack.i.bf16 %v2884_v36, %v2994_v40  ;;  %v497_v40 = vld [vmem:[%s13987_s1 + $0xe8] sm:$0xff]  ;;  %v498_v6 = vld [vmem:[%s13987_s1 + $0xf0] sm:$0xff] }
 0x2f8   : > { %v2998_v5 = vld [vmem:[#allocation2 + $0x64] sm:$0xff]  ;;  %vm534_vm11 = vcmp.gt.f32.partialorder %v498_v6, 0.5 }
 0x2f9   : > { %9276 = vrot.lane.b32.xlu1 %v9275_v8, %s10157_s18  ;;  %9281 = vrot.lane.b32.xlu0 %v9280_v12, %s10152_s15  ;;  %v495_v8 = vld [vmem:[%s13987_s1 + $0xd8] sm:$0xff]  ;;  %v2614_v12 = vsel %vm528_vm12, 1, %v10153_v27  ;;  %vm532_vm12 = vcmp.gt.f32.partialorder %v496_v18, 0.5  ;;  %v3035_v18 = vld [vmem:[#allocation2 + $0x6d] sm:$0xff] }
 0x2fa   : > { %vm531_vm9 = vcmp.gt.f32.partialorder %v495_v8, 0.5  ;;  %v2618_v10 = vsel %vm532_vm12, 1, %v10153_v27 }
 0x2fc   : > { %v11725_v32 = vpop.f32.mrb[24].mxu0 }
 0x2fd   : > { %9286 = vrot.lane.b32.xlu1 %v9285_v14, %s10156_s26  ;;  %2687 = vperm.xlu0 %9233, %v2610_v9   ;;  %v11728_v30 = vpop.f32.mrb[25].mxu0  ;;  %v2616_v9 = vsel %vm530_vm13, 1, %v10153_v27  ;;  %v2617_v14 = vsel %vm531_vm9, 1, %v10153_v27  ;;  %vm533_vm13 = vcmp.gt.f32.partialorder %v497_v40, 0.5  ;;  %v3036_v40 = vld [vmem:[#allocation2 + $0x75] sm:$0xff] }
 0x2fe   : > { %v2619_v31 = vsel %vm533_vm13, 1, %v10153_v27 }
 0x301   : > { %9291 = vrot.lane.b32.xlu1 %v9290_v35, %s10157_s18  ;;  %9296 = vrot.lane.b32.xlu0 %v9295_v37, %s10152_s15  ;;  %v9330_v35 = vpack.i.bf16 %v2920_v57, %v2996_v17  ;;  %v3032_v37 = vld [vmem:[#allocation2 + $0x55] sm:$0xff] }
 0x302   : > { %v9335_v59 = vpack.i.bf16 %v2922_v33, %v3032_v37  ;;  %v2885_v57 = vld [vmem:[#allocation2 + $0x39] sm:$0xff] }
 0x303   : > { %v3000_v37 = vld [vmem:[#allocation2 + $0x74] sm:$0xff] }
 0x305   : > { %9301 = vrot.lane.b32.xlu1 %v9300_v53, %s10156_s26  ;;  %2690 = vperm.xlu0 %9233, %v2611_v44  }
 0x309   : > { %9306 = vrot.lane.b32.xlu1 %v9305_v20, %s10157_s18  ;;  %9311 = vrot.lane.b32.xlu0 %v9310_v24, %s10152_s15  ;;  %v2997_v20 = vld [vmem:[#allocation2 + $0x5c] sm:$0xff]  ;;  %v9340_v24 = vpack.i.bf16 %v2885_v57, %v2995_v60 }
 0x30a   : > { %v9345_v62 = vpack.i.bf16 %v2921_v21, %v2997_v20  ;;  %v2886_v60 = vld [vmem:[#allocation2 + $0x41] sm:$0xff]  ;;  %v9360_v21 = vpack.i.bf16 %v2922_v33, %v2998_v5  ;;  %v2888_v33 = vld [vmem:[#allocation2 + $0x51] sm:$0xff] }
 0x30b   : > { %v9355_v19 = vpack.i.bf16 %v2886_v60, %v2996_v17 }
 0x30d   : > { %9316 = vrot.lane.b32.xlu1 %v9315_v43, %s10156_s26  ;;  %2693 = vperm.xlu0 %9233, %v2612_v55   ;;  %v2923_v55 = vld [vmem:[#allocation2 + $0x4a] sm:$0xff] }
 0x30e   : > { %v9350_v43 = vpack.i.bf16 %v2923_v55, %v3033_v56  ;;  %v2926_v56 = vld [vmem:[#allocation2 + $0x62] sm:$0xff] }
 0x311   : > { %9321 = vrot.lane.b32.xlu1 %v9320_v45, %s10157_s18  ;;  %2696 = vperm.xlu0 %9233, %v2613_v11   ;;  %v3034_v11 = vld [vmem:[#allocation2 + $0x65] sm:$0xff]  ;;  %v2620_v45 = vsel %vm534_vm11, 1, %v10153_v27 }
 0x312   : > { %v9365_v8 = vpack.i.bf16 %v2924_v52, %v3034_v11  ;;  %v2927_v11 = vld [vmem:[#allocation2 + $0x6a] sm:$0xff] }
 0x315   : > { %2699 = vperm.xlu1 %9234, %v2614_v12   ;;  %2702 = vperm.xlu0 %9233, %v2615_v13   ;;  %v2999_v12 = vld [vmem:[#allocation2 + $0x6c] sm:$0xff]  ;;  %v499_v13 = vld [vmem:[%s13987_s1 + $0xf8] sm:$0xff] }
 0x316   : > { %v9375_v17 = vpack.i.bf16 %v2923_v55, %v2999_v12  ;;  %vm535_vm9 = vcmp.gt.f32.partialorder %v499_v13, 0.5  ;;  %v3001_v55 = vld [vmem:[#allocation2 + $0x7c] sm:$0xff] }
 0x317   : > { %v2621_v36 = vsel %vm535_vm9, 1, %v10153_v27 }
 0x319   : > { %2705 = vperm.xlu1 %9234, %v2616_v9   ;;  %2708 = vperm.xlu0 %9233, %v2617_v14   ;;  %v2887_v9 = vld [vmem:[#allocation2 + $0x49] sm:$0xff] }
 0x31a   : > { %v9370_v14 = vpack.i.bf16 %v2887_v9, %v2997_v20  ;;  %v9390_v20 = vpack.i.bf16 %v2924_v52, %v3000_v37  ;;  %v3002_v52 = vld [vmem:[#allocation2 + $0x84] sm:$0xff] }
 0x31b   : > { %v9420_v9 = vpack.i.bf16 %v2926_v56, %v3002_v52 }
 0x31c   : > { %v11774_v44 = vpop.f32.mrb[26].mxu0 }
 0x31d   : > { %9326 = vrot.lane.b32.xlu1 %v9325_v34, %s10152_s15  ;;  %9331 = vrot.lane.b32.xlu0 %v9330_v35, %s10156_s26  ;;  %v11778_v53 = vpop.f32.mrb[27].mxu0  ;;  %v2925_v34 = vld [vmem:[#allocation2 + $0x5a] sm:$0xff] }
 0x31e   : > { %v9380_v35 = vpack.i.bf16 %v2925_v34, %v3035_v18  ;;  %v9405_v60 = vpack.i.bf16 %v2925_v34, %v3001_v55  ;;  %v11827_v18 = vld [vmem:[#allocation2 + $0x72] sm:$0xff] }
 0x31f   : > { %v11830_v34 = vld [vmem:[#allocation2 + $0x8c] sm:$0xff] }
 0x321   : > { %2711 = vperm.xlu1 %9234, %v2618_v10   ;;  %9336 = vrot.lane.b32.xlu0 %v9335_v59, %s10157_s18  ;;  %v500_v10 = vld [vmem:[%s13987_s1 + $0x100] sm:$0xff]  ;;  %v9385_v59 = vpack.i.bf16 %v2888_v33, %v2998_v5  ;;  %v9435_v33 = vpack.i.bf16 %v2927_v11, %v11830_v34 }
 0x322   : > { %vm536_vm12 = vcmp.gt.f32.partialorder %v500_v10, 0.5  ;;  %v2889_v5 = vld [vmem:[#allocation2 + $0x59] sm:$0xff] }
 0x323   : > { %v9400_v6 = vpack.i.bf16 %v2889_v5, %v2999_v12  ;;  %v2890_v12 = vld [vmem:[#allocation2 + $0x61] sm:$0xff] }
 0x324   : > { %v9415_v13 = vpack.i.bf16 %v2890_v12, %v3000_v37  ;;  %v2891_v37 = vld [vmem:[#allocation2 + $0x69] sm:$0xff] }
 0x325   : > { %9341 = vrot.lane.b32.xlu1 %v9340_v24, %s10152_s15  ;;  %9346 = vrot.lane.b32.xlu0 %v9345_v62, %s10156_s26  ;;  %v2622_v62 = vsel %vm536_vm12, 1, %v10153_v27  ;;  %v9430_v10 = vpack.i.bf16 %v2891_v37, %v3001_v55  ;;  %vm3967_vm12 = vcmask 785408  }
 0x329   : > { %2714 = vperm.xlu1 %9234, %v2619_v31   ;;  %9351 = vrot.lane.b32.xlu0 %v9350_v43, %s10157_s18  ;;  %v9395_v31 = vpack.i.bf16 %v2926_v56, %v3036_v40  ;;  %v501_v43 = vld [vmem:[%s13987_s1 + $0x108] sm:$0xff] }
 0x32a   : > { %vm537_vm13 = vcmp.gt.f32.partialorder %v501_v43, 0.5 }
 0x32d   : > { %9356 = vrot.lane.b32.xlu1 %v9355_v19, %s10152_s15  ;;  %9361 = vrot.lane.b32.xlu0 %v9360_v21, %s10156_s26  ;;  %v3037_v19 = vld [vmem:[#allocation2 + $0x7d] sm:$0xff]  ;;  %v2623_v21 = vsel %vm537_vm13, 1, %v10153_v27  ;;  %vm2588_vm13 = vcmask 258048  }
 0x32e   : > { %2589 = vst.msk [vmem:[#allocation2 + $0x143] sm:$0x1f] %vm2588_vm13, %v14026_v3 }
 0x331   : > { %2717 = vperm.xlu1 %9234, %v2620_v45   ;;  %9366 = vrot.lane.b32.xlu0 %v9365_v8, %s10157_s18  ;;  %v9410_v45 = vpack.i.bf16 %v2927_v11, %v3037_v19  ;;  %v502_v8 = vld [vmem:[%s13987_s1 + $0x110] sm:$0xff] }
 0x332   : > { %vm538_vm11 = vcmp.gt.f32.partialorder %v502_v8, 0.5  ;;  %v2892_v19 = vld [vmem:[#allocation2 + $0x71] sm:$0xff] }
 0x333   : > { %v9445_v11 = vpack.i.bf16 %v2892_v19, %v3002_v52  ;;  %v4147_v8 = vld [vmem:[%s13990_s4 + $0x118] sm:$0xff] }
 0x335   : > { %9371 = vrot.lane.b32.xlu1 %v9370_v14, %s10152_s15  ;;  %9376 = vrot.lane.b32.xlu0 %v9375_v17, %s10156_s26  ;;  %v3038_v14 = vld [vmem:[#allocation2 + $0x85] sm:$0xff]  ;;  %v2624_v17 = vsel %vm538_vm11, 1, %v10153_v27 }
 0x339   : > { %2720 = vperm.xlu1 %9234, %v2621_v36   ;;  %9381 = vrot.lane.b32.xlu0 %v9380_v35, %s10157_s18  ;;  %v9425_v36 = vpack.i.bf16 %v11827_v18, %v3038_v14  ;;  %v503_v35 = vld [vmem:[%s13987_s1 + $0x118] sm:$0xff] }
 0x33a   : > { %vm539_vm9 = vcmp.gt.f32.partialorder %v503_v35, 0.5 }
 0x33b   : > { %v2625_v40 = vsel %vm539_vm9, 1, %v10153_v27  ;;  %v4146_v27 = vld [vmem:[%s13990_s4 + $0x110] sm:$0xff] }
 0x33c   : > { %v11806_v57 = vpop.f32.mrb[28].mxu0 }
 0x33d   : > { %9386 = vrot.lane.b32.xlu1 %v9385_v59, %s10152_s15  ;;  %9391 = vrot.lane.b32.xlu0 %v9390_v20, %s10156_s26  ;;  %v11810_v24 = vpop.f32.mrb[29].mxu0  ;;  %v3039_v59 = vld [vmem:[#allocation2 + $0x8d] sm:$0xff] }
 0x341   : > { %2723 = vperm.xlu1 %9234, %v2622_v62   ;;  %9396 = vrot.lane.b32.xlu0 %v9395_v31, %s10157_s18  ;;  %v11840_v62 = vld [vmem:[#allocation2 + $0x7a] sm:$0xff] }
 0x342   : > { %v9440_v31 = vpack.i.bf16 %v11840_v62, %v3039_v59 }
 0x345   : > { %9401 = vrot.lane.b32.xlu1 %v9400_v6, %s10152_s15  ;;  %9406 = vrot.lane.b32.xlu0 %v9405_v60, %s10156_s26  ;;  %v2842_v6 = vld [vmem:[#allocation2] sm:$0xff] }
 0x349   : > { %2726 = vperm.xlu1 %9234, %v2623_v21   ;;  %9411 = vrot.lane.b32.xlu0 %v9410_v45, %s10157_s18  ;;  %v2952_v45 = vld [vmem:[#allocation2 + $0x13] sm:$0xff] }
 0x34d   : > { %9416 = vrot.lane.b32.xlu1 %v9415_v13, %s10152_s15  ;;  %9421 = vrot.lane.b32.xlu0 %v9420_v9, %s10156_s26 }
 0x351   : > { %2729 = vperm.xlu1 %9234, %v2624_v17   ;;  %9426 = vrot.lane.b32.xlu0 %v9425_v36, %s10157_s18 }
 0x353   : > { %v9237_v20 = vpop.permute.xlu0 %9236 }
 0x354   : > { %v9239_v43 = vunpack.i.h.bf16 %v9237_v20  ;;  %v9238_v5 = vunpack.i.l.bf16 %v9237_v20  ;;  %v2453_v20 = vadd.f32 %v11326_v41, %v11498_v51  ;;  %v2458_v41 = vadd.f32 %v11498_v51, %v11353_v29 }
 0x355   : > { %9431 = vrot.lane.b32.xlu1 %v9430_v10, %s10152_s15  ;;  %9436 = vrot.lane.b32.xlu0 %v9435_v33, %s10156_s26  ;;  %v8898_v33 = vpack.c.bf16 %v4147_v8, %v4146_v27 }
 0x356   : > { %v3894_v12 = vsel %vm2139_vm8, %v2842_v6, %v9239_v43  ;;  %v4004_v14 = vsel %vm2139_vm8, %v2952_v45, %v9238_v5 }
 0x357   : > { %v9242_v56 = vpop.permute.xlu1 %9241 }
 0x358   : > { %v9244_v55 = vunpack.i.h.bf16 %v9242_v56  ;;  %v9243_v60 = vunpack.i.l.bf16 %v9242_v56  ;;  %v2563_v56 = vmax.f32 %v2453_v20, 0.0 }
 0x359   : > { %2732 = vperm.xlu1 %9234, %v2625_v40   ;;  %9441 = vrot.lane.b32.xlu0 %v9440_v31, %s10157_s18 }
 0x35a   : > { %v4040_v52 = vsel %vm3930_vm5, %v4004_v14, %v9243_v60  ;;  %v3931_v36 = vsel %vm3930_vm5, %v3894_v12, %v9244_v55  ;;  %v2843_v55 = vld [vmem:[#allocation2 + $0x8] sm:$0xff] }
 0x35b   : > { %v9247_v21 = vpop.permute.xlu1 %9246 }
 0x35c   : > { %v9249_v13 = vunpack.i.h.bf16 %v9247_v21  ;;  %v9248_v9 = vunpack.i.l.bf16 %v9247_v21  ;;  %v11852_v17 = vpop.f32.mrb[30].mxu0 }
 0x35d   : > { %9446 = vrot.lane.b32.xlu1 %v9445_v11, %s10152_s15  ;;  %v11857_v35 = vpop.f32.mrb[31].mxu0  ;;  %v2953_v11 = vld [vmem:[#allocation2 + $0x1b] sm:$0xff] }
 0x35e   : > { %v4076_v37 = vsel %vm3967_vm12, %v4040_v52, %v9248_v9  ;;  %v3968_v10 = vsel %vm3967_vm12, %v3931_v36, %v9249_v13  ;;  %v2564_v9 = vmax.f32 %v2458_v41, 0.0  ;;  %v2463_v41 = vadd.f32 %v11350_v25, %v11498_v51 }
 0x35f   : > { %v9257_v59 = vpop.permute.xlu1 %9256  ;;  %4327 = vmatprep.mubr.f32.mxu0 %v4076_v37 }
 0x360   : > { %4328 = vmatmul.mubr.f32.vlgmr.msra.gmra.mrb[36].mxu0 %v3968_v10  ;;  %v9259_v19 = vunpack.i.h.bf16 %v9257_v59  ;;  %v9258_v21 = vunpack.i.l.bf16 %v9257_v59 }
 0x361   : > { %8897 = vmatpush3.bf16.msra.mxu0 %v11749_v16 }
 0x362   : > { %8899 = vmatprep.subr.bf16.mxu0 %v8898_v33 }
 0x363   : > { %v9262_v40 = vpop.permute.xlu1 %9261 }
 0x364   : > { %v11865_v31 = vpop.permute.xlu0 %2678  ;;  %v9264_v45 = vunpack.i.h.bf16 %v9262_v40  ;;  %v9263_v27 = vunpack.i.l.bf16 %v9262_v40 }
 0x365   : > { %vm2751_vm11 = vcmp.eq.s32.totalorder %v11865_v31, 1  ;;  %8901 = vmatpush3.bf16.msra.mxu0 %v8898_v33  ;;  %v11884_v33 = vld [vmem:[#allocation2 + $0x82] sm:$0xff] }
 0x366   : > { %v2787_v43 = vsel %vm2751_vm11, %v2563_v56, 0.0 }
 0x367   : > { %2823 = vst.msk [vmem:[#allocation2 + $0x9b] sm:$0xff] %vm2139_vm8, %v2787_v43  ;;  %v9272_v5 = vpop.permute.xlu1 %9271 }
 0x368   : > { %v9252_v6 = vpop.permute.xlu0 %9251 }
 0x369   : > { %v9254_v16 = vunpack.i.h.bf16 %v9252_v6  ;;  %v9253_v60 = vunpack.i.l.bf16 %v9252_v6 }
 0x36b   : > { %v9277_v8 = vpop.permute.xlu1 %9276  ;;  %v4005_v12 = vsel %vm2139_vm8, %v2953_v11, %v9253_v60  ;;  %v3895_v13 = vsel %vm2139_vm8, %v2843_v55, %v9254_v16  ;;  %v2893_v60 = vld [vmem:[#allocation2 + $0x79] sm:$0xff] }
 0x36c   : > { %v11875_v14 = vpop.permute.xlu0 %2681  ;;  %v4041_v52 = vsel %vm3930_vm5, %v4005_v12, %v9258_v21  ;;  %v3932_v29 = vsel %vm3930_vm5, %v3895_v13, %v9259_v19  ;;  %v9274_v19 = vunpack.i.h.bf16 %v9272_v5  ;;  %v9273_v21 = vunpack.i.l.bf16 %v9272_v5 }
 0x36d   : > { %vm14008_vm9 = vcmp.eq.s32.totalorder %v11875_v14, 1  ;;  %v4077_v36 = vsel %vm3967_vm12, %v4041_v52, %v9263_v27  ;;  %v3969_v37 = vsel %vm3967_vm12, %v3932_v29, %v9264_v45  ;;  %v9460_v11 = vpack.i.bf16 %v2893_v60, %v11830_v34  ;;  %v2954_v45 = vld [vmem:[#allocation2 + $0x23] sm:$0xff]  ;;  %v2844_v27 = vld [vmem:[#allocation2 + $0x10] sm:$0xff] }
 0x36e   : > { %v2788_v10 = vsel %vm14008_vm9, %v2564_v9, 0.0  ;;  %4332 = vmatprep.mubr.f32.mxu0 %v4077_v36  ;;  %v3040_v59 = vld [vmem:[#allocation2 + $0x95] sm:$0xff]  ;;  %v9279_v12 = vunpack.i.h.bf16 %v9277_v8  ;;  %v9278_v13 = vunpack.i.l.bf16 %v9277_v8  ;;  %v2565_v52 = vmax.f32 %v2463_v41, 0.0 }
 0x36f   : > { %v11886_v20 = vld [vmem:[#allocation2 + $0x94] sm:$0xff]  ;;  %2824 = vst.msk [vmem:[#allocation2 + $0xa3] sm:$0xff] %vm2139_vm8, %v2788_v10  ;;  %v9287_v40 = vpop.permute.xlu1 %9286  ;;  %4333 = vmatmul.mubr.f32.gmra.mrb[38].mxu0 %v3969_v37  ;;  %v9455_v56 = vpack.i.bf16 %v11884_v33, %v3040_v59  ;;  %v11911_v59 = vld [vmem:[#allocation2 + $0x8a] sm:$0xff] }
 0x370   : > { %v9450_v43 = vpack.i.bf16 %v11827_v18, %v11886_v20  ;;  %v9267_v6 = vpop.permute.xlu0 %9266 }
 0x371   : > { %v9269_v55 = vunpack.i.h.bf16 %v9267_v6  ;;  %v9268_v16 = vunpack.i.l.bf16 %v9267_v6  ;;  %9456 = vrot.lane.b32.xlu1 %v9455_v56, %s10157_s18 }
 0x372   : > { %9451 = vrot.lane.b32.xlu0 %v9450_v43, %s10156_s26 }
 0x373   : > { %v9292_v18 = vpop.permute.xlu1 %9291  ;;  %v4006_v9 = vsel %vm2139_vm8, %v2954_v45, %v9268_v16  ;;  %v3896_v25 = vsel %vm2139_vm8, %v2844_v27, %v9269_v55  ;;  %v2468_v55 = vadd.f32 %v11498_v51, %v11447_v63  ;;  %v9288_v45 = vunpack.i.l.bf16 %v9287_v40 }
 0x374   : > { %v11899_v29 = vpop.permute.xlu0 %2684  ;;  %v4042_v36 = vsel %vm3930_vm5, %v4006_v9, %v9273_v21  ;;  %v3933_v37 = vsel %vm3930_vm5, %v3896_v25, %v9274_v19  ;;  %v2894_v21 = vld [vmem:[#allocation2 + $0x81] sm:$0xff]  ;;  %v9293_v9 = vunpack.i.l.bf16 %v9292_v18 }
 0x375   : > { %vm14013_vm13 = vcmp.eq.s32.totalorder %v11899_v29, 1  ;;  %v4078_v34 = vsel %vm3967_vm12, %v4042_v36, %v9278_v13  ;;  %v3970_v5 = vsel %vm3967_vm12, %v3933_v37, %v9279_v12  ;;  %v9475_v27 = vpack.i.bf16 %v2894_v21, %v11886_v20  ;;  %v2955_v12 = vld [vmem:[#allocation2 + $0x2b] sm:$0xff]  ;;  %v2845_v13 = vld [vmem:[#allocation2 + $0x18] sm:$0xff] }
 0x376   : > { %9461 = vrot.lane.b32.xlu0 %v9460_v11, %s10152_s15  ;;  %v2789_v8 = vsel %vm14013_vm13, %v2565_v52, 0.0  ;;  %4337 = vmatprep.mubr.f32.mxu0 %v4078_v34  ;;  %v11909_v10 = vld [vmem:[#allocation2 + $0x9c] sm:$0xff]  ;;  %v9289_v11 = vunpack.i.h.bf16 %v9287_v40  ;;  %v2566_v51 = vmax.f32 %v2468_v55, 0.0 }
 0x377   : > { %v3041_v56 = vld [vmem:[#allocation2 + $0x9d] sm:$0xff]  ;;  %2825 = vst.msk [vmem:[#allocation2 + $0xab] sm:$0xff] %vm2139_vm8, %v2789_v8  ;;  %v11914_v43 = vpop.permute.xlu1 %9301  ;;  %4338 = vmatmul.mubr.f32.gmra.mrb[40].mxu0 %v3970_v5  ;;  %v9465_v41 = vpack.i.bf16 %v11840_v62, %v11909_v10  ;;  %v9294_v62 = vunpack.i.h.bf16 %v9292_v18 }
 0x378   : > { %v9470_v6 = vpack.i.bf16 %v11911_v59, %v3041_v56  ;;  %v9282_v16 = vpop.permute.xlu0 %9281  ;;  %v11940_v56 = vld [vmem:[#allocation2 + $0x92] sm:$0xff] }
 0x379   : > { %v9284_v60 = vunpack.i.h.bf16 %v9282_v16  ;;  %v9283_v19 = vunpack.i.l.bf16 %v9282_v16  ;;  %9466 = vrot.lane.b32.xlu1 %v9465_v41, %s10156_s26 }
 0x37a   : > { %9471 = vrot.lane.b32.xlu0 %v9470_v6, %s10157_s18 }
 0x37b   : > { %v4007_v25 = vsel %vm2139_vm8, %v2955_v12, %v9283_v19  ;;  %v3897_v63 = vsel %vm2139_vm8, %v2845_v13, %v9284_v60  ;;  %v9307_v52 = vpop.permute.xlu1 %9306  ;;  %v11951_v60 = vld [vmem:[%s13989_s3] ss:$0 sm:$0xff]  ;;  %v9304_v12 = vunpack.i.h.bf16 %v11914_v43 }
 0x37c   : > { %v11926_v36 = vpop.permute.xlu0 %2687  ;;  %v4043_v37 = vsel %vm3930_vm5, %v4007_v25, %v9288_v45  ;;  %v3934_v34 = vsel %vm3930_vm5, %v3897_v63, %v9289_v11  ;;  %v11930_v5 = vpop.f32.mrb[32].mxu0  ;;  %v2473_v19 = vadd.f32 %v11951_v60, %v11442_v50  ;;  %v2846_v25 = vld [vmem:[#allocation2 + $0x20] sm:$0xff]  ;;  %v9309_v63 = vunpack.i.h.bf16 %v9307_v52 }
 0x37d   : > { %vm14009_vm9 = vcmp.eq.s32.totalorder %v11926_v36, 1  ;;  %9476 = vrot.lane.b32.xlu1 %v9475_v27, %s10152_s15  ;;  %v4079_v20 = vsel %vm3967_vm12, %v4043_v37, %v9293_v9  ;;  %v3971_v40 = vsel %vm3967_vm12, %v3934_v34, %v9294_v62  ;;  %v11938_v8 = vpop.f32.mrb[33].mxu0  ;;  %v2895_v27 = vld [vmem:[#allocation2 + $0x89] sm:$0xff]  ;;  %v2956_v9 = vld [vmem:[#allocation2 + $0x33] sm:$0xff] }
 0x37e   : > { %v2790_v18 = vsel %vm14009_vm9, %v2566_v51, 0.0  ;;  %4342 = vmatprep.mubr.f32.mxu0 %v4079_v20  ;;  %v3042_v41 = vld [vmem:[#allocation2 + $0xa5] sm:$0xff]  ;;  %v9490_v62 = vpack.i.bf16 %v2895_v27, %v11909_v10  ;;  %v9308_v51 = vunpack.i.l.bf16 %v9307_v52  ;;  %v2567_v34 = vmax.f32 %v2473_v19, 0.0 }
 0x37f   : > { %v11942_v6 = vld [vmem:[#allocation2 + $0xa4] sm:$0xff]  ;;  %2826 = vst.msk [vmem:[#allocation2 + $0xb3] sm:$0xff] %vm2139_vm8, %v2790_v18  ;;  %4343 = vmatmul.mubr.f32.gmra.mrb[42].mxu0 %v3971_v40  ;;  %v9485_v55 = vpack.i.bf16 %v11940_v56, %v3042_v41  ;;  %v9317_v13 = vpop.permute.xlu1 %9316  ;;  %v11972_v41 = vld [vmem:[#allocation2 + $0x9a] sm:$0xff] }
 0x380   : > { %v9480_v16 = vpack.i.bf16 %v11884_v33, %v11942_v6  ;;  %v9297_v21 = vpop.permute.xlu0 %9296  ;;  %v9303_v33 = vunpack.i.l.bf16 %v11914_v43 }
 0x381   : > { %v9299_v11 = vunpack.i.h.bf16 %v9297_v21  ;;  %v9298_v45 = vunpack.i.l.bf16 %v9297_v21  ;;  %9486 = vrot.lane.b32.xlu1 %v9485_v55, %s10157_s18 }
 0x382   : > { %9481 = vrot.lane.b32.xlu0 %v9480_v16, %s10156_s26 }
 0x383   : > { %v4008_v50 = vsel %vm2139_vm8, %v2956_v9, %v9298_v45  ;;  %v3898_v37 = vsel %vm2139_vm8, %v2846_v25, %v9299_v11  ;;  %v2478_v11 = vadd.f32 %v11951_v60, %v11596_v38  ;;  %v9322_v45 = vpop.permute.xlu1 %9321  ;;  %v9319_v9 = vunpack.i.h.bf16 %v9317_v13 }
 0x384   : > { %v11962_v20 = vpop.permute.xlu0 %2690  ;;  %v4044_v40 = vsel %vm3930_vm5, %v4008_v50, %v9303_v33  ;;  %v3935_v18 = vsel %vm3930_vm5, %v3898_v37, %v9304_v12  ;;  %v9318_v25 = vunpack.i.l.bf16 %v9317_v13  ;;  %v2847_v50 = vld [vmem:[#allocation2 + $0x28] sm:$0xff]  ;;  %v9324_v37 = vunpack.i.h.bf16 %v9322_v45 }
 0x385   : > { %vm14010_vm9 = vcmp.eq.s32.totalorder %v11962_v20, 1  ;;  %v4080_v10 = vsel %vm3967_vm12, %v4044_v40, %v9308_v51  ;;  %v3972_v43 = vsel %vm3967_vm12, %v3935_v18, %v9309_v63  ;;  %v2957_v51 = vld [vmem:[#allocation2 + $0x3b] sm:$0xff]  ;;  %v2483_v40 = vadd.f32 %v11951_v60, %v11589_v39 }
 0x386   : > { %9491 = vrot.lane.b32.xlu0 %v9490_v62, %s10152_s15  ;;  %v2791_v52 = vsel %vm14010_vm9, %v2567_v34, 0.0  ;;  %4347 = vmatprep.mubr.f32.mxu0 %v4080_v10  ;;  %v3043_v55 = vld [vmem:[#allocation2 + $0xad] sm:$0xff]  ;;  %v2568_v18 = vmax.f32 %v2478_v11, 0.0  ;;  %v11999_v39 = vld [vmem:[#allocation2 + $0xa2] sm:$0xff] }
 0x387   : > { %v11974_v16 = vld [vmem:[#allocation2 + $0xac] sm:$0xff]  ;;  %2827 = vst.msk [vmem:[#allocation2 + $0xbb] sm:$0xff] %vm2139_vm8, %v2791_v52  ;;  %4348 = vmatmul.mubr.f32.gmra.mrb[44].mxu0 %v3972_v43  ;;  %v9500_v19 = vpack.i.bf16 %v11972_v41, %v3043_v55 }
 0x388   : > { %v9495_v21 = vpack.i.bf16 %v11911_v59, %v11974_v16  ;;  %v9312_v27 = vpop.permute.xlu0 %9311  ;;  %v2896_v62 = vld [vmem:[#allocation2 + $0x91] sm:$0xff]  ;;  %v9323_v59 = vunpack.i.l.bf16 %v9322_v45  ;;  %v3062_v11 = vld [vmem:[#allocation2 + $0x26] sm:$0xff] }
 0x389   : > { %v9314_v12 = vunpack.i.h.bf16 %v9312_v27  ;;  %v9313_v33 = vunpack.i.l.bf16 %v9312_v27  ;;  %v9505_v63 = vpack.i.bf16 %v2896_v62, %v11942_v6  ;;  %v2488_v62 = vadd.f32 %v11951_v60, %v11728_v30 }
 0x38a   : > { %9501 = vrot.lane.b32.xlu0 %v9500_v19, %s10157_s18  ;;  %9496 = vrot.lane.b32.xlu1 %v9495_v21, %s10156_s26 }
 0x38b   : > { %v4009_v34 = vsel %vm2139_vm8, %v2957_v51, %v9313_v33  ;;  %v3899_v38 = vsel %vm2139_vm8, %v2847_v50, %v9314_v12  ;;  %v2569_v12 = vmax.f32 %v2483_v40, 0.0  ;;  %v2493_v33 = vadd.f32 %v11951_v60, %v11725_v32  ;;  %v3064_v32 = vld [vmem:[#allocation2 + $0x36] sm:$0xff] }
 0x38c   : > { %v11989_v10 = vpop.permute.xlu0 %2693  ;;  %v4045_v43 = vsel %vm3930_vm5, %v4009_v34, %v9318_v25  ;;  %v3936_v13 = vsel %vm3930_vm5, %v3899_v38, %v9319_v9  ;;  %v3063_v25 = vld [vmem:[#allocation2 + $0x2e] sm:$0xff]  ;;  %v2570_v50 = vmax.f32 %v2488_v62, 0.0  ;;  %v2898_v62 = vld [vmem:[#allocation2 + $0xa1] sm:$0xff] }
 0x38d   : > { %vm14011_vm9 = vcmp.eq.s32.totalorder %v11989_v10, 1  ;;  %v4081_v6 = vsel %vm3967_vm12, %v4045_v43, %v9323_v59  ;;  %v3973_v52 = vsel %vm3967_vm12, %v3936_v13, %v9324_v37  ;;  %v2571_v51 = vmax.f32 %v2493_v33, 0.0  ;;  %v3066_v13 = vld [vmem:[#allocation2 + $0x46] sm:$0xff]  ;;  %v3067_v33 = vld [vmem:[#allocation2 + $0x4e] sm:$0xff] }
 0x38e   : > { %9506 = vrot.lane.b32.xlu1 %v9505_v63, %s10152_s15  ;;  %v2792_v55 = vsel %vm14011_vm9, %v2568_v18, 0.0  ;;  %4352 = vmatprep.mubr.f32.mxu0 %v4081_v6  ;;  %v3044_v19 = vld [vmem:[#allocation2 + $0xb5] sm:$0xff]  ;;  %v2503_v37 = vadd.f32 %v11951_v60, %v11774_v44  ;;  %v2498_v59 = vadd.f32 %v11951_v60, %v11778_v53  ;;  %v12038_v53 = vld [vmem:[#allocation2 + $0xaa] sm:$0xff] }
 0x38f   : > { %v12001_v21 = vld [vmem:[#allocation2 + $0xb4] sm:$0xff]  ;;  %2828 = vst.msk [vmem:[#allocation2 + $0xc3] sm:$0xff] %vm2139_vm8, %v2792_v55  ;;  %4353 = vmatmul.mubr.f32.gmra.mrb[46].mxu0 %v3973_v52  ;;  %v9515_v45 = vpack.i.bf16 %v11999_v39, %v3044_v19 }
 0x390   : > { %v9510_v27 = vpack.i.bf16 %v11940_v56, %v12001_v21  ;;  %v12011_v9 = vpop.permute.xlu0 %2696  ;;  %8496 = vmatprep.mubr.msk.f32.mxu0 %vm2139_vm8, %v3062_v11  ;;  %v2897_v63 = vld [vmem:[#allocation2 + $0x99] sm:$0xff]  ;;  %v2573_v55 = vmax.f32 %v2503_v37, 0.0  ;;  %v2572_v19 = vmax.f32 %v2498_v59, 0.0 }
 0x391   : > { %vm14012_vm9 = vcmp.eq.s32.totalorder %v12011_v9, 1  ;;  %v9520_v30 = vpack.i.bf16 %v2897_v63, %v11974_v16  ;;  %v3065_v16 = vld [vmem:[#allocation2 + $0x3e] sm:$0xff]  ;;  %v3068_v63 = vld [vmem:[#allocation2 + $0x56] sm:$0xff] }
 0x392   : > { %9516 = vrot.lane.b32.xlu1 %v9515_v45, %s10157_s18  ;;  %9511 = vrot.lane.b32.xlu0 %v9510_v27, %s10156_s26  ;;  %v2793_v56 = vsel %vm14012_vm9, %v2569_v12, 0.0 }
 0x393   : > { %2829 = vst.msk [vmem:[#allocation2 + $0xcb] sm:$0xff] %vm2139_vm8, %v2793_v56  ;;  %8497 = vmatmul.mubr.msk.f32.vlgmr.msra.gmra.mrb[48].mxu0 %vm2139_vm8, %v3063_v25 }
 0x394   : > { %v12026_v34 = vpop.permute.xlu1 %2699  ;;  %v12028_v38 = vpop.permute.xlu0 %2702  ;;  %8499 = vmatprep.mubr.msk.f32.mxu0 %vm2139_vm8, %v3064_v32  ;;  %v9535_v32 = vpack.i.bf16 %v2898_v62, %v12001_v21 }
 0x395   : > { %vm14014_vm9 = vcmp.eq.s32.totalorder %v12026_v34, 1  ;;  %vm14015_vm13 = vcmp.eq.s32.totalorder %v12028_v38, 1 }
 0x396   : > { %9521 = vrot.lane.b32.xlu0 %v9520_v30, %s10152_s15  ;;  %v2794_v40 = vsel %vm14014_vm9, %v2570_v50, 0.0  ;;  %v2795_v44 = vsel %vm14015_vm13, %v2571_v51, 0.0  ;;  %v3045_v18 = vld [vmem:[#allocation2 + $0xbd] sm:$0xff]  ;;  %v2508_v51 = vadd.f32 %v11951_v60, %v11810_v24  ;;  %v3070_v24 = vld [vmem:[#allocation2 + $0x66] sm:$0xff] }
 0x397   : > { %v3009_v43 = vld [vmem:[#allocation2 + $0xbc] sm:$0xff]  ;;  %2830 = vst.msk [vmem:[#allocation2 + $0xd3] sm:$0xff] %vm2139_vm8, %v2794_v40  ;;  %2831 = vst.msk [vmem:[#allocation2 + $0xdb] sm:$0xff] %vm2139_vm8, %v2795_v44  ;;  %8500 = vmatmul.mubr.msk.f32.gmra.mrb[50].mxu0 %vm2139_vm8, %v3065_v16  ;;  %v9530_v6 = vpack.i.bf16 %v12038_v53, %v3045_v18  ;;  %v2848_v18 = vld [vmem:[#allocation2 + $0x30] sm:$0xff] }
 0x398   : > { %v9525_v52 = vpack.i.bf16 %v11972_v41, %v3009_v43  ;;  %v12045_v11 = vpop.permute.xlu1 %2705  ;;  %v12047_v45 = vpop.permute.xlu0 %2708  ;;  %8502 = vmatprep.mubr.msk.f32.mxu0 %vm2139_vm8, %v3066_v13  ;;  %v2958_v44 = vld [vmem:[#allocation2 + $0x43] sm:$0xff] }
 0x399   : > { %vm14016_vm9 = vcmp.eq.s32.totalorder %v12045_v11, 1  ;;  %vm2761_vm13 = vcmp.eq.s32.totalorder %v12047_v45, 1  ;;  %v12058_v12 = vpop.f32.mrb[34].mxu0 }
 0x39a   : > { %9531 = vrot.lane.b32.xlu0 %v9530_v6, %s10157_s18  ;;  %9526 = vrot.lane.b32.xlu1 %v9525_v52, %s10156_s26  ;;  %v2796_v27 = vsel %vm14016_vm9, %v2572_v19, 0.0  ;;  %v2797_v41 = vsel %vm2761_vm13, %v2573_v55, 0.0  ;;  %v12060_v56 = vld [vmem:[#allocation2 + $0xc4] sm:$0xff]  ;;  %v12064_v25 = vpop.f32.mrb[35].mxu0 }
 0x39b   : > { %2832 = vst.msk [vmem:[#allocation2 + $0xe3] sm:$0xff] %vm2139_vm8, %v2796_v27  ;;  %2833 = vst.msk [vmem:[#allocation2 + $0xeb] sm:$0xff] %vm2139_vm8, %v2797_v41  ;;  %8503 = vmatmul.mubr.msk.f32.gmra.mrb[52].mxu0 %vm2139_vm8, %v3067_v33  ;;  %v9540_v30 = vpack.i.bf16 %v11999_v39, %v12060_v56  ;;  %v3046_v59 = vld [vmem:[#allocation2 + $0xc5] sm:$0xff]  ;;  %v12075_v39 = vld [vmem:[#allocation2 + $0xb2] sm:$0xff]  ;;  %v2574_v33 = vmax.f32 %v2508_v51, 0.0 }
 0x39c   : > { %v9327_v50 = vpop.permute.xlu1 %9326  ;;  %v9332_v37 = vpop.permute.xlu0 %9331  ;;  %8505 = vmatprep.mubr.msk.f32.mxu0 %vm2139_vm8, %v3068_v63  ;;  %v3069_v6 = vld [vmem:[#allocation2 + $0x5e] sm:$0xff]  ;;  %v2899_v52 = vld [vmem:[#allocation2 + $0xa9] sm:$0xff]  ;;  %v9545_v55 = vpack.i.bf16 %v12075_v39, %v3046_v59 }
 0x39d   : > { %v9329_v16 = vunpack.i.h.bf16 %v9327_v50  ;;  %v9328_v40 = vunpack.i.l.bf16 %v9327_v50  ;;  %v9334_v21 = vunpack.i.h.bf16 %v9332_v37  ;;  %v9333_v13 = vunpack.i.l.bf16 %v9332_v37  ;;  %v3071_v51 = vld [vmem:[#allocation2 + $0x6e] sm:$0xff] }
 0x39e   : > { %9536 = vrot.lane.b32.xlu1 %v9535_v32, %s10152_s15  ;;  %9541 = vrot.lane.b32.xlu0 %v9540_v30, %s10156_s26  ;;  %v9550_v19 = vpack.i.bf16 %v2899_v52, %v3009_v43  ;;  %v12084_v32 = vld [vmem:[#allocation2 + $0xcc] sm:$0xff] }
 0x39f   : > { %8506 = vmatmul.mubr.msk.f32.gmra.mrb[54].mxu0 %vm2139_vm8, %v3069_v6  ;;  %v4010_v27 = vsel %vm2139_vm8, %v2958_v44, %v9328_v40  ;;  %v3900_v41 = vsel %vm2139_vm8, %v2848_v18, %v9329_v16  ;;  %v3047_v30 = vld [vmem:[#allocation2 + $0xcd] sm:$0xff]  ;;  %v12092_v16 = vld [vmem:[#allocation2 + $0xba] sm:$0xff]  ;;  %v9555_v6 = vpack.i.bf16 %v12038_v53, %v12084_v32 }
 0x3a0   : > { %v12081_v62 = vpop.permute.xlu1 %2711  ;;  %v9337_v63 = vpop.permute.xlu0 %9336  ;;  %8508 = vmatprep.mubr.msk.f32.mxu0 %vm2139_vm8, %v3070_v24  ;;  %v4046_v59 = vsel %vm3930_vm5, %v4010_v27, %v9333_v13  ;;  %v3937_v40 = vsel %vm3930_vm5, %v3900_v41, %v9334_v21  ;;  %v3072_v18 = vld [vmem:[#allocation2 + $0x76] sm:$0xff]  ;;  %v9560_v52 = vpack.i.bf16 %v12092_v16, %v3047_v30  ;;  %v2513_v13 = vadd.f32 %v11951_v60, %v11806_v57  ;;  %v2959_v53 = vld [vmem:[#allocation2 + $0x4b] sm:$0xff]  ;;  %v3073_v30 = vld [vmem:[#allocation2 + $0x7e] sm:$0xff] }
 0x3a1   : > { %14035 = vst [vmem:[#allocation4_spill] sm:$0xff] %v12081_v62  ;;  %vm14017_vm9 = vcmp.eq.s32.totalorder %v12081_v62, 1  ;;  %v9339_v50 = vunpack.i.h.bf16 %v9337_v63  ;;  %v9338_v37 = vunpack.i.l.bf16 %v9337_v63  ;;  %v12105_v21 = vld [vmem:[#allocation2 + $0xd4] sm:$0xff] }
 0x3a2   : > { %9546 = vrot.lane.b32.xlu1 %v9545_v55, %s10157_s18  ;;  %9551 = vrot.lane.b32.xlu0 %v9550_v19, %s10152_s15  ;;  %v2798_v43 = vsel %vm14017_vm9, %v2574_v33, 0.0  ;;  %v2849_v57 = vld [vmem:[#allocation2 + $0x38] sm:$0xff] }
 0x3a3   : > { %2834 = vst.msk [vmem:[#allocation2 + $0xf3] sm:$0xff] %vm2139_vm8, %v2798_v43  ;;  %8509 = vmatmul.mubr.msk.f32.gmra.mrb[56].mxu0 %vm2139_vm8, %v3071_v51  ;;  %v4082_v44 = vsel %vm3967_vm12, %v4046_v59, %v9338_v37  ;;  %v3974_v24 = vsel %vm3967_vm12, %v3937_v40, %v9339_v50  ;;  %v2900_v50 = vld [vmem:[#allocation2 + $0xb1] sm:$0xff]  ;;  %v3074_v37 = vld [vmem:[#allocation2 + $0x86] sm:$0xff]  ;;  %v9570_v51 = vpack.i.bf16 %v12075_v39, %v12105_v21 }
 0x3a4   : > { %v9342_v55 = vpop.permute.xlu1 %9341  ;;  %v9347_v19 = vpop.permute.xlu0 %9346  ;;  %4357 = vmatprep.mubr.f32.mxu1 %v4082_v44  ;;  %8511 = vmatprep.mubr.msk.f32.mxu0 %vm2139_vm8, %v3072_v18  ;;  %v9565_v43 = vpack.i.bf16 %v2900_v50, %v12060_v56  ;;  %v2575_v44 = vmax.f32 %v2513_v13, 0.0  ;;  %v3075_v39 = vld [vmem:[#allocation2 + $0x8e] sm:$0xff] }
 0x3a5   : > { %v9344_v27 = vunpack.i.h.bf16 %v9342_v55  ;;  %v9343_v41 = vunpack.i.l.bf16 %v9342_v55  ;;  %v9349_v33 = vunpack.i.h.bf16 %v9347_v19  ;;  %v9348_v63 = vunpack.i.l.bf16 %v9347_v19  ;;  %4358 = vmatmul.mubr.f32.vlgmr.msra.gmra.mrb[0].mxu1 %v3974_v24  ;;  %v12124_v19 = vld [vmem:[#allocation2 + $0xc2] sm:$0xff] }
 0x3a6   : > { %9556 = vrot.lane.b32.xlu1 %v9555_v6, %s10156_s26  ;;  %9561 = vrot.lane.b32.xlu0 %v9560_v52, %s10157_s18  ;;  %v3048_v52 = vld [vmem:[#allocation2 + $0xd5] sm:$0xff] }
 0x3a7   : > { %8512 = vmatmul.mubr.msk.f32.gmra.mrb[58].mxu0 %vm2139_vm8, %v3073_v30  ;;  %v4011_v59 = vsel %vm2139_vm8, %v2959_v53, %v9343_v41  ;;  %v3901_v40 = vsel %vm2139_vm8, %v2849_v57, %v9344_v27  ;;  %v2901_v27 = vld [vmem:[#allocation2 + $0xb9] sm:$0xff]  ;;  %v9575_v50 = vpack.i.bf16 %v12124_v19, %v3048_v52 }
 0x3a8   : > { %v12115_v18 = vpop.permute.xlu1 %2714  ;;  %v9352_v6 = vpop.permute.xlu0 %9351  ;;  %8514 = vmatprep.mubr.msk.f32.mxu0 %vm2139_vm8, %v3074_v37  ;;  %v4047_v13 = vsel %vm3930_vm5, %v4011_v59, %v9348_v63  ;;  %v3938_v41 = vsel %vm3930_vm5, %v3901_v40, %v9349_v33  ;;  %v3076_v30 = vld [vmem:[#allocation2 + $0x96] sm:$0xff]  ;;  %v9580_v57 = vpack.i.bf16 %v2901_v27, %v12084_v32  ;;  %v2518_v63 = vadd.f32 %v11951_v60, %v11857_v35  ;;  %v12140_v35 = vld [vmem:[#allocation2 + $0xca] sm:$0xff] }
 0x3a9   : > { %vm14018_vm9 = vcmp.eq.s32.totalorder %v12115_v18, 1  ;;  %v9354_v24 = vunpack.i.h.bf16 %v9352_v6  ;;  %v9353_v55 = vunpack.i.l.bf16 %v9352_v6  ;;  %v12136_v33 = vld [vmem:[#allocation2 + $0xdc] sm:$0xff]  ;;  %v2960_v32 = vld [vmem:[#allocation2 + $0x53] sm:$0xff] }
 0x3aa   : > { %9566 = vrot.lane.b32.xlu1 %v9565_v43, %s10152_s15  ;;  %9571 = vrot.lane.b32.xlu0 %v9570_v51, %s10156_s26  ;;  %v2799_v56 = vsel %vm14018_vm9, %v2575_v44, 0.0  ;;  %v3049_v59 = vld [vmem:[#allocation2 + $0xdd] sm:$0xff] }
 0x3ab   : > { %2835 = vst.msk [vmem:[#allocation2 + $0xfb] sm:$0xff] %vm2139_vm8, %v2799_v56  ;;  %8515 = vmatmul.mubr.msk.f32.gmra.mrb[60].mxu0 %vm2139_vm8, %v3075_v39  ;;  %v4083_v53 = vsel %vm3967_vm12, %v4047_v13, %v9353_v55  ;;  %v3975_v37 = vsel %vm3967_vm12, %v3938_v41, %v9354_v24  ;;  %v3077_v24 = vld [vmem:[#allocation2 + $0x9e] sm:$0xff]  ;;  %v3078_v56 = vld [vmem:[#allocation2 + $0xa6] sm:$0xff]  ;;  %v9585_v39 = vpack.i.bf16 %v12092_v16, %v12136_v33 }
 0x3ac   : > { %v9357_v43 = vpop.permute.xlu1 %9356  ;;  %v9362_v51 = vpop.permute.xlu0 %9361  ;;  %4362 = vmatprep.mubr.f32.mxu1 %v4083_v53  ;;  %8517 = vmatprep.mubr.msk.f32.mxu0 %vm2139_vm8, %v3076_v30  ;;  %v2850_v55 = vld [vmem:[#allocation2 + $0x40] sm:$0xff]  ;;  %v9590_v13 = vpack.i.bf16 %v12140_v35, %v3049_v59  ;;  %v2576_v53 = vmax.f32 %v2518_v63, 0.0 }
 0x3ad   : > { %v9359_v40 = vunpack.i.h.bf16 %v9357_v43  ;;  %v9358_v44 = vunpack.i.l.bf16 %v9357_v43  ;;  %v9364_v6 = vunpack.i.h.bf16 %v9362_v51  ;;  %v9363_v52 = vunpack.i.l.bf16 %v9362_v51  ;;  %4363 = vmatmul.mubr.f32.gmra.mrb[2].mxu1 %v3975_v37  ;;  %v3079_v51 = vld [vmem:[#allocation2 + $0xae] sm:$0xff]  ;;  %v2902_v59 = vld [vmem:[#allocation2 + $0xc1] sm:$0xff] }
 0x3ae   : > { %9576 = vrot.lane.b32.xlu1 %v9575_v50, %s10157_s18  ;;  %9581 = vrot.lane.b32.xlu0 %v9580_v57, %s10152_s15  ;;  %v12151_v57 = vld [vmem:[#allocation2 + $0xe4] sm:$0xff] }
 0x3af   : > { %8518 = vmatmul.mubr.msk.f32.gmra.mrb[62].mxu0 %vm2139_vm8, %v3077_v24  ;;  %v4012_v27 = vsel %vm2139_vm8, %v2960_v32, %v9358_v44  ;;  %v3902_v41 = vsel %vm2139_vm8, %v2850_v55, %v9359_v40  ;;  %v3080_v32 = vld [vmem:[#allocation2 + $0xb6] sm:$0xff]  ;;  %v9595_v24 = vpack.i.bf16 %v2902_v59, %v12105_v21  ;;  %v9600_v55 = vpack.i.bf16 %v12124_v19, %v12151_v57 }
 0x3b0   : > { %v12148_v30 = vpop.permute.xlu1 %2717  ;;  %v9367_v50 = vpop.permute.xlu0 %9366  ;;  %8520 = vmatprep.mubr.msk.f32.mxu0 %vm2139_vm8, %v3078_v56  ;;  %v4048_v63 = vsel %vm3930_vm5, %v4012_v27, %v9363_v52  ;;  %v3939_v40 = vsel %vm3930_vm5, %v3902_v41, %v9364_v6  ;;  %v2523_v52 = vadd.f32 %v11951_v60, %v11852_v17  ;;  %v3050_v6 = vld [vmem:[#allocation2 + $0xe5] sm:$0xff]  ;;  %v2961_v21 = vld [vmem:[#allocation2 + $0x5b] sm:$0xff] }
 0x3b1   : > { %14036 = vst [vmem:[#allocation5_spill] sm:$0xff] %v12148_v30  ;;  %vm14019_vm9 = vcmp.eq.s32.totalorder %v12148_v30, 1  ;;  %v9369_v37 = vunpack.i.h.bf16 %v9367_v50  ;;  %v9368_v43 = vunpack.i.l.bf16 %v9367_v50  ;;  %v2903_v17 = vld [vmem:[#allocation2 + $0xc9] sm:$0xff] }
 0x3b2   : > { %9586 = vrot.lane.b32.xlu1 %v9585_v39, %s10156_s26  ;;  %9591 = vrot.lane.b32.xlu0 %v9590_v13, %s10157_s18  ;;  %v2800_v16 = vsel %vm14019_vm9, %v2576_v53, 0.0  ;;  %v2851_v53 = vld [vmem:[#allocation2 + $0x48] sm:$0xff] }
 0x3b3   : > { %2836 = vst.msk [vmem:[#allocation2 + $0x103] sm:$0xff] %vm2139_vm8, %v2800_v16  ;;  %8521 = vmatmul.mubr.msk.f32.gmra.mrb[64].mxu0 %vm2139_vm8, %v3079_v51  ;;  %v4084_v44 = vsel %vm3967_vm12, %v4048_v63, %v9368_v43  ;;  %v3976_v56 = vsel %vm3967_vm12, %v3939_v40, %v9369_v37  ;;  %v3081_v37 = vld [vmem:[#allocation2 + $0xbe] sm:$0xff]  ;;  %v12172_v43 = vld [vmem:[#allocation2 + $0xd2] sm:$0xff]  ;;  %v3082_v16 = vld [vmem:[#allocation2 + $0xc6] sm:$0xff]  ;;  %v9610_v63 = vpack.i.bf16 %v2903_v17, %v12136_v33 }
 0x3b4   : > { %v9372_v39 = vpop.permute.xlu1 %9371  ;;  %v9377_v13 = vpop.permute.xlu0 %9376  ;;  %4367 = vmatprep.mubr.f32.mxu1 %v4084_v44  ;;  %8523 = vmatprep.mubr.msk.f32.mxu0 %vm2139_vm8, %v3080_v32  ;;  %v9605_v51 = vpack.i.bf16 %v12172_v43, %v3050_v6  ;;  %v2577_v44 = vmax.f32 %v2523_v52, 0.0  ;;  %v3083_v52 = vld [vmem:[#allocation2 + $0xce] sm:$0xff] }
 0x3b5   : > { %v9374_v27 = vunpack.i.h.bf16 %v9372_v39  ;;  %v9373_v41 = vunpack.i.l.bf16 %v9372_v39  ;;  %v9379_v19 = vunpack.i.h.bf16 %v9377_v13  ;;  %v9378_v50 = vunpack.i.l.bf16 %v9377_v13  ;;  %4368 = vmatmul.mubr.f32.gmra.mrb[4].mxu1 %v3976_v56  ;;  %v3051_v56 = vld [vmem:[#allocation2 + $0xed] sm:$0xff] }
 0x3b6   : > { %9596 = vrot.lane.b32.xlu1 %v9595_v24, %s10152_s15  ;;  %9601 = vrot.lane.b32.xlu0 %v9600_v55, %s10156_s26  ;;  %v12182_v55 = vld [vmem:[#allocation2 + $0xec] sm:$0xff] }
 0x3b7   : > { %8524 = vmatmul.mubr.msk.f32.gmra.mrb[66].mxu0 %vm2139_vm8, %v3081_v37  ;;  %v4013_v59 = vsel %vm2139_vm8, %v2961_v21, %v9373_v41  ;;  %v3903_v40 = vsel %vm2139_vm8, %v2851_v53, %v9374_v27  ;;  %v12190_v27 = vld [vmem:[#allocation2 + $0xda] sm:$0xff]  ;;  %v9615_v37 = vpack.i.bf16 %v12140_v35, %v12182_v55  ;;  %v2962_v35 = vld [vmem:[#allocation2 + $0x63] sm:$0xff] }
 0x3b8   : > { %v12179_v32 = vpop.permute.xlu1 %2720  ;;  %v9382_v24 = vpop.permute.xlu0 %9381  ;;  %8526 = vmatprep.mubr.msk.f32.mxu0 %vm2139_vm8, %v3082_v16  ;;  %v4049_v6 = vsel %vm3930_vm5, %v4013_v59, %v9378_v50  ;;  %v3940_v41 = vsel %vm3930_vm5, %v3903_v40, %v9379_v19  ;;  %v3084_v53 = vld [vmem:[#allocation2 + $0xd6] sm:$0xff]  ;;  %v9620_v17 = vpack.i.bf16 %v12190_v27, %v3051_v56  ;;  %v2528_v50 = vadd.f32 %v11951_v60, %v11938_v8  ;;  %v3085_v56 = vld [vmem:[#allocation2 + $0xde] sm:$0xff] }
 0x3b9   : > { %14037 = vst [vmem:[#allocation6_spill] sm:$0xff] %v12179_v32  ;;  %vm14020_vm9 = vcmp.eq.s32.totalorder %v12179_v32, 1  ;;  %v9384_v39 = vunpack.i.h.bf16 %v9382_v24  ;;  %v9383_v13 = vunpack.i.l.bf16 %v9382_v24  ;;  %v12203_v19 = vld [vmem:[#allocation2 + $0xf4] sm:$0xff] }
 0x3ba   : > { %9606 = vrot.lane.b32.xlu1 %v9605_v51, %s10157_s18  ;;  %9611 = vrot.lane.b32.xlu0 %v9610_v63, %s10152_s15  ;;  %v2801_v33 = vsel %vm14020_vm9, %v2577_v44, 0.0  ;;  %v2852_v8 = vld [vmem:[#allocation2 + $0x50] sm:$0xff] }
 0x3bb   : > { %2837 = vst.msk [vmem:[#allocation2 + $0x10b] sm:$0xff] %vm2139_vm8, %v2801_v33  ;;  %8527 = vmatmul.mubr.msk.f32.gmra.mrb[68].mxu0 %vm2139_vm8, %v3083_v52  ;;  %v4085_v21 = vsel %vm3967_vm12, %v4049_v6, %v9383_v13  ;;  %v3977_v16 = vsel %vm3967_vm12, %v3940_v41, %v9384_v39  ;;  %v2904_v39 = vld [vmem:[#allocation2 + $0xd1] sm:$0xff]  ;;  %v3086_v13 = vld [vmem:[#allocation2 + $0xe6] sm:$0xff]  ;;  %v9630_v52 = vpack.i.bf16 %v12172_v43, %v12203_v19 }
 0x3bc   : > { %v9387_v51 = vpop.permute.xlu1 %9386  ;;  %v9392_v63 = vpop.permute.xlu0 %9391  ;;  %4372 = vmatprep.mubr.f32.mxu1 %v4085_v21  ;;  %8529 = vmatprep.mubr.msk.f32.mxu0 %vm2139_vm8, %v3084_v53  ;;  %v9625_v33 = vpack.i.bf16 %v2904_v39, %v12151_v57  ;;  %v2578_v21 = vmax.f32 %v2528_v50, 0.0  ;;  %v3087_v43 = vld [vmem:[#allocation2 + $0xee] sm:$0xff] }
 0x3bd   : > { %v9389_v59 = vunpack.i.h.bf16 %v9387_v51  ;;  %v9388_v40 = vunpack.i.l.bf16 %v9387_v51  ;;  %v9394_v44 = vunpack.i.h.bf16 %v9392_v63  ;;  %v9393_v24 = vunpack.i.l.bf16 %v9392_v63  ;;  %4373 = vmatmul.mubr.f32.gmra.mrb[6].mxu1 %v3977_v16  ;;  %v12222_v63 = vld [vmem:[#allocation2 + $0xe2] sm:$0xff] }
 0x3be   : > { %9616 = vrot.lane.b32.xlu1 %v9615_v37, %s10156_s26  ;;  %9621 = vrot.lane.b32.xlu0 %v9620_v17, %s10157_s18  ;;  %v3052_v17 = vld [vmem:[#allocation2 + $0xf5] sm:$0xff] }
 0x3bf   : > { %8530 = vmatmul.mubr.msk.f32.gmra.mrb[70].mxu0 %vm2139_vm8, %v3085_v56  ;;  %v4014_v6 = vsel %vm2139_vm8, %v2962_v35, %v9388_v40  ;;  %v3904_v41 = vsel %vm2139_vm8, %v2852_v8, %v9389_v59  ;;  %v2905_v59 = vld [vmem:[#allocation2 + $0xd9] sm:$0xff]  ;;  %v9635_v39 = vpack.i.bf16 %v12222_v63, %v3052_v17 }
 0x3c0   : > { %v12213_v53 = vpop.permute.xlu1 %2723  ;;  %v9397_v37 = vpop.permute.xlu0 %9396  ;;  %8532 = vmatprep.mubr.msk.f32.mxu0 %vm2139_vm8, %v3086_v13  ;;  %v4050_v50 = vsel %vm3930_vm5, %v4014_v6, %v9393_v24  ;;  %v3941_v40 = vsel %vm3930_vm5, %v3904_v41, %v9394_v44  ;;  %v3088_v56 = vld [vmem:[#allocation2 + $0xf6] sm:$0xff]  ;;  %v9640_v8 = vpack.i.bf16 %v2905_v59, %v12182_v55  ;;  %v2533_v24 = vadd.f32 %v11951_v60, %v11930_v5  ;;  %v2963_v55 = vld [vmem:[#allocation2 + $0x6b] sm:$0xff] }
 0x3c1   : > { %14038 = vst [vmem:[#allocation7_spill] sm:$0xff] %v12213_v53  ;;  %vm14021_vm9 = vcmp.eq.s32.totalorder %v12213_v53, 1  ;;  %v9399_v16 = vunpack.i.h.bf16 %v9397_v37  ;;  %v9398_v51 = vunpack.i.l.bf16 %v9397_v37  ;;  %v12234_v44 = vld [vmem:[#allocation2 + $0xfc] sm:$0xff]  ;;  %v12238_v5 = vld [vmem:[#allocation2 + $0xea] sm:$0xff] }
 0x3c2   : > { %9626 = vrot.lane.b32.xlu1 %v9625_v33, %s10152_s15  ;;  %9631 = vrot.lane.b32.xlu0 %v9630_v52, %s10156_s26  ;;  %v2802_v57 = vsel %vm14021_vm9, %v2578_v21, 0.0  ;;  %v3053_v6 = vld [vmem:[#allocation2 + $0xfd] sm:$0xff] }
 0x3c3   : > { %2838 = vst.msk [vmem:[#allocation2 + $0x113] sm:$0xff] %vm2139_vm8, %v2802_v57  ;;  %8533 = vmatmul.mubr.msk.f32.gmra.mrb[72].mxu0 %vm2139_vm8, %v3087_v43  ;;  %v4086_v35 = vsel %vm3967_vm12, %v4050_v50, %v9398_v51  ;;  %v3978_v13 = vsel %vm3967_vm12, %v3941_v40, %v9399_v16  ;;  %v3089_v16 = vld [vmem:[#allocation2 + $0xfe] sm:$0xff]  ;;  %v3090_v57 = vld [vmem:[#allocation2 + $0x106] sm:$0xff]  ;;  %v9645_v43 = vpack.i.bf16 %v12190_v27, %v12234_v44 }
 0x3c4   : > { %v9402_v33 = vpop.permute.xlu1 %9401  ;;  %v9407_v52 = vpop.permute.xlu0 %9406  ;;  %4377 = vmatprep.mubr.f32.mxu1 %v4086_v35  ;;  %8535 = vmatprep.mubr.msk.f32.mxu0 %vm2139_vm8, %v3088_v56  ;;  %v2853_v51 = vld [vmem:[#allocation2 + $0x58] sm:$0xff]  ;;  %v9650_v50 = vpack.i.bf16 %v12238_v5, %v3053_v6  ;;  %v2579_v35 = vmax.f32 %v2533_v24, 0.0  ;;  %v2906_v6 = vld [vmem:[#allocation2 + $0xe1] sm:$0xff] }
 0x3c5   : > { %v9404_v41 = vunpack.i.h.bf16 %v9402_v33  ;;  %v9403_v21 = vunpack.i.l.bf16 %v9402_v33  ;;  %v9409_v37 = vunpack.i.h.bf16 %v9407_v52  ;;  %v9408_v17 = vunpack.i.l.bf16 %v9407_v52  ;;  %4378 = vmatmul.mubr.f32.gmra.mrb[8].mxu1 %v3978_v13 }
 0x3c6   : > { %9636 = vrot.lane.b32.xlu1 %v9635_v39, %s10157_s18  ;;  %9641 = vrot.lane.b32.xlu0 %v9640_v8, %s10152_s15  ;;  %v12249_v8 = vld [vmem:[#allocation2 + $0x104] sm:$0xff] }
 0x3c7   : > { %8536 = vmatmul.mubr.msk.f32.gmra.mrb[74].mxu0 %vm2139_vm8, %v3089_v16  ;;  %v4015_v59 = vsel %vm2139_vm8, %v2963_v55, %v9403_v21  ;;  %v3905_v40 = vsel %vm2139_vm8, %v2853_v51, %v9404_v41  ;;  %v9655_v55 = vpack.i.bf16 %v2906_v6, %v12203_v19  ;;  %v9660_v16 = vpack.i.bf16 %v12222_v63, %v12249_v8  ;;  %v2944_v63 = vld [vmem:[#allocation2 + $0xf2] sm:$0xff] }
 0x3c8   : > { %v12246_v56 = vpop.permute.xlu1 %2726  ;;  %v9412_v39 = vpop.permute.xlu0 %9411  ;;  %8538 = vmatprep.mubr.msk.f32.mxu0 %vm2139_vm8, %v3090_v57  ;;  %v4051_v24 = vsel %vm3930_vm5, %v4015_v59, %v9408_v17  ;;  %v3942_v41 = vsel %vm3930_vm5, %v3905_v40, %v9409_v37  ;;  %v2538_v57 = vadd.f32 %v11951_v60, %v12064_v25  ;;  %v3054_v37 = vld [vmem:[#allocation2 + $0x105] sm:$0xff]  ;;  %v2964_v40 = vld [vmem:[#allocation2 + $0x73] sm:$0xff] }
 0x3c9   : > { %14039 = vst [vmem:[#allocation8_spill] sm:$0xff] %v12246_v56  ;;  %vm14022_vm9 = vcmp.eq.s32.totalorder %v12246_v56, 1  ;;  %v9414_v13 = vunpack.i.h.bf16 %v9412_v39  ;;  %v9413_v33 = vunpack.i.l.bf16 %v9412_v39  ;;  %v2907_v39 = vld [vmem:[#allocation2 + $0xe9] sm:$0xff] }
 0x3ca   : > { %9646 = vrot.lane.b32.xlu1 %v9645_v43, %s10156_s26  ;;  %9651 = vrot.lane.b32.xlu0 %v9650_v50, %s10157_s18  ;;  %v2803_v27 = vsel %vm14022_vm9, %v2579_v35, 0.0  ;;  %v3091_v52 = vld [vmem:[#allocation2 + $0x10e] sm:$0xff]  ;;  %v9670_v25 = vpack.i.bf16 %v2907_v39, %v12234_v44 }
 0x3cb   : > { %2839 = vst.msk [vmem:[#allocation2 + $0x11b] sm:$0xff] %vm2139_vm8, %v2803_v27  ;;  %8539 = vmatmul.mubr.msk.f32.gmra.mrb[76].mxu0 %vm2139_vm8, %v3091_v52  ;;  %v4087_v21 = vsel %vm3967_vm12, %v4051_v24, %v9413_v33  ;;  %v3979_v51 = vsel %vm3967_vm12, %v3942_v41, %v9414_v13  ;;  %v2854_v13 = vld [vmem:[#allocation2 + $0x60] sm:$0xff]  ;;  %v9665_v33 = vpack.i.bf16 %v2944_v63, %v3054_v37  ;;  %v2580_v24 = vmax.f32 %v2538_v57, 0.0 }
 0x3cc   : > { %v9417_v17 = vpop.permute.xlu1 %9416  ;;  %v9422_v43 = vpop.permute.xlu0 %9421  ;;  %4382 = vmatprep.mubr.f32.mxu1 %v4087_v21  ;;  %v3019_v21 = vld [vmem:[#allocation2 + $0x10c] sm:$0xff]  ;;  %v2945_v57 = vld [vmem:[#allocation2 + $0xfa] sm:$0xff] }
 0x3cd   : > { %v9419_v50 = vunpack.i.h.bf16 %v9417_v17  ;;  %v9418_v59 = vunpack.i.l.bf16 %v9417_v17  ;;  %v9424_v19 = vunpack.i.h.bf16 %v9422_v43  ;;  %v9423_v35 = vunpack.i.l.bf16 %v9422_v43  ;;  %4383 = vmatmul.mubr.f32.gmra.mrb[10].mxu1 %v3979_v51 }
 0x3ce   : > { %9656 = vrot.lane.b32.xlu1 %v9655_v55, %s10152_s15  ;;  %9661 = vrot.lane.b32.xlu0 %v9660_v16, %s10156_s26  ;;  %v3055_v55 = vld [vmem:[#allocation2 + $0x10d] sm:$0xff] }
 0x3cf   : > { %v4016_v27 = vsel %vm2139_vm8, %v2964_v40, %v9418_v59  ;;  %v3906_v52 = vsel %vm2139_vm8, %v2854_v13, %v9419_v50  ;;  %v9675_v59 = vpack.i.bf16 %v12238_v5, %v3019_v21  ;;  %v9680_v40 = vpack.i.bf16 %v2945_v57, %v3055_v55  ;;  %v2908_v5 = vld [vmem:[#allocation2 + $0xf1] sm:$0xff]  ;;  %v2855_v55 = vld [vmem:[#allocation2 + $0x68] sm:$0xff] }
 0x3d0   : > { %v12272_v6 = vpop.permute.xlu1 %2729  ;;  %v9427_v41 = vpop.permute.xlu0 %9426  ;;  %v4052_v43 = vsel %vm3930_vm5, %v4016_v27, %v9423_v35  ;;  %v3943_v37 = vsel %vm3930_vm5, %v3906_v52, %v9424_v19  ;;  %v2543_v13 = vadd.f32 %v11951_v60, %v12058_v12 }
 0x3d1   : > { %14040 = vst [vmem:[#allocation9_spill] sm:$0xff] %v12272_v6  ;;  %vm14023_vm9 = vcmp.eq.s32.totalorder %v12272_v6, 1  ;;  %v9429_v16 = vunpack.i.h.bf16 %v9427_v41  ;;  %v9428_v51 = vunpack.i.l.bf16 %v9427_v41  ;;  %v2965_v41 = vld [vmem:[#allocation2 + $0x7b] sm:$0xff] }
 0x3d2   : > { %9666 = vrot.lane.b32.xlu1 %v9665_v33, %s10157_s18  ;;  %9671 = vrot.lane.b32.xlu0 %v9670_v25, %s10152_s15  ;;  %v2804_v44 = vsel %vm14023_vm9, %v2580_v24, 0.0  ;;  %v3092_v17 = vld [vmem:[#allocation2 + $0x116] sm:$0xff] }
 0x3d3   : > { %2840 = vst.msk [vmem:[#allocation2 + $0x123] sm:$0xff] %vm2139_vm8, %v2804_v44  ;;  %8541 = vmatprep.mubr.msk.f32.mxu0 %vm2139_vm8, %v3092_v17  ;;  %v4088_v50 = vsel %vm3967_vm12, %v4052_v43, %v9428_v51  ;;  %v3980_v39 = vsel %vm3967_vm12, %v3943_v37, %v9429_v16  ;;  %v12288_v35 = vld [vmem:[#allocation2 + $0x114] sm:$0xff]  ;;  %v9685_v16 = vpack.i.bf16 %v2908_v5, %v12249_v8  ;;  %v2581_v44 = vmax.f32 %v2543_v13, 0.0 }
 0x3d4   : > { %v9432_v33 = vpop.permute.xlu1 %9431  ;;  %v9437_v25 = vpop.permute.xlu0 %9436  ;;  %4387 = vmatprep.mubr.f32.mxu1 %v4088_v50  ;;  %v9690_v60 = vpack.i.bf16 %v2944_v63, %v12288_v35  ;;  %v3056_v37 = vld [vmem:[#allocation2 + $0x115] sm:$0xff] }
 0x3d5   : > { %v9434_v19 = vunpack.i.h.bf16 %v9432_v33  ;;  %v9433_v27 = vunpack.i.l.bf16 %v9432_v33  ;;  %v9439_v52 = vunpack.i.h.bf16 %v9437_v25  ;;  %v9438_v24 = vunpack.i.l.bf16 %v9437_v25  ;;  %4388 = vmatmul.mubr.f32.gmra.mrb[12].mxu1 %v3980_v39  ;;  %v2946_v39 = vld [vmem:[#allocation2 + $0x102] sm:$0xff]  ;;  %v2909_v13 = vld [vmem:[#allocation2 + $0xf9] sm:$0xff] }
 0x3d6   : > { %9676 = vrot.lane.b32.xlu1 %v9675_v59, %s10156_s26  ;;  %9681 = vrot.lane.b32.xlu0 %v9680_v40, %s10157_s18 }
 0x3d7   : > { %v4017_v12 = vsel %vm2139_vm8, %v2965_v41, %v9433_v27  ;;  %v3907_v51 = vsel %vm2139_vm8, %v2855_v55, %v9434_v19  ;;  %v9695_v19 = vpack.i.bf16 %v2946_v39, %v3056_v37  ;;  %v9700_v27 = vpack.i.bf16 %v2909_v13, %v3019_v21  ;;  %v2910_v21 = vld [vmem:[#allocation2 + $0x101] sm:$0xff] }
 0x3d8   : > { %v12296_v17 = vpop.permute.xlu1 %2732  ;;  %v9442_v43 = vpop.permute.xlu0 %9441  ;;  %v4053_v40 = vsel %vm3930_vm5, %v4017_v12, %v9438_v24  ;;  %v3944_v33 = vsel %vm3930_vm5, %v3907_v51, %v9439_v52  ;;  %v12311_v52 = vld [vmem:[#allocation2 + $0x10a] sm:$0xff] }
 0x3d9   : > { %14041 = vst [vmem:[#allocation10_spill] sm:$0xff] %v12296_v17  ;;  %vm2769_vm9 = vcmp.eq.s32.totalorder %v12296_v17, 1  ;;  %v9444_v50 = vunpack.i.h.bf16 %v9442_v43  ;;  %v9443_v59 = vunpack.i.l.bf16 %v9442_v43 }
 0x3da   : > { %9686 = vrot.lane.b32.xlu1 %v9685_v16, %s10152_s15  ;;  %9691 = vrot.lane.b32.xlu0 %v9690_v60, %s10156_s26  ;;  %v2805_v8 = vsel %vm2769_vm9, %v2581_v44, 0.0  ;;  %v3093_v63 = vld [vmem:[#allocation2 + $0x11e] sm:$0xff] }
 0x3db   : > { %2841 = vst.msk [vmem:[#allocation2 + $0x12b] sm:$0xff] %vm2139_vm8, %v2805_v8  ;;  %8542 = vmatmul.mubr.msk.f32.gmra.mrb[78].mxu0 %vm2139_vm8, %v3093_v63  ;;  %v4089_v25 = vsel %vm3967_vm12, %v4053_v40, %v9443_v59  ;;  %v3981_v5 = vsel %vm3967_vm12, %v3944_v33, %v9444_v50  ;;  %v3021_v41 = vld [vmem:[#allocation2 + $0x11c] sm:$0xff]  ;;  %v9715_v8 = vpack.i.bf16 %v2910_v21, %v12288_v35 }
 0x3dc   : > { %4392 = vmatprep.mubr.f32.mxu1 %v4089_v25  ;;  %v3057_v55 = vld [vmem:[#allocation2 + $0x11d] sm:$0xff]  ;;  %v9447_v24 = vpop.permute.xlu1 %9446  ;;  %v9705_v16 = vpack.i.bf16 %v2945_v57, %v3021_v41 }
 0x3dd   : > { %4393 = vmatmul.mubr.f32.gmra.mrb[14].mxu1 %v3981_v5  ;;  %v9710_v60 = vpack.i.bf16 %v12311_v52, %v3057_v55  ;;  %v9449_v12 = vunpack.i.h.bf16 %v9447_v24  ;;  %v9448_v51 = vunpack.i.l.bf16 %v9447_v24  ;;  %v2966_v25 = vld [vmem:[#allocation2 + $0x83] sm:$0xff] }
 0x3de   : > { %9696 = vrot.lane.b32.xlu1 %v9695_v19, %s10157_s18  ;;  %9701 = vrot.lane.b32.xlu0 %v9700_v27, %s10152_s15  ;;  %v2856_v27 = vld [vmem:[#allocation2 + $0x70] sm:$0xff]  ;;  %v4790_v24 = vld [vmem:[%s13992_s6 + $0x8] sm:$0xff] }
 0x3df   : > { %v4018_v5 = vsel %vm2139_vm8, %v2966_v25, %v9448_v51  ;;  %v2911_v55 = vld [vmem:[#allocation2 + $0x109] sm:$0xff]  ;;  %v3908_v35 = vsel %vm2139_vm8, %v2856_v27, %v9449_v12 }
 0x3e0   : > { %v9730_v21 = vpack.i.bf16 %v2911_v55, %v3021_v41  ;;  %v12340_v41 = vld [vmem:[#allocation2 + $0x11a] sm:$0xff] }
 0x3e2   : > { %9706 = vrot.lane.b32.xlu1 %v9705_v16, %s10156_s26  ;;  %9711 = vrot.lane.b32.xlu0 %v9710_v60, %s10157_s18  ;;  %v3094_v44 = vld [vmem:[#allocation2 + $0x126] sm:$0xff]  ;;  %v3095_v43 = vld [vmem:[#allocation2 + $0x12e] sm:$0xff] }
 0x3e3   : > { %v12316_v37 = vld [vmem:[#allocation2 + $0x124] sm:$0xff]  ;;  %v9457_v50 = vpop.permute.xlu1 %9456  ;;  %8544 = vmatprep.mubr.msk.f32.mxu0 %vm2139_vm8, %v3094_v44  ;;  %v2948_v60 = vld [vmem:[#allocation2 + $0x112] sm:$0xff] }
 0x3e4   : > { %v9452_v59 = vpop.permute.xlu0 %9451  ;;  %v9720_v57 = vpack.i.bf16 %v2946_v39, %v12316_v37  ;;  %v9459_v63 = vunpack.i.h.bf16 %v9457_v50  ;;  %v9458_v40 = vunpack.i.l.bf16 %v9457_v50  ;;  %8545 = vmatmul.mubr.msk.f32.gmra.mrb[80].mxu0 %vm2139_vm8, %v3095_v43  ;;  %v3058_v19 = vld [vmem:[#allocation2 + $0x125] sm:$0xff] }
 0x3e5   : > { %v9454_v13 = vunpack.i.h.bf16 %v9452_v59  ;;  %v9453_v33 = vunpack.i.l.bf16 %v9452_v59  ;;  %v4789_v39 = vld [vmem:[%s13992_s6] sm:$0xff]  ;;  %v9725_v50 = vpack.i.bf16 %v2948_v60, %v3058_v19 }
 0x3e6   : > { %9716 = vrot.lane.b32.xlu1 %v9715_v8, %s10152_s15  ;;  %9721 = vrot.lane.b32.xlu0 %v9720_v57, %s10156_s26  ;;  %v8902_v59 = vpack.c.bf16 %v4790_v24, %v4789_v39  ;;  %v12336_v8 = vld [vmem:[#allocation2 + $0x12c] sm:$0xff] }
 0x3e7   : > { %v4054_v16 = vsel %vm3930_vm5, %v4018_v5, %v9453_v33  ;;  %v3945_v44 = vsel %vm3930_vm5, %v3908_v35, %v9454_v13  ;;  %v3059_v57 = vld [vmem:[#allocation2 + $0x12d] sm:$0xff]  ;;  %v3096_v13 = vld [vmem:[#allocation2 + $0x136] sm:$0xff]  ;;  %v9735_v5 = vpack.i.bf16 %v12311_v52, %v12336_v8 }
 0x3e8   : > { %v9462_v43 = vpop.permute.xlu0 %9461  ;;  %v4090_v51 = vsel %vm3967_vm12, %v4054_v16, %v9458_v40  ;;  %v3982_v12 = vsel %vm3967_vm12, %v3945_v44, %v9459_v63  ;;  %8903 = vmatprep.subr.bf16.mxu0 %v8902_v59  ;;  %v3097_v40 = vld [vmem:[#allocation2 + $0x13e] sm:$0xff]  ;;  %v4791_v63 = vld [vmem:[%s13992_s6 + $0x10] sm:$0xff]  ;;  %v9740_v55 = vpack.i.bf16 %v12340_v41, %v3059_v57  ;;  %8547 = vmatprep.mubr.msk.f32.mxu0 %vm2139_vm8, %v3096_v13 }
 0x3e9   : > { %4397 = vmatprep.mubr.f32.mxu1 %v4090_v51  ;;  %v9464_v25 = vunpack.i.h.bf16 %v9462_v43  ;;  %v9463_v27 = vunpack.i.l.bf16 %v9462_v43  ;;  %8905 = vmatpush3.bf16.msra.mxu0 %v8902_v59  ;;  %v4792_v35 = vld [vmem:[%s13992_s6 + $0x18] sm:$0xff]  ;;  %v2967_v44 = vld [vmem:[#allocation2 + $0x8b] sm:$0xff] }
 0x3ea   : > { %9726 = vrot.lane.b32.xlu1 %v9725_v50, %s10157_s18  ;;  %9731 = vrot.lane.b32.xlu0 %v9730_v21, %s10152_s15  ;;  %v3024_v43 = vld [vmem:[#allocation2 + $0x134] sm:$0xff] }
 0x3eb   : > { %4398 = vmatmul.mubr.f32.gmra.mrb[16].mxu1 %v3982_v12  ;;  %v9467_v33 = vpop.permute.xlu1 %9466  ;;  %v2857_v51 = vld [vmem:[#allocation2 + $0x78] sm:$0xff]  ;;  %8548 = vmatmul.mubr.msk.f32.gmra.mrb[82].mxu0 %vm2139_vm8, %v3097_v40  ;;  %v4019_v52 = vsel %vm2139_vm8, %v2967_v44, %v9463_v27  ;;  %v8906_v12 = vpack.c.bf16 %v4792_v35, %v4791_v63  ;;  %v9750_v40 = vpack.i.bf16 %v2948_v60, %v3024_v43 }
 0x3ec   : > { %v9472_v19 = vpop.permute.xlu0 %9471  ;;  %v9469_v39 = vunpack.i.h.bf16 %v9467_v33  ;;  %v9468_v24 = vunpack.i.l.bf16 %v9467_v33  ;;  %v3909_v50 = vsel %vm2139_vm8, %v2857_v51, %v9464_v25  ;;  %v2912_v57 = vld [vmem:[#allocation2 + $0x111] sm:$0xff]  ;;  %v2913_v35 = vld [vmem:[#allocation2 + $0x119] sm:$0xff] }
 0x3ed   : > { %v9474_v16 = vunpack.i.h.bf16 %v9472_v19  ;;  %v9473_v21 = vunpack.i.l.bf16 %v9472_v19  ;;  %v9745_v48 = vpack.i.bf16 %v2912_v57, %v12316_v37  ;;  %8907 = vmatprep.subr.bf16.mxu0 %v8906_v12  ;;  %v3060_v27 = vld [vmem:[#allocation2 + $0x135] sm:$0xff]  ;;  %v9760_v37 = vpack.i.bf16 %v2913_v35, %v12336_v8 }
 0x3ee   : > { %9736 = vrot.lane.b32.xlu1 %v9735_v5, %s10156_s26  ;;  %9741 = vrot.lane.b32.xlu0 %v9740_v55, %s10157_s18  ;;  %v4055_v59 = vsel %vm3930_vm5, %v4019_v52, %v9468_v24  ;;  %v3946_v13 = vsel %vm3930_vm5, %v3909_v50, %v9469_v39  ;;  %v2950_v55 = vld [vmem:[#allocation2 + $0x122] sm:$0xff]  ;;  %v2968_v60 = vld [vmem:[#allocation2 + $0x93] sm:$0xff] }
 0x3ef   : > { %v9477_v33 = vpop.permute.xlu1 %9476  ;;  %v4091_v19 = vsel %vm3967_vm12, %v4055_v59, %v9473_v21  ;;  %v3983_v5 = vsel %vm3967_vm12, %v3946_v13, %v9474_v16  ;;  %8909 = vmatpush3.bf16.msra.mxu0 %v8906_v12  ;;  %v9755_v21 = vpack.i.bf16 %v2950_v55, %v3060_v27  ;;  %v2858_v16 = vld [vmem:[#allocation2 + $0x80] sm:$0xff]  ;;  %v2951_v12 = vld [vmem:[#allocation2 + $0x12a] sm:$0xff] }
 0x3f0   : > { %4402 = vmatprep.mubr.f32.mxu1 %v4091_v19  ;;  %v9479_v25 = vunpack.i.h.bf16 %v9477_v33  ;;  %v9478_v63 = vunpack.i.l.bf16 %v9477_v33  ;;  %v3025_v50 = vld [vmem:[#allocation2 + $0x13c] sm:$0xff] }
 0x3f1   : > { %4403 = vmatmul.mubr.f32.gmra.mrb[18].mxu1 %v3983_v5  ;;  %v3061_v59 = vld [vmem:[#allocation2 + $0x13d] sm:$0xff] }
 0x3f2   : > { %9746 = vrot.lane.b32.xlu1 %v9745_v48, %s10152_s15  ;;  %9751 = vrot.lane.b32.xlu0 %v9750_v40, %s10156_s26  ;;  %v4020_v48 = vsel %vm2139_vm8, %v2968_v60, %v9478_v63  ;;  %v3910_v57 = vsel %vm2139_vm8, %v2858_v16, %v9479_v25  ;;  %v9765_v40 = vpack.i.bf16 %v12340_v41, %v3025_v50  ;;  %v2969_v60 = vld [vmem:[#allocation2 + $0x9b] sm:$0xff]  ;;  %v2859_v16 = vld [vmem:[#allocation2 + $0x88] sm:$0xff] }
 0x3f3   : > { %v9487_v39 = vpop.permute.xlu1 %9486  ;;  %v9770_v5 = vpack.i.bf16 %v2951_v12, %v3061_v59 }
 0x3f4   : > { %v9482_v24 = vpop.permute.xlu0 %9481  ;;  %v9489_v44 = vunpack.i.h.bf16 %v9487_v39  ;;  %v9488_v43 = vunpack.i.l.bf16 %v9487_v39 }
 0x3f5   : > { %v9484_v51 = vunpack.i.h.bf16 %v9482_v24  ;;  %v9483_v52 = vunpack.i.l.bf16 %v9482_v24 }
 0x3f6   : > { %9756 = vrot.lane.b32.xlu1 %v9755_v21, %s10157_s18  ;;  %9761 = vrot.lane.b32.xlu0 %v9760_v37, %s10152_s15 }
 0x3f7   : > { %v4056_v13 = vsel %vm3930_vm5, %v4020_v48, %v9483_v52  ;;  %v3947_v8 = vsel %vm3930_vm5, %v3910_v57, %v9484_v51 }
 0x3f8   : > { %v9492_v33 = vpop.permute.xlu0 %9491  ;;  %v4092_v19 = vsel %vm3967_vm12, %v4056_v13, %v9488_v43  ;;  %v3984_v55 = vsel %vm3967_vm12, %v3947_v8, %v9489_v44 }
 0x3f9   : > { %4407 = vmatprep.mubr.f32.mxu1 %v4092_v19  ;;  %v9494_v27 = vunpack.i.h.bf16 %v9492_v33  ;;  %v9493_v35 = vunpack.i.l.bf16 %v9492_v33 }
 0x3fa   : > { %9766 = vrot.lane.b32.xlu1 %v9765_v40, %s10156_s26  ;;  %9771 = vrot.lane.b32.xlu0 %v9770_v5, %s10157_s18  ;;  %v2970_v5 = vld [vmem:[#allocation2 + $0xa3] sm:$0xff] }
 0x3fb   : > { %4408 = vmatmul.mubr.f32.gmra.mrb[20].mxu1 %v3984_v55  ;;  %v4021_v41 = vsel %vm2139_vm8, %v2969_v60, %v9493_v35  ;;  %v3911_v44 = vsel %vm2139_vm8, %v2859_v16, %v9494_v27  ;;  %v2860_v55 = vld [vmem:[#allocation2 + $0x90] sm:$0xff] }
 0x3fc   : > { %v9497_v25 = vpop.permute.xlu1 %9496  ;;  %v9502_v63 = vpop.permute.xlu0 %9501 }
 0x3fd   : > { %v9499_v39 = vunpack.i.h.bf16 %v9497_v25  ;;  %v9498_v24 = vunpack.i.l.bf16 %v9497_v25  ;;  %v9504_v21 = vunpack.i.h.bf16 %v9502_v63  ;;  %v9503_v37 = vunpack.i.l.bf16 %v9502_v63 }
 0x3ff   : > { %v4057_v43 = vsel %vm3930_vm5, %v4021_v41, %v9498_v24  ;;  %v3948_v51 = vsel %vm3930_vm5, %v3911_v44, %v9499_v39 }
 0x400   : > { %v9507_v52 = vpop.permute.xlu1 %9506  ;;  %v4093_v50 = vsel %vm3967_vm12, %v4057_v43, %v9503_v37  ;;  %v3985_v12 = vsel %vm3967_vm12, %v3948_v51, %v9504_v21 }
 0x401   : > { %4412 = vmatprep.mubr.f32.mxu1 %v4093_v50  ;;  %v9509_v59 = vunpack.i.h.bf16 %v9507_v52  ;;  %v9508_v48 = vunpack.i.l.bf16 %v9507_v52  ;;  %v2971_v50 = vld [vmem:[#allocation2 + $0xab] sm:$0xff] }
 0x402   : > { %4413 = vmatmul.mubr.f32.gmra.mrb[22].mxu1 %v3985_v12  ;;  %v2861_v12 = vld [vmem:[#allocation2 + $0x98] sm:$0xff] }
 0x403   : > { %v4022_v27 = vsel %vm2139_vm8, %v2970_v5, %v9508_v48  ;;  %v3912_v35 = vsel %vm2139_vm8, %v2860_v55, %v9509_v59 }
 0x404   : > { %v9517_v57 = vpop.permute.xlu1 %9516  ;;  %v9512_v13 = vpop.permute.xlu0 %9511 }
 0x405   : > { %v9519_v8 = vunpack.i.h.bf16 %v9517_v57  ;;  %v9518_v33 = vunpack.i.l.bf16 %v9517_v57  ;;  %v9514_v19 = vunpack.i.h.bf16 %v9512_v13  ;;  %v9513_v40 = vunpack.i.l.bf16 %v9512_v13 }
 0x407   : > { %v4058_v25 = vsel %vm3930_vm5, %v4022_v27, %v9513_v40  ;;  %v3949_v63 = vsel %vm3930_vm5, %v3912_v35, %v9514_v19 }
 0x408   : > { %v9522_v39 = vpop.permute.xlu0 %9521  ;;  %v4094_v24 = vsel %vm3967_vm12, %v4058_v25, %v9518_v33  ;;  %v3986_v21 = vsel %vm3967_vm12, %v3949_v63, %v9519_v8  ;;  %v2972_v25 = vld [vmem:[#allocation2 + $0xb3] sm:$0xff]  ;;  %v2862_v63 = vld [vmem:[#allocation2 + $0xa0] sm:$0xff] }
 0x409   : > { %4417 = vmatprep.mubr.f32.mxu1 %v4094_v24  ;;  %v9524_v37 = vunpack.i.h.bf16 %v9522_v39  ;;  %v9523_v60 = vunpack.i.l.bf16 %v9522_v39 }
 0x40a   : > { %4418 = vmatmul.mubr.f32.gmra.mrb[24].mxu1 %v3986_v21 }
 0x40b   : > { %v4023_v59 = vsel %vm2139_vm8, %v2971_v50, %v9523_v60  ;;  %v3913_v48 = vsel %vm2139_vm8, %v2861_v12, %v9524_v37 }
 0x40c   : > { %v9527_v16 = vpop.permute.xlu1 %9526  ;;  %v9532_v41 = vpop.permute.xlu0 %9531 }
 0x40d   : > { %v9529_v44 = vunpack.i.h.bf16 %v9527_v16  ;;  %v9528_v43 = vunpack.i.l.bf16 %v9527_v16  ;;  %v9534_v51 = vunpack.i.h.bf16 %v9532_v41  ;;  %v9533_v52 = vunpack.i.l.bf16 %v9532_v41 }
 0x40f   : > { %v4059_v57 = vsel %vm3930_vm5, %v4023_v59, %v9528_v43  ;;  %v3950_v13 = vsel %vm3930_vm5, %v3913_v48, %v9529_v44 }
 0x410   : > { %v9537_v8 = vpop.permute.xlu1 %9536  ;;  %v9542_v33 = vpop.permute.xlu0 %9541  ;;  %v4095_v19 = vsel %vm3967_vm12, %v4059_v57, %v9533_v52  ;;  %v3987_v40 = vsel %vm3967_vm12, %v3950_v13, %v9534_v51 }
 0x411   : > { %v9539_v5 = vunpack.i.h.bf16 %v9537_v8  ;;  %v9538_v55 = vunpack.i.l.bf16 %v9537_v8  ;;  %4422 = vmatprep.mubr.f32.mxu1 %v4095_v19  ;;  %v9544_v27 = vunpack.i.h.bf16 %v9542_v33  ;;  %v9543_v35 = vunpack.i.l.bf16 %v9542_v33  ;;  %v2973_v33 = vld [vmem:[#allocation2 + $0xbb] sm:$0xff]  ;;  %v2863_v19 = vld [vmem:[#allocation2 + $0xa8] sm:$0xff] }
 0x412   : > { %4423 = vmatmul.mubr.f32.gmra.mrb[26].mxu1 %v3987_v40 }
 0x413   : > { %v4024_v39 = vsel %vm2139_vm8, %v2972_v25, %v9538_v55  ;;  %v3914_v24 = vsel %vm2139_vm8, %v2862_v63, %v9539_v5 }
 0x414   : > { %v9547_v21 = vpop.permute.xlu1 %9546  ;;  %v9552_v37 = vpop.permute.xlu0 %9551  ;;  %v4060_v43 = vsel %vm3930_vm5, %v4024_v39, %v9543_v35  ;;  %v3951_v51 = vsel %vm3930_vm5, %v3914_v24, %v9544_v27 }
 0x415   : > { %v9549_v60 = vunpack.i.h.bf16 %v9547_v21  ;;  %v9548_v16 = vunpack.i.l.bf16 %v9547_v21  ;;  %v9554_v41 = vunpack.i.h.bf16 %v9552_v37  ;;  %v9553_v44 = vunpack.i.l.bf16 %v9552_v37 }
 0x417   : > { %v4096_v52 = vsel %vm3967_vm12, %v4060_v43, %v9548_v16  ;;  %v3988_v50 = vsel %vm3967_vm12, %v3951_v51, %v9549_v60  ;;  %v4025_v40 = vsel %vm2139_vm8, %v2973_v33, %v9553_v44  ;;  %v3915_v5 = vsel %vm2139_vm8, %v2863_v19, %v9554_v41  ;;  %v2974_v16 = vld [vmem:[#allocation2 + $0xc3] sm:$0xff]  ;;  %v2864_v44 = vld [vmem:[#allocation2 + $0xb0] sm:$0xff] }
 0x418   : > { %v9557_v12 = vpop.permute.xlu1 %9556  ;;  %v9562_v59 = vpop.permute.xlu0 %9561  ;;  %4427 = vmatprep.mubr.f32.mxu1 %v4096_v52 }
 0x419   : > { %v9559_v48 = vunpack.i.h.bf16 %v9557_v12  ;;  %v9558_v57 = vunpack.i.l.bf16 %v9557_v12  ;;  %v9564_v13 = vunpack.i.h.bf16 %v9562_v59  ;;  %v9563_v8 = vunpack.i.l.bf16 %v9562_v59  ;;  %4428 = vmatmul.mubr.f32.gmra.mrb[28].mxu1 %v3988_v50 }
 0x41b   : > { %v4061_v55 = vsel %vm3930_vm5, %v4025_v40, %v9558_v57  ;;  %v3952_v27 = vsel %vm3930_vm5, %v3915_v5, %v9559_v48 }
 0x41c   : > { %v9567_v35 = vpop.permute.xlu1 %9566  ;;  %v9572_v25 = vpop.permute.xlu0 %9571  ;;  %v4097_v63 = vsel %vm3967_vm12, %v4061_v55, %v9563_v8  ;;  %v3989_v39 = vsel %vm3967_vm12, %v3952_v27, %v9564_v13 }
 0x41d   : > { %v9569_v24 = vunpack.i.h.bf16 %v9567_v35  ;;  %v9568_v21 = vunpack.i.l.bf16 %v9567_v35  ;;  %4432 = vmatprep.mubr.f32.mxu1 %v4097_v63  ;;  %v9574_v37 = vunpack.i.h.bf16 %v9572_v25  ;;  %v9573_v60 = vunpack.i.l.bf16 %v9572_v25  ;;  %v2975_v25 = vld [vmem:[#allocation2 + $0xcb] sm:$0xff]  ;;  %v2865_v63 = vld [vmem:[#allocation2 + $0xb8] sm:$0xff] }
 0x41e   : > { %4433 = vmatmul.mubr.f32.gmra.mrb[30].mxu1 %v3989_v39 }
 0x41f   : > { %v4026_v41 = vsel %vm2139_vm8, %v2974_v16, %v9568_v21  ;;  %v3916_v43 = vsel %vm2139_vm8, %v2864_v44, %v9569_v24 }
 0x420   : > { %v9577_v51 = vpop.permute.xlu1 %9576  ;;  %v9582_v52 = vpop.permute.xlu0 %9581  ;;  %v4062_v57 = vsel %vm3930_vm5, %v4026_v41, %v9573_v60  ;;  %v3953_v13 = vsel %vm3930_vm5, %v3916_v43, %v9574_v37 }
 0x421   : > { %v9579_v50 = vunpack.i.h.bf16 %v9577_v51  ;;  %v9578_v12 = vunpack.i.l.bf16 %v9577_v51  ;;  %v9584_v59 = vunpack.i.h.bf16 %v9582_v52  ;;  %v9583_v48 = vunpack.i.l.bf16 %v9582_v52 }
 0x423   : > { %v4098_v8 = vsel %vm3967_vm12, %v4062_v57, %v9578_v12  ;;  %v3990_v33 = vsel %vm3967_vm12, %v3953_v13, %v9579_v50  ;;  %v4027_v39 = vsel %vm2139_vm8, %v2975_v25, %v9583_v48  ;;  %v3917_v24 = vsel %vm2139_vm8, %v2865_v63, %v9584_v59  ;;  %v2976_v12 = vld [vmem:[#allocation2 + $0xd3] sm:$0xff]  ;;  %v2866_v48 = vld [vmem:[#allocation2 + $0xc0] sm:$0xff] }
 0x424   : > { %v9587_v19 = vpop.permute.xlu1 %9586  ;;  %v9592_v40 = vpop.permute.xlu0 %9591  ;;  %4437 = vmatprep.mubr.f32.mxu1 %v4098_v8 }
 0x425   : > { %v9589_v5 = vunpack.i.h.bf16 %v9587_v19  ;;  %v9588_v55 = vunpack.i.l.bf16 %v9587_v19  ;;  %v9594_v27 = vunpack.i.h.bf16 %v9592_v40  ;;  %v9593_v35 = vunpack.i.l.bf16 %v9592_v40  ;;  %4438 = vmatmul.mubr.f32.gmra.mrb[32].mxu1 %v3990_v33 }
 0x427   : > { %v4063_v21 = vsel %vm3930_vm5, %v4027_v39, %v9588_v55  ;;  %v3954_v37 = vsel %vm3930_vm5, %v3917_v24, %v9589_v5 }
 0x428   : > { %v9597_v60 = vpop.permute.xlu1 %9596  ;;  %v9602_v16 = vpop.permute.xlu0 %9601  ;;  %v4099_v44 = vsel %vm3967_vm12, %v4063_v21, %v9593_v35  ;;  %v3991_v41 = vsel %vm3967_vm12, %v3954_v37, %v9594_v27 }
 0x429   : > { %v9599_v43 = vunpack.i.h.bf16 %v9597_v60  ;;  %v9598_v51 = vunpack.i.l.bf16 %v9597_v60  ;;  %4442 = vmatprep.mubr.f32.mxu1 %v4099_v44  ;;  %v9604_v52 = vunpack.i.h.bf16 %v9602_v16  ;;  %v9603_v50 = vunpack.i.l.bf16 %v9602_v16  ;;  %v2977_v16 = vld [vmem:[#allocation2 + $0xdb] sm:$0xff]  ;;  %v2867_v44 = vld [vmem:[#allocation2 + $0xc8] sm:$0xff] }
 0x42a   : > { %4443 = vmatmul.mubr.f32.gmra.mrb[34].mxu1 %v3991_v41 }
 0x42b   : > { %v4028_v59 = vsel %vm2139_vm8, %v2976_v12, %v9598_v51  ;;  %v3918_v57 = vsel %vm2139_vm8, %v2866_v48, %v9599_v43 }
 0x42c   : > { %v9607_v13 = vpop.permute.xlu1 %9606  ;;  %v9612_v8 = vpop.permute.xlu0 %9611  ;;  %v4064_v55 = vsel %vm3930_vm5, %v4028_v59, %v9603_v50  ;;  %v3955_v27 = vsel %vm3930_vm5, %v3918_v57, %v9604_v52 }
 0x42d   : > { %v9609_v33 = vunpack.i.h.bf16 %v9607_v13  ;;  %v9608_v19 = vunpack.i.l.bf16 %v9607_v13  ;;  %v9614_v40 = vunpack.i.h.bf16 %v9612_v8  ;;  %v9613_v5 = vunpack.i.l.bf16 %v9612_v8 }
 0x42f   : > { %v4100_v35 = vsel %vm3967_vm12, %v4064_v55, %v9608_v19  ;;  %v3992_v25 = vsel %vm3967_vm12, %v3955_v27, %v9609_v33  ;;  %v4029_v41 = vsel %vm2139_vm8, %v2977_v16, %v9613_v5  ;;  %v3919_v43 = vsel %vm2139_vm8, %v2867_v44, %v9614_v40  ;;  %v2978_v40 = vld [vmem:[#allocation2 + $0xe3] sm:$0xff]  ;;  %v2868_v55 = vld [vmem:[#allocation2 + $0xd0] sm:$0xff] }
 0x430   : > { %v9617_v63 = vpop.permute.xlu1 %9616  ;;  %v9622_v39 = vpop.permute.xlu0 %9621  ;;  %4447 = vmatprep.mubr.f32.mxu1 %v4100_v35 }
 0x431   : > { %v9619_v24 = vunpack.i.h.bf16 %v9617_v63  ;;  %v9618_v21 = vunpack.i.l.bf16 %v9617_v63  ;;  %v9624_v37 = vunpack.i.h.bf16 %v9622_v39  ;;  %v9623_v60 = vunpack.i.l.bf16 %v9622_v39  ;;  %4448 = vmatmul.mubr.f32.gmra.mrb[36].mxu1 %v3992_v25 }
 0x433   : > { %v4065_v51 = vsel %vm3930_vm5, %v4029_v41, %v9618_v21  ;;  %v3956_v52 = vsel %vm3930_vm5, %v3919_v43, %v9619_v24  ;;  %v12428_v50 = vpop.f32.mrb[36].mxu0 }
 0x434   : > { %v9627_v12 = vpop.permute.xlu1 %9626  ;;  %v4101_v48 = vsel %vm3967_vm12, %v4065_v51, %v9623_v60  ;;  %v3993_v59 = vsel %vm3967_vm12, %v3956_v52, %v9624_v37  ;;  %v9632_v8 = vpop.permute.xlu0 %9631 }
 0x435   : > { %v9629_v57 = vunpack.i.h.bf16 %v9627_v12  ;;  %v9628_v13 = vunpack.i.l.bf16 %v9627_v12  ;;  %v4331_v33 = vpop.f32.mrb[37].mxu0  ;;  %4452 = vmatprep.mubr.f32.mxu1 %v4101_v48  ;;  %v9634_v19 = vunpack.i.h.bf16 %v9632_v8  ;;  %v9633_v5 = vunpack.i.l.bf16 %v9632_v8  ;;  %v2979_v48 = vld [vmem:[#allocation2 + $0xeb] sm:$0xff] }
 0x436   : > { %4453 = vmatmul.mubr.f32.gmra.mrb[38].mxu1 %v3993_v59  ;;  %v2869_v59 = vld [vmem:[#allocation2 + $0xd8] sm:$0xff] }
 0x437   : > { %v4030_v27 = vsel %vm2139_vm8, %v2978_v40, %v9628_v13  ;;  %v3920_v35 = vsel %vm2139_vm8, %v2868_v55, %v9629_v57 }
 0x438   : > { %v9637_v25 = vpop.permute.xlu1 %9636  ;;  %v9642_v24 = vpop.permute.xlu0 %9641  ;;  %v4066_v60 = vsel %vm3930_vm5, %v4030_v27, %v9633_v5  ;;  %v3957_v16 = vsel %vm3930_vm5, %v3920_v35, %v9634_v19 }
 0x439   : > { %v9639_v63 = vunpack.i.h.bf16 %v9637_v25  ;;  %v9638_v39 = vunpack.i.l.bf16 %v9637_v25  ;;  %v9644_v21 = vunpack.i.h.bf16 %v9642_v24  ;;  %v9643_v37 = vunpack.i.l.bf16 %v9642_v24 }
 0x43b   : > { %v4102_v44 = vsel %vm3967_vm12, %v4066_v60, %v9638_v39  ;;  %v3994_v41 = vsel %vm3967_vm12, %v3957_v16, %v9639_v63  ;;  %v4031_v8 = vsel %vm2139_vm8, %v2979_v48, %v9643_v37  ;;  %v3921_v33 = vsel %vm2139_vm8, %v2869_v59, %v9644_v21  ;;  %v2980_v60 = vld [vmem:[#allocation2 + $0xf3] sm:$0xff]  ;;  %v2870_v37 = vld [vmem:[#allocation2 + $0xe0] sm:$0xff] }
 0x43c   : > { %v9647_v43 = vpop.permute.xlu1 %9646  ;;  %4457 = vmatprep.mubr.f32.mxu1 %v4102_v44  ;;  %v9652_v12 = vpop.permute.xlu0 %9651 }
 0x43d   : > { %v9649_v51 = vunpack.i.h.bf16 %v9647_v43  ;;  %v9648_v52 = vunpack.i.l.bf16 %v9647_v43  ;;  %4458 = vmatmul.mubr.f32.gmra.mrb[40].mxu1 %v3994_v41  ;;  %v9654_v57 = vunpack.i.h.bf16 %v9652_v12  ;;  %v9653_v13 = vunpack.i.l.bf16 %v9652_v12 }
 0x43f   : > { %v4067_v19 = vsel %vm3930_vm5, %v4031_v8, %v9648_v52  ;;  %v3958_v5 = vsel %vm3930_vm5, %v3921_v33, %v9649_v51 }
 0x440   : > { %v9657_v40 = vpop.permute.xlu1 %9656  ;;  %v4103_v55 = vsel %vm3967_vm12, %v4067_v19, %v9653_v13  ;;  %v3995_v27 = vsel %vm3967_vm12, %v3958_v5, %v9654_v57  ;;  %v9662_v63 = vpop.permute.xlu0 %9661 }
 0x441   : > { %v9659_v35 = vunpack.i.h.bf16 %v9657_v40  ;;  %v9658_v25 = vunpack.i.l.bf16 %v9657_v40  ;;  %4462 = vmatprep.mubr.f32.mxu1 %v4103_v55  ;;  %v9664_v39 = vunpack.i.h.bf16 %v9662_v63  ;;  %v9663_v24 = vunpack.i.l.bf16 %v9662_v63 }
 0x442   : > { %4463 = vmatmul.mubr.f32.gmra.mrb[42].mxu1 %v3995_v27  ;;  %v12444_v16 = vpop.f32.mrb[38].mxu0  ;;  %v2981_v27 = vld [vmem:[#allocation2 + $0xfb] sm:$0xff] }
 0x443   : > { %v4032_v21 = vsel %vm2139_vm8, %v2980_v60, %v9658_v25  ;;  %v3922_v44 = vsel %vm2139_vm8, %v2870_v37, %v9659_v35  ;;  %v4336_v41 = vpop.f32.mrb[39].mxu0  ;;  %v2871_v35 = vld [vmem:[#allocation2 + $0xe8] sm:$0xff] }
 0x444   : > { %v9667_v43 = vpop.permute.xlu1 %9666  ;;  %v9672_v12 = vpop.permute.xlu0 %9671  ;;  %v4068_v57 = vsel %vm3930_vm5, %v4032_v21, %v9663_v24  ;;  %v3959_v13 = vsel %vm3930_vm5, %v3922_v44, %v9664_v39 }
 0x445   : > { %v9669_v51 = vunpack.i.h.bf16 %v9667_v43  ;;  %v9668_v52 = vunpack.i.l.bf16 %v9667_v43  ;;  %v9674_v48 = vunpack.i.h.bf16 %v9672_v12  ;;  %v9673_v59 = vunpack.i.l.bf16 %v9672_v12 }
 0x447   : > { %v4104_v8 = vsel %vm3967_vm12, %v4068_v57, %v9668_v52  ;;  %v3996_v33 = vsel %vm3967_vm12, %v3959_v13, %v9669_v51  ;;  %v4033_v60 = vsel %vm2139_vm8, %v2981_v27, %v9673_v59  ;;  %v3923_v24 = vsel %vm2139_vm8, %v2871_v35, %v9674_v48  ;;  %v2982_v48 = vld [vmem:[#allocation2 + $0x103] sm:$0xff] }
 0x448   : > { %v9677_v19 = vpop.permute.xlu1 %9676  ;;  %4467 = vmatprep.mubr.f32.mxu1 %v4104_v8  ;;  %v9682_v55 = vpop.permute.xlu0 %9681  ;;  %v2872_v8 = vld [vmem:[#allocation2 + $0xf0] sm:$0xff] }
 0x449   : > { %v9679_v5 = vunpack.i.h.bf16 %v9677_v19  ;;  %v9678_v40 = vunpack.i.l.bf16 %v9677_v19  ;;  %4468 = vmatmul.mubr.f32.gmra.mrb[44].mxu1 %v3996_v33  ;;  %v9684_v25 = vunpack.i.h.bf16 %v9682_v55  ;;  %v9683_v63 = vunpack.i.l.bf16 %v9682_v55 }
 0x44a   : > { %v12454_v37 = vpop.f32.mrb[40].mxu0 }
 0x44b   : > { %v4069_v39 = vsel %vm3930_vm5, %v4033_v60, %v9678_v40  ;;  %v3960_v21 = vsel %vm3930_vm5, %v3923_v24, %v9679_v5  ;;  %v4341_v41 = vpop.f32.mrb[41].mxu0 }
 0x44c   : > { %v9687_v44 = vpop.permute.xlu1 %9686  ;;  %v4105_v43 = vsel %vm3967_vm12, %v4069_v39, %v9683_v63  ;;  %v3997_v51 = vsel %vm3967_vm12, %v3960_v21, %v9684_v25  ;;  %v9692_v57 = vpop.permute.xlu0 %9691 }
 0x44d   : > { %v9689_v52 = vunpack.i.h.bf16 %v9687_v44  ;;  %v9688_v12 = vunpack.i.l.bf16 %v9687_v44  ;;  %4472 = vmatprep.mubr.f32.mxu1 %v4105_v43  ;;  %v9694_v13 = vunpack.i.h.bf16 %v9692_v57  ;;  %v9693_v59 = vunpack.i.l.bf16 %v9692_v57  ;;  %v2873_v57 = vld [vmem:[#allocation2 + $0xf8] sm:$0xff] }
 0x44e   : > { %4473 = vmatmul.mubr.f32.gmra.mrb[46].mxu1 %v3997_v51 }
 0x44f   : > { %v4034_v33 = vsel %vm2139_vm8, %v2982_v48, %v9688_v12  ;;  %v3924_v19 = vsel %vm2139_vm8, %v2872_v8, %v9689_v52  ;;  %v2983_v12 = vld [vmem:[#allocation2 + $0x10b] sm:$0xff] }
 0x450   : > { %v9697_v5 = vpop.permute.xlu1 %9696  ;;  %v9702_v27 = vpop.permute.xlu0 %9701  ;;  %v4070_v25 = vsel %vm3930_vm5, %v4034_v33, %v9693_v59  ;;  %v3961_v60 = vsel %vm3930_vm5, %v3924_v19, %v9694_v13 }
 0x451   : > { %v9699_v40 = vunpack.i.h.bf16 %v9697_v5  ;;  %v9698_v55 = vunpack.i.l.bf16 %v9697_v5  ;;  %v9704_v35 = vunpack.i.h.bf16 %v9702_v27  ;;  %v9703_v63 = vunpack.i.l.bf16 %v9702_v27 }
 0x452   : > { %v12464_v24 = vpop.f32.mrb[42].mxu0 }
 0x453   : > { %v4106_v39 = vsel %vm3967_vm12, %v4070_v25, %v9698_v55  ;;  %v3998_v21 = vsel %vm3967_vm12, %v3961_v60, %v9699_v40  ;;  %v4346_v41 = vpop.f32.mrb[43].mxu0  ;;  %v4035_v59 = vsel %vm2139_vm8, %v2983_v12, %v9703_v63  ;;  %v3925_v13 = vsel %vm2139_vm8, %v2873_v57, %v9704_v35  ;;  %v2874_v63 = vld [vmem:[#allocation2 + $0x100] sm:$0xff] }
 0x454   : > { %v9707_v44 = vpop.permute.xlu1 %9706  ;;  %4477 = vmatprep.mubr.f32.mxu1 %v4106_v39  ;;  %v9712_v52 = vpop.permute.xlu0 %9711 }
 0x455   : > { %v9709_v43 = vunpack.i.h.bf16 %v9707_v44  ;;  %v9708_v51 = vunpack.i.l.bf16 %v9707_v44  ;;  %4478 = vmatmul.mubr.f32.gmra.mrb[48].mxu1 %v3998_v21  ;;  %v9714_v48 = vunpack.i.h.bf16 %v9712_v52  ;;  %v9713_v8 = vunpack.i.l.bf16 %v9712_v52  ;;  %v2984_v44 = vld [vmem:[#allocation2 + $0x113] sm:$0xff] }
 0x457   : > { %v4071_v33 = vsel %vm3930_vm5, %v4035_v59, %v9708_v51  ;;  %v3962_v19 = vsel %vm3930_vm5, %v3925_v13, %v9709_v43 }
 0x458   : > { %v9717_v5 = vpop.permute.xlu1 %9716  ;;  %v4107_v40 = vsel %vm3967_vm12, %v4071_v33, %v9713_v8  ;;  %v3999_v55 = vsel %vm3967_vm12, %v3962_v19, %v9714_v48  ;;  %v9722_v60 = vpop.permute.xlu0 %9721 }
 0x459   : > { %v9719_v27 = vunpack.i.h.bf16 %v9717_v5  ;;  %v9718_v25 = vunpack.i.l.bf16 %v9717_v5  ;;  %4482 = vmatprep.mubr.f32.mxu1 %v4107_v40  ;;  %v9724_v39 = vunpack.i.h.bf16 %v9722_v60  ;;  %v9723_v21 = vunpack.i.l.bf16 %v9722_v60  ;;  %v2985_v60 = vld [vmem:[#allocation2 + $0x11b] sm:$0xff] }
 0x45a   : > { %4483 = vmatmul.mubr.f32.gmra.mrb[50].mxu1 %v3999_v55  ;;  %v12474_v41 = vpop.f32.mrb[44].mxu0 }
 0x45b   : > { %v4036_v35 = vsel %vm2139_vm8, %v2984_v44, %v9718_v25  ;;  %v3926_v43 = vsel %vm2139_vm8, %v2874_v63, %v9719_v27  ;;  %v4351_v52 = vpop.f32.mrb[45].mxu0  ;;  %v2875_v44 = vld [vmem:[#allocation2 + $0x108] sm:$0xff] }
 0x45c   : > { %v9727_v51 = vpop.permute.xlu1 %9726  ;;  %v9732_v48 = vpop.permute.xlu0 %9731  ;;  %v4072_v13 = vsel %vm3930_vm5, %v4036_v35, %v9723_v21  ;;  %v3963_v33 = vsel %vm3930_vm5, %v3926_v43, %v9724_v39 }
 0x45d   : > { %v9729_v12 = vunpack.i.h.bf16 %v9727_v51  ;;  %v9728_v57 = vunpack.i.l.bf16 %v9727_v51  ;;  %v9734_v8 = vunpack.i.h.bf16 %v9732_v48  ;;  %v9733_v59 = vunpack.i.l.bf16 %v9732_v48 }
 0x45f   : > { %v4108_v19 = vsel %vm3967_vm12, %v4072_v13, %v9728_v57  ;;  %v4000_v5 = vsel %vm3967_vm12, %v3963_v33, %v9729_v12  ;;  %v4037_v52 = vsel %vm2139_vm8, %v2985_v60, %v9733_v59  ;;  %v3927_v21 = vsel %vm2139_vm8, %v2875_v44, %v9734_v8  ;;  %v12489_v12 = vld [vmem:[%s13991_s5] ss:$0 sm:$0xff] }
 0x460   : > { %v9737_v40 = vpop.permute.xlu1 %9736  ;;  %4487 = vmatprep.mubr.f32.mxu1 %v4108_v19  ;;  %v9742_v27 = vpop.permute.xlu0 %9741  ;;  %v4335_v8 = vadd.f32 %v12489_v12, %v12444_v16  ;;  %v4330_v60 = vadd.f32 %v12489_v12, %v12428_v50 }
 0x461   : > { %v9739_v55 = vunpack.i.h.bf16 %v9737_v40  ;;  %v9738_v25 = vunpack.i.l.bf16 %v9737_v40  ;;  %4488 = vmatmul.mubr.f32.gmra.mrb[52].mxu1 %v4000_v5  ;;  %v9744_v63 = vunpack.i.h.bf16 %v9742_v27  ;;  %v9743_v51 = vunpack.i.l.bf16 %v9742_v27  ;;  %v2876_v27 = vld [vmem:[#allocation2 + $0x110] sm:$0xff] }
 0x462   : > { %v4354_v35 = vpop.f32.mrb[46].mxu0 }
 0x463   : > { %v4073_v39 = vsel %vm3930_vm5, %v4037_v52, %v9738_v25  ;;  %v3964_v43 = vsel %vm3930_vm5, %v3927_v21, %v9739_v55  ;;  %v4356_v48 = vpop.f32.mrb[47].mxu0  ;;  %v2986_v25 = vld [vmem:[#allocation2 + $0x123] sm:$0xff] }
 0x464   : > { %v9747_v57 = vpop.permute.xlu1 %9746  ;;  %v4109_v13 = vsel %vm3967_vm12, %v4073_v39, %v9743_v51  ;;  %v4001_v33 = vsel %vm3967_vm12, %v3964_v43, %v9744_v63  ;;  %v9752_v5 = vpop.permute.xlu0 %9751  ;;  %v4345_v43 = vadd.f32 %v12489_v12, %v12464_v24 }
 0x465   : > { %v9749_v19 = vunpack.i.h.bf16 %v9747_v57  ;;  %v9748_v59 = vunpack.i.l.bf16 %v9747_v57  ;;  %4492 = vmatprep.mubr.f32.mxu1 %v4109_v13  ;;  %v9754_v40 = vunpack.i.h.bf16 %v9752_v5  ;;  %v9753_v55 = vunpack.i.l.bf16 %v9752_v5 }
 0x466   : > { %4493 = vmatmul.mubr.f32.gmra.mrb[54].mxu1 %v4001_v33  ;;  %v8498_v44 = vpop.f32.mrb[48].mxu0 }
 0x467   : > { %v4038_v51 = vsel %vm2139_vm8, %v2986_v25, %v9748_v59  ;;  %v3928_v63 = vsel %vm2139_vm8, %v2876_v27, %v9749_v19  ;;  %v4580_v52 = vadd.f32 %v8498_v44, %v4335_v8  ;;  %v4574_v39 = vpop.f32.mrb[49].mxu0  ;;  %v4340_v59 = vadd.f32 %v12489_v12, %v12454_v37  ;;  %v2987_v37 = vld [vmem:[#allocation2 + $0x12b] sm:$0xff] }
 0x468   : > { %v9757_v21 = vpop.permute.xlu1 %9756  ;;  %v9762_v48 = vpop.permute.xlu0 %9761  ;;  %v4575_v13 = vadd.f32 %v4574_v39, %v4330_v60  ;;  %v4074_v3 = vsel %vm3930_vm5, %v4038_v51, %v9753_v55  ;;  %v3965_v50 = vsel %vm3930_vm5, %v3928_v63, %v9754_v40  ;;  %v4355_v39 = vadd.f32 %v12489_v12, %v4354_v35  ;;  %v2877_v63 = vld [vmem:[#allocation2 + $0x118] sm:$0xff] }
 0x469   : > { %v9759_v16 = vunpack.i.h.bf16 %v9757_v21  ;;  %v9758_v57 = vunpack.i.l.bf16 %v9757_v21  ;;  %v9764_v33 = vunpack.i.h.bf16 %v9762_v48  ;;  %v9763_v5 = vunpack.i.l.bf16 %v9762_v48 }
 0x46a   : > { %v4753_v19 = vmax.f32 %v4575_v13, 0.0  ;;  %v8501_v8 = vpop.f32.mrb[50].mxu0  ;;  %v4754_v24 = vmax.f32 %v4580_v52, 0.0  ;;  %v4350_v35 = vadd.f32 %v12489_v12, %v12474_v41 }
 0x46b   : > { %v4110_v25 = vsel %vm3967_vm12, %v4074_v3, %v9758_v57  ;;  %v4002_v27 = vsel %vm3967_vm12, %v3965_v50, %v9759_v16  ;;  %v4590_v44 = vadd.f32 %v8501_v8, %v4345_v43  ;;  %v4584_v60 = vpop.f32.mrb[51].mxu0  ;;  %v4039_v52 = vsel %vm2139_vm8, %v2987_v37, %v9763_v5 }
 0x46c   : > { %v9767_v21 = vpop.permute.xlu1 %9766  ;;  %4497 = vmatprep.mubr.f32.mxu1 %v4110_v25  ;;  %v9772_v51 = vpop.permute.xlu0 %9771  ;;  %v4585_v40 = vadd.f32 %v4584_v60, %v4340_v59  ;;  %8558 = vmatprep.mubr.msk.f32.mxu0 %vm2139_vm8, %v4753_v19  ;;  %v3929_v43 = vsel %vm2139_vm8, %v2877_v63, %v9764_v33 }
 0x46d   : > { %v9769_v48 = vunpack.i.h.bf16 %v9767_v21  ;;  %v9768_v55 = vunpack.i.l.bf16 %v9767_v21  ;;  %4498 = vmatmul.mubr.f32.gmra.mrb[56].mxu1 %v4002_v27  ;;  %v9774_v13 = vunpack.i.h.bf16 %v9772_v51  ;;  %v9773_v3 = vunpack.i.l.bf16 %v9772_v51  ;;  %8559 = vmatmul.mubr.msk.f32.vlgmr.msra.gmra.mrb[84].mxu0 %vm2139_vm8, %v4754_v24 }
 0x46e   : > { %v4755_v16 = vmax.f32 %v4585_v40, 0.0  ;;  %v8504_v57 = vpop.f32.mrb[52].mxu0  ;;  %v4756_v19 = vmax.f32 %v4590_v44, 0.0 }
 0x46f   : > { %v4075_v50 = vsel %vm3930_vm5, %v4039_v52, %v9768_v55  ;;  %v3966_v59 = vsel %vm3930_vm5, %v3929_v43, %v9769_v48  ;;  %v4600_v8 = vadd.f32 %v8504_v57, %v4355_v39  ;;  %v4594_v25 = vpop.f32.mrb[53].mxu0 }
 0x470   : > { %v4111_v27 = vsel %vm3967_vm12, %v4075_v50, %v9773_v3  ;;  %v4003_v24 = vsel %vm3967_vm12, %v3966_v59, %v9774_v13  ;;  %v4595_v21 = vadd.f32 %v4594_v25, %v4350_v35  ;;  %8561 = vmatprep.mubr.msk.f32.mxu0 %vm2139_vm8, %v4755_v16  ;;  %vm5191_vm12 = vcmask 518144  }
 0x471   : > { %4502 = vmatprep.mubr.f32.mxu1 %v4111_v27  ;;  %8562 = vmatmul.mubr.msk.f32.gmra.mrb[86].mxu0 %vm2139_vm8, %v4756_v19  ;;  %v4758_v5 = vmax.f32 %v4600_v8, 0.0 }
 0x472   : > { %4503 = vmatmul.mubr.f32.gmra.mrb[58].mxu1 %v4003_v24  ;;  %v4757_v41 = vmax.f32 %v4595_v21, 0.0  ;;  %v8507_v33 = vpop.f32.mrb[54].mxu0 }
 0x473   : > { %v4604_v60 = vpop.f32.mrb[55].mxu0 }
 0x474   : > { %8564 = vmatprep.mubr.msk.f32.mxu0 %vm2139_vm8, %v4757_v41 }
 0x475   : > { %8565 = vmatmul.mubr.msk.f32.gmra.mrb[88].mxu0 %vm2139_vm8, %v4758_v5 }
 0x476   : > { %v8510_v44 = vpop.f32.mrb[56].mxu0 }
 0x477   : > { %v4614_v39 = vpop.f32.mrb[57].mxu0 }
 0x478   : > { %v4359_v48 = vpop.f32.mrb[0].mxu1 }
 0x479   : > { %v4360_v55 = vadd.f32 %v12489_v12, %v4359_v48  ;;  %v4361_v51 = vpop.f32.mrb[1].mxu1 }
 0x47a   : > { %v8513_v40 = vpop.f32.mrb[58].mxu0 }
 0x47b   : > { %v4624_v37 = vpop.f32.mrb[59].mxu0  ;;  %v4605_v63 = vadd.f32 %v4604_v60, %v4360_v55 }
 0x47d   : > { %v4759_v13 = vmax.f32 %v4605_v63, 0.0 }
 0x47e   : > { %v8516_v3 = vpop.f32.mrb[60].mxu0 }
 0x47f   : > { %v4634_v52 = vpop.f32.mrb[61].mxu0  ;;  %8567 = vmatprep.mubr.msk.f32.mxu0 %vm2139_vm8, %v4759_v13 }
 0x480   : > { %v4364_v43 = vpop.f32.mrb[2].mxu1 }
 0x481   : > { %v4365_v35 = vadd.f32 %v12489_v12, %v4364_v43  ;;  %v4366_v16 = vpop.f32.mrb[3].mxu1 }
 0x482   : > { %v12525_v57 = vpop.f32.mrb[62].mxu0 }
 0x483   : > { %v4644_v50 = vpop.f32.mrb[63].mxu0  ;;  %v4610_v59 = vadd.f32 %v8507_v33, %v4365_v35 }
 0x485   : > { %v4760_v19 = vmax.f32 %v4610_v59, 0.0 }
 0x486   : > { %v12527_v8 = vpop.f32.mrb[64].mxu0 }
 0x487   : > { %v12529_v25 = vpop.f32.mrb[65].mxu0  ;;  %8568 = vmatmul.mubr.msk.f32.gmra.mrb[90].mxu0 %vm2139_vm8, %v4760_v19 }
 0x488   : > { %v4369_v27 = vpop.f32.mrb[4].mxu1 }
 0x489   : > { %v4370_v24 = vadd.f32 %v12489_v12, %v4369_v27  ;;  %v4371_v21 = vpop.f32.mrb[5].mxu1 }
 0x48a   : > { %v12533_v41 = vpop.f32.mrb[66].mxu0 }
 0x48b   : > { %v12535_v5 = vpop.f32.mrb[67].mxu0  ;;  %v4615_v60 = vadd.f32 %v4614_v39, %v4370_v24 }
 0x48d   : > { %v4761_v48 = vmax.f32 %v4615_v60, 0.0 }
 0x48e   : > { %v12537_v55 = vpop.f32.mrb[68].mxu0 }
 0x48f   : > { %v12539_v33 = vpop.f32.mrb[69].mxu0  ;;  %8570 = vmatprep.mubr.msk.f32.mxu0 %vm2139_vm8, %v4761_v48 }
 0x490   : > { %v4374_v51 = vpop.f32.mrb[6].mxu1 }
 0x491   : > { %v4375_v63 = vadd.f32 %v12489_v12, %v4374_v51  ;;  %v4376_v13 = vpop.f32.mrb[7].mxu1 }
 0x492   : > { %v12543_v43 = vpop.f32.mrb[70].mxu0 }
 0x493   : > { %v12545_v35 = vpop.f32.mrb[71].mxu0  ;;  %v4620_v16 = vadd.f32 %v8510_v44, %v4375_v63 }
 0x495   : > { %v4762_v59 = vmax.f32 %v4620_v16, 0.0 }
 0x496   : > { %v12547_v19 = vpop.f32.mrb[72].mxu0 }
 0x497   : > { %v12549_v39 = vpop.f32.mrb[73].mxu0  ;;  %8571 = vmatmul.mubr.msk.f32.gmra.mrb[92].mxu0 %vm2139_vm8, %v4762_v59 }
 0x498   : > { %v4379_v27 = vpop.f32.mrb[8].mxu1 }
 0x499   : > { %v4380_v24 = vadd.f32 %v12489_v12, %v4379_v27  ;;  %v4381_v21 = vpop.f32.mrb[9].mxu1 }
 0x49a   : > { %v12553_v60 = vpop.f32.mrb[74].mxu0 }
 0x49b   : > { %v12555_v48 = vpop.f32.mrb[75].mxu0  ;;  %v4625_v51 = vadd.f32 %v4624_v37, %v4380_v24 }
 0x49d   : > { %v4763_v13 = vmax.f32 %v4625_v51, 0.0 }
 0x49e   : > { %v12557_v6 = vpop.f32.mrb[76].mxu0 }
 0x49f   : > { %v12559_v44 = vpop.f32.mrb[77].mxu0  ;;  %8573 = vmatprep.mubr.msk.f32.mxu0 %vm2139_vm8, %v4763_v13 }
 0x4a0   : > { %v4384_v63 = vpop.f32.mrb[10].mxu1 }
 0x4a1   : > { %v4385_v16 = vadd.f32 %v12489_v12, %v4384_v63  ;;  %v4386_v59 = vpop.f32.mrb[11].mxu1 }
 0x4a3   : > { %v4630_v17 = vadd.f32 %v8513_v40, %v4385_v16 }
 0x4a5   : > { %v4764_v53 = vmax.f32 %v4630_v17, 0.0 }
 0x4a7   : > { %8574 = vmatmul.mubr.msk.f32.gmra.mrb[94].mxu0 %vm2139_vm8, %v4764_v53 }
 0x4a8   : > { %v4389_v27 = vpop.f32.mrb[12].mxu1 }
 0x4a9   : > { %v4390_v21 = vadd.f32 %v12489_v12, %v4389_v27  ;;  %v4391_v56 = vpop.f32.mrb[13].mxu1 }
 0x4ab   : > { %v4635_v37 = vadd.f32 %v4634_v52, %v4390_v21 }
 0x4ad   : > { %v4765_v24 = vmax.f32 %v4635_v37, 0.0 }
 0x4ae   : > { %v12565_v51 = vpop.f32.mrb[78].mxu0 }
 0x4af   : > { %v12567_v30 = vpop.f32.mrb[79].mxu0  ;;  %8576 = vmatprep.mubr.msk.f32.mxu0 %vm2139_vm8, %v4765_v24 }
 0x4b0   : > { %v4394_v13 = vpop.f32.mrb[14].mxu1 }
 0x4b1   : > { %v4395_v63 = vadd.f32 %v12489_v12, %v4394_v13  ;;  %v4396_v59 = vpop.f32.mrb[15].mxu1 }
 0x4b3   : > { %v4640_v40 = vadd.f32 %v8516_v3, %v4395_v63 }
 0x4b5   : > { %v4766_v17 = vmax.f32 %v4640_v40, 0.0 }
 0x4b7   : > { %v12571_v16 = vpop.f32.mrb[80].mxu0  ;;  %8577 = vmatmul.mubr.msk.f32.gmra.mrb[96].mxu0 %vm2139_vm8, %v4766_v17  ;;  %v6309_v17 = vld [vmem:[%s13994_s8 + $0x200] sm:$0xff] }
 0x4b8   : > { %v12574_v53 = vpop.f32.mrb[81].mxu0 }
 0x4be   : > { %v4399_v56 = vpop.f32.mrb[16].mxu1  ;;  %v12577_v21 = vpop.f32.mrb[82].mxu0 }
 0x4bf   : > { %v4400_v52 = vadd.f32 %v12489_v12, %v4399_v56  ;;  %v4401_v27 = vpop.f32.mrb[17].mxu1  ;;  %v12579_v24 = vpop.f32.mrb[83].mxu0 }
 0x4c1   : > { %v4645_v37 = vadd.f32 %v4644_v50, %v4400_v52  ;;  %v6310_v50 = vld [vmem:[%s13994_s8 + $0x208] sm:$0xff] }
 0x4c2   : > { %v9006_v56 = vpack.c.bf16 %v6310_v50, %v6309_v17  ;;  %v6315_v50 = vld [vmem:[%s13994_s8 + $0x230] sm:$0xff] }
 0x4c3   : > { %v4767_v32 = vmax.f32 %v4645_v37, 0.0  ;;  %v6312_v37 = vld [vmem:[%s13994_s8 + $0x218] sm:$0xff] }
 0x4c4   : > { %v4404_v3 = vpop.f32.mrb[18].mxu1  ;;  %9007 = vmatprep.subr.bf16.mxu0 %v9006_v56 }
 0x4c5   : > { %8579 = vmatprep.mubr.msk.f32.mxu0 %vm2139_vm8, %v4767_v32  ;;  %v4405_v13 = vadd.f32 %v12489_v12, %v4404_v3  ;;  %v4406_v63 = vpop.f32.mrb[19].mxu1  ;;  %9009 = vmatpush3.bf16.msra.mxu0 %v9006_v56  ;;  %v6313_v3 = vld [vmem:[%s13994_s8 + $0x220] sm:$0xff]  ;;  %v6316_v56 = vld [vmem:[%s13994_s8 + $0x238] sm:$0xff] }
 0x4c7   : > { %v4650_v59 = vadd.f32 %v12525_v57, %v4405_v13  ;;  %v6311_v57 = vld [vmem:[%s13994_s8 + $0x210] sm:$0xff] }
 0x4c8   : > { %v9010_v63 = vpack.c.bf16 %v6312_v37, %v6311_v57 }
 0x4c9   : > { %v4768_v40 = vmax.f32 %v4650_v59, 0.0  ;;  %v6314_v59 = vld [vmem:[%s13994_s8 + $0x228] sm:$0xff] }
 0x4ca   : > { %v9014_v17 = vpack.c.bf16 %v6314_v59, %v6313_v3  ;;  %9011 = vmatprep.subr.bf16.mxu0 %v9010_v63 }
 0x4cb   : > { %8580 = vmatmul.mubr.msk.f32.gmra.mrb[98].mxu0 %vm2139_vm8, %v4768_v40  ;;  %v14042_v40 = vmov 0.0  }
 0x4cc   : > { %5192 = vst.msk [vmem:[#allocation3 + $0x10] sm:$0x7] %vm5191_vm12, %v14042_v40  ;;  %9013 = vmatpush3.bf16.msra.mxu0 %v9010_v63  ;;  %vm14055_vm12 = vcmp.eq.s32.totalorder %v12011_v9, 1  ;;  %v6289_v9 = vld [vmem:[%s13994_s8 + $0x160] sm:$0xff] }
 0x4cd   : > { %9015 = vmatprep.subr.bf16.mxu0 %v9014_v17 }
 0x4ce   : > { %v4409_v52 = vpop.f32.mrb[20].mxu1 }
 0x4cf   : > { %v4410_v32 = vadd.f32 %v12489_v12, %v4409_v52  ;;  %v4411_v27 = vpop.f32.mrb[21].mxu1 }
 0x4d0   : > { %9017 = vmatpush3.bf16.msra.mxu0 %v9014_v17 }
 0x4d1   : > { %v4655_v13 = vadd.f32 %v12529_v25, %v4410_v32  ;;  %v9018_v32 = vpack.c.bf16 %v6316_v56, %v6315_v50 }
 0x4d3   : > { %v4769_v52 = vmax.f32 %v4655_v13, 0.0  ;;  %9019 = vmatprep.subr.bf16.mxu0 %v9018_v32 }
 0x4d4   : > { %9021 = vmatpush3.bf16.msra.mxu0 %v9018_v32 }
 0x4d5   : > { %8582 = vmatprep.mubr.msk.f32.mxu0 %vm2139_vm8, %v4769_v52  ;;  %v4414_v25 = vpop.f32.mrb[22].mxu1 }
 0x4d6   : > { %v4415_v27 = vadd.f32 %v12489_v12, %v4414_v25  ;;  %v4416_v57 = vpop.f32.mrb[23].mxu1 }
 0x4d8   : > { %v4660_v37 = vadd.f32 %v12527_v8, %v4415_v27 }
 0x4da   : > { %v4770_v3 = vmax.f32 %v4660_v37, 0.0 }
 0x4dc   : > { %8583 = vmatmul.mubr.msk.f32.gmra.mrb[100].mxu0 %vm2139_vm8, %v4770_v3 }
 0x4dd   : > { %v4419_v59 = vpop.f32.mrb[24].mxu1 }
 0x4de   : > { %v4420_v13 = vadd.f32 %v12489_v12, %v4419_v59  ;;  %v4421_v63 = vpop.f32.mrb[25].mxu1 }
 0x4e0   : > { %v4665_v52 = vadd.f32 %v12535_v5, %v4420_v13 }
 0x4e2   : > { %v4771_v62 = vmax.f32 %v4665_v52, 0.0 }
 0x4e4   : > { %8585 = vmatprep.mubr.msk.f32.mxu0 %vm2139_vm8, %v4771_v62 }
 0x4e5   : > { %v4424_v50 = vpop.f32.mrb[26].mxu1 }
 0x4e6   : > { %v4425_v56 = vadd.f32 %v12489_v12, %v4424_v50  ;;  %v4426_v25 = vpop.f32.mrb[27].mxu1 }
 0x4e8   : > { %v4670_v8 = vadd.f32 %v12533_v41, %v4425_v56 }
 0x4ea   : > { %v4772_v17 = vmax.f32 %v4670_v8, 0.0 }
 0x4ec   : > { %v4429_v27 = vpop.f32.mrb[28].mxu1  ;;  %8586 = vmatmul.mubr.msk.f32.gmra.mrb[102].mxu0 %vm2139_vm8, %v4772_v17 }
 0x4ed   : > { %v4430_v32 = vadd.f32 %v12489_v12, %v4429_v27  ;;  %v4431_v57 = vpop.f32.mrb[29].mxu1 }
 0x4ee   : > { %v6246_v57 = vld [vmem:[%s13994_s8 + $0x8] sm:$0xff] }
 0x4ef   : > { %v4675_v37 = vadd.f32 %v12539_v33, %v4430_v32 }
 0x4f1   : > { %v4773_v3 = vmax.f32 %v4675_v37, 0.0  ;;  %v4434_v5 = vpop.f32.mrb[30].mxu1 }
 0x4f2   : > { %v4435_v59 = vadd.f32 %v12489_v12, %v4434_v5  ;;  %v4436_v62 = vpop.f32.mrb[31].mxu1 }
 0x4f3   : > { %8588 = vmatprep.mubr.msk.f32.mxu0 %vm2139_vm8, %v4773_v3 }
 0x4f4   : > { %v4680_v13 = vadd.f32 %v12537_v55, %v4435_v59  ;;  %v6245_v55 = vld [vmem:[%s13994_s8] sm:$0xff] }
 0x4f6   : > { %v4774_v63 = vmax.f32 %v4680_v13, 0.0 }
 0x4f8   : > { %v4439_v41 = vpop.f32.mrb[32].mxu1  ;;  %8589 = vmatmul.mubr.msk.f32.gmra.mrb[104].mxu0 %vm2139_vm8, %v4774_v63 }
 0x4f9   : > { %v4440_v52 = vadd.f32 %v12489_v12, %v4439_v41  ;;  %v4441_v50 = vpop.f32.mrb[33].mxu1 }
 0x4fb   : > { %v4685_v56 = vadd.f32 %v12545_v35, %v4440_v52  ;;  %v8911_v35 = vpack.c.bf16 %v6246_v57, %v6245_v55 }
 0x4fd   : > { %v4775_v25 = vmax.f32 %v4685_v56, 0.0  ;;  %v4444_v33 = vpop.f32.mrb[34].mxu1  ;;  %8912 = vmatpush1.bf16.msra.mxu1 %v8911_v35 }
 0x4fe   : > { %v4445_v8 = vadd.f32 %v12489_v12, %v4444_v33  ;;  %v4446_v17 = vpop.f32.mrb[35].mxu1 }
 0x4ff   : > { %8591 = vmatprep.mubr.msk.f32.mxu0 %vm2139_vm8, %v4775_v25  ;;  %v6248_v17 = vld [vmem:[%s13994_s8 + $0x18] sm:$0xff] }
 0x500   : > { %v4690_v27 = vadd.f32 %v12543_v43, %v4445_v8  ;;  %v14043_v43 = vmov 0.0|0.0   ;;  %v6247_v8 = vld [vmem:[%s13994_s8 + $0x10] sm:$0xff] }
 0x501   : > { %8913 = vmatprep.subr.bf16.mxu1 %v14043_v43 }
 0x502   : > { %v4776_v32 = vmax.f32 %v4690_v27, 0.0  ;;  %v8914_v27 = vpack.c.bf16 %v6248_v17, %v6247_v8 }
 0x504   : > { %v4449_v37 = vpop.f32.mrb[36].mxu1  ;;  %8592 = vmatmul.mubr.msk.f32.gmra.mrb[106].mxu0 %vm2139_vm8, %v4776_v32  ;;  %v6250_v32 = vld [vmem:[%s13994_s8 + $0x28] sm:$0xff]  ;;  %8915 = vmatpush1.bf16.msra.mxu1 %v8914_v27 }
 0x505   : > { %v4450_v3 = vadd.f32 %v12489_v12, %v4449_v37  ;;  %v4451_v5 = vpop.f32.mrb[37].mxu1  ;;  %8916 = vmatprep.subr.bf16.mxu1 %v14043_v43 }
 0x506   : > { %v6252_v5 = vld [vmem:[%s13994_s8 + $0x38] sm:$0xff] }
 0x507   : > { %v4695_v59 = vadd.f32 %v12549_v39, %v4450_v3  ;;  %v6251_v3 = vld [vmem:[%s13994_s8 + $0x30] sm:$0xff] }
 0x509   : > { %v4777_v62 = vmax.f32 %v4695_v59, 0.0  ;;  %v4454_v13 = vpop.f32.mrb[38].mxu1 }
 0x50a   : > { %v4455_v63 = vadd.f32 %v12489_v12, %v4454_v13  ;;  %v4456_v41 = vpop.f32.mrb[39].mxu1  ;;  %v8920_v13 = vpack.c.bf16 %v6252_v5, %v6251_v3  ;;  %v6260_v3 = vld [vmem:[%s13994_s8 + $0x78] sm:$0xff] }
 0x50b   : > { %8594 = vmatprep.mubr.msk.f32.mxu0 %vm2139_vm8, %v4777_v62  ;;  %v6254_v41 = vld [vmem:[%s13994_s8 + $0x48] sm:$0xff] }
 0x50c   : > { %v4700_v52 = vadd.f32 %v12547_v19, %v4455_v63  ;;  %v6249_v19 = vld [vmem:[%s13994_s8 + $0x20] sm:$0xff] }
 0x50d   : > { %v8917_v35 = vpack.c.bf16 %v6250_v32, %v6249_v19  ;;  %v6253_v63 = vld [vmem:[%s13994_s8 + $0x40] sm:$0xff] }
 0x50e   : > { %v4778_v50 = vmax.f32 %v4700_v52, 0.0 }
 0x50f   : > { %8918 = vmatpush1.bf16.msra.mxu1 %v8917_v35 }
 0x510   : > { %v4459_v56 = vpop.f32.mrb[40].mxu1  ;;  %8595 = vmatmul.mubr.msk.f32.gmra.mrb[108].mxu0 %vm2139_vm8, %v4778_v50  ;;  %8919 = vmatprep.subr.bf16.mxu1 %v14043_v43 }
 0x511   : > { %v4460_v25 = vadd.f32 %v12489_v12, %v4459_v56  ;;  %v4461_v33 = vpop.f32.mrb[41].mxu1 }
 0x512   : > { %v6255_v33 = vld [vmem:[%s13994_s8 + $0x50] sm:$0xff] }
 0x513   : > { %v4705_v39 = vadd.f32 %v12555_v48, %v4460_v25  ;;  %8921 = vmatpush1.bf16.msra.mxu1 %v8920_v13 }
 0x514   : > { %8922 = vmatprep.subr.bf16.mxu1 %v14043_v43 }
 0x515   : > { %v4779_v55 = vmax.f32 %v4705_v39, 0.0  ;;  %v4464_v57 = vpop.f32.mrb[42].mxu1  ;;  %v6256_v39 = vld [vmem:[%s13994_s8 + $0x58] sm:$0xff] }
 0x516   : > { %v4465_v48 = vadd.f32 %v12489_v12, %v4464_v57  ;;  %v4466_v37 = vpop.f32.mrb[43].mxu1  ;;  %v8926_v32 = vpack.c.bf16 %v6256_v39, %v6255_v33  ;;  %v6257_v57 = vld [vmem:[%s13994_s8 + $0x60] sm:$0xff]  ;;  %v6264_v33 = vld [vmem:[%s13994_s8 + $0x98] sm:$0xff] }
 0x517   : > { %8597 = vmatprep.mubr.msk.f32.mxu0 %vm2139_vm8, %v4779_v55  ;;  %v6259_v37 = vld [vmem:[%s13994_s8 + $0x70] sm:$0xff] }
 0x518   : > { %v4710_v59 = vadd.f32 %v12553_v60, %v4465_v48  ;;  %v8923_v60 = vpack.c.bf16 %v6254_v41, %v6253_v63  ;;  %v6258_v48 = vld [vmem:[%s13994_s8 + $0x68] sm:$0xff]  ;;  %v6261_v63 = vld [vmem:[%s13994_s8 + $0x80] sm:$0xff] }
 0x519   : > { %v6262_v41 = vld [vmem:[%s13994_s8 + $0x88] sm:$0xff] }
 0x51a   : > { %v4780_v62 = vmax.f32 %v4710_v59, 0.0  ;;  %8924 = vmatpush1.bf16.msra.mxu1 %v8923_v60 }
 0x51b   : > { %8925 = vmatprep.subr.bf16.mxu1 %v14043_v43 }
 0x51c   : > { %v4469_v52 = vpop.f32.mrb[44].mxu1  ;;  %8598 = vmatmul.mubr.msk.f32.gmra.mrb[110].mxu0 %vm2139_vm8, %v4780_v62  ;;  %v8932_v62 = vpack.c.bf16 %v6260_v3, %v6259_v37  ;;  %v6268_v37 = vld [vmem:[%s13994_s8 + $0xb8] sm:$0xff] }
 0x51d   : > { %v4470_v50 = vadd.f32 %v12489_v12, %v4469_v52  ;;  %v4471_v56 = vpop.f32.mrb[45].mxu1 }
 0x51e   : > { %8927 = vmatpush1.bf16.msra.mxu1 %v8926_v32 }
 0x51f   : > { %v4715_v25 = vadd.f32 %v12559_v44, %v4470_v50  ;;  %8928 = vmatprep.subr.bf16.mxu1 %v14043_v43 }
 0x521   : > { %v4781_v8 = vmax.f32 %v4715_v25, 0.0  ;;  %v4474_v17 = vpop.f32.mrb[46].mxu1  ;;  %v8935_v25 = vpack.c.bf16 %v6262_v41, %v6261_v63 }
 0x522   : > { %v4475_v19 = vadd.f32 %v12489_v12, %v4474_v17  ;;  %v4476_v27 = vpop.f32.mrb[47].mxu1 }
 0x523   : > { %8600 = vmatprep.mubr.msk.f32.mxu0 %vm2139_vm8, %v4781_v8 }
 0x524   : > { %v4720_v44 = vadd.f32 %v12557_v6, %v4475_v19  ;;  %v8929_v6 = vpack.c.bf16 %v6258_v48, %v6257_v57  ;;  %v6267_v48 = vld [vmem:[%s13994_s8 + $0xb0] sm:$0xff] }
 0x526   : > { %v4782_v55 = vmax.f32 %v4720_v44, 0.0  ;;  %8930 = vmatpush1.bf16.msra.mxu1 %v8929_v6  ;;  %v6265_v44 = vld [vmem:[%s13994_s8 + $0xa0] sm:$0xff] }
 0x527   : > { %8931 = vmatprep.subr.bf16.mxu1 %v14043_v43 }
 0x528   : > { %v4479_v35 = vpop.f32.mrb[48].mxu1  ;;  %8601 = vmatmul.mubr.msk.f32.gmra.mrb[112].mxu0 %vm2139_vm8, %v4782_v55 }
 0x529   : > { %v4480_v5 = vadd.f32 %v12489_v12, %v4479_v35  ;;  %v4481_v59 = vpop.f32.mrb[49].mxu1 }
 0x52a   : > { %8933 = vmatpush1.bf16.msra.mxu1 %v8932_v62  ;;  %v8944_v59 = vpack.c.bf16 %v6268_v37, %v6267_v48  ;;  %v6270_v62 = vld [vmem:[%s13994_s8 + $0xc8] sm:$0xff] }
 0x52b   : > { %v4725_v13 = vadd.f32 %v12567_v30, %v4480_v5  ;;  %8934 = vmatprep.subr.bf16.mxu1 %v14043_v43  ;;  %v6263_v30 = vld [vmem:[%s13994_s8 + $0x90] sm:$0xff] }
 0x52c   : > { %v8938_v17 = vpack.c.bf16 %v6264_v33, %v6263_v30 }
 0x52d   : > { %v4783_v52 = vmax.f32 %v4725_v13, 0.0  ;;  %v4484_v50 = vpop.f32.mrb[50].mxu1 }
 0x52e   : > { %v4485_v56 = vadd.f32 %v12489_v12, %v4484_v50  ;;  %v4486_v60 = vpop.f32.mrb[51].mxu1  ;;  %8936 = vmatpush1.bf16.msra.mxu1 %v8935_v25  ;;  %v6271_v50 = vld [vmem:[%s13994_s8 + $0xd0] sm:$0xff] }
 0x52f   : > { %8603 = vmatprep.mubr.msk.f32.mxu0 %vm2139_vm8, %v4783_v52  ;;  %8937 = vmatprep.subr.bf16.mxu1 %v14043_v43  ;;  %v12755_v52 = vld [vmem:[%s13993_s7] ss:$0 sm:$0xff] }
 0x530   : > { %v4730_v39 = vadd.f32 %v12565_v51, %v4485_v56  ;;  %v6266_v51 = vld [vmem:[%s13994_s8 + $0xa8] sm:$0xff]  ;;  %v6272_v56 = vld [vmem:[%s13994_s8 + $0xd8] sm:$0xff] }
 0x531   : > { %v8941_v57 = vpack.c.bf16 %v6266_v51, %v6265_v44 }
 0x532   : > { %v4784_v8 = vmax.f32 %v4730_v39, 0.0  ;;  %8939 = vmatpush1.bf16.msra.mxu1 %v8938_v17 }
 0x533   : > { %8940 = vmatprep.subr.bf16.mxu1 %v14043_v43 }
 0x534   : > { %v4489_v19 = vpop.f32.mrb[52].mxu1  ;;  %8604 = vmatmul.mubr.msk.f32.gmra.mrb[114].mxu0 %vm2139_vm8, %v4784_v8  ;;  %v8950_v8 = vpack.c.bf16 %v6272_v56, %v6271_v50 }
 0x535   : > { %v4490_v27 = vadd.f32 %v12489_v12, %v4489_v19  ;;  %v4491_v32 = vpop.f32.mrb[53].mxu1 }
 0x536   : > { %8942 = vmatpush1.bf16.msra.mxu1 %v8941_v57 }
 0x537   : > { %v4735_v55 = vadd.f32 %v12574_v53, %v4490_v27  ;;  %8943 = vmatprep.subr.bf16.mxu1 %v14043_v43  ;;  %v6269_v53 = vld [vmem:[%s13994_s8 + $0xc0] sm:$0xff] }
 0x538   : > { %v8947_v41 = vpack.c.bf16 %v6270_v62, %v6269_v53  ;;  %v6276_v53 = vld [vmem:[%s13994_s8 + $0xf8] sm:$0xff] }
 0x539   : > { %v4785_v35 = vmax.f32 %v4735_v55, 0.0  ;;  %v4494_v6 = vpop.f32.mrb[54].mxu1 }
 0x53a   : > { %v4495_v3 = vadd.f32 %v12489_v12, %v4494_v6  ;;  %v4496_v5 = vpop.f32.mrb[55].mxu1  ;;  %8945 = vmatpush1.bf16.msra.mxu1 %v8944_v59  ;;  %v6275_v59 = vld [vmem:[%s13994_s8 + $0xf0] sm:$0xff] }
 0x53b   : > { %8606 = vmatprep.mubr.msk.f32.mxu0 %vm2139_vm8, %v4785_v35  ;;  %8946 = vmatprep.subr.bf16.mxu1 %v14043_v43 }
 0x53c   : > { %v4740_v13 = vadd.f32 %v12571_v16, %v4495_v3  ;;  %v6274_v3 = vld [vmem:[%s13994_s8 + $0xe8] sm:$0xff] }
 0x53e   : > { %v4786_v63 = vmax.f32 %v4740_v13, 0.0  ;;  %8948 = vmatpush1.bf16.msra.mxu1 %v8947_v41 }
 0x53f   : > { %8949 = vmatprep.subr.bf16.mxu1 %v14043_v43 }
 0x540   : > { %v4499_v60 = vpop.f32.mrb[56].mxu1  ;;  %8607 = vmatmul.mubr.msk.f32.gmra.mrb[116].mxu0 %vm2139_vm8, %v4786_v63  ;;  %v8560_v30 = vpop.f32.mrb[84].mxu0 }
 0x541   : > { %v4500_v16 = vadd.f32 %v12489_v12, %v4499_v60  ;;  %v4501_v25 = vpop.f32.mrb[57].mxu1  ;;  %v4980_v33 = vadd.f32 %v8560_v30, %v12755_v52  ;;  %v4974_v39 = vpop.f32.mrb[85].mxu0 }
 0x542   : > { %v4975_v19 = vadd.f32 %v12755_v52, %v4974_v39  ;;  %8951 = vmatpush1.bf16.msra.mxu1 %v8950_v8  ;;  %v5305_v39 = vld [vmem:[#allocation3 + $0x1] sm:$0xff] }
 0x543   : > { %v4745_v17 = vadd.f32 %v12579_v24, %v4500_v16  ;;  %v5154_v27 = vmax.f32 %v4980_v33, 0.0  ;;  %v6273_v24 = vld [vmem:[%s13994_s8 + $0xe0] sm:$0xff]  ;;  %8952 = vmatprep.subr.bf16.mxu1 %v14043_v43  ;;  %v8956_v16 = vpack.c.bf16 %v6276_v53, %v6275_v59  ;;  %v5306_v33 = vld [vmem:[#allocation3 + $0x9] sm:$0xff] }
 0x544   : > { %v5153_v44 = vmax.f32 %v4975_v19, 0.0  ;;  %v8563_v55 = vpop.f32.mrb[86].mxu0  ;;  %v8953_v5 = vpack.c.bf16 %v6274_v3, %v6273_v24 }
 0x545   : > { %v4787_v32 = vmax.f32 %v4745_v17, 0.0  ;;  %v4504_v51 = vpop.f32.mrb[58].mxu1  ;;  %v5198_v57 = vsel %vm2735_vm1, %v5154_v27, 0.0  ;;  %v4990_v37 = vadd.f32 %v8563_v55, %v12755_v52  ;;  %v4984_v6 = vpop.f32.mrb[87].mxu0  ;;  %vm14045_vm1 = vcmp.eq.s32.totalorder %v11650_v15, 1 }
 0x546   : > { %v4505_v48 = vadd.f32 %v12489_v12, %v4504_v51  ;;  %v4506_v35 = vpop.f32.mrb[59].mxu1  ;;  %5234 = vst.msk [vmem:[#allocation3 + $0x1b] sm:$0xff] %vm3930_vm5, %v5198_v57  ;;  %v5197_v61 = vsel %vm2734_vm2, %v5153_v44, 0.0  ;;  %v4985_v12 = vadd.f32 %v12755_v52, %v4984_v6  ;;  %8954 = vmatpush1.bf16.msra.mxu1 %v8953_v5  ;;  %vm14046_vm2 = vcmp.eq.s32.totalorder %v11675_v28, 1 }
 0x547   : > { %8609 = vmatprep.mubr.msk.f32.mxu0 %vm2139_vm8, %v4787_v32  ;;  %5233 = vst.msk [vmem:[#allocation3 + $0x13] sm:$0xff] %vm3930_vm5, %v5197_v61  ;;  %v5156_v62 = vmax.f32 %v4990_v37, 0.0  ;;  %8955 = vmatprep.subr.bf16.mxu1 %v14043_v43 }
 0x548   : > { %v4750_v46 = vadd.f32 %v12577_v21, %v4505_v48  ;;  %v5155_v13 = vmax.f32 %v4985_v12, 0.0  ;;  %v8566_v63 = vpop.f32.mrb[88].mxu0 }
 0x549   : > { %v5200_v50 = vsel %vm2737_vm4, %v5156_v62, 0.0  ;;  %v5000_v56 = vadd.f32 %v8566_v63, %v12755_v52  ;;  %v4994_v60 = vpop.f32.mrb[89].mxu0  ;;  %vm14048_vm4 = vcmp.eq.s32.totalorder %v11694_v2, 1 }
 0x54a   : > { %v4788_v41 = vmax.f32 %v4750_v46, 0.0  ;;  %5236 = vst.msk [vmem:[#allocation3 + $0x2b] sm:$0xff] %vm3930_vm5, %v5200_v50  ;;  %v5199_v25 = vsel %vm2736_vm3, %v5155_v13, 0.0  ;;  %v4995_v30 = vadd.f32 %v12755_v52, %v4994_v60  ;;  %8957 = vmatpush1.bf16.msra.mxu1 %v8956_v16  ;;  %vm14047_vm3 = vcmp.eq.s32.totalorder %v11673_v42, 1 }
 0x54b   : > { %5235 = vst.msk [vmem:[#allocation3 + $0x23] sm:$0xff] %vm3930_vm5, %v5199_v25  ;;  %v5158_v21 = vmax.f32 %v5000_v56, 0.0  ;;  %8958 = vmatprep.subr.bf16.mxu1 %v14043_v43 }
 0x54c   : > { %8610 = vmatmul.mubr.msk.f32.gmra.mrb[118].mxu0 %vm2139_vm8, %v4788_v41  ;;  %v5157_v7 = vmax.f32 %v4995_v30, 0.0  ;;  %vm14044_vm8 = vcmp.eq.s32.totalorder %v11652_v22, 1 }
 0x54d   : > { %v5202_v8 = vsel %vm2739_vm7, %v5158_v21, 0.0  ;;  %vm14050_vm7 = vcmp.eq.s32.totalorder %v11708_v58, 1 }
 0x54e   : > { %5238 = vst.msk [vmem:[#allocation3 + $0x3b] sm:$0xff] %vm3930_vm5, %v5202_v8  ;;  %v5201_v0 = vsel %vm2738_vm6, %v5157_v7, 0.0  ;;  %v12809_v17 = vld [vmem:[#allocation3 + $0x1a] sm:$0xff]  ;;  %v12811_v19 = vld [vmem:[#allocation3 + $0x12] sm:$0xff]  ;;  %vm14049_vm6 = vcmp.eq.s32.totalorder %v11692_v47, 1 }
 0x54f   : > { %5237 = vst.msk [vmem:[#allocation3 + $0x33] sm:$0xff] %vm3930_vm5, %v5201_v0  ;;  %v9780_v27 = vpack.i.bf16 %v5306_v33, %v12809_v17  ;;  %v9775_v32 = vpack.i.bf16 %v5305_v39, %v12811_v19  ;;  %v5308_v26 = vld [vmem:[#allocation3 + $0x19] sm:$0xff]  ;;  %v5307_v44 = vld [vmem:[#allocation3 + $0x11] sm:$0xff] }
 0x551   : > { %9781 = vrot.lane.b32.xlu0 %v9780_v27, %s10156_s26  ;;  %9776 = vrot.lane.b32.xlu1 %v9775_v32, %s10156_s26 }
 0x552   : > { %v5489_v23 = vld [vmem:[#allocation3 + $0x26] sm:$0xff] }
 0x553   : > { %v12819_v51 = vld [vmem:[#allocation3 + $0x2a] sm:$0xff]  ;;  %v12821_v55 = vld [vmem:[#allocation3 + $0x22] sm:$0xff]  ;;  %8628 = vmatprep.mubr.msk.f32.mxu0 %vm3930_vm5, %v5489_v23 }
 0x554   : > { %v9790_v57 = vpack.i.bf16 %v5308_v26, %v12819_v51  ;;  %v9785_v48 = vpack.i.bf16 %v5307_v44, %v12821_v55  ;;  %v5310_v37 = vld [vmem:[#allocation3 + $0x29] sm:$0xff]  ;;  %v5309_v61 = vld [vmem:[#allocation3 + $0x21] sm:$0xff] }
 0x556   : > { %9791 = vrot.lane.b32.xlu0 %v9790_v57, %s10156_s26  ;;  %9786 = vrot.lane.b32.xlu1 %v9785_v48, %s10156_s26  ;;  %v5490_v35 = vld [vmem:[#allocation3 + $0x2e] sm:$0xff]  ;;  %v5491_v6 = vld [vmem:[#allocation3 + $0x36] sm:$0xff] }
 0x557   : > { %v12828_v24 = vld [vmem:[#allocation3 + $0x3a] sm:$0xff]  ;;  %8629 = vmatmul.mubr.msk.f32.vlgmr.msra.gmra.mrb[120].mxu0 %vm3930_vm5, %v5490_v35  ;;  %v12832_v12 = vld [vmem:[#allocation3 + $0x32] sm:$0xff] }
 0x558   : > { %v9800_v3 = vpack.i.bf16 %v5310_v37, %v12828_v24  ;;  %8631 = vmatprep.mubr.msk.f32.mxu0 %vm3930_vm5, %v5491_v6  ;;  %v9795_v5 = vpack.i.bf16 %v5309_v61, %v12832_v12  ;;  %v5312_v56 = vld [vmem:[#allocation3 + $0x39] sm:$0xff]  ;;  %v5311_v21 = vld [vmem:[#allocation3 + $0x31] sm:$0xff] }
 0x55a   : > { %9801 = vrot.lane.b32.xlu0 %v9800_v3, %s10156_s26  ;;  %9796 = vrot.lane.b32.xlu1 %v9795_v5, %s10156_s26  ;;  %v8569_v59 = vpop.f32.mrb[90].mxu0 }
 0x55b   : > { %v5010_v53 = vadd.f32 %v8569_v59, %v12755_v52  ;;  %v5004_v46 = vpop.f32.mrb[91].mxu0 }
 0x55c   : > { %v5005_v62 = vadd.f32 %v12755_v52, %v5004_v46 }
 0x55d   : > { %v5160_v13 = vmax.f32 %v5010_v53, 0.0 }
 0x55e   : > { %v5159_v63 = vmax.f32 %v5005_v62, 0.0 }
 0x55f   : > { %v5204_v41 = vsel %vm2741_vm15, %v5160_v13, 0.0  ;;  %vm14051_vm15 = vcmp.eq.s32.totalorder %v11899_v29, 1 }
 0x560   : > { %5240 = vst.msk [vmem:[#allocation3 + $0x4b] sm:$0xff] %vm3930_vm5, %v5204_v41  ;;  %v5203_v50 = vsel %vm2740_vm14, %v5159_v63, 0.0  ;;  %vm5195_vm14 = vcmask 520192  }
 0x561   : > { %5239 = vst.msk [vmem:[#allocation3 + $0x43] sm:$0xff] %vm3930_vm5, %v5203_v50 }
 0x562   : > { %5196 = vst.msk [vmem:[#allocation3 + $0x143] sm:$0x1f] %vm5195_vm14, %v14042_v40 }
 0x568   : > { %v5492_v60 = vld [vmem:[#allocation3 + $0x3e] sm:$0xff]  ;;  %v5493_v16 = vld [vmem:[#allocation3 + $0x46] sm:$0xff] }
 0x569   : > { %v12846_v25 = vld [vmem:[#allocation3 + $0x4a] sm:$0xff]  ;;  %8632 = vmatmul.mubr.msk.f32.gmra.mrb[122].mxu0 %vm3930_vm5, %v5492_v60  ;;  %v12850_v7 = vld [vmem:[#allocation3 + $0x42] sm:$0xff] }
 0x56a   : > { %v9810_v30 = vpack.i.bf16 %v5312_v56, %v12846_v25  ;;  %v8572_v54 = vpop.f32.mrb[92].mxu0  ;;  %8634 = vmatprep.mubr.msk.f32.mxu0 %vm3930_vm5, %v5493_v16  ;;  %v9805_v49 = vpack.i.bf16 %v5311_v21, %v12850_v7  ;;  %v5314_v44 = vld [vmem:[#allocation3 + $0x49] sm:$0xff]  ;;  %v5313_v35 = vld [vmem:[#allocation3 + $0x41] sm:$0xff] }
 0x56b   : > { %v5020_v33 = vadd.f32 %v8572_v54, %v12755_v52  ;;  %v5014_v39 = vpop.f32.mrb[93].mxu0  ;;  %v5278_v45 = vld [vmem:[#allocation3 + $0x48] sm:$0xff] }
 0x56c   : > { %9811 = vrot.lane.b32.xlu0 %v9810_v30, %s10156_s26  ;;  %v5015_v8 = vadd.f32 %v12755_v52, %v5014_v39  ;;  %9806 = vrot.lane.b32.xlu1 %v9805_v49, %s10156_s26 }
 0x56d   : > { %v5162_v0 = vmax.f32 %v5020_v33, 0.0 }
 0x56e   : > { %v5161_v27 = vmax.f32 %v5015_v8, 0.0 }
 0x56f   : > { %v5206_v32 = vsel %vm2743_vm10, %v5162_v0, 0.0  ;;  %vm14053_vm10 = vcmp.eq.s32.totalorder %v11962_v20, 1  ;;  %v6283_v20 = vld [vmem:[%s13994_s8 + $0x130] sm:$0xff] }
 0x570   : > { %5242 = vst.msk [vmem:[#allocation3 + $0x5b] sm:$0xff] %vm3930_vm5, %v5206_v32  ;;  %v5205_v26 = vsel %vm2742_vm0, %v5161_v27, 0.0  ;;  %vm14052_vm0 = vcmp.eq.s32.totalorder %v11875_v14, 1 }
 0x571   : > { %5241 = vst.msk [vmem:[#allocation3 + $0x53] sm:$0xff] %vm3930_vm5, %v5205_v26 }
 0x578   : > { %v5494_v23 = vld [vmem:[#allocation3 + $0x4e] sm:$0xff]  ;;  %v5495_v57 = vld [vmem:[#allocation3 + $0x56] sm:$0xff] }
 0x579   : > { %v12864_v48 = vld [vmem:[#allocation3 + $0x5a] sm:$0xff]  ;;  %8635 = vmatmul.mubr.msk.f32.gmra.mrb[124].mxu0 %vm3930_vm5, %v5494_v23  ;;  %v12868_v6 = vld [vmem:[#allocation3 + $0x52] sm:$0xff] }
 0x57a   : > { %v9820_v37 = vpack.i.bf16 %v5314_v44, %v12864_v48  ;;  %v8575_v1 = vpop.f32.mrb[94].mxu0  ;;  %8637 = vmatprep.mubr.msk.f32.mxu0 %vm3930_vm5, %v5495_v57  ;;  %v9815_v4 = vpack.i.bf16 %v5313_v35, %v12868_v6  ;;  %v5316_v13 = vld [vmem:[#allocation3 + $0x59] sm:$0xff]  ;;  %v5315_v60 = vld [vmem:[#allocation3 + $0x51] sm:$0xff] }
 0x57b   : > { %v5030_v3 = vadd.f32 %v8575_v1, %v12755_v52  ;;  %v5024_v61 = vpop.f32.mrb[95].mxu0 }
 0x57c   : > { %9821 = vrot.lane.b32.xlu0 %v9820_v37, %s10156_s26  ;;  %v5025_v5 = vadd.f32 %v12755_v52, %v5024_v61  ;;  %9816 = vrot.lane.b32.xlu1 %v9815_v4, %s10156_s26 }
 0x57d   : > { %v5164_v59 = vmax.f32 %v5030_v3, 0.0 }
 0x57e   : > { %v5163_v53 = vmax.f32 %v5025_v5, 0.0 }
 0x57f   : > { %v5208_v46 = vsel %vm14044_vm8, %v5164_v59, 0.0  ;;  %vm14056_vm8 = vcmp.eq.s32.totalorder %v11989_v10, 1 }
 0x580   : > { %5244 = vst.msk [vmem:[#allocation3 + $0x6b] sm:$0xff] %vm3930_vm5, %v5208_v46  ;;  %v5207_v62 = vsel %vm14045_vm1, %v5163_v53, 0.0  ;;  %vm14057_vm1 = vcmp.eq.s32.totalorder %v12028_v38, 1 }
 0x581   : > { %5243 = vst.msk [vmem:[#allocation3 + $0x63] sm:$0xff] %vm3930_vm5, %v5207_v62 }
 0x588   : > { %v5496_v63 = vld [vmem:[#allocation3 + $0x5e] sm:$0xff]  ;;  %v5497_v41 = vld [vmem:[#allocation3 + $0x66] sm:$0xff] }
 0x589   : > { %v12882_v50 = vld [vmem:[#allocation3 + $0x6a] sm:$0xff]  ;;  %8638 = vmatmul.mubr.msk.f32.gmra.mrb[126].mxu0 %vm3930_vm5, %v5496_v63  ;;  %v12886_v16 = vld [vmem:[#allocation3 + $0x62] sm:$0xff] }
 0x58a   : > { %v9830_v56 = vpack.i.bf16 %v5316_v13, %v12882_v50  ;;  %v8578_v22 = vpop.f32.mrb[96].mxu0  ;;  %8640 = vmatprep.mubr.msk.f32.mxu0 %vm3930_vm5, %v5497_v41  ;;  %v9825_v15 = vpack.i.bf16 %v5315_v60, %v12886_v16  ;;  %v5318_v0 = vld [vmem:[#allocation3 + $0x69] sm:$0xff]  ;;  %v5317_v23 = vld [vmem:[#allocation3 + $0x61] sm:$0xff] }
 0x58b   : > { %v5040_v30 = vadd.f32 %v8578_v22, %v12755_v52  ;;  %v5034_v21 = vpop.f32.mrb[97].mxu0 }
 0x58c   : > { %9831 = vrot.lane.b32.xlu0 %v9830_v56, %s10156_s26  ;;  %v5035_v54 = vadd.f32 %v12755_v52, %v5034_v21  ;;  %9826 = vrot.lane.b32.xlu1 %v9825_v15, %s10156_s26 }
 0x58d   : > { %v5166_v49 = vmax.f32 %v5040_v30, 0.0 }
 0x58e   : > { %v5165_v33 = vmax.f32 %v5035_v54, 0.0 }
 0x58f   : > { %v5210_v39 = vsel %vm14046_vm2, %v5166_v49, 0.0  ;;  %vm14058_vm2 = vcmp.eq.s32.totalorder %v12026_v34, 1 }
 0x590   : > { %5246 = vst.msk [vmem:[#allocation3 + $0x7b] sm:$0xff] %vm3930_vm5, %v5210_v39  ;;  %v5209_v8 = vsel %vm14047_vm3, %v5165_v33, 0.0  ;;  %vm14059_vm3 = vcmp.eq.s32.totalorder %v12045_v11, 1  ;;  %v6297_v11 = vld [vmem:[%s13994_s8 + $0x1a0] sm:$0xff] }
 0x591   : > { %5245 = vst.msk [vmem:[#allocation3 + $0x73] sm:$0xff] %vm3930_vm5, %v5209_v8 }
 0x598   : > { %v5498_v27 = vld [vmem:[#allocation3 + $0x6e] sm:$0xff]  ;;  %v5499_v32 = vld [vmem:[#allocation3 + $0x76] sm:$0xff] }
 0x599   : > { %v12900_v26 = vld [vmem:[#allocation3 + $0x7a] sm:$0xff]  ;;  %8641 = vmatmul.mubr.msk.f32.gmra.mrb[128].mxu0 %vm3930_vm5, %v5498_v27  ;;  %v12904_v57 = vld [vmem:[#allocation3 + $0x72] sm:$0xff] }
 0x59a   : > { %v9840_v44 = vpack.i.bf16 %v5318_v0, %v12900_v26  ;;  %8643 = vmatprep.mubr.msk.f32.mxu0 %vm3930_vm5, %v5499_v32  ;;  %v9835_v28 = vpack.i.bf16 %v5317_v23, %v12904_v57  ;;  %v5320_v59 = vld [vmem:[#allocation3 + $0x79] sm:$0xff]  ;;  %v5319_v41 = vld [vmem:[#allocation3 + $0x71] sm:$0xff] }
 0x59c   : > { %9841 = vrot.lane.b32.xlu0 %v9840_v44, %s10156_s26  ;;  %9836 = vrot.lane.b32.xlu1 %v9835_v28, %s10156_s26 }
 0x59e   : > { %v8581_v42 = vpop.f32.mrb[98].mxu0 }
 0x59f   : > { %v5050_v37 = vadd.f32 %v8581_v42, %v12755_v52  ;;  %v5044_v35 = vpop.f32.mrb[99].mxu0 }
 0x5a0   : > { %v5045_v1 = vadd.f32 %v12755_v52, %v5044_v35 }
 0x5a1   : > { %v5168_v4 = vmax.f32 %v5050_v37, 0.0 }
 0x5a2   : > { %v5167_v3 = vmax.f32 %v5045_v1, 0.0 }
 0x5a3   : > { %v5212_v61 = vsel %vm14048_vm4, %v5168_v4, 0.0  ;;  %v5269_v4 = vld [vmem:[#allocation3] sm:$0xff] }
 0x5a4   : > { %5248 = vst.msk [vmem:[#allocation3 + $0x8b] sm:$0xff] %vm3930_vm5, %v5212_v61  ;;  %v5211_v5 = vsel %vm14049_vm6, %v5167_v3, 0.0 }
 0x5a5   : > { %5247 = vst.msk [vmem:[#allocation3 + $0x83] sm:$0xff] %vm3930_vm5, %v5211_v5  ;;  %v5341_v5 = vld [vmem:[#allocation3 + $0x2] sm:$0xff] }
 0x5ac   : > { %v5500_v53 = vld [vmem:[#allocation3 + $0x7e] sm:$0xff]  ;;  %v5501_v46 = vld [vmem:[#allocation3 + $0x86] sm:$0xff] }
 0x5ad   : > { %v12918_v62 = vld [vmem:[#allocation3 + $0x8a] sm:$0xff]  ;;  %8644 = vmatmul.mubr.msk.f32.gmra.mrb[130].mxu0 %vm3930_vm5, %v5500_v53  ;;  %v12922_v2 = vld [vmem:[#allocation3 + $0x82] sm:$0xff] }
 0x5ae   : > { %v9850_v63 = vpack.i.bf16 %v5320_v59, %v12918_v62  ;;  %8646 = vmatprep.mubr.msk.f32.mxu0 %vm3930_vm5, %v5501_v46  ;;  %v9845_v60 = vpack.i.bf16 %v5319_v41, %v12922_v2  ;;  %v5322_v49 = vld [vmem:[#allocation3 + $0x89] sm:$0xff]  ;;  %v5321_v0 = vld [vmem:[#allocation3 + $0x81] sm:$0xff]  ;;  %v6277_v59 = vld [vmem:[%s13994_s8 + $0x100] sm:$0xff] }
 0x5af   : > { %v8584_v13 = vpop.f32.mrb[100].mxu0  ;;  %v6278_v53 = vld [vmem:[%s13994_s8 + $0x108] sm:$0xff] }
 0x5b0   : > { %v5060_v56 = vadd.f32 %v8584_v13, %v12755_v52  ;;  %v5054_v47 = vpop.f32.mrb[101].mxu0  ;;  %9851 = vrot.lane.b32.xlu0 %v9850_v63, %s10156_s26  ;;  %9846 = vrot.lane.b32.xlu1 %v9845_v60, %s10156_s26  ;;  %v5342_v63 = vld [vmem:[#allocation3 + $0xa] sm:$0xff] }
 0x5b1   : > { %v5055_v22 = vadd.f32 %v12755_v52, %v5054_v47  ;;  %v6279_v60 = vld [vmem:[%s13994_s8 + $0x110] sm:$0xff] }
 0x5b2   : > { %v5170_v15 = vmax.f32 %v5060_v56, 0.0  ;;  %v8959_v56 = vpack.c.bf16 %v6278_v53, %v6277_v59 }
 0x5b3   : > { %v5169_v30 = vmax.f32 %v5055_v22, 0.0  ;;  %v6280_v22 = vld [vmem:[%s13994_s8 + $0x118] sm:$0xff] }
 0x5b4   : > { %v5214_v21 = vsel %vm2751_vm11, %v5170_v15, 0.0  ;;  %vm14054_vm11 = vcmp.eq.s32.totalorder %v11926_v36, 1 }
 0x5b5   : > { %5250 = vst.msk [vmem:[#allocation3 + $0x9b] sm:$0xff] %vm3930_vm5, %v5214_v21  ;;  %v5213_v54 = vsel %vm14050_vm7, %v5169_v30, 0.0  ;;  %v5270_v21 = vld [vmem:[#allocation3 + $0x8] sm:$0xff] }
 0x5b6   : > { %5249 = vst.msk [vmem:[#allocation3 + $0x93] sm:$0xff] %vm3930_vm5, %v5213_v54 }
 0x5bd   : > { %v5502_v33 = vld [vmem:[#allocation3 + $0x8e] sm:$0xff]  ;;  %v5503_v39 = vld [vmem:[#allocation3 + $0x96] sm:$0xff] }
 0x5be   : > { %v12937_v8 = vld [vmem:[#allocation3 + $0x9a] sm:$0xff]  ;;  %8647 = vmatmul.mubr.msk.f32.gmra.mrb[132].mxu0 %vm3930_vm5, %v5502_v33  ;;  %v12941_v27 = vld [vmem:[#allocation3 + $0x92] sm:$0xff] }
 0x5bf   : > { %v9860_v31 = vpack.i.bf16 %v5322_v49, %v12937_v8  ;;  %v8587_v32 = vpop.f32.mrb[102].mxu0  ;;  %8649 = vmatprep.mubr.msk.f32.mxu0 %vm3930_vm5, %v5503_v39  ;;  %v9855_v58 = vpack.i.bf16 %v5321_v0, %v12941_v27  ;;  %v8962_v0 = vpack.c.bf16 %v6280_v22, %v6279_v60  ;;  %v5272_v22 = vld [vmem:[#allocation3 + $0x18] sm:$0xff] }
 0x5c0   : > { %v5070_v44 = vadd.f32 %v8587_v32, %v12755_v52  ;;  %v5064_v40 = vpop.f32.mrb[103].mxu0  ;;  %v6281_v32 = vld [vmem:[%s13994_s8 + $0x120] sm:$0xff] }
 0x5c1   : > { %9861 = vrot.lane.b32.xlu0 %v9860_v31, %s10156_s26  ;;  %v5065_v23 = vadd.f32 %v12755_v52, %v5064_v40  ;;  %9856 = vrot.lane.b32.xlu1 %v9855_v58, %s10156_s26  ;;  %v5324_v31 = vld [vmem:[#allocation3 + $0x99] sm:$0xff] }
 0x5c2   : > { %v5172_v28 = vmax.f32 %v5070_v44, 0.0  ;;  %v6282_v58 = vld [vmem:[%s13994_s8 + $0x128] sm:$0xff] }
 0x5c3   : > { %v5171_v42 = vmax.f32 %v5065_v23, 0.0  ;;  %v9782_v35 = vpop.permute.xlu0 %9781  ;;  %v9777_v1 = vpop.permute.xlu1 %9776 }
 0x5c4   : > { %v5216_v37 = vsel %vm14051_vm15, %v5172_v28, 0.0  ;;  %v9779_v61 = vunpack.i.h.bf16 %v9777_v1  ;;  %v9783_v29 = vunpack.i.l.bf16 %v9782_v35  ;;  %v9778_v46 = vunpack.i.l.bf16 %v9777_v1 }
 0x5c5   : > { %5252 = vst.msk [vmem:[#allocation3 + $0xab] sm:$0xff] %vm3930_vm5, %v5216_v37  ;;  %v5215_v3 = vsel %vm14052_vm0, %v5171_v42, 0.0  ;;  %v9784_v47 = vunpack.i.h.bf16 %v9782_v35 }
 0x5c6   : > { %5251 = vst.msk [vmem:[#allocation3 + $0xa3] sm:$0xff] %vm3930_vm5, %v5215_v3  ;;  %v6101_v13 = vsel %vm3930_vm5, %v5269_v4, %v9779_v61  ;;  %v6137_v14 = vsel %vm3930_vm5, %v5341_v5, %v9778_v46  ;;  %v6138_v30 = vsel %vm3930_vm5, %v5342_v63, %v9783_v29  ;;  %v5323_v61 = vld [vmem:[#allocation3 + $0x91] sm:$0xff] }
 0x5c7   : > { %6496 = vmatprep.mubr.f32.mxu1 %v6137_v14  ;;  %v6102_v23 = vsel %vm3930_vm5, %v5270_v21, %v9784_v47 }
 0x5c8   : > { %v9787_v41 = vpop.permute.xlu1 %9786  ;;  %6497 = vmatmul.mubr.f32.vlgmr.msra.gmra.mrb[60].mxu1 %v6101_v13  ;;  %v9792_v54 = vpop.permute.xlu0 %9791  ;;  %v8965_v13 = vpack.c.bf16 %v6282_v58, %v6281_v32 }
 0x5c9   : > { %v9788_v15 = vunpack.i.l.bf16 %v9787_v41  ;;  %6501 = vmatprep.mubr.f32.mxu1 %v6138_v30  ;;  %8960 = vmatpush1.bf16.msra.mxu1 %v8959_v56  ;;  %v9789_v44 = vunpack.i.h.bf16 %v9787_v41  ;;  %v9793_v35 = vunpack.i.l.bf16 %v9792_v54  ;;  %v9794_v63 = vunpack.i.h.bf16 %v9792_v54  ;;  %v6284_v56 = vld [vmem:[%s13994_s8 + $0x138] sm:$0xff]  ;;  %v6285_v54 = vld [vmem:[%s13994_s8 + $0x140] sm:$0xff] }
 0x5ca   : > { %8961 = vmatprep.subr.bf16.mxu1 %v14043_v43 }
 0x5cb   : > { %v8590_v49 = vpop.f32.mrb[104].mxu0  ;;  %v6139_v4 = vsel %vm3930_vm5, %v12811_v19, %v9788_v15  ;;  %v5271_v19 = vld [vmem:[#allocation3 + $0x10] sm:$0xff]  ;;  %v6140_v36 = vsel %vm3930_vm5, %v12809_v17, %v9793_v35  ;;  %v8968_v15 = vpack.c.bf16 %v6284_v56, %v6283_v20  ;;  %v6104_v21 = vsel %vm3930_vm5, %v5272_v22, %v9794_v63  ;;  %v5274_v63 = vld [vmem:[#allocation3 + $0x28] sm:$0xff]  ;;  %v6290_v20 = vld [vmem:[%s13994_s8 + $0x168] sm:$0xff] }
 0x5cc   : > { %v5080_v33 = vadd.f32 %v8590_v49, %v12755_v52  ;;  %v5074_v39 = vpop.f32.mrb[105].mxu0  ;;  %6502 = vmatmul.mubr.f32.gmra.mrb[62].mxu1 %v6102_v23  ;;  %v9797_v53 = vpop.permute.xlu1 %9796  ;;  %v6103_v41 = vsel %vm3930_vm5, %v5271_v19, %v9789_v44  ;;  %v6286_v49 = vld [vmem:[%s13994_s8 + $0x148] sm:$0xff]  ;;  %v6288_v23 = vld [vmem:[%s13994_s8 + $0x158] sm:$0xff] }
 0x5cd   : > { %v5075_v40 = vadd.f32 %v12755_v52, %v5074_v39  ;;  %v5504_v28 = vld [vmem:[#allocation3 + $0x9e] sm:$0xff]  ;;  %v5505_v42 = vld [vmem:[#allocation3 + $0xa6] sm:$0xff]  ;;  %6506 = vmatprep.mubr.f32.mxu1 %v6139_v4  ;;  %8963 = vmatpush1.bf16.msra.mxu1 %v8962_v0  ;;  %v9798_v47 = vunpack.i.l.bf16 %v9797_v53  ;;  %v9802_v60 = vpop.permute.xlu0 %9801  ;;  %v9799_v30 = vunpack.i.h.bf16 %v9797_v53  ;;  %v8971_v44 = vpack.c.bf16 %v6286_v49, %v6285_v54 }
 0x5ce   : > { %v12979_v37 = vld [vmem:[#allocation3 + $0xaa] sm:$0xff]  ;;  %v5174_v1 = vmax.f32 %v5080_v33, 0.0  ;;  %8650 = vmatmul.mubr.msk.f32.gmra.mrb[134].mxu0 %vm3930_vm5, %v5504_v28  ;;  %v12986_v5 = vld [vmem:[#allocation3 + $0xa2] sm:$0xff]  ;;  %8964 = vmatprep.subr.bf16.mxu1 %v14043_v43  ;;  %v9803_v33 = vunpack.i.l.bf16 %v9802_v60  ;;  %v9804_v28 = vunpack.i.h.bf16 %v9802_v60 }
 0x5cf   : > { %v9870_v3 = vpack.i.bf16 %v5324_v31, %v12979_v37  ;;  %v5173_v59 = vmax.f32 %v5075_v40, 0.0  ;;  %8652 = vmatprep.mubr.msk.f32.mxu0 %vm3930_vm5, %v5505_v42  ;;  %v9865_v29 = vpack.i.bf16 %v5323_v61, %v12986_v5  ;;  %v6141_v17 = vsel %vm3930_vm5, %v12821_v55, %v9798_v47  ;;  %v5273_v31 = vld [vmem:[#allocation3 + $0x20] sm:$0xff]  ;;  %v5326_v58 = vld [vmem:[#allocation3 + $0xa9] sm:$0xff] }
 0x5d0   : > { %v5218_v46 = vsel %vm14053_vm10, %v5174_v1, 0.0  ;;  %6507 = vmatmul.mubr.f32.gmra.mrb[64].mxu1 %v6103_v41  ;;  %v6287_v40 = vld [vmem:[%s13994_s8 + $0x150] sm:$0xff]  ;;  %v6105_v42 = vsel %vm3930_vm5, %v5273_v31, %v9799_v30  ;;  %v6142_v61 = vsel %vm3930_vm5, %v12819_v51, %v9803_v33  ;;  %v6106_v41 = vsel %vm3930_vm5, %v5274_v63, %v9804_v28  ;;  %v6292_v30 = vld [vmem:[%s13994_s8 + $0x178] sm:$0xff] }
 0x5d1   : > { %9871 = vrot.lane.b32.xlu0 %v9870_v3, %s10156_s26  ;;  %5254 = vst.msk [vmem:[#allocation3 + $0xbb] sm:$0xff] %vm3930_vm5, %v5218_v46  ;;  %v5217_v14 = vsel %vm14054_vm11, %v5173_v59, 0.0  ;;  %9866 = vrot.lane.b32.xlu1 %v9865_v29, %s10156_s26  ;;  %v5325_v53 = vld [vmem:[#allocation3 + $0xa1] sm:$0xff]  ;;  %v8974_v51 = vpack.c.bf16 %v6288_v23, %v6287_v40  ;;  %v8977_v47 = vpack.c.bf16 %v6290_v20, %v6289_v9 }
 0x5d2   : > { %5253 = vst.msk [vmem:[#allocation3 + $0xb3] sm:$0xff] %vm3930_vm5, %v5217_v14  ;;  %6511 = vmatprep.mubr.f32.mxu1 %v6140_v36  ;;  %8966 = vmatpush1.bf16.msra.mxu1 %v8965_v13  ;;  %v6295_v20 = vld [vmem:[%s13994_s8 + $0x190] sm:$0xff] }
 0x5d3   : > { %8967 = vmatprep.subr.bf16.mxu1 %v14043_v43 }
 0x5d4   : > { %6512 = vmatmul.mubr.f32.gmra.mrb[66].mxu1 %v6104_v21  ;;  %v5275_v21 = vld [vmem:[#allocation3 + $0x30] sm:$0xff] }
 0x5d5   : > { %6516 = vmatprep.mubr.f32.mxu1 %v6141_v17 }
 0x5d6   : > { %8969 = vmatpush1.bf16.msra.mxu1 %v8968_v15  ;;  %v6291_v15 = vld [vmem:[%s13994_s8 + $0x170] sm:$0xff] }
 0x5d7   : > { %v8593_v39 = vpop.f32.mrb[106].mxu0  ;;  %8970 = vmatprep.subr.bf16.mxu1 %v14043_v43 }
 0x5d8   : > { %v5090_v0 = vadd.f32 %v8593_v39, %v12755_v52  ;;  %v5084_v32 = vpop.f32.mrb[107].mxu0  ;;  %6517 = vmatmul.mubr.f32.gmra.mrb[68].mxu1 %v6105_v42 }
 0x5d9   : > { %v5085_v55 = vadd.f32 %v12755_v52, %v5084_v32  ;;  %v5506_v35 = vld [vmem:[#allocation3 + $0xae] sm:$0xff]  ;;  %v5507_v1 = vld [vmem:[#allocation3 + $0xb6] sm:$0xff]  ;;  %6521 = vmatprep.mubr.f32.mxu1 %v6142_v61  ;;  %v8980_v32 = vpack.c.bf16 %v6292_v30, %v6291_v15 }
 0x5da   : > { %v13027_v4 = vld [vmem:[#allocation3 + $0xba] sm:$0xff]  ;;  %v5176_v3 = vmax.f32 %v5090_v0, 0.0  ;;  %8653 = vmatmul.mubr.msk.f32.gmra.mrb[136].mxu0 %vm3930_vm5, %v5506_v35  ;;  %v13034_v29 = vld [vmem:[#allocation3 + $0xb2] sm:$0xff]  ;;  %8972 = vmatpush1.bf16.msra.mxu1 %v8971_v44 }
 0x5db   : > { %v9880_v59 = vpack.i.bf16 %v5326_v58, %v13027_v4  ;;  %v5175_v46 = vmax.f32 %v5085_v55, 0.0  ;;  %8655 = vmatprep.mubr.msk.f32.mxu0 %vm3930_vm5, %v5507_v1  ;;  %v9875_v19 = vpack.i.bf16 %v5325_v53, %v13034_v29  ;;  %8973 = vmatprep.subr.bf16.mxu1 %v14043_v43  ;;  %v5328_v0 = vld [vmem:[#allocation3 + $0xb9] sm:$0xff]  ;;  %v5327_v42 = vld [vmem:[#allocation3 + $0xb1] sm:$0xff] }
 0x5dc   : > { %v5220_v13 = vsel %vm14055_vm12, %v5176_v3, 0.0  ;;  %6522 = vmatmul.mubr.f32.gmra.mrb[70].mxu1 %v6106_v41  ;;  %v5276_v3 = vld [vmem:[#allocation3 + $0x38] sm:$0xff] }
 0x5dd   : > { %9881 = vrot.lane.b32.xlu0 %v9880_v59, %s10156_s26  ;;  %5256 = vst.msk [vmem:[#allocation3 + $0xcb] sm:$0xff] %vm3930_vm5, %v5220_v13  ;;  %v5219_v14 = vsel %vm14056_vm8, %v5175_v46, 0.0  ;;  %9876 = vrot.lane.b32.xlu1 %v9875_v19, %s10156_s26  ;;  %v6293_v53 = vld [vmem:[%s13994_s8 + $0x180] sm:$0xff]  ;;  %v6294_v46 = vld [vmem:[%s13994_s8 + $0x188] sm:$0xff] }
 0x5de   : > { %5255 = vst.msk [vmem:[#allocation3 + $0xc3] sm:$0xff] %vm3930_vm5, %v5219_v14  ;;  %v9812_v56 = vpop.permute.xlu0 %9811  ;;  %v9807_v10 = vpop.permute.xlu1 %9806  ;;  %8975 = vmatpush1.bf16.msra.mxu1 %v8974_v51  ;;  %v8983_v38 = vpack.c.bf16 %v6294_v46, %v6293_v53 }
 0x5df   : > { %v9813_v36 = vunpack.i.l.bf16 %v9812_v56  ;;  %v9809_v60 = vunpack.i.h.bf16 %v9807_v10  ;;  %v9808_v22 = vunpack.i.l.bf16 %v9807_v10  ;;  %8976 = vmatprep.subr.bf16.mxu1 %v14043_v43  ;;  %v9814_v17 = vunpack.i.h.bf16 %v9812_v56  ;;  %v6296_v56 = vld [vmem:[%s13994_s8 + $0x198] sm:$0xff] }
 0x5e0   : > { %v8986_v30 = vpack.c.bf16 %v6296_v56, %v6295_v20 }
 0x5e1   : > { %v6143_v54 = vsel %vm3930_vm5, %v12832_v12, %v9808_v22  ;;  %v6107_v33 = vsel %vm3930_vm5, %v5275_v21, %v9809_v60  ;;  %v6144_v44 = vsel %vm3930_vm5, %v12828_v24, %v9813_v36  ;;  %v6108_v59 = vsel %vm3930_vm5, %v5276_v3, %v9814_v17 }
 0x5e2   : > { %6526 = vmatprep.mubr.f32.mxu1 %v6143_v54  ;;  %8978 = vmatpush1.bf16.msra.mxu1 %v8977_v47  ;;  %v5277_v54 = vld [vmem:[#allocation3 + $0x40] sm:$0xff] }
 0x5e3   : > { %v8596_v49 = vpop.f32.mrb[108].mxu0  ;;  %6527 = vmatmul.mubr.f32.gmra.mrb[72].mxu1 %v6107_v33  ;;  %8979 = vmatprep.subr.bf16.mxu1 %v14043_v43 }
 0x5e4   : > { %v5100_v39 = vadd.f32 %v8596_v49, %v12755_v52  ;;  %v5094_v31 = vpop.f32.mrb[109].mxu0  ;;  %6531 = vmatprep.mubr.f32.mxu1 %v6144_v44 }
 0x5e5   : > { %v5095_v58 = vadd.f32 %v12755_v52, %v5094_v31  ;;  %v5508_v40 = vld [vmem:[#allocation3 + $0xbe] sm:$0xff]  ;;  %v5509_v23 = vld [vmem:[#allocation3 + $0xc6] sm:$0xff] }
 0x5e6   : > { %v13068_v12 = vld [vmem:[#allocation3 + $0xca] sm:$0xff]  ;;  %v5178_v28 = vmax.f32 %v5100_v39, 0.0  ;;  %8656 = vmatmul.mubr.msk.f32.gmra.mrb[138].mxu0 %vm3930_vm5, %v5508_v40  ;;  %v13073_v35 = vld [vmem:[#allocation3 + $0xc2] sm:$0xff]  ;;  %8981 = vmatpush1.bf16.msra.mxu1 %v8980_v32 }
 0x5e7   : > { %v9890_v55 = vpack.i.bf16 %v5328_v0, %v13068_v12  ;;  %v5177_v1 = vmax.f32 %v5095_v58, 0.0  ;;  %8658 = vmatprep.mubr.msk.f32.mxu0 %vm3930_vm5, %v5509_v23  ;;  %v9885_v24 = vpack.i.bf16 %v5327_v42, %v13073_v35  ;;  %6532 = vmatmul.mubr.f32.gmra.mrb[74].mxu1 %v6108_v59  ;;  %v5330_v34 = vld [vmem:[#allocation3 + $0xc9] sm:$0xff]  ;;  %v5329_v33 = vld [vmem:[#allocation3 + $0xc1] sm:$0xff] }
 0x5e8   : > { %v5222_v61 = vsel %vm14057_vm1, %v5178_v28, 0.0  ;;  %8982 = vmatprep.subr.bf16.mxu1 %v14043_v43  ;;  %v6298_v28 = vld [vmem:[%s13994_s8 + $0x1a8] sm:$0xff] }
 0x5e9   : > { %9891 = vrot.lane.b32.xlu0 %v9890_v55, %s10156_s26  ;;  %5258 = vst.msk [vmem:[#allocation3 + $0xdb] sm:$0xff] %vm3930_vm5, %v5222_v61  ;;  %v5221_v19 = vsel %vm14058_vm2, %v5177_v1, 0.0  ;;  %9886 = vrot.lane.b32.xlu1 %v9885_v24, %s10156_s26  ;;  %v8989_v55 = vpack.c.bf16 %v6298_v28, %v6297_v11 }
 0x5ea   : > { %5257 = vst.msk [vmem:[#allocation3 + $0xd3] sm:$0xff] %vm3930_vm5, %v5221_v19  ;;  %8984 = vmatpush1.bf16.msra.mxu1 %v8983_v38 }
 0x5eb   : > { %8985 = vmatprep.subr.bf16.mxu1 %v14043_v43 }
 0x5ee   : > { %v9822_v13 = vpop.permute.xlu0 %9821  ;;  %v9817_v14 = vpop.permute.xlu1 %9816  ;;  %8987 = vmatpush1.bf16.msra.mxu1 %v8986_v30  ;;  %v6300_v30 = vld [vmem:[%s13994_s8 + $0x1b8] sm:$0xff] }
 0x5ef   : > { %v8599_v63 = vpop.f32.mrb[110].mxu0  ;;  %v9823_v51 = vunpack.i.l.bf16 %v9822_v13  ;;  %v9819_v10 = vunpack.i.h.bf16 %v9817_v14  ;;  %v9818_v47 = vunpack.i.l.bf16 %v9817_v14  ;;  %v9824_v58 = vunpack.i.h.bf16 %v9822_v13  ;;  %8988 = vmatprep.subr.bf16.mxu1 %v14043_v43 }
 0x5f0   : > { %v5110_v41 = vadd.f32 %v8599_v63, %v12755_v52  ;;  %v5104_v9 = vpop.f32.mrb[111].mxu0 }
 0x5f1   : > { %v5105_v36 = vadd.f32 %v12755_v52, %v5104_v9  ;;  %v5510_v60 = vld [vmem:[#allocation3 + $0xce] sm:$0xff]  ;;  %v5511_v22 = vld [vmem:[#allocation3 + $0xd6] sm:$0xff]  ;;  %v6145_v31 = vsel %vm3930_vm5, %v12850_v7, %v9818_v47  ;;  %v6109_v0 = vsel %vm3930_vm5, %v5277_v54, %v9819_v10  ;;  %v6146_v7 = vsel %vm3930_vm5, %v12846_v25, %v9823_v51 }
 0x5f2   : > { %v13102_v15 = vld [vmem:[#allocation3 + $0xda] sm:$0xff]  ;;  %v5180_v21 = vmax.f32 %v5110_v41, 0.0  ;;  %8659 = vmatmul.mubr.msk.f32.gmra.mrb[140].mxu0 %vm3930_vm5, %v5510_v60  ;;  %v13106_v17 = vld [vmem:[#allocation3 + $0xd2] sm:$0xff]  ;;  %6536 = vmatprep.mubr.f32.mxu1 %v6145_v31  ;;  %v6110_v23 = vsel %vm3930_vm5, %v5278_v45, %v9824_v58 }
 0x5f3   : > { %v9900_v49 = vpack.i.bf16 %v5330_v34, %v13102_v15  ;;  %v5179_v39 = vmax.f32 %v5105_v36, 0.0  ;;  %8661 = vmatprep.mubr.msk.f32.mxu0 %vm3930_vm5, %v5511_v22  ;;  %v9895_v32 = vpack.i.bf16 %v5329_v33, %v13106_v17  ;;  %6537 = vmatmul.mubr.f32.gmra.mrb[76].mxu1 %v6109_v0  ;;  %v5332_v3 = vld [vmem:[#allocation3 + $0xd9] sm:$0xff]  ;;  %v5331_v38 = vld [vmem:[#allocation3 + $0xd1] sm:$0xff]  ;;  %v14061_v34 = vld [vmem:[#allocation4_spill] sm:$0xff] }
 0x5f4   : > { %v5224_v44 = vsel %vm2761_vm13, %v5180_v21, 0.0  ;;  %6541 = vmatprep.mubr.f32.mxu1 %v6146_v7  ;;  %8990 = vmatpush1.bf16.msra.mxu1 %v8989_v55  ;;  %vm14060_vm13 = vcmp.eq.s32.totalorder %v12115_v18, 1  ;;  %vm14062_vm4 = vcmp.eq.s32.totalorder %v14061_v34, 1  ;;  %v5279_v36 = vld [vmem:[#allocation3 + $0x50] sm:$0xff]  ;;  %v6299_v22 = vld [vmem:[%s13994_s8 + $0x1b0] sm:$0xff]  ;;  %v5280_v33 = vld [vmem:[#allocation3 + $0x58] sm:$0xff] }
 0x5f5   : > { %9901 = vrot.lane.b32.xlu0 %v9900_v49, %s10156_s26  ;;  %5260 = vst.msk [vmem:[#allocation3 + $0xeb] sm:$0xff] %vm3930_vm5, %v5224_v44  ;;  %v5223_v40 = vsel %vm14059_vm3, %v5179_v39, 0.0  ;;  %9896 = vrot.lane.b32.xlu1 %v9895_v32, %s10156_s26  ;;  %v8992_v54 = vpack.c.bf16 %v6300_v30, %v6299_v22 }
 0x5f6   : > { %5259 = vst.msk [vmem:[#allocation3 + $0xe3] sm:$0xff] %vm3930_vm5, %v5223_v40  ;;  %8991 = vmatprep.subr.bf16.mxu1 %v14043_v43 }
 0x5f7   : > { %6542 = vmatmul.mubr.f32.gmra.mrb[78].mxu1 %v6110_v23 }
 0x5f8   : > { %8993 = vmatpush1.bf16.msra.mxu1 %v8992_v54 }
 0x5f9   : > { %8994 = vmatprep.subr.bf16.mxu1 %v14043_v43 }
 0x5fb   : > { %v8602_v42 = vpop.f32.mrb[112].mxu0 }
 0x5fc   : > { %v5120_v25 = vadd.f32 %v8602_v42, %v12755_v52  ;;  %v5114_v1 = vpop.f32.mrb[113].mxu0  ;;  %v14063_v42 = vld [vmem:[#allocation6_spill] sm:$0xff] }
 0x5fd   : > { %v5115_v24 = vadd.f32 %v12755_v52, %v5114_v1  ;;  %v5512_v61 = vld [vmem:[#allocation3 + $0xde] sm:$0xff]  ;;  %v5513_v59 = vld [vmem:[#allocation3 + $0xe6] sm:$0xff]  ;;  %vm14064_vm6 = vcmp.eq.s32.totalorder %v14063_v42, 1 }
 0x5fe   : > { %v13133_v53 = vld [vmem:[#allocation3 + $0xea] sm:$0xff]  ;;  %v5182_v46 = vmax.f32 %v5120_v25, 0.0  ;;  %8662 = vmatmul.mubr.msk.f32.gmra.mrb[142].mxu0 %vm3930_vm5, %v5512_v61  ;;  %v13138_v13 = vld [vmem:[#allocation3 + $0xe2] sm:$0xff]  ;;  %v9832_v51 = vpop.permute.xlu0 %9831  ;;  %v9827_v9 = vpop.permute.xlu1 %9826  ;;  %v6301_v25 = vld [vmem:[%s13994_s8 + $0x1c0] sm:$0xff] }
 0x5ff   : > { %v9910_v19 = vpack.i.bf16 %v5332_v3, %v13133_v53  ;;  %v5181_v63 = vmax.f32 %v5115_v24, 0.0  ;;  %8664 = vmatprep.mubr.msk.f32.mxu0 %vm3930_vm5, %v5513_v59  ;;  %v9905_v14 = vpack.i.bf16 %v5331_v38, %v13138_v13  ;;  %v9833_v56 = vunpack.i.l.bf16 %v9832_v51  ;;  %v5334_v32 = vld [vmem:[#allocation3 + $0xe9] sm:$0xff]  ;;  %v5333_v23 = vld [vmem:[#allocation3 + $0xe1] sm:$0xff] }
 0x600   : > { %v5226_v41 = vsel %vm14060_vm13, %v5182_v46, 0.0  ;;  %v9829_v10 = vunpack.i.h.bf16 %v9827_v9  ;;  %v9828_v47 = vunpack.i.l.bf16 %v9827_v9  ;;  %v9834_v21 = vunpack.i.h.bf16 %v9832_v51  ;;  %v6302_v1 = vld [vmem:[%s13994_s8 + $0x1c8] sm:$0xff]  ;;  %v14065_v3 = vld [vmem:[#allocation5_spill] sm:$0xff] }
 0x601   : > { %9911 = vrot.lane.b32.xlu0 %v9910_v19, %s10156_s26  ;;  %5262 = vst.msk [vmem:[#allocation3 + $0xfb] sm:$0xff] %vm3930_vm5, %v5226_v41  ;;  %v5225_v20 = vsel %vm14062_vm4, %v5181_v63, 0.0  ;;  %9906 = vrot.lane.b32.xlu1 %v9905_v14, %s10156_s26  ;;  %v6148_v49 = vsel %vm3930_vm5, %v12864_v48, %v9833_v56  ;;  %vm14066_vm7 = vcmp.eq.s32.totalorder %v14065_v3, 1  ;;  %v8995_v61 = vpack.c.bf16 %v6302_v1, %v6301_v25  ;;  %v5281_v51 = vld [vmem:[#allocation3 + $0x60] sm:$0xff] }
 0x602   : > { %5261 = vst.msk [vmem:[#allocation3 + $0xf3] sm:$0xff] %vm3930_vm5, %v5225_v20  ;;  %v6147_v18 = vsel %vm3930_vm5, %v12868_v6, %v9828_v47  ;;  %v6111_v60 = vsel %vm3930_vm5, %v5279_v36, %v9829_v10  ;;  %v6112_v31 = vsel %vm3930_vm5, %v5280_v33, %v9834_v21  ;;  %v10136_v20 = vld [vmem:[%s13993_s7] ss:$0 sm:$0xff]  ;;  %v6303_v36 = vld [vmem:[%s13994_s8 + $0x1d0] sm:$0xff] }
 0x603   : > { %6546 = vmatprep.mubr.f32.mxu1 %v6147_v18  ;;  %8996 = vmatpush1.bf16.msra.mxu1 %v8995_v61 }
 0x604   : > { %6547 = vmatmul.mubr.f32.gmra.mrb[80].mxu1 %v6111_v60  ;;  %8997 = vmatprep.subr.bf16.mxu1 %v14043_v43 }
 0x605   : > { %6551 = vmatprep.mubr.f32.mxu1 %v6148_v49 }
 0x607   : > { %v8605_v6 = vpop.f32.mrb[114].mxu0 }
 0x608   : > { %v5130_v39 = vadd.f32 %v8605_v6, %v12755_v52  ;;  %v5124_v0 = vpop.f32.mrb[115].mxu0  ;;  %6552 = vmatmul.mubr.f32.gmra.mrb[82].mxu1 %v6112_v31 }
 0x609   : > { %v5125_v58 = vadd.f32 %v12755_v52, %v5124_v0  ;;  %v5514_v44 = vld [vmem:[#allocation3 + $0xee] sm:$0xff]  ;;  %v5515_v40 = vld [vmem:[#allocation3 + $0xf6] sm:$0xff] }
 0x60a   : > { %v13165_v7 = vld [vmem:[#allocation3 + $0xfa] sm:$0xff]  ;;  %v5184_v48 = vmax.f32 %v5130_v39, 0.0  ;;  %8665 = vmatmul.mubr.msk.f32.gmra.mrb[144].mxu0 %vm3930_vm5, %v5514_v44  ;;  %v13169_v11 = vld [vmem:[#allocation3 + $0xf2] sm:$0xff]  ;;  %v5282_v0 = vld [vmem:[#allocation3 + $0x68] sm:$0xff] }
 0x60b   : > { %v9920_v45 = vpack.i.bf16 %v5334_v32, %v13165_v7  ;;  %v5183_v28 = vmax.f32 %v5125_v58, 0.0  ;;  %8667 = vmatprep.mubr.msk.f32.mxu0 %vm3930_vm5, %v5515_v40  ;;  %v9915_v55 = vpack.i.bf16 %v5333_v23, %v13169_v11  ;;  %v5336_v47 = vld [vmem:[#allocation3 + $0xf9] sm:$0xff]  ;;  %v5335_v33 = vld [vmem:[#allocation3 + $0xf1] sm:$0xff]  ;;  %v14067_v32 = vld [vmem:[#allocation8_spill] sm:$0xff] }
 0x60c   : > { %v5228_v52 = vsel %vm14064_vm6, %v5184_v48, 0.0  ;;  %vm14068_vm14 = vcmp.eq.s32.totalorder %v14067_v32, 1  ;;  %v14069_v40 = vld [vmem:[#allocation7_spill] sm:$0xff] }
 0x60d   : > { %9921 = vrot.lane.b32.xlu0 %v9920_v45, %s10156_s26  ;;  %5264 = vst.msk [vmem:[#allocation3 + $0x10b] sm:$0xff] %vm3930_vm5, %v5228_v52  ;;  %v5227_v24 = vsel %vm14066_vm7, %v5183_v28, 0.0  ;;  %9916 = vrot.lane.b32.xlu1 %v9915_v55, %s10156_s26  ;;  %vm14070_vm15 = vcmp.eq.s32.totalorder %v14069_v40, 1  ;;  %v6305_v45 = vld [vmem:[%s13994_s8 + $0x1e0] sm:$0xff]  ;;  %v6306_v23 = vld [vmem:[%s13994_s8 + $0x1e8] sm:$0xff] }
 0x60e   : > { %5263 = vst.msk [vmem:[#allocation3 + $0x103] sm:$0xff] %vm3930_vm5, %v5227_v24  ;;  %v9842_v59 = vpop.permute.xlu0 %9841  ;;  %v9837_v46 = vpop.permute.xlu1 %9836  ;;  %v9001_v28 = vpack.c.bf16 %v6306_v23, %v6305_v45  ;;  %v5454_v45 = vld [vmem:[#allocation3 + $0x2d] sm:$0xff]  ;;  %v5453_v23 = vld [vmem:[#allocation3 + $0x25] sm:$0xff] }
 0x60f   : > { %v9843_v19 = vunpack.i.l.bf16 %v9842_v59  ;;  %v9839_v38 = vunpack.i.h.bf16 %v9837_v46  ;;  %v9838_v63 = vunpack.i.l.bf16 %v9837_v46  ;;  %v9844_v34 = vunpack.i.h.bf16 %v9842_v59 }
 0x611   : > { %v6149_v14 = vsel %vm3930_vm5, %v12886_v16, %v9838_v63  ;;  %v6113_v9 = vsel %vm3930_vm5, %v5281_v51, %v9839_v38  ;;  %v6304_v16 = vld [vmem:[%s13994_s8 + $0x1d8] sm:$0xff]  ;;  %v6150_v60 = vsel %vm3930_vm5, %v12882_v50, %v9843_v19  ;;  %v6114_v44 = vsel %vm3930_vm5, %v5282_v0, %v9844_v34 }
 0x612   : > { %6556 = vmatprep.mubr.f32.mxu1 %v6149_v14  ;;  %v8998_v54 = vpack.c.bf16 %v6304_v16, %v6303_v36 }
 0x613   : > { %v8608_v41 = vpop.f32.mrb[116].mxu0  ;;  %6557 = vmatmul.mubr.f32.gmra.mrb[84].mxu1 %v6113_v9 }
 0x614   : > { %v5140_v56 = vadd.f32 %v10136_v20, %v8608_v41  ;;  %v5134_v10 = vpop.f32.mrb[117].mxu0  ;;  %6561 = vmatprep.mubr.f32.mxu1 %v6150_v60  ;;  %8999 = vmatpush1.bf16.msra.mxu1 %v8998_v54 }
 0x615   : > { %v5135_v18 = vadd.f32 %v10136_v20, %v5134_v10  ;;  %v5516_v22 = vld [vmem:[#allocation3 + $0xfe] sm:$0xff]  ;;  %v5517_v30 = vld [vmem:[#allocation3 + $0x106] sm:$0xff]  ;;  %9000 = vmatprep.subr.bf16.mxu1 %v14043_v43 }
 0x616   : > { %v13202_v21 = vld [vmem:[#allocation3 + $0x10a] sm:$0xff]  ;;  %v5186_v49 = vmax.f32 %v5140_v56, 0.0  ;;  %8668 = vmatmul.mubr.msk.f32.gmra.mrb[146].mxu0 %vm3930_vm5, %v5516_v22  ;;  %v13206_v39 = vld [vmem:[#allocation3 + $0x102] sm:$0xff] }
 0x617   : > { %v9930_v6 = vpack.i.bf16 %v5336_v47, %v13202_v21  ;;  %v5185_v31 = vmax.f32 %v5135_v18, 0.0  ;;  %8670 = vmatprep.mubr.msk.f32.mxu0 %vm3930_vm5, %v5517_v30  ;;  %v9925_v50 = vpack.i.bf16 %v5335_v33, %v13206_v39  ;;  %6562 = vmatmul.mubr.f32.gmra.mrb[86].mxu1 %v6114_v44  ;;  %v5338_v25 = vld [vmem:[#allocation3 + $0x109] sm:$0xff]  ;;  %v5337_v19 = vld [vmem:[#allocation3 + $0x101] sm:$0xff] }
 0x618   : > { %v5230_v58 = vsel %vm14068_vm14, %v5186_v49, 0.0  ;;  %9002 = vmatpush1.bf16.msra.mxu1 %v9001_v28  ;;  %v14072_v56 = vld [vmem:[#allocation9_spill] sm:$0xff] }
 0x619   : > { %9931 = vrot.lane.b32.xlu0 %v9930_v6, %s10156_s26  ;;  %5266 = vst.msk [vmem:[#allocation3 + $0x11b] sm:$0xff] %vm3930_vm5, %v5230_v58  ;;  %v5229_v48 = vsel %vm14070_vm15, %v5185_v31, 0.0  ;;  %9926 = vrot.lane.b32.xlu1 %v9925_v50, %s10156_s26  ;;  %vm14073_vm0 = vcmp.eq.s32.totalorder %v14072_v56, 1  ;;  %v5283_v18 = vld [vmem:[#allocation3 + $0x70] sm:$0xff]  ;;  %v5284_v6 = vld [vmem:[#allocation3 + $0x78] sm:$0xff] }
 0x61a   : > { %5265 = vst.msk [vmem:[#allocation3 + $0x113] sm:$0xff] %vm3930_vm5, %v5229_v48  ;;  %9003 = vmatprep.subr.bf16.mxu1 %v14043_v43  ;;  %v6307_v43 = vld [vmem:[%s13994_s8 + $0x1f0] sm:$0xff] }
 0x61f   : > { %v8611_v55 = vpop.f32.mrb[118].mxu0 }
 0x620   : > { %v5150_v42 = vadd.f32 %v10136_v20, %v8611_v55  ;;  %v5144_v52 = vpop.f32.mrb[119].mxu0  ;;  %v5416_v55 = vld [vmem:[#allocation3 + $0x1c] sm:$0xff] }
 0x621   : > { %v5145_v1 = vadd.f32 %v10136_v20, %v5144_v52  ;;  %v5518_v3 = vld [vmem:[#allocation3 + $0x10e] sm:$0xff]  ;;  %v5519_v24 = vld [vmem:[#allocation3 + $0x116] sm:$0xff]  ;;  %v9960_v52 = vpack.i.bf16 %v5416_v55, %v5454_v45 }
 0x622   : > { %v13226_v61 = vld [vmem:[#allocation3 + $0x11a] sm:$0xff]  ;;  %v5188_v59 = vmax.f32 %v5150_v42, 0.0  ;;  %8671 = vmatmul.mubr.msk.f32.gmra.mrb[148].mxu0 %vm3930_vm5, %v5518_v3  ;;  %v13231_v38 = vld [vmem:[#allocation3 + $0x112] sm:$0xff]  ;;  %v9852_v51 = vpop.permute.xlu0 %9851  ;;  %v9847_v34 = vpop.permute.xlu1 %9846 }
 0x623   : > { %v9940_v46 = vpack.i.bf16 %v5338_v25, %v13226_v61  ;;  %v5187_v63 = vmax.f32 %v5145_v1, 0.0  ;;  %8673 = vmatprep.mubr.msk.f32.mxu0 %vm3930_vm5, %v5519_v24  ;;  %v9935_v14 = vpack.i.bf16 %v5337_v19, %v13231_v38  ;;  %v6308_v20 = vld [vmem:[%s13994_s8 + $0x1f8] sm:$0xff]  ;;  %v9853_v47 = vunpack.i.l.bf16 %v9852_v51  ;;  %v5340_v50 = vld [vmem:[#allocation3 + $0x119] sm:$0xff] }
 0x624   : > { %v5232_v9 = vsel %vm2769_vm9, %v5188_v59, 0.0  ;;  %v9849_v36 = vunpack.i.h.bf16 %v9847_v34  ;;  %v9848_v16 = vunpack.i.l.bf16 %v9847_v34  ;;  %v9004_v60 = vpack.c.bf16 %v6308_v20, %v6307_v43  ;;  %v5339_v40 = vld [vmem:[#allocation3 + $0x111] sm:$0xff]  ;;  %v5456_v24 = vld [vmem:[#allocation3 + $0x3d] sm:$0xff] }
 0x625   : > { %9941 = vrot.lane.b32.xlu0 %v9940_v46, %s10156_s26  ;;  %5268 = vst.msk [vmem:[#allocation3 + $0x12b] sm:$0xff] %vm3930_vm5, %v5232_v9  ;;  %v5231_v10 = vsel %vm14073_vm0, %v5187_v63, 0.0  ;;  %9936 = vrot.lane.b32.xlu1 %v9935_v14, %s10156_s26  ;;  %v9854_v54 = vunpack.i.h.bf16 %v9852_v51  ;;  %v6152_v49 = vsel %vm3930_vm5, %v12900_v26, %v9853_v47  ;;  %v5415_v25 = vld [vmem:[#allocation3 + $0x14] sm:$0xff]  ;;  %v5285_v51 = vld [vmem:[#allocation3 + $0x80] sm:$0xff]  ;;  %v13266_v14 = vld [vmem:[#allocation3 + $0x2c] sm:$0xff] }
 0x626   : > { %5267 = vst.msk [vmem:[#allocation3 + $0x123] sm:$0xff] %vm3930_vm5, %v5231_v10  ;;  %v6151_v22 = vsel %vm3930_vm5, %v12904_v57, %v9848_v16  ;;  %v6115_v30 = vsel %vm3930_vm5, %v5283_v18, %v9849_v36  ;;  %9005 = vmatpush1.bf16.msra.mxu1 %v9004_v60  ;;  %v9955_v3 = vpack.i.bf16 %v5415_v25, %v5453_v23  ;;  %v5455_v63 = vld [vmem:[#allocation3 + $0x35] sm:$0xff]  ;;  %v13272_v43 = vld [vmem:[#allocation3 + $0x24] sm:$0xff]  ;;  %v5458_v10 = vld [vmem:[#allocation3 + $0x4d] sm:$0xff] }
 0x627   : > { %6566 = vmatprep.mubr.f32.mxu1 %v6151_v22  ;;  %v6116_v31 = vsel %vm3930_vm5, %v5284_v6, %v9854_v54  ;;  %v9970_v34 = vpack.i.bf16 %v13266_v14, %v5456_v24  ;;  %v9965_v56 = vpack.i.bf16 %v13272_v43, %v5455_v63  ;;  %v5457_v36 = vld [vmem:[#allocation3 + $0x45] sm:$0xff]  ;;  %v13282_v60 = vld [vmem:[#allocation3 + $0x34] sm:$0xff]  ;;  %v5460_v54 = vld [vmem:[#allocation3 + $0x5d] sm:$0xff] }
 0x628   : > { %6567 = vmatmul.mubr.f32.gmra.mrb[88].mxu1 %v6115_v30  ;;  %v5286_v16 = vld [vmem:[#allocation3 + $0x88] sm:$0xff]  ;;  %v9975_v30 = vpack.i.bf16 %v13282_v60, %v5457_v36  ;;  %v13303_v45 = vld [vmem:[#allocation3 + $0x54] sm:$0xff]  ;;  %v5464_v55 = vld [vmem:[#allocation3 + $0x7d] sm:$0xff] }
 0x629   : > { %6571 = vmatprep.mubr.f32.mxu1 %v6152_v49  ;;  %v13288_v49 = vld [vmem:[#allocation3 + $0x4c] sm:$0xff]  ;;  %v13314_v63 = vld [vmem:[#allocation3 + $0x64] sm:$0xff] }
 0x62a   : > { %v13254_v33 = vpop.f32.mrb[120].mxu0  ;;  %v13308_v24 = vld [vmem:[#allocation3 + $0x6c] sm:$0xff] }
 0x62b   : > { %v13257_v0 = vpop.f32.mrb[121].mxu0 }
 0x62c   : > { %6572 = vmatmul.mubr.f32.gmra.mrb[90].mxu1 %v6116_v31  ;;  %v5522_v28 = vld [vmem:[#allocation3 + $0x12e] sm:$0xff]  ;;  %v9990_v31 = vpack.i.bf16 %v13288_v49, %v5460_v54 }
 0x62d   : > { %v5520_v57 = vld [vmem:[#allocation3 + $0x11e] sm:$0xff]  ;;  %v5521_v32 = vld [vmem:[#allocation3 + $0x126] sm:$0xff] }
 0x62e   : > { %v5378_v58 = vld [vmem:[#allocation3 + $0x12a] sm:$0xff]  ;;  %8674 = vmatmul.mubr.msk.f32.gmra.mrb[150].mxu0 %vm3930_vm5, %v5520_v57  ;;  %v5377_v48 = vld [vmem:[#allocation3 + $0x122] sm:$0xff] }
 0x62f   : > { %v9950_v44 = vpack.i.bf16 %v5340_v50, %v5378_v58  ;;  %8676 = vmatprep.mubr.msk.f32.mxu0 %vm3930_vm5, %v5521_v32  ;;  %v9945_v26 = vpack.i.bf16 %v5339_v40, %v5377_v48  ;;  %v13293_v50 = vld [vmem:[#allocation3 + $0x44] sm:$0xff]  ;;  %v5462_v58 = vld [vmem:[#allocation3 + $0x6d] sm:$0xff]  ;;  %v13300_v40 = vld [vmem:[#allocation3 + $0x5c] sm:$0xff] }
 0x631   : > { %9951 = vrot.lane.b32.xlu0 %v9950_v44, %s10156_s26  ;;  %9946 = vrot.lane.b32.xlu1 %v9945_v26, %s10156_s26  ;;  %v5461_v44 = vld [vmem:[#allocation3 + $0x65] sm:$0xff]  ;;  %v10000_v26 = vpack.i.bf16 %v13300_v40, %v5462_v58 }
 0x632   : > { %8677 = vmatmul.mubr.msk.f32.gmra.mrb[152].mxu0 %vm3930_vm5, %v5522_v28  ;;  %v9995_v28 = vpack.i.bf16 %v13303_v45, %v5461_v44 }
 0x633   : > { %v9862_v42 = vpop.permute.xlu0 %9861  ;;  %v9857_v1 = vpop.permute.xlu1 %9856 }
 0x634   : > { %v9863_v59 = vunpack.i.l.bf16 %v9862_v42  ;;  %v9859_v46 = vunpack.i.h.bf16 %v9857_v1  ;;  %v9858_v19 = vunpack.i.l.bf16 %v9857_v1  ;;  %v9864_v20 = vunpack.i.h.bf16 %v9862_v42  ;;  %v5463_v1 = vld [vmem:[#allocation3 + $0x75] sm:$0xff] }
 0x635   : > { %9961 = vrot.lane.b32.xlu0 %v9960_v52, %s10156_s26  ;;  %9956 = vrot.lane.b32.xlu1 %v9955_v3, %s10156_s26  ;;  %v5287_v3 = vld [vmem:[#allocation3 + $0x90] sm:$0xff] }
 0x636   : > { %v6153_v41 = vsel %vm3930_vm5, %v12922_v2, %v9858_v19  ;;  %v6117_v9 = vsel %vm3930_vm5, %v5285_v51, %v9859_v46  ;;  %v6154_v47 = vsel %vm3930_vm5, %v12918_v62, %v9863_v59  ;;  %v13279_v2 = vld [vmem:[#allocation3 + $0x3c] sm:$0xff]  ;;  %v6118_v22 = vsel %vm3930_vm5, %v5286_v16, %v9864_v20  ;;  %v5465_v20 = vld [vmem:[#allocation3 + $0x85] sm:$0xff] }
 0x637   : > { %6576 = vmatprep.mubr.f32.mxu1 %v6153_v41  ;;  %v9980_v18 = vpack.i.bf16 %v13279_v2, %v5458_v10  ;;  %v5459_v62 = vld [vmem:[#allocation3 + $0x55] sm:$0xff]  ;;  %v10010_v19 = vpack.i.bf16 %v13308_v24, %v5464_v55  ;;  %v10005_v41 = vpack.i.bf16 %v13314_v63, %v5463_v1  ;;  %v5469_v55 = vld [vmem:[#allocation3 + $0xa5] sm:$0xff] }
 0x638   : > { %6577 = vmatmul.mubr.f32.gmra.mrb[92].mxu1 %v6117_v9  ;;  %v9985_v32 = vpack.i.bf16 %v13293_v50, %v5459_v62  ;;  %v5466_v9 = vld [vmem:[#allocation3 + $0x8d] sm:$0xff] }
 0x639   : > { %9971 = vrot.lane.b32.xlu0 %v9970_v34, %s10156_s26  ;;  %9966 = vrot.lane.b32.xlu1 %v9965_v56, %s10156_s26  ;;  %v5288_v56 = vld [vmem:[#allocation3 + $0x98] sm:$0xff] }
 0x63a   : > { %6581 = vmatprep.mubr.f32.mxu1 %v6154_v47  ;;  %v13324_v47 = vld [vmem:[#allocation3 + $0x74] sm:$0xff] }
 0x63b   : > { %v10015_v16 = vpack.i.bf16 %v13324_v47, %v5465_v20 }
 0x63c   : > { %6582 = vmatmul.mubr.f32.gmra.mrb[94].mxu1 %v6118_v22  ;;  %v13290_v6 = vpop.f32.mrb[122].mxu0  ;;  %v13330_v22 = vld [vmem:[#allocation3 + $0x8c] sm:$0xff] }
 0x63d   : > { %9981 = vrot.lane.b32.xlu0 %v9980_v18, %s10156_s26  ;;  %9976 = vrot.lane.b32.xlu1 %v9975_v30, %s10156_s26  ;;  %v13295_v57 = vpop.f32.mrb[123].mxu0  ;;  %v5468_v18 = vld [vmem:[#allocation3 + $0x9d] sm:$0xff] }
 0x63e   : > { %v10030_v62 = vpack.i.bf16 %v13330_v22, %v5468_v18  ;;  %v13364_v18 = vld [vmem:[#allocation3 + $0xbc] sm:$0xff] }
 0x641   : > { %9991 = vrot.lane.b32.xlu0 %v9990_v31, %s10156_s26  ;;  %9986 = vrot.lane.b32.xlu1 %v9985_v32, %s10156_s26  ;;  %v13335_v31 = vld [vmem:[#allocation3 + $0x84] sm:$0xff] }
 0x643   : > { %v9872_v48 = vpop.permute.xlu0 %9871  ;;  %v9867_v23 = vpop.permute.xlu1 %9866 }
 0x644   : > { %v9873_v42 = vunpack.i.l.bf16 %v9872_v48  ;;  %v9869_v52 = vunpack.i.h.bf16 %v9867_v23  ;;  %v9868_v25 = vunpack.i.l.bf16 %v9867_v23  ;;  %v9874_v51 = vunpack.i.h.bf16 %v9872_v48  ;;  %v5470_v48 = vld [vmem:[#allocation3 + $0xad] sm:$0xff] }
 0x645   : > { %10001 = vrot.lane.b32.xlu0 %v10000_v26, %s10156_s26  ;;  %9996 = vrot.lane.b32.xlu1 %v9995_v28, %s10156_s26 }
 0x646   : > { %v6155_v59 = vsel %vm3930_vm5, %v12941_v27, %v9868_v25  ;;  %v6119_v46 = vsel %vm3930_vm5, %v5287_v3, %v9869_v52  ;;  %v6156_v34 = vsel %vm3930_vm5, %v12937_v8, %v9873_v42  ;;  %v13321_v27 = vld [vmem:[#allocation3 + $0x7c] sm:$0xff]  ;;  %v6120_v36 = vsel %vm3930_vm5, %v5288_v56, %v9874_v51  ;;  %v13358_v56 = vld [vmem:[#allocation3 + $0xa4] sm:$0xff] }
 0x647   : > { %6586 = vmatprep.mubr.f32.mxu1 %v6155_v59  ;;  %v10020_v10 = vpack.i.bf16 %v13321_v27, %v5466_v9  ;;  %v5467_v8 = vld [vmem:[#allocation3 + $0x95] sm:$0xff]  ;;  %v5289_v42 = vld [vmem:[#allocation3 + $0xa0] sm:$0xff] }
 0x648   : > { %6587 = vmatmul.mubr.f32.gmra.mrb[96].mxu1 %v6119_v46  ;;  %v10025_v44 = vpack.i.bf16 %v13335_v31, %v5467_v8  ;;  %v13342_v52 = vld [vmem:[#allocation3 + $0x9c] sm:$0xff]  ;;  %v13348_v59 = vld [vmem:[#allocation3 + $0x94] sm:$0xff] }
 0x649   : > { %10011 = vrot.lane.b32.xlu0 %v10010_v19, %s10156_s26  ;;  %10006 = vrot.lane.b32.xlu1 %v10005_v41, %s10156_s26  ;;  %v10040_v3 = vpack.i.bf16 %v13342_v52, %v5470_v48  ;;  %v10035_v19 = vpack.i.bf16 %v13348_v59, %v5469_v55  ;;  %v5472_v51 = vld [vmem:[#allocation3 + $0xbd] sm:$0xff]  ;;  %v5471_v9 = vld [vmem:[#allocation3 + $0xb5] sm:$0xff] }
 0x64a   : > { %6591 = vmatprep.mubr.f32.mxu1 %v6156_v34  ;;  %v5290_v34 = vld [vmem:[#allocation3 + $0xa8] sm:$0xff]  ;;  %v5476_v48 = vld [vmem:[#allocation3 + $0xdd] sm:$0xff]  ;;  %v5475_v55 = vld [vmem:[#allocation3 + $0xd5] sm:$0xff] }
 0x64c   : > { %6592 = vmatmul.mubr.f32.gmra.mrb[98].mxu1 %v6120_v36  ;;  %v13332_v30 = vpop.f32.mrb[124].mxu0  ;;  %v10045_v36 = vpack.i.bf16 %v13358_v56, %v5471_v9 }
 0x64d   : > { %10021 = vrot.lane.b32.xlu0 %v10020_v10, %s10156_s26  ;;  %10016 = vrot.lane.b32.xlu1 %v10015_v16, %s10156_s26  ;;  %14074 = vst [vmem:[#allocation4_spill] sm:$0xff] %v13332_v30  ;;  %v13337_v32 = vpop.f32.mrb[125].mxu0  ;;  %v5474_v16 = vld [vmem:[#allocation3 + $0xcd] sm:$0xff] }
 0x64f   : > { %v9882_v54 = vpop.permute.xlu0 %9881  ;;  %v9877_v58 = vpop.permute.xlu1 %9876 }
 0x650   : > { %v9883_v26 = vunpack.i.l.bf16 %v9882_v54  ;;  %v9879_v23 = vunpack.i.h.bf16 %v9877_v58  ;;  %v9878_v28 = vunpack.i.l.bf16 %v9877_v58  ;;  %v9884_v46 = vunpack.i.h.bf16 %v9882_v54 }
 0x651   : > { %10031 = vrot.lane.b32.xlu0 %v10030_v62, %s10156_s26  ;;  %10026 = vrot.lane.b32.xlu1 %v10025_v44, %s10156_s26  ;;  %v10060_v54 = vpack.i.bf16 %v13364_v18, %v5474_v16  ;;  %v13367_v62 = vld [vmem:[#allocation3 + $0xb4] sm:$0xff] }
 0x652   : > { %v6157_v25 = vsel %vm3930_vm5, %v12986_v5, %v9878_v28  ;;  %v6121_v1 = vsel %vm3930_vm5, %v5289_v42, %v9879_v23  ;;  %v6158_v41 = vsel %vm3930_vm5, %v12979_v37, %v9883_v26  ;;  %v13355_v5 = vld [vmem:[#allocation3 + $0xac] sm:$0xff]  ;;  %v6122_v10 = vsel %vm3930_vm5, %v5290_v34, %v9884_v46  ;;  %v5292_v16 = vld [vmem:[#allocation3 + $0xb8] sm:$0xff] }
 0x653   : > { %6596 = vmatprep.mubr.f32.mxu1 %v6157_v25  ;;  %v10050_v20 = vpack.i.bf16 %v13355_v5, %v5472_v51  ;;  %v5473_v37 = vld [vmem:[#allocation3 + $0xc5] sm:$0xff]  ;;  %v5291_v42 = vld [vmem:[#allocation3 + $0xb0] sm:$0xff] }
 0x654   : > { %6597 = vmatmul.mubr.f32.gmra.mrb[100].mxu1 %v6121_v1  ;;  %v10055_v44 = vpack.i.bf16 %v13367_v62, %v5473_v37  ;;  %v13372_v25 = vld [vmem:[#allocation3 + $0xcc] sm:$0xff]  ;;  %v13380_v51 = vld [vmem:[#allocation3 + $0xc4] sm:$0xff] }
 0x655   : > { %10041 = vrot.lane.b32.xlu0 %v10040_v3, %s10156_s26  ;;  %10036 = vrot.lane.b32.xlu1 %v10035_v19, %s10156_s26  ;;  %v10070_v19 = vpack.i.bf16 %v13372_v25, %v5476_v48  ;;  %v10065_v34 = vpack.i.bf16 %v13380_v51, %v5475_v55  ;;  %v13398_v48 = vld [vmem:[#allocation3 + $0xec] sm:$0xff] }
 0x656   : > { %6601 = vmatprep.mubr.f32.mxu1 %v6158_v41 }
 0x658   : > { %6602 = vmatmul.mubr.f32.gmra.mrb[102].mxu1 %v6122_v10 }
 0x659   : > { %10051 = vrot.lane.b32.xlu0 %v10050_v20, %s10156_s26  ;;  %10046 = vrot.lane.b32.xlu1 %v10045_v36, %s10156_s26  ;;  %v5478_v20 = vld [vmem:[#allocation3 + $0xed] sm:$0xff]  ;;  %v13389_v36 = vld [vmem:[#allocation3 + $0xdc] sm:$0xff] }
 0x65a   : > { %v10080_v37 = vpack.i.bf16 %v13389_v36, %v5478_v20  ;;  %v5293_v20 = vld [vmem:[#allocation3 + $0xc0] sm:$0xff] }
 0x65b   : > { %v9892_v8 = vpop.permute.xlu0 %9891  ;;  %v9887_v58 = vpop.permute.xlu1 %9886 }
 0x65c   : > { %v9893_v26 = vunpack.i.l.bf16 %v9892_v8  ;;  %v9889_v23 = vunpack.i.h.bf16 %v9887_v58  ;;  %v9888_v28 = vunpack.i.l.bf16 %v9887_v58  ;;  %v13374_v1 = vpop.f32.mrb[126].mxu0  ;;  %v9894_v41 = vunpack.i.h.bf16 %v9892_v8  ;;  %v13392_v8 = vld [vmem:[#allocation3 + $0xd4] sm:$0xff] }
 0x65d   : > { %10061 = vrot.lane.b32.xlu0 %v10060_v54, %s10156_s26  ;;  %10056 = vrot.lane.b32.xlu1 %v10055_v44, %s10156_s26  ;;  %14075 = vst [vmem:[#allocation6_spill] sm:$0xff] %v13374_v1  ;;  %v13382_v9 = vpop.f32.mrb[127].mxu0  ;;  %v5480_v44 = vld [vmem:[#allocation3 + $0xfd] sm:$0xff] }
 0x65e   : > { %v6159_v3 = vsel %vm3930_vm5, %v13034_v29, %v9888_v28  ;;  %v6123_v46 = vsel %vm3930_vm5, %v5291_v42, %v9889_v23  ;;  %14076 = vst [vmem:[#allocation5_spill] sm:$0xff] %v13382_v9  ;;  %v6160_v10 = vsel %vm3930_vm5, %v13027_v4, %v9893_v26  ;;  %v5477_v29 = vld [vmem:[#allocation3 + $0xe5] sm:$0xff]  ;;  %v6124_v54 = vsel %vm3930_vm5, %v5292_v16, %v9894_v41  ;;  %v5479_v4 = vld [vmem:[#allocation3 + $0xf5] sm:$0xff] }
 0x65f   : > { %6606 = vmatprep.mubr.f32.mxu1 %v6159_v3  ;;  %v10075_v58 = vpack.i.bf16 %v13392_v8, %v5477_v29  ;;  %v10090_v23 = vpack.i.bf16 %v13398_v48, %v5480_v44  ;;  %v13401_v28 = vld [vmem:[#allocation3 + $0xe4] sm:$0xff]  ;;  %v5482_v3 = vld [vmem:[#allocation3 + $0x10d] sm:$0xff] }
 0x660   : > { %6607 = vmatmul.mubr.f32.gmra.mrb[104].mxu1 %v6123_v46  ;;  %v10085_v42 = vpack.i.bf16 %v13401_v28, %v5479_v4  ;;  %v5484_v4 = vld [vmem:[#allocation3 + $0x11d] sm:$0xff] }
 0x661   : > { %10071 = vrot.lane.b32.xlu0 %v10070_v19, %s10156_s26  ;;  %10066 = vrot.lane.b32.xlu1 %v10065_v34, %s10156_s26  ;;  %v5481_v34 = vld [vmem:[#allocation3 + $0x105] sm:$0xff] }
 0x662   : > { %6611 = vmatprep.mubr.f32.mxu1 %v6160_v10  ;;  %v13406_v10 = vld [vmem:[#allocation3 + $0xfc] sm:$0xff] }
 0x664   : > { %6612 = vmatmul.mubr.f32.gmra.mrb[106].mxu1 %v6124_v54  ;;  %v13412_v54 = vld [vmem:[#allocation3 + $0xf4] sm:$0xff] }
 0x665   : > { %10081 = vrot.lane.b32.xlu0 %v10080_v37, %s10156_s26  ;;  %10076 = vrot.lane.b32.xlu1 %v10075_v58, %s10156_s26  ;;  %v10100_v37 = vpack.i.bf16 %v13406_v10, %v5482_v3  ;;  %v10095_v44 = vpack.i.bf16 %v13412_v54, %v5481_v34  ;;  %v5294_v3 = vld [vmem:[#allocation3 + $0xc8] sm:$0xff] }
 0x667   : > { %v9902_v26 = vpop.permute.xlu0 %9901  ;;  %v9897_v55 = vpop.permute.xlu1 %9896 }
 0x668   : > { %v9903_v46 = vunpack.i.l.bf16 %v9902_v26  ;;  %v9899_v19 = vunpack.i.h.bf16 %v9897_v55  ;;  %v9898_v41 = vunpack.i.l.bf16 %v9897_v55  ;;  %v9904_v58 = vunpack.i.h.bf16 %v9902_v26  ;;  %v5483_v55 = vld [vmem:[#allocation3 + $0x115] sm:$0xff] }
 0x669   : > { %10091 = vrot.lane.b32.xlu0 %v10090_v23, %s10156_s26  ;;  %10086 = vrot.lane.b32.xlu1 %v10085_v42, %s10156_s26 }
 0x66a   : > { %v6161_v29 = vsel %vm3930_vm5, %v13073_v35, %v9898_v41  ;;  %v6125_v16 = vsel %vm3930_vm5, %v5293_v20, %v9899_v19  ;;  %v6162_v23 = vsel %vm3930_vm5, %v13068_v12, %v9903_v46  ;;  %v13419_v35 = vld [vmem:[#allocation3 + $0x10c] sm:$0xff]  ;;  %v13424_v19 = vld [vmem:[#allocation3 + $0x104] sm:$0xff]  ;;  %v6126_v34 = vsel %vm3930_vm5, %v5294_v3, %v9904_v58  ;;  %v13430_v12 = vld [vmem:[#allocation3 + $0x11c] sm:$0xff] }
 0x66b   : > { %6616 = vmatprep.mubr.f32.mxu1 %v6161_v29  ;;  %v10110_v26 = vpack.i.bf16 %v13419_v35, %v5484_v4  ;;  %v10105_v20 = vpack.i.bf16 %v13424_v19, %v5483_v55  ;;  %v5486_v46 = vld [vmem:[#allocation3 + $0x12d] sm:$0xff]  ;;  %v5485_v29 = vld [vmem:[#allocation3 + $0x125] sm:$0xff]  ;;  %v5488_v55 = vld [vmem:[#allocation3 + $0x13d] sm:$0xff] }
 0x66c   : > { %6617 = vmatmul.mubr.f32.gmra.mrb[108].mxu1 %v6125_v16  ;;  %v13421_v42 = vpop.f32.mrb[128].mxu0  ;;  %v13438_v58 = vld [vmem:[#allocation3 + $0x12c] sm:$0xff] }
 0x66d   : > { %10101 = vrot.lane.b32.xlu0 %v10100_v37, %s10156_s26  ;;  %10096 = vrot.lane.b32.xlu1 %v10095_v44, %s10156_s26  ;;  %14077 = vst [vmem:[#allocation8_spill] sm:$0xff] %v13421_v42  ;;  %v13426_v41 = vpop.f32.mrb[129].mxu0  ;;  %v10120_v37 = vpack.i.bf16 %v13430_v12, %v5486_v46  ;;  %v13435_v44 = vld [vmem:[#allocation3 + $0x114] sm:$0xff] }
 0x66e   : > { %6621 = vmatprep.mubr.f32.mxu1 %v6162_v23  ;;  %14078 = vst [vmem:[#allocation7_spill] sm:$0xff] %v13426_v41  ;;  %v10115_v23 = vpack.i.bf16 %v13435_v44, %v5485_v29  ;;  %v10130_v29 = vpack.i.bf16 %v13438_v58, %v5488_v55 }
 0x670   : > { %6622 = vmatmul.mubr.f32.gmra.mrb[110].mxu1 %v6126_v34  ;;  %v5487_v34 = vld [vmem:[#allocation3 + $0x135] sm:$0xff] }
 0x671   : > { %10111 = vrot.lane.b32.xlu0 %v10110_v26, %s10156_s26  ;;  %10106 = vrot.lane.b32.xlu1 %v10105_v20, %s10156_s26  ;;  %v13441_v26 = vld [vmem:[#allocation3 + $0x124] sm:$0xff]  ;;  %v5295_v20 = vld [vmem:[#allocation3 + $0xd0] sm:$0xff] }
 0x672   : > { %v10125_v30 = vpack.i.bf16 %v13441_v26, %v5487_v34 }
 0x673   : > { %v9912_v16 = vpop.permute.xlu0 %9911  ;;  %v9907_v4 = vpop.permute.xlu1 %9906 }
 0x674   : > { %v9913_v3 = vunpack.i.l.bf16 %v9912_v16  ;;  %v9909_v42 = vunpack.i.h.bf16 %v9907_v4  ;;  %v9908_v41 = vunpack.i.l.bf16 %v9907_v4  ;;  %v9914_v9 = vunpack.i.h.bf16 %v9912_v16  ;;  %v5296_v4 = vld [vmem:[#allocation3 + $0xd8] sm:$0xff] }
 0x675   : > { %10121 = vrot.lane.b32.xlu0 %v10120_v37, %s10156_s26  ;;  %10116 = vrot.lane.b32.xlu1 %v10115_v23, %s10156_s26 }
 0x676   : > { %v6163_v46 = vsel %vm3930_vm5, %v13106_v17, %v9908_v41  ;;  %v6127_v1 = vsel %vm3930_vm5, %v5295_v20, %v9909_v42  ;;  %v6164_v37 = vsel %vm3930_vm5, %v13102_v15, %v9913_v3  ;;  %v6128_v17 = vsel %vm3930_vm5, %v5296_v4, %v9914_v9  ;;  %v5297_v20 = vld [vmem:[#allocation3 + $0xe0] sm:$0xff] }
 0x677   : > { %6626 = vmatprep.mubr.f32.mxu1 %v6163_v46  ;;  %v5298_v46 = vld [vmem:[#allocation3 + $0xe8] sm:$0xff] }
 0x678   : > { %6627 = vmatmul.mubr.f32.gmra.mrb[112].mxu1 %v6127_v1 }
 0x679   : > { %10131 = vrot.lane.b32.xlu0 %v10130_v29, %s10156_s26  ;;  %10126 = vrot.lane.b32.xlu1 %v10125_v30, %s10156_s26 }
 0x67a   : > { %6631 = vmatprep.mubr.f32.mxu1 %v6164_v37 }
 0x67c   : > { %6632 = vmatmul.mubr.f32.gmra.mrb[114].mxu1 %v6128_v17 }
 0x67f   : > { %v9922_v42 = vpop.permute.xlu0 %9921  ;;  %v9917_v41 = vpop.permute.xlu1 %9916 }
 0x680   : > { %v9923_v23 = vunpack.i.l.bf16 %v9922_v42  ;;  %v9919_v16 = vunpack.i.h.bf16 %v9917_v41  ;;  %v9918_v55 = vunpack.i.l.bf16 %v9917_v41  ;;  %v13454_v34 = vpop.f32.mrb[130].mxu0  ;;  %v9924_v3 = vunpack.i.h.bf16 %v9922_v42 }
 0x681   : > { %v13459_v30 = vpop.f32.mrb[131].mxu0 }
 0x682   : > { %v6165_v1 = vsel %vm3930_vm5, %v13138_v13, %v9918_v55  ;;  %v6129_v15 = vsel %vm3930_vm5, %v5297_v20, %v9919_v16  ;;  %v6166_v9 = vsel %vm3930_vm5, %v13133_v53, %v9923_v23  ;;  %v6130_v29 = vsel %vm3930_vm5, %v5298_v46, %v9924_v3  ;;  %v5299_v55 = vld [vmem:[#allocation3 + $0xf0] sm:$0xff] }
 0x683   : > { %6636 = vmatprep.mubr.f32.mxu1 %v6165_v1 }
 0x684   : > { %6637 = vmatmul.mubr.f32.gmra.mrb[116].mxu1 %v6129_v15  ;;  %v5300_v15 = vld [vmem:[#allocation3 + $0xf8] sm:$0xff] }
 0x685   : > { %6641 = vmatprep.mubr.f32.mxu1 %v6166_v9 }
 0x688   : > { %6642 = vmatmul.mubr.f32.gmra.mrb[118].mxu1 %v6130_v29 }
 0x68b   : > { %v9932_v37 = vpop.permute.xlu0 %9931  ;;  %v9927_v4 = vpop.permute.xlu1 %9926 }
 0x68c   : > { %v9933_v17 = vunpack.i.l.bf16 %v9932_v37  ;;  %v9929_v41 = vunpack.i.h.bf16 %v9927_v4  ;;  %v9928_v13 = vunpack.i.l.bf16 %v9927_v4  ;;  %v9934_v20 = vunpack.i.h.bf16 %v9932_v37  ;;  %v5301_v37 = vld [vmem:[#allocation3 + $0x100] sm:$0xff] }
 0x68e   : > { %v6167_v42 = vsel %vm3930_vm5, %v13169_v11, %v9928_v13  ;;  %v6131_v16 = vsel %vm3930_vm5, %v5299_v55, %v9929_v41  ;;  %v6168_v53 = vsel %vm3930_vm5, %v13165_v7, %v9933_v17  ;;  %v6132_v3 = vsel %vm3930_vm5, %v5300_v15, %v9934_v20  ;;  %v5302_v55 = vld [vmem:[#allocation3 + $0x108] sm:$0xff] }
 0x68f   : > { %6646 = vmatprep.mubr.f32.mxu1 %v6167_v42 }
 0x690   : > { %6647 = vmatmul.mubr.f32.gmra.mrb[120].mxu1 %v6131_v16 }
 0x691   : > { %6651 = vmatprep.mubr.f32.mxu1 %v6168_v53  ;;  %v13469_v23 = vpop.f32.mrb[132].mxu0 }
 0x692   : > { %v13471_v1 = vpop.f32.mrb[133].mxu0 }
 0x694   : > { %6652 = vmatmul.mubr.f32.gmra.mrb[122].mxu1 %v6132_v3 }
 0x697   : > { %v9942_v9 = vpop.permute.xlu0 %9941  ;;  %v9937_v46 = vpop.permute.xlu1 %9936 }
 0x698   : > { %v9943_v11 = vunpack.i.l.bf16 %v9942_v9  ;;  %v9939_v29 = vunpack.i.h.bf16 %v9937_v46  ;;  %v9938_v4 = vunpack.i.l.bf16 %v9937_v46  ;;  %v9944_v17 = vunpack.i.h.bf16 %v9942_v9  ;;  %v5303_v9 = vld [vmem:[#allocation3 + $0x110] sm:$0xff] }
 0x69a   : > { %v6169_v41 = vsel %vm3930_vm5, %v13206_v39, %v9938_v4  ;;  %v6133_v7 = vsel %vm3930_vm5, %v5301_v37, %v9939_v29  ;;  %v6170_v13 = vsel %vm3930_vm5, %v13202_v21, %v9943_v11  ;;  %v6134_v42 = vsel %vm3930_vm5, %v5302_v55, %v9944_v17  ;;  %v5304_v17 = vld [vmem:[#allocation3 + $0x118] sm:$0xff] }
 0x69b   : > { %6656 = vmatprep.mubr.f32.mxu1 %v6169_v41 }
 0x69c   : > { %6657 = vmatmul.mubr.f32.gmra.mrb[124].mxu1 %v6133_v7 }
 0x69d   : > { %6661 = vmatprep.mubr.f32.mxu1 %v6170_v13 }
 0x6a0   : > { %6662 = vmatmul.mubr.f32.gmra.mrb[126].mxu1 %v6134_v42 }
 0x6a1   : > { %v13480_v16 = vpop.f32.mrb[134].mxu0 }
 0x6a2   : > { %v13482_v20 = vpop.f32.mrb[135].mxu0 }
 0x6a3   : > { %v9952_v53 = vpop.permute.xlu0 %9951  ;;  %v9947_v15 = vpop.permute.xlu1 %9946 }
 0x6a4   : > { %v9953_v39 = vunpack.i.l.bf16 %v9952_v53  ;;  %v9949_v3 = vunpack.i.h.bf16 %v9947_v15  ;;  %v9948_v46 = vunpack.i.l.bf16 %v9947_v15  ;;  %v9954_v11 = vunpack.i.h.bf16 %v9952_v53 }
 0x6a6   : > { %v6171_v29 = vsel %vm3930_vm5, %v13231_v38, %v9948_v46  ;;  %v6135_v21 = vsel %vm3930_vm5, %v5303_v9, %v9949_v3  ;;  %v6172_v41 = vsel %vm3930_vm5, %v13226_v61, %v9953_v39  ;;  %v6136_v55 = vsel %vm3930_vm5, %v5304_v17, %v9954_v11  ;;  %v5379_v46 = vld [vmem:[#allocation3 + $0x13] sm:$0xff]  ;;  %v5380_v11 = vld [vmem:[#allocation3 + $0x1b] sm:$0xff] }
 0x6a7   : > { %v9957_v4 = vpop.permute.xlu1 %9956  ;;  %6666 = vmatprep.mubr.f32.mxu1 %v6171_v29  ;;  %v9962_v7 = vpop.permute.xlu0 %9961 }
 0x6a8   : > { %v9958_v37 = vunpack.i.l.bf16 %v9957_v4  ;;  %6667 = vmatmul.mubr.f32.gmra.mrb[128].mxu1 %v6135_v21  ;;  %v9959_v13 = vunpack.i.h.bf16 %v9957_v4  ;;  %v9963_v42 = vunpack.i.l.bf16 %v9962_v7  ;;  %v9964_v9 = vunpack.i.h.bf16 %v9962_v7  ;;  %v5381_v7 = vld [vmem:[#allocation3 + $0x23] sm:$0xff] }
 0x6a9   : > { %6671 = vmatprep.mubr.f32.mxu1 %v6172_v41 }
 0x6aa   : > { %v6209_v38 = vsel %vm3930_vm5, %v13272_v43, %v9958_v37  ;;  %v6173_v61 = vsel %vm3930_vm5, %v5379_v46, %v9959_v13  ;;  %v6210_v29 = vsel %vm3930_vm5, %v13266_v14, %v9963_v42  ;;  %v6174_v43 = vsel %vm3930_vm5, %v5380_v11, %v9964_v9  ;;  %v5523_v42 = vld [vmem:[#allocation3 + $0x136] sm:$0xff]  ;;  %v5524_v9 = vld [vmem:[#allocation3 + $0x13e] sm:$0xff] }
 0x6ab   : > { %v9967_v15 = vpop.permute.xlu1 %9966  ;;  %v9972_v21 = vpop.permute.xlu0 %9971  ;;  %8679 = vmatprep.mubr.msk.f32.mxu0 %vm3930_vm5, %v5523_v42  ;;  %v7203_v11 = vld [vmem:[%s13996_s10] sm:$0xff] }
 0x6ac   : > { %6672 = vmatmul.mubr.f32.gmra.mrb[130].mxu1 %v6136_v55  ;;  %v9968_v39 = vunpack.i.l.bf16 %v9967_v15  ;;  %v9969_v4 = vunpack.i.h.bf16 %v9967_v15  ;;  %v9973_v37 = vunpack.i.l.bf16 %v9972_v21  ;;  %v9974_v13 = vunpack.i.h.bf16 %v9972_v21  ;;  %8680 = vmatmul.mubr.msk.f32.gmra.mrb[154].mxu0 %vm3930_vm5, %v5524_v9  ;;  %v5384_v9 = vld [vmem:[#allocation3 + $0x3b] sm:$0xff] }
 0x6ad   : > { %6741 = vmatprep.mubr.f32.mxu1 %v6209_v38  ;;  %v13492_v53 = vpop.f32.mrb[136].mxu0 }
 0x6ae   : > { %v13494_v3 = vpop.f32.mrb[137].mxu0  ;;  %v6211_v41 = vsel %vm3930_vm5, %v13282_v60, %v9968_v39  ;;  %v6175_v55 = vsel %vm3930_vm5, %v5381_v7, %v9969_v4  ;;  %v6212_v14 = vsel %vm3930_vm5, %v13279_v2, %v9973_v37  ;;  %v7204_v4 = vld [vmem:[%s13996_s10 + $0x8] sm:$0xff] }
 0x6af   : > { %v9977_v17 = vpop.permute.xlu1 %9976  ;;  %v9982_v15 = vpop.permute.xlu0 %9981 }
 0x6b0   : > { %6742 = vmatmul.mubr.f32.vlgmr.msra.gmra.mrb[60].mxu1 %v6173_v61  ;;  %v9978_v38 = vunpack.i.l.bf16 %v9977_v17  ;;  %v5382_v61 = vld [vmem:[#allocation3 + $0x2b] sm:$0xff]  ;;  %v9979_v39 = vunpack.i.h.bf16 %v9977_v17  ;;  %v9983_v21 = vunpack.i.l.bf16 %v9982_v15 }
 0x6b1   : > { %6746 = vmatprep.mubr.f32.mxu1 %v6210_v29  ;;  %v6176_v29 = vsel %vm3930_vm5, %v5382_v61, %v9974_v13  ;;  %v7206_v17 = vld [vmem:[%s13996_s10 + $0x18] sm:$0xff]  ;;  %v9984_v13 = vunpack.i.h.bf16 %v9982_v15 }
 0x6b2   : > { %v6213_v2 = vsel %vm3930_vm5, %v13293_v50, %v9978_v38  ;;  %v5383_v50 = vld [vmem:[#allocation3 + $0x33] sm:$0xff] }
 0x6b3   : > { %v9987_v37 = vpop.permute.xlu1 %9986  ;;  %v9992_v42 = vpop.permute.xlu0 %9991 }
 0x6b4   : > { %6747 = vmatmul.mubr.f32.gmra.mrb[62].mxu1 %v6174_v43  ;;  %v7205_v43 = vld [vmem:[%s13996_s10 + $0x10] sm:$0xff]  ;;  %v9988_v38 = vunpack.i.l.bf16 %v9987_v37  ;;  %v9989_v61 = vunpack.i.h.bf16 %v9987_v37 }
 0x6b5   : > { %6751 = vmatprep.mubr.f32.mxu1 %v6211_v41  ;;  %v9022_v41 = vpack.c.bf16 %v7204_v4, %v7203_v11  ;;  %v9026_v7 = vpack.c.bf16 %v7206_v17, %v7205_v43 }
 0x6b6   : > { %v6215_v15 = vsel %vm3930_vm5, %v13303_v45, %v9988_v38 }
 0x6b7   : > { %9023 = vmatprep.subr.bf16.mxu0 %v9022_v41  ;;  %v10002_v17 = vpop.permute.xlu0 %10001 }
 0x6b8   : > { %6752 = vmatmul.mubr.f32.gmra.mrb[64].mxu1 %v6175_v55  ;;  %v6177_v55 = vsel %vm3930_vm5, %v5383_v50, %v9979_v39  ;;  %9025 = vmatpush3.bf16.msra.mxu0 %v9022_v41  ;;  %v9997_v39 = vpop.permute.xlu1 %9996  ;;  %v5386_v50 = vld [vmem:[#allocation3 + $0x4b] sm:$0xff] }
 0x6b9   : > { %6756 = vmatprep.mubr.f32.mxu1 %v6212_v14  ;;  %v13505_v46 = vpop.f32.mrb[138].mxu0  ;;  %v6214_v14 = vsel %vm3930_vm5, %v13288_v49, %v9983_v21  ;;  %9027 = vmatprep.subr.bf16.mxu0 %v9026_v7  ;;  %v5385_v49 = vld [vmem:[#allocation3 + $0x43] sm:$0xff]  ;;  %v9994_v21 = vunpack.i.h.bf16 %v9992_v42  ;;  %v9998_v41 = vunpack.i.l.bf16 %v9997_v39  ;;  %v9999_v45 = vunpack.i.h.bf16 %v9997_v39  ;;  %v5388_v39 = vld [vmem:[#allocation3 + $0x5b] sm:$0xff] }
 0x6ba   : > { %v13508_v60 = vpop.f32.mrb[139].mxu0  ;;  %v6179_v43 = vsel %vm3930_vm5, %v5385_v49, %v9989_v61 }
 0x6bc   : > { %6757 = vmatmul.mubr.f32.gmra.mrb[66].mxu1 %v6176_v29  ;;  %v6178_v29 = vsel %vm3930_vm5, %v5384_v9, %v9984_v13  ;;  %9029 = vmatpush3.bf16.msra.mxu0 %v9026_v7  ;;  %v6180_v7 = vsel %vm3930_vm5, %v5386_v50, %v9994_v21  ;;  %v10003_v13 = vunpack.i.l.bf16 %v10002_v17  ;;  %v10007_v38 = vpop.permute.xlu1 %10006 }
 0x6bd   : > { %6761 = vmatprep.mubr.f32.mxu1 %v6213_v2  ;;  %v9993_v2 = vunpack.i.l.bf16 %v9992_v42  ;;  %v10004_v42 = vunpack.i.h.bf16 %v10002_v17  ;;  %v10008_v61 = vunpack.i.l.bf16 %v10007_v38  ;;  %v10009_v49 = vunpack.i.h.bf16 %v10007_v38 }
 0x6bf   : > { %v6216_v37 = vsel %vm3930_vm5, %v13300_v40, %v9993_v2  ;;  %v6218_v40 = vsel %vm3930_vm5, %v13308_v24, %v10003_v13  ;;  %v5390_v13 = vld [vmem:[#allocation3 + $0x6b] sm:$0xff] }
 0x6c0   : > { %6762 = vmatmul.mubr.f32.gmra.mrb[68].mxu1 %v6177_v55  ;;  %v6217_v55 = vsel %vm3930_vm5, %v13314_v63, %v9998_v41  ;;  %v6182_v63 = vsel %vm3930_vm5, %v5388_v39, %v10004_v42  ;;  %v10017_v41 = vpop.permute.xlu1 %10016 }
 0x6c1   : > { %6766 = vmatprep.mubr.f32.mxu1 %v6214_v14  ;;  %v5387_v14 = vld [vmem:[#allocation3 + $0x53] sm:$0xff]  ;;  %v10018_v50 = vunpack.i.l.bf16 %v10017_v41 }
 0x6c2   : > { %v6181_v9 = vsel %vm3930_vm5, %v5387_v14, %v9999_v45 }
 0x6c4   : > { %6767 = vmatmul.mubr.f32.gmra.mrb[70].mxu1 %v6178_v29  ;;  %v10012_v29 = vpop.permute.xlu0 %10011  ;;  %v10027_v42 = vpop.permute.xlu1 %10026 }
 0x6c5   : > { %6771 = vmatprep.mubr.f32.mxu1 %v6215_v15  ;;  %v13532_v11 = vpop.f32.mrb[140].mxu0  ;;  %v10013_v21 = vunpack.i.l.bf16 %v10012_v29  ;;  %v10014_v17 = vunpack.i.h.bf16 %v10012_v29  ;;  %v10028_v39 = vunpack.i.l.bf16 %v10027_v42 }
 0x6c6   : > { %v13534_v4 = vpop.f32.mrb[141].mxu0 }
 0x6c7   : > { %v6220_v45 = vsel %vm3930_vm5, %v13321_v27, %v10013_v21  ;;  %v6184_v38 = vsel %vm3930_vm5, %v5390_v13, %v10014_v17  ;;  %v5392_v21 = vld [vmem:[#allocation3 + $0x7b] sm:$0xff] }
 0x6c8   : > { %6772 = vmatmul.mubr.f32.gmra.mrb[72].mxu1 %v6179_v43  ;;  %v6219_v43 = vsel %vm3930_vm5, %v13324_v47, %v10008_v61  ;;  %v6221_v47 = vsel %vm3930_vm5, %v13335_v31, %v10018_v50  ;;  %v10037_v17 = vpop.permute.xlu1 %10036 }
 0x6c9   : > { %6776 = vmatprep.mubr.f32.mxu1 %v6216_v37  ;;  %v5389_v37 = vld [vmem:[#allocation3 + $0x63] sm:$0xff] }
 0x6ca   : > { %v6183_v24 = vsel %vm3930_vm5, %v5389_v37, %v10009_v49  ;;  %v6223_v37 = vsel %vm3930_vm5, %v13348_v59, %v10028_v39 }
 0x6cc   : > { %6777 = vmatmul.mubr.f32.gmra.mrb[74].mxu1 %v6180_v7  ;;  %v10022_v7 = vpop.permute.xlu0 %10021 }
 0x6cd   : > { %6781 = vmatprep.mubr.f32.mxu1 %v6217_v55  ;;  %v10019_v55 = vunpack.i.h.bf16 %v10017_v41  ;;  %v10023_v14 = vunpack.i.l.bf16 %v10022_v7  ;;  %v10024_v29 = vunpack.i.h.bf16 %v10022_v7  ;;  %v10038_v7 = vunpack.i.l.bf16 %v10037_v17 }
 0x6cf   : > { %v6222_v49 = vsel %vm3930_vm5, %v13330_v22, %v10023_v14  ;;  %v6186_v31 = vsel %vm3930_vm5, %v5392_v21, %v10024_v29  ;;  %v5394_v14 = vld [vmem:[#allocation3 + $0x8b] sm:$0xff]  ;;  %v10047_v29 = vpop.permute.xlu1 %10046 }
 0x6d0   : > { %6782 = vmatmul.mubr.f32.gmra.mrb[76].mxu1 %v6181_v9 }
 0x6d1   : > { %6786 = vmatprep.mubr.f32.mxu1 %v6218_v40  ;;  %v13545_v2 = vpop.f32.mrb[142].mxu0  ;;  %v5391_v40 = vld [vmem:[#allocation3 + $0x73] sm:$0xff] }
 0x6d2   : > { %v13547_v15 = vpop.f32.mrb[143].mxu0  ;;  %v6185_v27 = vsel %vm3930_vm5, %v5391_v40, %v10019_v55  ;;  %v6225_v40 = vsel %vm3930_vm5, %v13358_v56, %v10038_v7 }
 0x6d4   : > { %6787 = vmatmul.mubr.f32.gmra.mrb[78].mxu1 %v6182_v63  ;;  %v10032_v63 = vpop.permute.xlu0 %10031 }
 0x6d5   : > { %6791 = vmatprep.mubr.f32.mxu1 %v6219_v43  ;;  %v10029_v43 = vunpack.i.h.bf16 %v10027_v42  ;;  %v10033_v41 = vunpack.i.l.bf16 %v10032_v63  ;;  %v10034_v50 = vunpack.i.h.bf16 %v10032_v63 }
 0x6d7   : > { %v6224_v22 = vsel %vm3930_vm5, %v13342_v52, %v10033_v41  ;;  %v6188_v59 = vsel %vm3930_vm5, %v5394_v14, %v10034_v50 }
 0x6d8   : > { %6792 = vmatmul.mubr.f32.gmra.mrb[80].mxu1 %v6183_v24  ;;  %v5393_v24 = vld [vmem:[#allocation3 + $0x83] sm:$0xff]  ;;  %v10042_v13 = vpop.permute.xlu0 %10041 }
 0x6d9   : > { %6796 = vmatprep.mubr.f32.mxu1 %v6220_v45  ;;  %v6187_v45 = vsel %vm3930_vm5, %v5393_v24, %v10029_v43  ;;  %v10043_v42 = vunpack.i.l.bf16 %v10042_v13  ;;  %v10044_v39 = vunpack.i.h.bf16 %v10042_v13  ;;  %v5396_v43 = vld [vmem:[#allocation3 + $0x9b] sm:$0xff] }
 0x6db   : > { %v6226_v63 = vsel %vm3930_vm5, %v13355_v5, %v10043_v42  ;;  %v6190_v41 = vsel %vm3930_vm5, %v5396_v43, %v10044_v39 }
 0x6dc   : > { %6797 = vmatmul.mubr.f32.gmra.mrb[82].mxu1 %v6184_v38  ;;  %v10052_v21 = vpop.permute.xlu0 %10051 }
 0x6dd   : > { %6801 = vmatprep.mubr.f32.mxu1 %v6221_v47  ;;  %v13558_v9 = vpop.f32.mrb[144].mxu0  ;;  %v10039_v47 = vunpack.i.h.bf16 %v10037_v17  ;;  %v10057_v17 = vpop.permute.xlu1 %10056  ;;  %v10054_v7 = vunpack.i.h.bf16 %v10052_v21 }
 0x6de   : > { %v13560_v61 = vpop.f32.mrb[145].mxu0 }
 0x6e0   : > { %6802 = vmatmul.mubr.f32.gmra.mrb[84].mxu1 %v6185_v27  ;;  %v5395_v27 = vld [vmem:[#allocation3 + $0x93] sm:$0xff]  ;;  %v10062_v14 = vpop.permute.xlu0 %10061 }
 0x6e1   : > { %6806 = vmatprep.mubr.f32.mxu1 %v6222_v49  ;;  %v6189_v52 = vsel %vm3930_vm5, %v5395_v27, %v10039_v47  ;;  %v10048_v49 = vunpack.i.l.bf16 %v10047_v29  ;;  %v5398_v47 = vld [vmem:[#allocation3 + $0xab] sm:$0xff]  ;;  %v10063_v42 = vunpack.i.l.bf16 %v10062_v14  ;;  %v5399_v27 = vld [vmem:[#allocation3 + $0xb3] sm:$0xff]  ;;  %v10064_v39 = vunpack.i.h.bf16 %v10062_v14 }
 0x6e3   : > { %v6227_v56 = vsel %vm3930_vm5, %v13367_v62, %v10048_v49  ;;  %v6192_v62 = vsel %vm3930_vm5, %v5398_v47, %v10054_v7  ;;  %v5401_v7 = vld [vmem:[#allocation3 + $0xc3] sm:$0xff]  ;;  %v7207_v47 = vld [vmem:[%s13996_s10 + $0x20] sm:$0xff] }
 0x6e4   : > { %6807 = vmatmul.mubr.f32.gmra.mrb[86].mxu1 %v6186_v31  ;;  %v10049_v31 = vunpack.i.h.bf16 %v10047_v29  ;;  %v10067_v29 = vpop.permute.xlu1 %10066 }
 0x6e5   : > { %6811 = vmatprep.mubr.f32.mxu1 %v6223_v37  ;;  %v10053_v37 = vunpack.i.l.bf16 %v10052_v21  ;;  %v10068_v49 = vunpack.i.l.bf16 %v10067_v29 }
 0x6e7   : > { %v6228_v13 = vsel %vm3930_vm5, %v13364_v18, %v10053_v37  ;;  %v6230_v18 = vsel %vm3930_vm5, %v13372_v25, %v10063_v42  ;;  %v5402_v42 = vld [vmem:[#allocation3 + $0xcb] sm:$0xff] }
 0x6e8   : > { %6812 = vmatmul.mubr.f32.gmra.mrb[88].mxu1 %v6187_v45  ;;  %v5397_v45 = vld [vmem:[#allocation3 + $0xa3] sm:$0xff] }
 0x6e9   : > { %6816 = vmatprep.mubr.f32.mxu1 %v6224_v22  ;;  %v13571_v55 = vpop.f32.mrb[146].mxu0  ;;  %v6191_v5 = vsel %vm3930_vm5, %v5397_v45, %v10049_v31  ;;  %v10058_v22 = vunpack.i.l.bf16 %v10057_v17  ;;  %v5400_v31 = vld [vmem:[#allocation3 + $0xbb] sm:$0xff] }
 0x6ea   : > { %v13573_v38 = vpop.f32.mrb[147].mxu0 }
 0x6ec   : > { %6817 = vmatmul.mubr.f32.gmra.mrb[90].mxu1 %v6188_v59  ;;  %v10059_v59 = vunpack.i.h.bf16 %v10057_v17  ;;  %v10077_v17 = vpop.permute.xlu1 %10076 }
 0x6ed   : > { %6821 = vmatprep.mubr.f32.mxu1 %v6225_v40  ;;  %v6229_v40 = vsel %vm3930_vm5, %v13380_v51, %v10058_v22  ;;  %v6194_v51 = vsel %vm3930_vm5, %v5400_v31, %v10064_v39  ;;  %v7209_v39 = vld [vmem:[%s13996_s10 + $0x30] sm:$0xff] }
 0x6f0   : > { %6822 = vmatmul.mubr.f32.gmra.mrb[92].mxu1 %v6189_v52  ;;  %v6193_v52 = vsel %vm3930_vm5, %v5399_v27, %v10059_v59 }
 0x6f1   : > { %6826 = vmatprep.mubr.f32.mxu1 %v6226_v63  ;;  %v10072_v63 = vpop.permute.xlu0 %10071 }
 0x6f2   : > { %v10073_v37 = vunpack.i.l.bf16 %v10072_v63 }
 0x6f4   : > { %6827 = vmatmul.mubr.f32.gmra.mrb[94].mxu1 %v6190_v41  ;;  %v10069_v41 = vunpack.i.h.bf16 %v10067_v29  ;;  %v6232_v14 = vsel %vm3930_vm5, %v13389_v36, %v10073_v37 }
 0x6f5   : > { %6831 = vmatprep.mubr.f32.mxu1 %v6227_v56  ;;  %v13584_v24 = vpop.f32.mrb[148].mxu0  ;;  %v6231_v56 = vsel %vm3930_vm5, %v13392_v8, %v10068_v49  ;;  %v7208_v8 = vld [vmem:[%s13996_s10 + $0x28] sm:$0xff]  ;;  %v10082_v59 = vpop.permute.xlu0 %10081 }
 0x6f6   : > { %v13586_v50 = vpop.f32.mrb[149].mxu0  ;;  %v6195_v22 = vsel %vm3930_vm5, %v5401_v7, %v10069_v41  ;;  %v10083_v27 = vunpack.i.l.bf16 %v10082_v59  ;;  %v10087_v49 = vpop.permute.xlu1 %10086  ;;  %v10084_v31 = vunpack.i.h.bf16 %v10082_v59 }
 0x6f8   : > { %6832 = vmatmul.mubr.f32.gmra.mrb[96].mxu1 %v6191_v5  ;;  %v10074_v5 = vunpack.i.h.bf16 %v10072_v63  ;;  %v5403_v63 = vld [vmem:[#allocation3 + $0xd3] sm:$0xff] }
 0x6f9   : > { %6836 = vmatprep.mubr.f32.mxu1 %v6228_v13  ;;  %v10078_v13 = vunpack.i.l.bf16 %v10077_v17  ;;  %v10092_v37 = vpop.permute.xlu0 %10091 }
 0x6fa   : > { %v6196_v29 = vsel %vm3930_vm5, %v5402_v42, %v10074_v5  ;;  %v10093_v5 = vunpack.i.l.bf16 %v10092_v37  ;;  %v5406_v42 = vld [vmem:[#allocation3 + $0xeb] sm:$0xff] }
 0x6fb   : > { %v6233_v36 = vsel %vm3930_vm5, %v13401_v28, %v10078_v13  ;;  %v6234_v28 = vsel %vm3930_vm5, %v13398_v48, %v10083_v27  ;;  %v10097_v13 = vpop.permute.xlu1 %10096 }
 0x6fc   : > { %6837 = vmatmul.mubr.f32.gmra.mrb[98].mxu1 %v6192_v62  ;;  %v9030_v62 = vpack.c.bf16 %v7208_v8, %v7207_v47  ;;  %v10094_v47 = vunpack.i.h.bf16 %v10092_v37  ;;  %v10098_v59 = vunpack.i.l.bf16 %v10097_v13  ;;  %v6236_v48 = vsel %vm3930_vm5, %v13406_v10, %v10093_v5 }
 0x6fd   : > { %6841 = vmatprep.mubr.f32.mxu1 %v6229_v40  ;;  %v10079_v40 = vunpack.i.h.bf16 %v10077_v17  ;;  %v10089_v17 = vunpack.i.h.bf16 %v10087_v49 }
 0x6fe   : > { %9031 = vmatprep.subr.bf16.mxu0 %v9030_v62 }
 0x6ff   : > { %9033 = vmatpush3.bf16.msra.mxu0 %v9030_v62  ;;  %v6197_v41 = vsel %vm3930_vm5, %v5403_v63, %v10079_v40  ;;  %v10102_v62 = vpop.permute.xlu0 %10101  ;;  %v10099_v40 = vunpack.i.h.bf16 %v10097_v13  ;;  %v5410_v13 = vld [vmem:[#allocation3 + $0x10b] sm:$0xff] }
 0x700   : > { %6842 = vmatmul.mubr.f32.gmra.mrb[100].mxu1 %v6193_v52  ;;  %v7210_v52 = vld [vmem:[%s13996_s10 + $0x38] sm:$0xff]  ;;  %v10103_v27 = vunpack.i.l.bf16 %v10102_v62 }
 0x701   : > { %6846 = vmatprep.mubr.f32.mxu1 %v6230_v18  ;;  %v13597_v21 = vpop.f32.mrb[150].mxu0  ;;  %v9034_v18 = vpack.c.bf16 %v7210_v52, %v7209_v39  ;;  %v5407_v39 = vld [vmem:[#allocation3 + $0xf3] sm:$0xff]  ;;  %v10104_v52 = vunpack.i.h.bf16 %v10102_v62 }
 0x702   : > { %v13599_v43 = vpop.f32.mrb[151].mxu0  ;;  %v6238_v10 = vsel %vm3930_vm5, %v13419_v35, %v10103_v27  ;;  %v5451_v27 = vld [vmem:[#allocation3 + $0x134] sm:$0xff] }
 0x703   : > { %9035 = vmatprep.subr.bf16.mxu0 %v9034_v18  ;;  %v10112_v63 = vpop.permute.xlu0 %10111 }
 0x704   : > { %6847 = vmatmul.mubr.f32.gmra.mrb[102].mxu1 %v6194_v51  ;;  %v10088_v51 = vunpack.i.l.bf16 %v10087_v49  ;;  %9037 = vmatpush3.bf16.msra.mxu0 %v9034_v18  ;;  %v6201_v49 = vsel %vm3930_vm5, %v5407_v39, %v10099_v40 }
 0x705   : > { %6851 = vmatprep.mubr.f32.mxu1 %v6231_v56  ;;  %v13604_v45 = vpop.f32.mrb[152].mxu0  ;;  %v5404_v56 = vld [vmem:[#allocation3 + $0xdb] sm:$0xff] }
 0x706   : > { %v13606_v25 = vpop.f32.mrb[153].mxu0  ;;  %v6198_v7 = vsel %vm3930_vm5, %v5404_v56, %v10084_v31  ;;  %v5408_v31 = vld [vmem:[#allocation3 + $0xfb] sm:$0xff]  ;;  %v5409_v56 = vld [vmem:[#allocation3 + $0x103] sm:$0xff] }
 0x708   : > { %6852 = vmatmul.mubr.f32.gmra.mrb[104].mxu1 %v6195_v22  ;;  %v6235_v22 = vsel %vm3930_vm5, %v13412_v54, %v10088_v51  ;;  %v6237_v54 = vsel %vm3930_vm5, %v13424_v19, %v10098_v59  ;;  %v6202_v51 = vsel %vm3930_vm5, %v5408_v31, %v10104_v52  ;;  %v5414_v31 = vld [vmem:[#allocation3 + $0x12b] sm:$0xff] }
 0x709   : > { %6856 = vmatprep.mubr.f32.mxu1 %v6232_v14  ;;  %v5405_v14 = vld [vmem:[#allocation3 + $0xe3] sm:$0xff] }
 0x70a   : > { %v6199_v8 = vsel %vm3930_vm5, %v5405_v14, %v10089_v17  ;;  %v10114_v17 = vunpack.i.h.bf16 %v10112_v63 }
 0x70c   : > { %6857 = vmatmul.mubr.f32.gmra.mrb[106].mxu1 %v6196_v29  ;;  %v6200_v29 = vsel %vm3930_vm5, %v5406_v42, %v10094_v47  ;;  %v6204_v47 = vsel %vm3930_vm5, %v5410_v13, %v10114_v17 }
 0x70d   : > { %6861 = vmatprep.mubr.f32.mxu1 %v6233_v36  ;;  %v10107_v36 = vpop.permute.xlu1 %10106 }
 0x70e   : > { %v10108_v18 = vunpack.i.l.bf16 %v10107_v36 }
 0x710   : > { %6862 = vmatmul.mubr.f32.gmra.mrb[108].mxu1 %v6197_v41  ;;  %v10109_v41 = vunpack.i.h.bf16 %v10107_v36  ;;  %v6239_v19 = vsel %vm3930_vm5, %v13435_v44, %v10108_v18  ;;  %v5413_v18 = vld [vmem:[#allocation3 + $0x123] sm:$0xff] }
 0x711   : > { %6866 = vmatprep.mubr.f32.mxu1 %v6234_v28  ;;  %v10113_v28 = vunpack.i.l.bf16 %v10112_v63  ;;  %v10117_v37 = vpop.permute.xlu1 %10116 }
 0x712   : > { %v10118_v5 = vunpack.i.l.bf16 %v10117_v37  ;;  %v10119_v14 = vunpack.i.h.bf16 %v10117_v37 }
 0x713   : > { %v6240_v35 = vsel %vm3930_vm5, %v13430_v12, %v10113_v28 }
 0x714   : > { %6867 = vmatmul.mubr.f32.gmra.mrb[110].mxu1 %v6198_v7  ;;  %v6203_v7 = vsel %vm3930_vm5, %v5409_v56, %v10109_v41  ;;  %v6241_v44 = vsel %vm3930_vm5, %v13441_v26, %v10118_v5 }
 0x715   : > { %6871 = vmatprep.mubr.f32.mxu1 %v6235_v22  ;;  %v10122_v22 = vpop.permute.xlu0 %10121  ;;  %v10127_v59 = vpop.permute.xlu1 %10126 }
 0x716   : > { %v10124_v62 = vunpack.i.h.bf16 %v10122_v22  ;;  %v10128_v40 = vunpack.i.l.bf16 %v10127_v59  ;;  %v10129_v36 = vunpack.i.h.bf16 %v10127_v59 }
 0x718   : > { %6872 = vmatmul.mubr.f32.gmra.mrb[112].mxu1 %v6199_v8  ;;  %v10123_v8 = vunpack.i.l.bf16 %v10122_v22  ;;  %v6243_v26 = vsel %vm3930_vm5, %v5451_v27, %v10128_v40  ;;  %v6207_v63 = vsel %vm3930_vm5, %v5413_v18, %v10129_v36  ;;  %v7607_v36 = vld [vmem:[%s13998_s12] sm:$0xff] }
 0x719   : > { %6876 = vmatprep.mubr.f32.mxu1 %v6236_v48  ;;  %v5411_v48 = vld [vmem:[#allocation3 + $0x113] sm:$0xff] }
 0x71a   : > { %v6205_v42 = vsel %vm3930_vm5, %v5411_v48, %v10119_v14  ;;  %v6242_v12 = vsel %vm3930_vm5, %v13438_v58, %v10123_v8 }
 0x71c   : > { %6877 = vmatmul.mubr.f32.gmra.mrb[114].mxu1 %v6200_v29  ;;  %v10132_v29 = vpop.permute.xlu0 %10131 }
 0x71d   : > { %6881 = vmatprep.mubr.f32.mxu1 %v6237_v54  ;;  %v5412_v54 = vld [vmem:[#allocation3 + $0x11b] sm:$0xff]  ;;  %v10133_v52 = vunpack.i.l.bf16 %v10132_v29 }
 0x71e   : > { %v6206_v39 = vsel %vm3930_vm5, %v5412_v54, %v10124_v62 }
 0x720   : > { %6882 = vmatmul.mubr.f32.gmra.mrb[116].mxu1 %v6201_v49  ;;  %v5452_v49 = vld [vmem:[#allocation3 + $0x13c] sm:$0xff] }
 0x721   : > { %6886 = vmatprep.mubr.f32.mxu1 %v6238_v10  ;;  %v10134_v10 = vunpack.i.h.bf16 %v10132_v29  ;;  %v6244_v58 = vsel %vm3930_vm5, %v5452_v49, %v10133_v52 }
 0x723   : > { %v6208_v41 = vsel %vm3930_vm5, %v5414_v31, %v10134_v10  ;;  %v7612_v31 = vld [vmem:[%s13998_s12 + $0x28] sm:$0xff] }
 0x724   : > { %6887 = vmatmul.mubr.f32.gmra.mrb[118].mxu1 %v6202_v51  ;;  %v13661_v51 = vld [vmem:[%s13995_s9] ss:$0 sm:$0xff] }
 0x725   : > { %6891 = vmatprep.mubr.f32.mxu1 %v6239_v19 }
 0x728   : > { %6892 = vmatmul.mubr.f32.gmra.mrb[120].mxu1 %v6203_v7 }
 0x729   : > { %6896 = vmatprep.mubr.f32.mxu1 %v6240_v35 }
 0x72c   : > { %6897 = vmatmul.mubr.f32.gmra.mrb[122].mxu1 %v6204_v47 }
 0x72d   : > { %6901 = vmatprep.mubr.f32.mxu1 %v6241_v44 }
 0x730   : > { %6902 = vmatmul.mubr.f32.gmra.mrb[124].mxu1 %v6205_v42 }
 0x731   : > { %6906 = vmatprep.mubr.f32.mxu1 %v6242_v12 }
 0x734   : > { %6907 = vmatmul.mubr.f32.gmra.mrb[126].mxu1 %v6206_v39  ;;  %v7608_v39 = vld [vmem:[%s13998_s12 + $0x8] sm:$0xff] }
 0x735   : > { %6911 = vmatprep.mubr.f32.mxu1 %v6243_v26  ;;  %v9038_v26 = vpack.c.bf16 %v7608_v39, %v7607_v36  ;;  %v7617_v36 = vld [vmem:[%s13998_s12 + $0x50] sm:$0xff]  ;;  %v7618_v39 = vld [vmem:[%s13998_s12 + $0x58] sm:$0xff] }
 0x737   : > { %9039 = vmatprep.subr.bf16.mxu0 %v9038_v26 }
 0x738   : > { %6912 = vmatmul.mubr.f32.gmra.mrb[128].mxu1 %v6207_v63 }
 0x739   : > { %6916 = vmatprep.mubr.f32.mxu1 %v6244_v58  ;;  %v7611_v58 = vld [vmem:[%s13998_s12 + $0x20] sm:$0xff] }
 0x73c   : > { %6917 = vmatmul.mubr.f32.gmra.mrb[130].mxu1 %v6208_v41  ;;  %v14079_v41 = vld [vmem:[#allocation4_spill] sm:$0xff] }
 0x77f   : > { %v13669_v44 = vpop.f32.mrb[154].mxu0 }
 0x783   : > { %v6743_v28 = vpop.f32.mrb[60].mxu1 }
 0x784   : > { %v9102_v19 = vadd.f32 %v13661_v51, %v6743_v28  ;;  %v6745_v37 = vpop.f32.mrb[61].mxu1 }
 0x786   : > { %v6989_v56 = vadd.f32 %v9102_v19, %v13257_v0  ;;  %v13673_v0 = vpop.f32.mrb[155].mxu0 }
 0x787   : > { %v6748_v17 = vpop.f32.mrb[62].mxu1 }
 0x788   : > { %v7167_v7 = vmax.f32 %v6989_v56, 0.0  ;;  %v9103_v5 = vadd.f32 %v13661_v51, %v6748_v17  ;;  %v6750_v35 = vpop.f32.mrb[63].mxu1 }
 0x789   : > { %v7614_v35 = vld [vmem:[%s13998_s12 + $0x38] sm:$0xff] }
 0x78a   : > { %v6994_v22 = vadd.f32 %v9103_v5, %v13254_v33  ;;  %8698 = vmatprep.mubr.msk.f32.mxu0 %vm3930_vm5, %v7167_v7  ;;  %v9046_v7 = vpack.c.bf16 %v7612_v31, %v7611_v58  ;;  %v7613_v5 = vld [vmem:[%s13998_s12 + $0x30] sm:$0xff]  ;;  %v7620_v58 = vld [vmem:[%s13998_s12 + $0x68] sm:$0xff] }
 0x78b   : > { %v6753_v13 = vpop.f32.mrb[64].mxu1  ;;  %v14083_v31 = vld [vmem:[#allocation8_spill] sm:$0xff] }
 0x78c   : > { %v7168_v14 = vmax.f32 %v6994_v22, 0.0  ;;  %v9104_v47 = vadd.f32 %v13661_v51, %v6753_v13  ;;  %v6755_v8 = vpop.f32.mrb[65].mxu1  ;;  %v14080_v22 = vld [vmem:[#allocation5_spill] sm:$0xff] }
 0x78e   : > { %v6999_v59 = vadd.f32 %v9104_v47, %v13295_v57  ;;  %8699 = vmatmul.mubr.msk.f32.vlgmr.msra.gmra.mrb[156].mxu0 %vm3930_vm5, %v7168_v14 }
 0x78f   : > { %v6758_v48 = vpop.f32.mrb[66].mxu1  ;;  %9041 = vmatpush3.bf16.msra.mxu0 %v9038_v26 }
 0x790   : > { %v7169_v62 = vmax.f32 %v6999_v59, 0.0  ;;  %v9105_v42 = vadd.f32 %v13661_v51, %v6758_v48  ;;  %v6760_v33 = vpop.f32.mrb[67].mxu1  ;;  %v9050_v48 = vpack.c.bf16 %v7614_v35, %v7613_v5 }
 0x791   : > { %v14081_v33 = vld [vmem:[#allocation6_spill] sm:$0xff] }
 0x792   : > { %v7004_v40 = vadd.f32 %v9105_v42, %v13290_v6  ;;  %8701 = vmatprep.mubr.msk.f32.mxu0 %vm3930_vm5, %v7169_v62  ;;  %v7609_v6 = vld [vmem:[%s13998_s12 + $0x10] sm:$0xff]  ;;  %v7615_v62 = vld [vmem:[%s13998_s12 + $0x40] sm:$0xff]  ;;  %v7616_v42 = vld [vmem:[%s13998_s12 + $0x48] sm:$0xff] }
 0x793   : > { %v6763_v12 = vpop.f32.mrb[68].mxu1 }
 0x794   : > { %v7170_v29 = vmax.f32 %v7004_v40, 0.0  ;;  %v9106_v27 = vadd.f32 %v13661_v51, %v6763_v12  ;;  %v6765_v54 = vpop.f32.mrb[69].mxu1 }
 0x796   : > { %v7009_v57 = vadd.f32 %v9106_v27, %v13337_v32  ;;  %8702 = vmatmul.mubr.msk.f32.gmra.mrb[158].mxu0 %vm3930_vm5, %v7170_v29  ;;  %v7610_v32 = vld [vmem:[%s13998_s12 + $0x18] sm:$0xff] }
 0x797   : > { %v6768_v52 = vpop.f32.mrb[70].mxu1  ;;  %v9042_v63 = vpack.c.bf16 %v7610_v32, %v7609_v6  ;;  %v14082_v6 = vld [vmem:[#allocation7_spill] sm:$0xff] }
 0x798   : > { %v7171_v49 = vmax.f32 %v7009_v57, 0.0  ;;  %v9107_v18 = vadd.f32 %v13661_v51, %v6768_v52  ;;  %v6770_v10 = vpop.f32.mrb[71].mxu1  ;;  %v9054_v57 = vpack.c.bf16 %v7616_v42, %v7615_v62 }
 0x799   : > { %9043 = vmatprep.subr.bf16.mxu0 %v9042_v63  ;;  %v9058_v10 = vpack.c.bf16 %v7618_v39, %v7617_v36 }
 0x79a   : > { %v7014_v28 = vadd.f32 %v9107_v18, %v14079_v41  ;;  %8704 = vmatprep.mubr.msk.f32.mxu0 %vm3930_vm5, %v7171_v49  ;;  %9045 = vmatpush3.bf16.msra.mxu0 %v9042_v63  ;;  %v7619_v63 = vld [vmem:[%s13998_s12 + $0x60] sm:$0xff] }
 0x79b   : > { %v6773_v19 = vpop.f32.mrb[72].mxu1  ;;  %9047 = vmatprep.subr.bf16.mxu0 %v9046_v7 }
 0x79c   : > { %v7172_v37 = vmax.f32 %v7014_v28, 0.0  ;;  %v9108_v56 = vadd.f32 %v13661_v51, %v6773_v19  ;;  %v6775_v17 = vpop.f32.mrb[73].mxu1 }
 0x79d   : > { %v9062_v17 = vpack.c.bf16 %v7620_v58, %v7619_v63 }
 0x79e   : > { %v7019_v13 = vadd.f32 %v9108_v56, %v14080_v22  ;;  %8705 = vmatmul.mubr.msk.f32.gmra.mrb[160].mxu0 %vm3930_vm5, %v7172_v37 }
 0x79f   : > { %v6778_v14 = vpop.f32.mrb[74].mxu1  ;;  %9049 = vmatpush3.bf16.msra.mxu0 %v9046_v7 }
 0x7a0   : > { %v7173_v47 = vmax.f32 %v7019_v13, 0.0  ;;  %v9109_v8 = vadd.f32 %v13661_v51, %v6778_v14  ;;  %v6780_v59 = vpop.f32.mrb[75].mxu1  ;;  %9051 = vmatprep.subr.bf16.mxu0 %v9050_v48 }
 0x7a2   : > { %v7024_v40 = vadd.f32 %v9109_v8, %v14081_v33  ;;  %8707 = vmatprep.mubr.msk.f32.mxu0 %vm3930_vm5, %v7173_v47 }
 0x7a3   : > { %v6783_v12 = vpop.f32.mrb[76].mxu1  ;;  %9053 = vmatpush3.bf16.msra.mxu0 %v9050_v48 }
 0x7a4   : > { %v7174_v29 = vmax.f32 %v7024_v40, 0.0  ;;  %v9110_v27 = vadd.f32 %v13661_v51, %v6783_v12  ;;  %v6785_v54 = vpop.f32.mrb[77].mxu1  ;;  %9055 = vmatprep.subr.bf16.mxu0 %v9054_v57 }
 0x7a6   : > { %v7029_v52 = vadd.f32 %v9110_v27, %v14082_v6  ;;  %8708 = vmatmul.mubr.msk.f32.gmra.mrb[162].mxu0 %vm3930_vm5, %v7174_v29 }
 0x7a7   : > { %v6788_v26 = vpop.f32.mrb[78].mxu1  ;;  %9057 = vmatpush3.bf16.msra.mxu0 %v9054_v57 }
 0x7a8   : > { %v7175_v32 = vmax.f32 %v7029_v52, 0.0  ;;  %v9111_v49 = vadd.f32 %v13661_v51, %v6788_v26  ;;  %v6790_v18 = vpop.f32.mrb[79].mxu1  ;;  %9059 = vmatprep.subr.bf16.mxu0 %v9058_v10 }
 0x7aa   : > { %v7034_v41 = vadd.f32 %v9111_v49, %v14083_v31  ;;  %8710 = vmatprep.mubr.msk.f32.mxu0 %vm3930_vm5, %v7175_v32 }
 0x7ab   : > { %v6793_v28 = vpop.f32.mrb[80].mxu1  ;;  %9061 = vmatpush3.bf16.msra.mxu0 %v9058_v10 }
 0x7ac   : > { %v7176_v19 = vmax.f32 %v7034_v41, 0.0  ;;  %v9112_v37 = vadd.f32 %v13661_v51, %v6793_v28  ;;  %v6795_v56 = vpop.f32.mrb[81].mxu1  ;;  %9063 = vmatprep.subr.bf16.mxu0 %v9062_v17 }
 0x7ae   : > { %v7039_v7 = vadd.f32 %v9112_v37, %v13459_v30  ;;  %8711 = vmatmul.mubr.msk.f32.gmra.mrb[164].mxu0 %vm3930_vm5, %v7176_v19 }
 0x7af   : > { %v6798_v5 = vpop.f32.mrb[82].mxu1  ;;  %9065 = vmatpush3.bf16.msra.mxu0 %v9062_v17 }
 0x7b0   : > { %v7177_v35 = vmax.f32 %v7039_v7, 0.0  ;;  %v9113_v22 = vadd.f32 %v13661_v51, %v6798_v5  ;;  %v6800_v13 = vpop.f32.mrb[83].mxu1 }
 0x7b2   : > { %v7044_v14 = vadd.f32 %v9113_v22, %v13454_v34  ;;  %8713 = vmatprep.mubr.msk.f32.mxu0 %vm3930_vm5, %v7177_v35 }
 0x7b3   : > { %v6803_v47 = vpop.f32.mrb[84].mxu1 }
 0x7b4   : > { %v7178_v8 = vmax.f32 %v7044_v14, 0.0  ;;  %v9114_v59 = vadd.f32 %v13661_v51, %v6803_v47  ;;  %v6805_v48 = vpop.f32.mrb[85].mxu1 }
 0x7b6   : > { %v7049_v30 = vadd.f32 %v9114_v59, %v13471_v1  ;;  %8714 = vmatmul.mubr.msk.f32.gmra.mrb[166].mxu0 %vm3930_vm5, %v7178_v8 }
 0x7b7   : > { %v6808_v62 = vpop.f32.mrb[86].mxu1 }
 0x7b8   : > { %v7179_v42 = vmax.f32 %v7049_v30, 0.0  ;;  %v9115_v33 = vadd.f32 %v13661_v51, %v6808_v62  ;;  %v6810_v40 = vpop.f32.mrb[87].mxu1 }
 0x7ba   : > { %v7054_v12 = vadd.f32 %v9115_v33, %v13469_v23  ;;  %8716 = vmatprep.mubr.msk.f32.mxu0 %vm3930_vm5, %v7179_v42 }
 0x7bb   : > { %v6813_v34 = vpop.f32.mrb[88].mxu1 }
 0x7bc   : > { %v7180_v29 = vmax.f32 %v7054_v12, 0.0  ;;  %v9116_v27 = vadd.f32 %v13661_v51, %v6813_v34  ;;  %v6815_v54 = vpop.f32.mrb[89].mxu1 }
 0x7be   : > { %v7059_v57 = vadd.f32 %v9116_v27, %v13482_v20  ;;  %8717 = vmatmul.mubr.msk.f32.gmra.mrb[168].mxu0 %vm3930_vm5, %v7180_v29 }
 0x7bf   : > { %v6818_v1 = vpop.f32.mrb[90].mxu1 }
 0x7c0   : > { %v7181_v36 = vmax.f32 %v7059_v57, 0.0  ;;  %v9117_v39 = vadd.f32 %v13661_v51, %v6818_v1  ;;  %v6820_v6 = vpop.f32.mrb[91].mxu1  ;;  %v7622_v1 = vld [vmem:[%s13998_s12 + $0x78] sm:$0xff] }
 0x7c2   : > { %v7064_v52 = vadd.f32 %v9117_v39, %v13480_v16  ;;  %8719 = vmatprep.mubr.msk.f32.mxu0 %vm3930_vm5, %v7181_v36 }
 0x7c3   : > { %v6823_v23 = vpop.f32.mrb[92].mxu1 }
 0x7c4   : > { %v7182_v26 = vmax.f32 %v7064_v52, 0.0  ;;  %v9118_v32 = vadd.f32 %v13661_v51, %v6823_v23  ;;  %v6825_v49 = vpop.f32.mrb[93].mxu1 }
 0x7c6   : > { %v7069_v18 = vadd.f32 %v9118_v32, %v13494_v3  ;;  %8720 = vmatmul.mubr.msk.f32.gmra.mrb[170].mxu0 %vm3930_vm5, %v7182_v26 }
 0x7c7   : > { %v6828_v20 = vpop.f32.mrb[94].mxu1 }
 0x7c8   : > { %v7183_v10 = vmax.f32 %v7069_v18, 0.0  ;;  %v9119_v63 = vadd.f32 %v13661_v51, %v6828_v20  ;;  %v6830_v58 = vpop.f32.mrb[95].mxu1 }
 0x7ca   : > { %v7074_v31 = vadd.f32 %v9119_v63, %v13492_v53  ;;  %8722 = vmatprep.mubr.msk.f32.mxu0 %vm3930_vm5, %v7183_v10 }
 0x7cb   : > { %v6833_v16 = vpop.f32.mrb[96].mxu1 }
 0x7cc   : > { %v7184_v41 = vmax.f32 %v7074_v31, 0.0  ;;  %v9120_v28 = vadd.f32 %v13661_v51, %v6833_v16  ;;  %v6835_v19 = vpop.f32.mrb[97].mxu1 }
 0x7ce   : > { %v7079_v37 = vadd.f32 %v9120_v28, %v13508_v60  ;;  %8723 = vmatmul.mubr.msk.f32.gmra.mrb[172].mxu0 %vm3930_vm5, %v7184_v41 }
 0x7cf   : > { %v6838_v3 = vpop.f32.mrb[98].mxu1 }
 0x7d0   : > { %v7185_v56 = vmax.f32 %v7079_v37, 0.0  ;;  %v9121_v17 = vadd.f32 %v13661_v51, %v6838_v3  ;;  %v6840_v7 = vpop.f32.mrb[99].mxu1 }
 0x7d2   : > { %v7084_v5 = vadd.f32 %v9121_v17, %v13505_v46  ;;  %8725 = vmatprep.mubr.msk.f32.mxu0 %vm3930_vm5, %v7185_v56 }
 0x7d3   : > { %v6843_v53 = vpop.f32.mrb[100].mxu1 }
 0x7d4   : > { %v7186_v35 = vmax.f32 %v7084_v5, 0.0  ;;  %v9122_v22 = vadd.f32 %v13661_v51, %v6843_v53  ;;  %v6845_v13 = vpop.f32.mrb[101].mxu1 }
 0x7d6   : > { %v7089_v14 = vadd.f32 %v9122_v22, %v13534_v4  ;;  %8726 = vmatmul.mubr.msk.f32.gmra.mrb[174].mxu0 %vm3930_vm5, %v7186_v35 }
 0x7d7   : > { %v6848_v60 = vpop.f32.mrb[102].mxu1 }
 0x7d8   : > { %v7187_v47 = vmax.f32 %v7089_v14, 0.0  ;;  %v9123_v8 = vadd.f32 %v13661_v51, %v6848_v60  ;;  %v6850_v59 = vpop.f32.mrb[103].mxu1 }
 0x7da   : > { %v7094_v48 = vadd.f32 %v9123_v8, %v13532_v11  ;;  %8728 = vmatprep.mubr.msk.f32.mxu0 %vm3930_vm5, %v7187_v47 }
 0x7db   : > { %v6853_v46 = vpop.f32.mrb[104].mxu1 }
 0x7dc   : > { %v7188_v30 = vmax.f32 %v7094_v48, 0.0  ;;  %v9124_v62 = vadd.f32 %v13661_v51, %v6853_v46  ;;  %v6855_v42 = vpop.f32.mrb[105].mxu1 }
 0x7de   : > { %v7099_v33 = vadd.f32 %v9124_v62, %v13547_v15  ;;  %8729 = vmatmul.mubr.msk.f32.gmra.mrb[176].mxu0 %vm3930_vm5, %v7188_v30  ;;  %v7621_v15 = vld [vmem:[%s13998_s12 + $0x70] sm:$0xff] }
 0x7df   : > { %v6858_v4 = vpop.f32.mrb[106].mxu1 }
 0x7e0   : > { %v7189_v40 = vmax.f32 %v7099_v33, 0.0  ;;  %v9125_v12 = vadd.f32 %v13661_v51, %v6858_v4  ;;  %v6860_v34 = vpop.f32.mrb[107].mxu1 }
 0x7e2   : > { %v7104_v29 = vadd.f32 %v9125_v12, %v13545_v2  ;;  %8731 = vmatprep.mubr.msk.f32.mxu0 %vm3930_vm5, %v7189_v40  ;;  %v9066_v2 = vpack.c.bf16 %v7622_v1, %v7621_v15 }
 0x7e3   : > { %v6863_v11 = vpop.f32.mrb[108].mxu1 }
 0x7e4   : > { %v7190_v27 = vmax.f32 %v7104_v29, 0.0  ;;  %v9126_v54 = vadd.f32 %v13661_v51, %v6863_v11  ;;  %v6865_v57 = vpop.f32.mrb[109].mxu1  ;;  %9067 = vmatprep.subr.bf16.mxu0 %v9066_v2 }
 0x7e5   : > { %9069 = vmatpush3.bf16.msra.mxu0 %v9066_v2  ;;  %v13826_v57 = vld [vmem:[%s13997_s11] ss:$0 sm:$0xff] }
 0x7e6   : > { %v7109_v36 = vadd.f32 %v9126_v54, %v13560_v61  ;;  %8732 = vmatmul.mubr.msk.f32.gmra.mrb[178].mxu0 %vm3930_vm5, %v7190_v27 }
 0x7e7   : > { %v6868_v39 = vpop.f32.mrb[110].mxu1 }
 0x7e8   : > { %v7191_v6 = vmax.f32 %v7109_v36, 0.0  ;;  %v9127_v52 = vadd.f32 %v13661_v51, %v6868_v39  ;;  %v6870_v23 = vpop.f32.mrb[111].mxu1 }
 0x7ea   : > { %v7114_v26 = vadd.f32 %v9127_v52, %v13558_v9  ;;  %8734 = vmatprep.mubr.msk.f32.mxu0 %vm3930_vm5, %v7191_v6 }
 0x7eb   : > { %v6873_v32 = vpop.f32.mrb[112].mxu1 }
 0x7ec   : > { %v7192_v49 = vmax.f32 %v7114_v26, 0.0  ;;  %v9128_v18 = vadd.f32 %v13661_v51, %v6873_v32  ;;  %v6875_v20 = vpop.f32.mrb[113].mxu1 }
 0x7ee   : > { %v7119_v61 = vadd.f32 %v9128_v18, %v13573_v38  ;;  %8735 = vmatmul.mubr.msk.f32.gmra.mrb[180].mxu0 %vm3930_vm5, %v7192_v49 }
 0x7ef   : > { %v6878_v10 = vpop.f32.mrb[114].mxu1 }
 0x7f0   : > { %v7193_v63 = vmax.f32 %v7119_v61, 0.0  ;;  %v9129_v58 = vadd.f32 %v13661_v51, %v6878_v10  ;;  %v6880_v31 = vpop.f32.mrb[115].mxu1 }
 0x7f2   : > { %v7124_v16 = vadd.f32 %v9129_v58, %v13571_v55  ;;  %8737 = vmatprep.mubr.msk.f32.mxu0 %vm3930_vm5, %v7193_v63 }
 0x7f3   : > { %v6883_v9 = vpop.f32.mrb[116].mxu1 }
 0x7f4   : > { %v7194_v41 = vmax.f32 %v7124_v16, 0.0  ;;  %v9130_v28 = vadd.f32 %v13661_v51, %v6883_v9  ;;  %v6885_v19 = vpop.f32.mrb[117].mxu1 }
 0x7f6   : > { %v7129_v37 = vadd.f32 %v9130_v28, %v13586_v50  ;;  %8738 = vmatmul.mubr.msk.f32.gmra.mrb[182].mxu0 %vm3930_vm5, %v7194_v41 }
 0x7f7   : > { %v6888_v38 = vpop.f32.mrb[118].mxu1 }
 0x7f8   : > { %v7195_v3 = vmax.f32 %v7129_v37, 0.0  ;;  %v9131_v56 = vadd.f32 %v13661_v51, %v6888_v38  ;;  %v6890_v17 = vpop.f32.mrb[119].mxu1 }
 0x7fa   : > { %v7134_v7 = vadd.f32 %v9131_v56, %v13584_v24  ;;  %8740 = vmatprep.mubr.msk.f32.mxu0 %vm3930_vm5, %v7195_v3 }
 0x7fb   : > { %v6893_v55 = vpop.f32.mrb[120].mxu1 }
 0x7fc   : > { %v7196_v5 = vmax.f32 %v7134_v7, 0.0  ;;  %v9132_v53 = vadd.f32 %v13661_v51, %v6893_v55  ;;  %v6895_v35 = vpop.f32.mrb[121].mxu1 }
 0x7fe   : > { %v7139_v22 = vadd.f32 %v9132_v53, %v13599_v43  ;;  %8741 = vmatmul.mubr.msk.f32.gmra.mrb[184].mxu0 %vm3930_vm5, %v7196_v5 }
 0x7ff   : > { %v6898_v50 = vpop.f32.mrb[122].mxu1 }
 0x800   : > { %v7197_v13 = vmax.f32 %v7139_v22, 0.0  ;;  %v9133_v14 = vadd.f32 %v13661_v51, %v6898_v50  ;;  %v6900_v60 = vpop.f32.mrb[123].mxu1 }
 0x802   : > { %v7144_v47 = vadd.f32 %v9133_v14, %v13597_v21  ;;  %8743 = vmatprep.mubr.msk.f32.mxu0 %vm3930_vm5, %v7197_v13 }
 0x803   : > { %v6903_v24 = vpop.f32.mrb[124].mxu1 }
 0x804   : > { %v7198_v8 = vmax.f32 %v7144_v47, 0.0  ;;  %v9134_v59 = vadd.f32 %v13661_v51, %v6903_v24  ;;  %v6905_v48 = vpop.f32.mrb[125].mxu1 }
 0x806   : > { %v7149_v46 = vadd.f32 %v9134_v59, %v13606_v25  ;;  %8744 = vmatmul.mubr.msk.f32.gmra.mrb[186].mxu0 %vm3930_vm5, %v7198_v8 }
 0x807   : > { %v6908_v43 = vpop.f32.mrb[126].mxu1 }
 0x808   : > { %v7199_v30 = vmax.f32 %v7149_v46, 0.0  ;;  %v9135_v62 = vadd.f32 %v13661_v51, %v6908_v43  ;;  %v6910_v42 = vpop.f32.mrb[127].mxu1 }
 0x80a   : > { %v7154_v33 = vadd.f32 %v9135_v62, %v13604_v45  ;;  %8746 = vmatprep.mubr.msk.f32.mxu0 %vm3930_vm5, %v7199_v30 }
 0x80b   : > { %v6913_v21 = vpop.f32.mrb[128].mxu1 }
 0x80c   : > { %v7200_v4 = vmax.f32 %v7154_v33, 0.0  ;;  %v9136_v40 = vadd.f32 %v13661_v51, %v6913_v21  ;;  %v6915_v12 = vpop.f32.mrb[129].mxu1 }
 0x80e   : > { %v7159_v34 = vadd.f32 %v9136_v40, %v13673_v0  ;;  %8747 = vmatmul.mubr.msk.f32.gmra.mrb[188].mxu0 %vm3930_vm5, %v7200_v4 }
 0x80f   : > { %v6918_v25 = vpop.f32.mrb[130].mxu1 }
 0x810   : > { %v7201_v29 = vmax.f32 %v7159_v34, 0.0  ;;  %v9137_v11 = vadd.f32 %v13661_v51, %v6918_v25  ;;  %v6920_v27 = vpop.f32.mrb[131].mxu1 }
 0x812   : > { %v7164_v54 = vadd.f32 %v9137_v11, %v13669_v44  ;;  %8749 = vmatprep.mubr.msk.f32.mxu0 %vm3930_vm5, %v7201_v29 }
 0x814   : > { %v7202_v45 = vmax.f32 %v7164_v54, 0.0 }
 0x816   : > { %8750 = vmatmul.mubr.msk.f32.gmra.mrb[190].mxu0 %vm3930_vm5, %v7202_v45  ;;  %vm7875_vm5 = vcmask 392192  }
 0x861   : > { %v8700_v0 = vpop.f32.mrb[156].mxu0 }
 0x862   : > { %v7398_v15 = vadd.f32 %v8700_v0, %v13826_v57  ;;  %v7392_v1 = vpop.f32.mrb[157].mxu0 }
 0x863   : > { %v7393_v36 = vadd.f32 %v13826_v57, %v7392_v1 }
 0x864   : > { %v7572_v2 = vmax.f32 %v7398_v15, 0.0 }
 0x865   : > { %v7571_v51 = vmax.f32 %v7393_v36, 0.0 }
 0x867   : > { %8784 = vmatprep.mubr.f32.mxu0 %v7571_v51 }
 0x868   : > { %8785 = vmatmul.mubr.f32.vlgmr.msra.gmra.mrb[192].mxu0 %v7572_v2 }
 0x869   : > { %v8703_v44 = vpop.f32.mrb[158].mxu0 }
 0x86a   : > { %v7408_v39 = vadd.f32 %v8703_v44, %v13826_v57  ;;  %v7402_v6 = vpop.f32.mrb[159].mxu0 }
 0x86b   : > { %v7403_v52 = vadd.f32 %v13826_v57, %v7402_v6 }
 0x86c   : > { %v7574_v26 = vmax.f32 %v7408_v39, 0.0 }
 0x86d   : > { %v7573_v23 = vmax.f32 %v7403_v52, 0.0 }
 0x86f   : > { %8787 = vmatprep.mubr.f32.mxu0 %v7573_v23 }
 0x870   : > { %8788 = vmatmul.mubr.f32.gmra.mrb[194].mxu0 %v7574_v26 }
 0x871   : > { %v8706_v32 = vpop.f32.mrb[160].mxu0 }
 0x872   : > { %v7418_v49 = vadd.f32 %v8706_v32, %v13826_v57  ;;  %v7412_v18 = vpop.f32.mrb[161].mxu0 }
 0x873   : > { %v7413_v20 = vadd.f32 %v13826_v57, %v7412_v18 }
 0x874   : > { %v7576_v10 = vmax.f32 %v7418_v49, 0.0 }
 0x875   : > { %v7575_v61 = vmax.f32 %v7413_v20, 0.0 }
 0x877   : > { %8790 = vmatprep.mubr.f32.mxu0 %v7575_v61 }
 0x878   : > { %8791 = vmatmul.mubr.f32.gmra.mrb[196].mxu0 %v7576_v10 }
 0x879   : > { %v8709_v63 = vpop.f32.mrb[162].mxu0 }
 0x87a   : > { %v7428_v58 = vadd.f32 %v8709_v63, %v13826_v57  ;;  %v7422_v31 = vpop.f32.mrb[163].mxu0 }
 0x87b   : > { %v7423_v16 = vadd.f32 %v13826_v57, %v7422_v31 }
 0x87c   : > { %v7578_v41 = vmax.f32 %v7428_v58, 0.0 }
 0x87d   : > { %v7577_v9 = vmax.f32 %v7423_v16, 0.0 }
 0x87f   : > { %8793 = vmatprep.mubr.f32.mxu0 %v7577_v9 }
 0x880   : > { %8794 = vmatmul.mubr.f32.gmra.mrb[198].mxu0 %v7578_v41 }
 0x881   : > { %v8712_v28 = vpop.f32.mrb[164].mxu0 }
 0x882   : > { %v7438_v19 = vadd.f32 %v8712_v28, %v13826_v57  ;;  %v7432_v37 = vpop.f32.mrb[165].mxu0 }
 0x883   : > { %v7433_v38 = vadd.f32 %v13826_v57, %v7432_v37 }
 0x884   : > { %v7580_v56 = vmax.f32 %v7438_v19, 0.0 }
 0x885   : > { %v7579_v3 = vmax.f32 %v7433_v38, 0.0 }
 0x887   : > { %8796 = vmatprep.mubr.f32.mxu0 %v7579_v3 }
 0x888   : > { %8797 = vmatmul.mubr.f32.gmra.mrb[200].mxu0 %v7580_v56 }
 0x889   : > { %v8715_v17 = vpop.f32.mrb[166].mxu0 }
 0x88a   : > { %v7448_v7 = vadd.f32 %v8715_v17, %v13826_v57  ;;  %v7442_v55 = vpop.f32.mrb[167].mxu0 }
 0x88b   : > { %v7443_v5 = vadd.f32 %v13826_v57, %v7442_v55 }
 0x88c   : > { %v7582_v35 = vmax.f32 %v7448_v7, 0.0 }
 0x88d   : > { %v7581_v53 = vmax.f32 %v7443_v5, 0.0 }
 0x88f   : > { %8799 = vmatprep.mubr.f32.mxu0 %v7581_v53 }
 0x890   : > { %8800 = vmatmul.mubr.f32.gmra.mrb[202].mxu0 %v7582_v35 }
 0x891   : > { %v8718_v22 = vpop.f32.mrb[168].mxu0 }
 0x892   : > { %v7458_v50 = vadd.f32 %v8718_v22, %v13826_v57  ;;  %v7452_v13 = vpop.f32.mrb[169].mxu0 }
 0x893   : > { %v7453_v14 = vadd.f32 %v13826_v57, %v7452_v13 }
 0x894   : > { %v7584_v47 = vmax.f32 %v7458_v50, 0.0 }
 0x895   : > { %v7583_v60 = vmax.f32 %v7453_v14, 0.0 }
 0x897   : > { %8802 = vmatprep.mubr.f32.mxu0 %v7583_v60 }
 0x898   : > { %8803 = vmatmul.mubr.f32.gmra.mrb[204].mxu0 %v7584_v47 }
 0x899   : > { %v8721_v24 = vpop.f32.mrb[170].mxu0 }
 0x89a   : > { %v7468_v8 = vadd.f32 %v8721_v24, %v13826_v57  ;;  %v7462_v59 = vpop.f32.mrb[171].mxu0 }
 0x89b   : > { %v7463_v48 = vadd.f32 %v13826_v57, %v7462_v59 }
 0x89c   : > { %v7586_v43 = vmax.f32 %v7468_v8, 0.0 }
 0x89d   : > { %v7585_v46 = vmax.f32 %v7463_v48, 0.0  ;;  %v13868_v48 = vld [vmem:[%s13999_s13] ss:$0 sm:$0xff] }
 0x89f   : > { %8805 = vmatprep.mubr.f32.mxu0 %v7585_v46 }
 0x8a0   : > { %8806 = vmatmul.mubr.f32.gmra.mrb[206].mxu0 %v7586_v43 }
 0x8a1   : > { %v8724_v30 = vpop.f32.mrb[172].mxu0 }
 0x8a2   : > { %v7478_v62 = vadd.f32 %v8724_v30, %v13826_v57  ;;  %v7472_v42 = vpop.f32.mrb[173].mxu0 }
 0x8a3   : > { %v7473_v33 = vadd.f32 %v13826_v57, %v7472_v42 }
 0x8a4   : > { %v7588_v4 = vmax.f32 %v7478_v62, 0.0 }
 0x8a5   : > { %v7587_v21 = vmax.f32 %v7473_v33, 0.0 }
 0x8a7   : > { %8808 = vmatprep.mubr.f32.mxu0 %v7587_v21 }
 0x8a8   : > { %8809 = vmatmul.mubr.f32.gmra.mrb[208].mxu0 %v7588_v4 }
 0x8a9   : > { %v8727_v40 = vpop.f32.mrb[174].mxu0 }
 0x8aa   : > { %v7488_v12 = vadd.f32 %v8727_v40, %v13826_v57  ;;  %v7482_v34 = vpop.f32.mrb[175].mxu0 }
 0x8ab   : > { %v7483_v25 = vadd.f32 %v13826_v57, %v7482_v34 }
 0x8ac   : > { %v7590_v11 = vmax.f32 %v7488_v12, 0.0 }
 0x8ad   : > { %v7589_v29 = vmax.f32 %v7483_v25, 0.0 }
 0x8af   : > { %8811 = vmatprep.mubr.f32.mxu0 %v7589_v29 }
 0x8b0   : > { %8812 = vmatmul.mubr.f32.gmra.mrb[210].mxu0 %v7590_v11 }
 0x8b1   : > { %v8730_v27 = vpop.f32.mrb[176].mxu0 }
 0x8b2   : > { %v7498_v54 = vadd.f32 %v8730_v27, %v13826_v57  ;;  %v7492_v45 = vpop.f32.mrb[177].mxu0 }
 0x8b3   : > { %v7493_v0 = vadd.f32 %v13826_v57, %v7492_v45 }
 0x8b4   : > { %v7592_v1 = vmax.f32 %v7498_v54, 0.0 }
 0x8b5   : > { %v7591_v15 = vmax.f32 %v7493_v0, 0.0 }
 0x8b7   : > { %8814 = vmatprep.mubr.f32.mxu0 %v7591_v15 }
 0x8b8   : > { %8815 = vmatmul.mubr.f32.gmra.mrb[212].mxu0 %v7592_v1 }
 0x8b9   : > { %v8733_v36 = vpop.f32.mrb[178].mxu0 }
 0x8ba   : > { %v7508_v51 = vadd.f32 %v8733_v36, %v13826_v57  ;;  %v7502_v2 = vpop.f32.mrb[179].mxu0 }
 0x8bb   : > { %v7503_v44 = vadd.f32 %v13826_v57, %v7502_v2 }
 0x8bc   : > { %v7594_v6 = vmax.f32 %v7508_v51, 0.0 }
 0x8bd   : > { %v7593_v39 = vmax.f32 %v7503_v44, 0.0 }
 0x8bf   : > { %8817 = vmatprep.mubr.f32.mxu0 %v7593_v39 }
 0x8c0   : > { %8818 = vmatmul.mubr.f32.gmra.mrb[214].mxu0 %v7594_v6 }
 0x8c1   : > { %v8736_v52 = vpop.f32.mrb[180].mxu0 }
 0x8c2   : > { %v7518_v23 = vadd.f32 %v8736_v52, %v13826_v57  ;;  %v7512_v26 = vpop.f32.mrb[181].mxu0 }
 0x8c3   : > { %v7513_v32 = vadd.f32 %v13826_v57, %v7512_v26 }
 0x8c4   : > { %v7596_v18 = vmax.f32 %v7518_v23, 0.0 }
 0x8c5   : > { %v7595_v49 = vmax.f32 %v7513_v32, 0.0 }
 0x8c7   : > { %8820 = vmatprep.mubr.f32.mxu0 %v7595_v49 }
 0x8c8   : > { %8821 = vmatmul.mubr.f32.gmra.mrb[216].mxu0 %v7596_v18 }
 0x8c9   : > { %v8739_v20 = vpop.f32.mrb[182].mxu0 }
 0x8ca   : > { %v7528_v61 = vadd.f32 %v8739_v20, %v13826_v57  ;;  %v7522_v10 = vpop.f32.mrb[183].mxu0 }
 0x8cb   : > { %v7523_v63 = vadd.f32 %v13826_v57, %v7522_v10 }
 0x8cc   : > { %v7598_v31 = vmax.f32 %v7528_v61, 0.0 }
 0x8cd   : > { %v7597_v58 = vmax.f32 %v7523_v63, 0.0 }
 0x8cf   : > { %8823 = vmatprep.mubr.f32.mxu0 %v7597_v58 }
 0x8d0   : > { %8824 = vmatmul.mubr.f32.gmra.mrb[218].mxu0 %v7598_v31 }
 0x8d1   : > { %v8742_v16 = vpop.f32.mrb[184].mxu0 }
 0x8d2   : > { %v7538_v9 = vadd.f32 %v8742_v16, %v13826_v57  ;;  %v7532_v41 = vpop.f32.mrb[185].mxu0 }
 0x8d3   : > { %v7533_v28 = vadd.f32 %v13826_v57, %v7532_v41 }
 0x8d4   : > { %v7600_v37 = vmax.f32 %v7538_v9, 0.0 }
 0x8d5   : > { %v7599_v19 = vmax.f32 %v7533_v28, 0.0 }
 0x8d7   : > { %8826 = vmatprep.mubr.f32.mxu0 %v7599_v19 }
 0x8d8   : > { %8827 = vmatmul.mubr.f32.gmra.mrb[220].mxu0 %v7600_v37 }
 0x8d9   : > { %v8745_v38 = vpop.f32.mrb[186].mxu0 }
 0x8da   : > { %v7548_v3 = vadd.f32 %v8745_v38, %v13826_v57  ;;  %v7542_v56 = vpop.f32.mrb[187].mxu0 }
 0x8db   : > { %v7543_v17 = vadd.f32 %v13826_v57, %v7542_v56 }
 0x8dc   : > { %v7602_v55 = vmax.f32 %v7548_v3, 0.0 }
 0x8dd   : > { %v7601_v7 = vmax.f32 %v7543_v17, 0.0 }
 0x8df   : > { %8829 = vmatprep.mubr.f32.mxu0 %v7601_v7 }
 0x8e0   : > { %8830 = vmatmul.mubr.f32.gmra.mrb[222].mxu0 %v7602_v55 }
 0x8e1   : > { %v8748_v5 = vpop.f32.mrb[188].mxu0 }
 0x8e2   : > { %v7558_v53 = vadd.f32 %v8748_v5, %v13826_v57  ;;  %v7552_v35 = vpop.f32.mrb[189].mxu0 }
 0x8e3   : > { %v7553_v22 = vadd.f32 %v13826_v57, %v7552_v35 }
 0x8e4   : > { %v7604_v13 = vmax.f32 %v7558_v53, 0.0 }
 0x8e5   : > { %v7603_v50 = vmax.f32 %v7553_v22, 0.0 }
 0x8e7   : > { %8832 = vmatprep.mubr.f32.mxu0 %v7603_v50 }
 0x8e8   : > { %8833 = vmatmul.mubr.f32.gmra.mrb[224].mxu0 %v7604_v13 }
 0x8e9   : > { %v8751_v14 = vpop.f32.mrb[190].mxu0 }
 0x8ea   : > { %v7568_v60 = vadd.f32 %v8751_v14, %v13826_v57  ;;  %v7562_v47 = vpop.f32.mrb[191].mxu0 }
 0x8eb   : > { %v7563_v24 = vadd.f32 %v13826_v57, %v7562_v47 }
 0x8ec   : > { %v7606_v59 = vmax.f32 %v7568_v60, 0.0 }
 0x8ed   : > { %v7605_v8 = vmax.f32 %v7563_v24, 0.0 }
 0x8ef   : > { %8835 = vmatprep.mubr.f32.mxu0 %v7605_v8 }
 0x8f0   : > { %8836 = vmatmul.mubr.f32.gmra.mrb[226].mxu0 %v7606_v59 }
 0x93b   : > { %v8786_v57 = vpop.f32.mrb[192].mxu0 }
 0x93c   : > { %v7702_v46 = vadd.f32 %v8786_v57, %v13868_v48  ;;  %v7696_v43 = vpop.f32.mrb[193].mxu0 }
 0x93d   : > { %v7697_v30 = vadd.f32 %v13868_v48, %v7696_v43 }
 0x93e   : > { %7877 = vst.msk [vmem:[%s13873_s24 + $0x8] sm:$0xff] %vm7875_vm5, %v7702_v46 }
 0x93f   : > { %7876 = vst.msk [vmem:[%s13873_s24] sm:$0xff] %vm7875_vm5, %v7697_v30 }
 0x943   : > { %v8789_v62 = vpop.f32.mrb[194].mxu0 }
 0x944   : > { %v7712_v42 = vadd.f32 %v8789_v62, %v13868_v48  ;;  %v7706_v33 = vpop.f32.mrb[195].mxu0 }
 0x945   : > { %v7707_v21 = vadd.f32 %v13868_v48, %v7706_v33 }
 0x946   : > { %7879 = vst.msk [vmem:[%s13873_s24 + $0x18] sm:$0xff] %vm7875_vm5, %v7712_v42 }
 0x947   : > { %7878 = vst.msk [vmem:[%s13873_s24 + $0x10] sm:$0xff] %vm7875_vm5, %v7707_v21 }
 0x94b   : > { %v8792_v4 = vpop.f32.mrb[196].mxu0 }
 0x94c   : > { %v7722_v40 = vadd.f32 %v8792_v4, %v13868_v48  ;;  %v7716_v12 = vpop.f32.mrb[197].mxu0 }
 0x94d   : > { %v7717_v34 = vadd.f32 %v13868_v48, %v7716_v12 }
 0x94e   : > { %7881 = vst.msk [vmem:[%s13873_s24 + $0x28] sm:$0xff] %vm7875_vm5, %v7722_v40 }
 0x94f   : > { %7880 = vst.msk [vmem:[%s13873_s24 + $0x20] sm:$0xff] %vm7875_vm5, %v7717_v34 }
 0x953   : > { %v8795_v25 = vpop.f32.mrb[198].mxu0 }
 0x954   : > { %v7732_v29 = vadd.f32 %v8795_v25, %v13868_v48  ;;  %v7726_v11 = vpop.f32.mrb[199].mxu0 }
 0x955   : > { %v7727_v27 = vadd.f32 %v13868_v48, %v7726_v11 }
 0x956   : > { %7883 = vst.msk [vmem:[%s13873_s24 + $0x38] sm:$0xff] %vm7875_vm5, %v7732_v29 }
 0x957   : > { %7882 = vst.msk [vmem:[%s13873_s24 + $0x30] sm:$0xff] %vm7875_vm5, %v7727_v27 }
 0x95b   : > { %v8798_v54 = vpop.f32.mrb[200].mxu0 }
 0x95c   : > { %v7742_v45 = vadd.f32 %v8798_v54, %v13868_v48  ;;  %v7736_v0 = vpop.f32.mrb[201].mxu0 }
 0x95d   : > { %v7737_v15 = vadd.f32 %v13868_v48, %v7736_v0 }
 0x95e   : > { %7885 = vst.msk [vmem:[%s13873_s24 + $0x48] sm:$0xff] %vm7875_vm5, %v7742_v45 }
 0x95f   : > { %7884 = vst.msk [vmem:[%s13873_s24 + $0x40] sm:$0xff] %vm7875_vm5, %v7737_v15 }
 0x963   : > { %v8801_v1 = vpop.f32.mrb[202].mxu0 }
 0x964   : > { %v7752_v36 = vadd.f32 %v8801_v1, %v13868_v48  ;;  %v7746_v51 = vpop.f32.mrb[203].mxu0 }
 0x965   : > { %v7747_v2 = vadd.f32 %v13868_v48, %v7746_v51 }
 0x966   : > { %7887 = vst.msk [vmem:[%s13873_s24 + $0x58] sm:$0xff] %vm7875_vm5, %v7752_v36 }
 0x967   : > { %7886 = vst.msk [vmem:[%s13873_s24 + $0x50] sm:$0xff] %vm7875_vm5, %v7747_v2 }
 0x96b   : > { %v8804_v44 = vpop.f32.mrb[204].mxu0 }
 0x96c   : > { %v7762_v39 = vadd.f32 %v8804_v44, %v13868_v48  ;;  %v7756_v6 = vpop.f32.mrb[205].mxu0 }
 0x96d   : > { %v7757_v52 = vadd.f32 %v13868_v48, %v7756_v6 }
 0x96e   : > { %7889 = vst.msk [vmem:[%s13873_s24 + $0x68] sm:$0xff] %vm7875_vm5, %v7762_v39 }
 0x96f   : > { %7888 = vst.msk [vmem:[%s13873_s24 + $0x60] sm:$0xff] %vm7875_vm5, %v7757_v52 }
 0x973   : > { %v8807_v23 = vpop.f32.mrb[206].mxu0 }
 0x974   : > { %v7772_v26 = vadd.f32 %v8807_v23, %v13868_v48  ;;  %v7766_v32 = vpop.f32.mrb[207].mxu0 }
 0x975   : > { %v7767_v49 = vadd.f32 %v13868_v48, %v7766_v32 }
 0x976   : > { %7891 = vst.msk [vmem:[%s13873_s24 + $0x78] sm:$0xff] %vm7875_vm5, %v7772_v26 }
 0x977   : > { %7890 = vst.msk [vmem:[%s13873_s24 + $0x70] sm:$0xff] %vm7875_vm5, %v7767_v49 }
 0x97b   : > { %v8810_v18 = vpop.f32.mrb[208].mxu0 }
 0x97c   : > { %v7782_v20 = vadd.f32 %v8810_v18, %v13868_v48  ;;  %v7776_v61 = vpop.f32.mrb[209].mxu0 }
 0x97d   : > { %v7777_v10 = vadd.f32 %v13868_v48, %v7776_v61 }
 0x97e   : > { %7893 = vst.msk [vmem:[%s13873_s24 + $0x88] sm:$0xff] %vm7875_vm5, %v7782_v20 }
 0x97f   : > { %7892 = vst.msk [vmem:[%s13873_s24 + $0x80] sm:$0xff] %vm7875_vm5, %v7777_v10 }
 0x983   : > { %v8813_v63 = vpop.f32.mrb[210].mxu0 }
 0x984   : > { %v7792_v58 = vadd.f32 %v8813_v63, %v13868_v48  ;;  %v7786_v31 = vpop.f32.mrb[211].mxu0 }
 0x985   : > { %v7787_v16 = vadd.f32 %v13868_v48, %v7786_v31 }
 0x986   : > { %7895 = vst.msk [vmem:[%s13873_s24 + $0x98] sm:$0xff] %vm7875_vm5, %v7792_v58 }
 0x987   : > { %7894 = vst.msk [vmem:[%s13873_s24 + $0x90] sm:$0xff] %vm7875_vm5, %v7787_v16 }
 0x98b   : > { %v8816_v9 = vpop.f32.mrb[212].mxu0 }
 0x98c   : > { %v7802_v41 = vadd.f32 %v8816_v9, %v13868_v48  ;;  %v7796_v28 = vpop.f32.mrb[213].mxu0 }
 0x98d   : > { %v7797_v19 = vadd.f32 %v13868_v48, %v7796_v28 }
 0x98e   : > { %7897 = vst.msk [vmem:[%s13873_s24 + $0xa8] sm:$0xff] %vm7875_vm5, %v7802_v41 }
 0x98f   : > { %7896 = vst.msk [vmem:[%s13873_s24 + $0xa0] sm:$0xff] %vm7875_vm5, %v7797_v19 }
 0x993   : > { %v8819_v37 = vpop.f32.mrb[214].mxu0 }
 0x994   : > { %v7812_v38 = vadd.f32 %v8819_v37, %v13868_v48  ;;  %v7806_v3 = vpop.f32.mrb[215].mxu0 }
 0x995   : > { %v7807_v56 = vadd.f32 %v13868_v48, %v7806_v3 }
 0x996   : > { %7899 = vst.msk [vmem:[%s13873_s24 + $0xb8] sm:$0xff] %vm7875_vm5, %v7812_v38 }
 0x997   : > { %7898 = vst.msk [vmem:[%s13873_s24 + $0xb0] sm:$0xff] %vm7875_vm5, %v7807_v56 }
 0x99b   : > { %v8822_v17 = vpop.f32.mrb[216].mxu0 }
 0x99c   : > { %v7822_v7 = vadd.f32 %v8822_v17, %v13868_v48  ;;  %v7816_v55 = vpop.f32.mrb[217].mxu0 }
 0x99d   : > { %v7817_v5 = vadd.f32 %v13868_v48, %v7816_v55 }
 0x99e   : > { %7901 = vst.msk [vmem:[%s13873_s24 + $0xc8] sm:$0xff] %vm7875_vm5, %v7822_v7 }
 0x99f   : > { %7900 = vst.msk [vmem:[%s13873_s24 + $0xc0] sm:$0xff] %vm7875_vm5, %v7817_v5 }
 0x9a3   : > { %v8825_v53 = vpop.f32.mrb[218].mxu0 }
 0x9a4   : > { %v7832_v35 = vadd.f32 %v8825_v53, %v13868_v48  ;;  %v7826_v22 = vpop.f32.mrb[219].mxu0 }
 0x9a5   : > { %v7827_v50 = vadd.f32 %v13868_v48, %v7826_v22 }
 0x9a6   : > { %7903 = vst.msk [vmem:[%s13873_s24 + $0xd8] sm:$0xff] %vm7875_vm5, %v7832_v35 }
 0x9a7   : > { %7902 = vst.msk [vmem:[%s13873_s24 + $0xd0] sm:$0xff] %vm7875_vm5, %v7827_v50 }
 0x9ab   : > { %v8828_v13 = vpop.f32.mrb[220].mxu0 }
 0x9ac   : > { %v7842_v14 = vadd.f32 %v8828_v13, %v13868_v48  ;;  %v7836_v60 = vpop.f32.mrb[221].mxu0 }
 0x9ad   : > { %v7837_v47 = vadd.f32 %v13868_v48, %v7836_v60 }
 0x9ae   : > { %7905 = vst.msk [vmem:[%s13873_s24 + $0xe8] sm:$0xff] %vm7875_vm5, %v7842_v14 }
 0x9af   : > { %7904 = vst.msk [vmem:[%s13873_s24 + $0xe0] sm:$0xff] %vm7875_vm5, %v7837_v47 }
 0x9b3   : > { %v8831_v24 = vpop.f32.mrb[222].mxu0 }
 0x9b4   : > { %v7852_v8 = vadd.f32 %v8831_v24, %v13868_v48  ;;  %v7846_v59 = vpop.f32.mrb[223].mxu0 }
 0x9b5   : > { %v7847_v57 = vadd.f32 %v13868_v48, %v7846_v59 }
 0x9b6   : > { %7907 = vst.msk [vmem:[%s13873_s24 + $0xf8] sm:$0xff] %vm7875_vm5, %v7852_v8 }
 0x9b7   : > { %7906 = vst.msk [vmem:[%s13873_s24 + $0xf0] sm:$0xff] %vm7875_vm5, %v7847_v57 }
 0x9bb   : > { %v8834_v46 = vpop.f32.mrb[224].mxu0 }
 0x9bc   : > { %v7862_v43 = vadd.f32 %v8834_v46, %v13868_v48  ;;  %v7856_v30 = vpop.f32.mrb[225].mxu0 }
 0x9bd   : > { %v7857_v62 = vadd.f32 %v13868_v48, %v7856_v30 }
 0x9be   : > { %7909 = vst.msk [vmem:[%s13873_s24 + $0x108] sm:$0xff] %vm7875_vm5, %v7862_v43 }
 0x9bf   : > { %7908 = vst.msk [vmem:[%s13873_s24 + $0x100] sm:$0xff] %vm7875_vm5, %v7857_v62 }
 0x9c3   : > { %v8837_v42 = vpop.f32.mrb[226].mxu0 }
 0x9c4   : > { %v7872_v33 = vadd.f32 %v8837_v42, %v13868_v48  ;;  %v7866_v21 = vpop.f32.mrb[227].mxu0 }
 0x9c5   : > { %v7867_v4 = vadd.f32 %v13868_v48, %v7866_v21 }
 0x9c6   : > { %7911 = vst.msk [vmem:[%s13873_s24 + $0x118] sm:$0xff] %vm7875_vm5, %v7872_v33 }
 0x9c7   : > { %7910 = vst.msk [vmem:[%s13873_s24 + $0x110] sm:$0xff] %vm7875_vm5, %v7867_v4 }
 0x9c8 PF: > { %s24_s29 = sadd.s32 1, %s10143_s29  }
 0x9c9   : > { %p21_p4 = scmp.ge.s32.totalorder %s24_s29, 4  }
 0x9cb   :  { %23 = sbr.rel (!%p21_p4) target bundleno = 1 (0x1), region = 106 }

</bundles_post_ra>
